<compile_context>
chip_gen: v7x
topology: tpu7x:2x2x1
jax: 0.10.0
libtpu: 0.0.40
codegen_flags: <defaults>
</compile_context>

<pallas_src>
import functools

import numpy as np
import jax
import jax.numpy as jnp
from jax.experimental import pallas as pl
from jax.experimental.pallas import tpu as pltpu

LEAK = 0.2
BN_EPS = 1e-5
KSZ, STRIDE, PAD = 4, 2, 1        # every conv: kernel 4, stride 2, padding 1
CPAD = 128                        # all channel dims padded to one full lane tile
BT = 8                            # in-kernel batch group (keeps every slice 8-aligned)

# MXU operand dtype.  bf16 is the native MXU rate on every generation; accumulation
# and all epilogues stay float32.  Set to jnp.float32 for exact-f32 numerics.
MXU_DTYPE = jnp.bfloat16

ALL_TAPS = tuple((kh, kw) for kh in range(KSZ) for kw in range(KSZ))
VALID4_TAPS = ((1, 1), (1, 2), (2, 1), (2, 2))   # taps that hit conv4's 2x2 input


def _round_up(v, m):
    return (v + m - 1) // m * m


def _mm(a, b):
    return jnp.dot(a.astype(MXU_DTYPE), b.astype(MXU_DTYPE),
                   preferred_element_type=jnp.float32)


# ------------------------------ fused kernel ------------------------------
def _make_kernel(n, n_pad):
    groups = n_pad // BT
    m2_valid, m3_valid = n * 16, n * 4      # valid (non-padded) rows for BN stats

    def leaky(y):
        return jnp.maximum(y, LEAK * y)

    def batchnorm(y, g_ref, b_ref, m_valid):
        # training-mode BatchNorm2d: stats over the valid N*H*W rows, biased variance
        yv = y[:m_valid, :]                                   # 8-aligned static slice
        inv_m = 1.0 / float(m_valid)
        mean = jnp.sum(yv, axis=0, keepdims=True) * inv_m
        var = jnp.sum(yv * yv, axis=0, keepdims=True) * inv_m - mean * mean
        var = jnp.maximum(var, 0.0)
        return (y - mean) * jax.lax.rsqrt(var + BN_EPS) * g_ref[...] + b_ref[...]

    def conv_group(s_ref, w_ref, h_prev_b, g, rows_in, rows_out, n_pairs):
        # One group of BT images: one gather matmul (all taps stacked on M), then
        # n_pairs K=256 tap-pair weight matmuls on 8-row-aligned static slices.
        h_g = h_prev_b[g * rows_in:(g + 1) * rows_in, :]
        patch = _mm(s_ref[...], h_g).astype(MXU_DTYPE)        # (n_taps*rows_out, 128)
        acc = jnp.zeros((rows_out, CPAD), jnp.float32)
        for j in range(n_pairs):
            pair = jnp.concatenate(
                [patch[(2 * j) * rows_out:(2 * j + 1) * rows_out, :],
                 patch[(2 * j + 1) * rows_out:(2 * j + 2) * rows_out, :]], axis=1)
            acc = acc + _mm(pair, w_ref[j])                   # (rows_out, 256)x(256,128)
        return acc

    def conv_layer(s_ref, w_ref, h_prev, rows_in, rows_out, n_pairs):
        h_b = h_prev.astype(MXU_DTYPE)                        # cast once per layer
        parts = [conv_group(s_ref, w_ref, h_b, g, rows_in, rows_out, n_pairs)
                 for g in range(groups)]
        return parts[0] if groups == 1 else jnp.concatenate(parts, axis=0)

    def kernel(a1_ref, w1_ref,
               s2_ref, w2_ref, g2_ref, b2_ref,
               s3_ref, w3_ref, g3_ref, b3_ref,
               s4_ref, w4_ref,
               o_ref):
        # layer 1: conv(1 -> 28) + LeakyReLU   (host-side im2col -> one matmul)
        h1 = leaky(_mm(a1_ref[...], w1_ref[...]))                       # (n_pad*64, 128)
        # layer 2: conv(28 -> 56) + BatchNorm + LeakyReLU
        y2 = conv_layer(s2_ref, w2_ref, h1, BT * 64, BT * 16, 8)        # (n_pad*16, 128)
        h2 = leaky(batchnorm(y2, g2_ref, b2_ref, m2_valid))
        # layer 3: conv(56 -> 112) + BatchNorm + LeakyReLU
        y3 = conv_layer(s3_ref, w3_ref, h2, BT * 16, BT * 4, 8)         # (n_pad*4, 128)
        h3 = leaky(batchnorm(y3, g3_ref, b3_ref, m3_valid))
        # layer 4: conv(112 -> 1) + Sigmoid  (only the 4 taps hitting the 2x2 input)
        y4 = conv_layer(s4_ref, w4_ref, h3, BT * 4, BT, 2)              # (n_pad, 128)
        o_ref[...] = pl.reciprocal(1.0 + jnp.exp(-y4), approx=True)

    return kernel


# ------------------------------ host-side packing ------------------------------
def _full_block(shape):
    nd = len(shape)
    return pl.BlockSpec(shape, lambda *_: (0,) * nd)


def _pad2(m, rows, cols):
    r, c = m.shape
    return jnp.pad(m, ((0, rows - r), (0, cols - c)))


def _pad_vec(v):
    return _pad2(v.reshape(1, -1).astype(jnp.float32), 1, CPAD)


def _prep_w1(w_oihw):
    """(28,1,4,4) -> (128,128) im2col weight, rows ordered (kh, kw, cin)."""
    cout, cin, kh, kw = w_oihw.shape
    m = jnp.transpose(w_oihw, (2, 3, 1, 0)).reshape(kh * kw * cin, cout)
    return _pad2(m.astype(jnp.float32), CPAD, CPAD).astype(MXU_DTYPE)


def _prep_w_pairs(w_oihw, taps):
    """(Cout,Cin,4,4) -> (len(taps)//2, 256, 128): tap-pairs stacked along K."""
    blocks = []
    for kh, kw in taps:
        blk = _pad2(w_oihw[:, :, kh, kw].T.astype(jnp.float32), CPAD, CPAD)  # (Cin,Cout)
        blocks.append(blk)
    pairs = [jnp.concatenate([blocks[2 * j], blocks[2 * j + 1]], axis=0)
             for j in range(len(taps) // 2)]
    return jnp.stack(pairs, axis=0).astype(MXU_DTYPE)


@functools.lru_cache(maxsize=None)
def _group_gather_np(h_in, taps):
    """Batch-independent 0/1 gather for one group of BT images (k=4,s=2,p=1).
    Row (tap, b, ho, wo) selects input row (b, 2*ho+kh-1, 2*wo+kw-1); an all-zero
    row encodes the zero padding at the border."""
    h_out = h_in // STRIDE
    s = np.zeros((len(taps) * BT * h_out * h_out, BT * h_in * h_in), np.float32)
    for t, (kh, kw) in enumerate(taps):
        for b in range(BT):
            for ho in range(h_out):
                hi = STRIDE * ho + kh - PAD
                if not 0 <= hi < h_in:
                    continue
                for wo in range(h_out):
                    wi = STRIDE * wo + kw - PAD
                    if not 0 <= wi < h_in:
                        continue
                    r = ((t * BT + b) * h_out + ho) * h_out + wo
                    c = (b * h_in + hi) * h_in + wi
                    s[r, c] = 1.0
    return s


def pack_params(params):
    """One-time packing of weights / BN params / gather selectors (call outside jit)."""
    return dict(
        w1=_prep_w1(params["w1"]),
        w2=_prep_w_pairs(params["w2"], ALL_TAPS),
        w3=_prep_w_pairs(params["w3"], ALL_TAPS),
        w4=_prep_w_pairs(params["w4"], VALID4_TAPS),
        g2=_pad_vec(params["g2"]), b2=_pad_vec(params["b2"]),
        g3=_pad_vec(params["g3"]), b3=_pad_vec(params["b3"]),
        s2=jnp.asarray(_group_gather_np(8, ALL_TAPS), MXU_DTYPE),     # (2048, 512)
        s3=jnp.asarray(_group_gather_np(4, ALL_TAPS), MXU_DTYPE),     # (512, 128)
        s4=jnp.asarray(_group_gather_np(2, VALID4_TAPS), MXU_DTYPE),  # (32, 32)
    )


def _im2col_conv1(x_nhwc):
    """k=4,s=2,p=1 im2col of (N,16,16,1) -> (N*64, 16), cols ordered (kh, kw, cin)."""
    n, h, w, c = x_nhwc.shape
    ho, wo = h // STRIDE, w // STRIDE
    xp = jnp.pad(x_nhwc, ((0, 0), (PAD, PAD), (PAD, PAD), (0, 0)))
    cols = []
    for kh in range(KSZ):
        for kw in range(KSZ):
            cols.append(xp[:, kh:kh + STRIDE * ho:STRIDE, kw:kw + STRIDE * wo:STRIDE, :])
    patches = jnp.stack(cols, axis=3)                    # (N, Ho, Wo, 16, C)
    return patches.reshape(n * ho * wo, KSZ * KSZ * c)


# ------------------------------ forward pass ------------------------------
def discriminator_forward(x_nchw, packed):
    n, cin, h, w = x_nchw.shape
    if cin != 1 or h != 16 or w != 16:
        raise ValueError("expected input of shape (N, 1, 16, 16)")
    if n % 2 != 0:
        raise ValueError("batch size must be even (8-row-aligned BN stat slices)")
    n_pad = _round_up(n, BT)

    x = jnp.transpose(x_nchw, (0, 2, 3, 1)).astype(jnp.float32)       # NHWC
    x = jnp.pad(x, ((0, n_pad - n), (0, 0), (0, 0), (0, 0)))          # pad batch to 8k
    a1 = _pad2(_im2col_conv1(x), n_pad * 64, CPAD).astype(MXU_DTYPE)

    inputs = [a1, packed["w1"],
              packed["s2"], packed["w2"], packed["g2"], packed["b2"],
              packed["s3"], packed["w3"], packed["g3"], packed["b3"],
              packed["s4"], packed["w4"]]
    out = pl.pallas_call(
        _make_kernel(n, n_pad),
        out_shape=jax.ShapeDtypeStruct((n_pad, CPAD), jnp.float32),
        grid=(1,),
        in_specs=[_full_block(t.shape) for t in inputs],
        out_specs=_full_block((n_pad, CPAD)),
        compiler_params=pltpu.CompilerParams(
            dimension_semantics=("arbitrary",),
            vmem_limit_bytes=32 * 1024 * 1024),
    )(*inputs)

    # valid rows are the first n; the single real output channel is column 0
    return out[:n, 0].reshape(n, 1, 1, 1)


def init_params(key):
    k1, k2, k3, k4 = jax.random.split(key, 4)
    std = 0.02
    return {
        "w1": std * jax.random.normal(k1, (28, 1, 4, 4), jnp.float32),
        "w2": std * jax.random.normal(k2, (56, 28, 4, 4), jnp.float32),
        "w3": std * jax.random.normal(k3, (112, 56, 4, 4), jnp.float32),
        "w4": std * jax.random.normal(k4, (1, 112, 4, 4), jnp.float32),
        # BatchNorm affine params (PyTorch default init: gamma=1, beta=0)
        "g2": jnp.ones((56,), jnp.float32),  "b2": jnp.zeros((56,), jnp.float32),
        "g3": jnp.ones((112,), jnp.float32), "b3": jnp.zeros((112,), jnp.float32),
    }


# ------------------------- plain-XLA reference (sanity) -------------------------
def _reference_forward(x_nchw, params):
    def conv(x, w):
        return jax.lax.conv_general_dilated(
            x, w, window_strides=(STRIDE, STRIDE),
            padding=((PAD, PAD), (PAD, PAD)),
            dimension_numbers=("NCHW", "OIHW", "NCHW"),
            precision=jax.lax.Precision.HIGHEST)

    def bn(x, g, b):
        mean = jnp.mean(x, axis=(0, 2, 3), keepdims=True)
        var = jnp.mean(jnp.square(x - mean), axis=(0, 2, 3), keepdims=True)
        xn = (x - mean) * jax.lax.rsqrt(var + BN_EPS)
        return xn * g.reshape(1, -1, 1, 1) + b.reshape(1, -1, 1, 1)

    def leaky(x):
        return jnp.maximum(x, LEAK * x)

    h = leaky(conv(x_nchw, params["w1"]))
    h = leaky(bn(conv(h, params["w2"]), params["g2"], params["b2"]))
    h = leaky(bn(conv(h, params["w3"]), params["g3"], params["b3"]))
    return jax.nn.sigmoid(conv(h, params["w4"]))


if __name__ == "__main__":
    key = jax.random.PRNGKey(0)
    kp, kx = jax.random.split(key)
    params = init_params(kp)
    packed = pack_params(params)          # one-time layout/packing, outside the jit
    # 16x16 single-channel input: 16 -> 8 -> 4 -> 2 -> 1 through the 4 convs.
    x = jax.random.normal(kx, (2, 1, 16, 16), jnp.float32)

    fwd = jax.jit(discriminator_forward)
    out = jax.block_until_ready(fwd(x, packed))

    assert out.shape == (2, 1, 1, 1), out.shape
    assert bool(jnp.all(jnp.isfinite(out)))
    assert bool(jnp.all((out >= 0.0) & (out <= 1.0)))

    # sanity-check the fused bf16-MXU kernel against a float32 plain-XLA reference
    ref = jax.block_until_ready(_reference_forward(x, params))
    assert bool(jnp.allclose(out, ref, rtol=0.0, atol=2e-2)), \
        float(jnp.max(jnp.abs(out - ref)))

    print("KERNEL_OK")
</pallas_src>

<mosaic_0001>
module attributes {stable_mosaic.version = 11 : i64} {
  func.func @kernel(%arg0: i32, %arg1: memref<512x128xbf16, #tpu.memory_space<vmem>>, %arg2: memref<128x128xbf16, #tpu.memory_space<vmem>>, %arg3: memref<2048x512xbf16, #tpu.memory_space<vmem>>, %arg4: memref<8x256x128xbf16, #tpu.memory_space<vmem>>, %arg5: memref<1x128xf32, #tpu.memory_space<vmem>>, %arg6: memref<1x128xf32, #tpu.memory_space<vmem>>, %arg7: memref<512x128xbf16, #tpu.memory_space<vmem>>, %arg8: memref<8x256x128xbf16, #tpu.memory_space<vmem>>, %arg9: memref<1x128xf32, #tpu.memory_space<vmem>>, %arg10: memref<1x128xf32, #tpu.memory_space<vmem>>, %arg11: memref<32x32xbf16, #tpu.memory_space<vmem>>, %arg12: memref<2x256x128xbf16, #tpu.memory_space<vmem>>, %arg13: memref<8x128xf32, #tpu.memory_space<vmem>>) attributes {dimension_semantics = [#tpu.dimension_semantics<arbitrary>], iteration_bounds = array<i64: 1>, scalar_prefetch = 0 : i64, scratch_operands = 0 : i64, tpu.core_type = #tpu.core_type<tc>, window_params = [{pipeline_mode = #tpu.pipeline_mode<synchronous>, transform_indices = @transform_0, window_bounds = array<i64: 512, 128>}, {pipeline_mode = #tpu.pipeline_mode<synchronous>, transform_indices = @transform_1, window_bounds = array<i64: 128, 128>}, {pipeline_mode = #tpu.pipeline_mode<synchronous>, transform_indices = @transform_2, window_bounds = array<i64: 2048, 512>}, {pipeline_mode = #tpu.pipeline_mode<synchronous>, transform_indices = @transform_3, window_bounds = array<i64: 8, 256, 128>}, {pipeline_mode = #tpu.pipeline_mode<synchronous>, transform_indices = @transform_4, window_bounds = array<i64: 1, 128>}, {pipeline_mode = #tpu.pipeline_mode<synchronous>, transform_indices = @transform_5, window_bounds = array<i64: 1, 128>}, {pipeline_mode = #tpu.pipeline_mode<synchronous>, transform_indices = @transform_6, window_bounds = array<i64: 512, 128>}, {pipeline_mode = #tpu.pipeline_mode<synchronous>, transform_indices = @transform_7, window_bounds = array<i64: 8, 256, 128>}, {pipeline_mode = #tpu.pipeline_mode<synchronous>, transform_indices = @transform_8, window_bounds = array<i64: 1, 128>}, {pipeline_mode = #tpu.pipeline_mode<synchronous>, transform_indices = @transform_9, window_bounds = array<i64: 1, 128>}, {pipeline_mode = #tpu.pipeline_mode<synchronous>, transform_indices = @transform_10, window_bounds = array<i64: 32, 32>}, {pipeline_mode = #tpu.pipeline_mode<synchronous>, transform_indices = @transform_11, window_bounds = array<i64: 2, 256, 128>}, {pipeline_mode = #tpu.pipeline_mode<synchronous>, transform_indices = @transform_12, window_bounds = array<i64: 8, 128>}]} {
    %c0 = arith.constant 0 : index
    %c0_0 = arith.constant 0 : index
    %0 = vector.load %arg1[%c0, %c0_0] : memref<512x128xbf16, #tpu.memory_space<vmem>>, vector<512x128xbf16>
    %c0_1 = arith.constant 0 : index
    %c0_2 = arith.constant 0 : index
    %1 = vector.load %arg2[%c0_1, %c0_2] : memref<128x128xbf16, #tpu.memory_space<vmem>>, vector<128x128xbf16>
    %cst = arith.constant dense<0.000000e+00> : vector<512x128xf32>
    %2 = tpu.matmul %0, %1, %cst {dimension_numbers = #tpu.dot_dimension_numbers<[1], [0], [0], [1], [0, 0, 1, 1], [], []>} : vector<512x128xbf16>, vector<128x128xbf16>, vector<512x128xf32> -> vector<512x128xf32>
    %cst_3 = arith.constant 2.000000e-01 : f32
    %3 = vector.broadcast %cst_3 : f32 to vector<512x128xf32>
    %4 = arith.mulf %3, %2 : vector<512x128xf32>
    %5 = arith.maximumf %2, %4 : vector<512x128xf32>
    %6 = arith.truncf %5 : vector<512x128xf32> to vector<512x128xbf16>
    %c0_4 = arith.constant 0 : index
    %c0_5 = arith.constant 0 : index
    %7 = vector.load %arg3[%c0_4, %c0_5] : memref<2048x512xbf16, #tpu.memory_space<vmem>>, vector<2048x512xbf16>
    %cst_6 = arith.constant dense<0.000000e+00> : vector<2048x128xf32>
    %8 = tpu.matmul %7, %6, %cst_6 {dimension_numbers = #tpu.dot_dimension_numbers<[1], [0], [0], [1], [0, 0, 1, 1], [], []>} : vector<2048x512xbf16>, vector<512x128xbf16>, vector<2048x128xf32> -> vector<2048x128xf32>
    %9 = arith.truncf %8 : vector<2048x128xf32> to vector<2048x128xbf16>
    %cst_7 = arith.constant 0.000000e+00 : f32
    %10 = vector.broadcast %cst_7 : f32 to vector<128x128xf32>
    %11 = vector.extract_strided_slice %9 {offsets = [0, 0], sizes = [128, 128], strides = [1, 1]} : vector<2048x128xbf16> to vector<128x128xbf16>
    %12 = vector.extract_strided_slice %9 {offsets = [128, 0], sizes = [128, 128], strides = [1, 1]} : vector<2048x128xbf16> to vector<128x128xbf16>
    %13 = tpu.concatenate %11, %12 in 1 : vector<128x128xbf16>, vector<128x128xbf16> -> vector<128x256xbf16>
    %c0_8 = arith.constant 0 : index
    %c0_9 = arith.constant 0 : index
    %c0_10 = arith.constant 0 : index
    %14 = vector.load %arg4[%c0_8, %c0_9, %c0_10] : memref<8x256x128xbf16, #tpu.memory_space<vmem>>, vector<1x256x128xbf16>
    %15 = vector.shape_cast %14 : vector<1x256x128xbf16> to vector<256x128xbf16>
    %cst_11 = arith.constant dense<0.000000e+00> : vector<128x128xf32>
    %16 = tpu.matmul %13, %15, %cst_11 {dimension_numbers = #tpu.dot_dimension_numbers<[1], [0], [0], [1], [0, 0, 1, 1], [], []>} : vector<128x256xbf16>, vector<256x128xbf16>, vector<128x128xf32> -> vector<128x128xf32>
    %17 = arith.addf %10, %16 : vector<128x128xf32>
    %18 = vector.extract_strided_slice %9 {offsets = [256, 0], sizes = [128, 128], strides = [1, 1]} : vector<2048x128xbf16> to vector<128x128xbf16>
    %19 = vector.extract_strided_slice %9 {offsets = [384, 0], sizes = [128, 128], strides = [1, 1]} : vector<2048x128xbf16> to vector<128x128xbf16>
    %20 = tpu.concatenate %18, %19 in 1 : vector<128x128xbf16>, vector<128x128xbf16> -> vector<128x256xbf16>
    %c1 = arith.constant 1 : index
    %c0_12 = arith.constant 0 : index
    %c0_13 = arith.constant 0 : index
    %21 = vector.load %arg4[%c1, %c0_12, %c0_13] : memref<8x256x128xbf16, #tpu.memory_space<vmem>>, vector<1x256x128xbf16>
    %22 = vector.shape_cast %21 : vector<1x256x128xbf16> to vector<256x128xbf16>
    %cst_14 = arith.constant dense<0.000000e+00> : vector<128x128xf32>
    %23 = tpu.matmul %20, %22, %cst_14 {dimension_numbers = #tpu.dot_dimension_numbers<[1], [0], [0], [1], [0, 0, 1, 1], [], []>} : vector<128x256xbf16>, vector<256x128xbf16>, vector<128x128xf32> -> vector<128x128xf32>
    %24 = arith.addf %17, %23 : vector<128x128xf32>
    %25 = vector.extract_strided_slice %9 {offsets = [512, 0], sizes = [128, 128], strides = [1, 1]} : vector<2048x128xbf16> to vector<128x128xbf16>
    %26 = vector.extract_strided_slice %9 {offsets = [640, 0], sizes = [128, 128], strides = [1, 1]} : vector<2048x128xbf16> to vector<128x128xbf16>
    %27 = tpu.concatenate %25, %26 in 1 : vector<128x128xbf16>, vector<128x128xbf16> -> vector<128x256xbf16>
    %c2 = arith.constant 2 : index
    %c0_15 = arith.constant 0 : index
    %c0_16 = arith.constant 0 : index
    %28 = vector.load %arg4[%c2, %c0_15, %c0_16] : memref<8x256x128xbf16, #tpu.memory_space<vmem>>, vector<1x256x128xbf16>
    %29 = vector.shape_cast %28 : vector<1x256x128xbf16> to vector<256x128xbf16>
    %cst_17 = arith.constant dense<0.000000e+00> : vector<128x128xf32>
    %30 = tpu.matmul %27, %29, %cst_17 {dimension_numbers = #tpu.dot_dimension_numbers<[1], [0], [0], [1], [0, 0, 1, 1], [], []>} : vector<128x256xbf16>, vector<256x128xbf16>, vector<128x128xf32> -> vector<128x128xf32>
    %31 = arith.addf %24, %30 : vector<128x128xf32>
    %32 = vector.extract_strided_slice %9 {offsets = [768, 0], sizes = [128, 128], strides = [1, 1]} : vector<2048x128xbf16> to vector<128x128xbf16>
    %33 = vector.extract_strided_slice %9 {offsets = [896, 0], sizes = [128, 128], strides = [1, 1]} : vector<2048x128xbf16> to vector<128x128xbf16>
    %34 = tpu.concatenate %32, %33 in 1 : vector<128x128xbf16>, vector<128x128xbf16> -> vector<128x256xbf16>
    %c3 = arith.constant 3 : index
    %c0_18 = arith.constant 0 : index
    %c0_19 = arith.constant 0 : index
    %35 = vector.load %arg4[%c3, %c0_18, %c0_19] : memref<8x256x128xbf16, #tpu.memory_space<vmem>>, vector<1x256x128xbf16>
    %36 = vector.shape_cast %35 : vector<1x256x128xbf16> to vector<256x128xbf16>
    %cst_20 = arith.constant dense<0.000000e+00> : vector<128x128xf32>
    %37 = tpu.matmul %34, %36, %cst_20 {dimension_numbers = #tpu.dot_dimension_numbers<[1], [0], [0], [1], [0, 0, 1, 1], [], []>} : vector<128x256xbf16>, vector<256x128xbf16>, vector<128x128xf32> -> vector<128x128xf32>
    %38 = arith.addf %31, %37 : vector<128x128xf32>
    %39 = vector.extract_strided_slice %9 {offsets = [1024, 0], sizes = [128, 128], strides = [1, 1]} : vector<2048x128xbf16> to vector<128x128xbf16>
    %40 = vector.extract_strided_slice %9 {offsets = [1152, 0], sizes = [128, 128], strides = [1, 1]} : vector<2048x128xbf16> to vector<128x128xbf16>
    %41 = tpu.concatenate %39, %40 in 1 : vector<128x128xbf16>, vector<128x128xbf16> -> vector<128x256xbf16>
    %c4 = arith.constant 4 : index
    %c0_21 = arith.constant 0 : index
    %c0_22 = arith.constant 0 : index
    %42 = vector.load %arg4[%c4, %c0_21, %c0_22] : memref<8x256x128xbf16, #tpu.memory_space<vmem>>, vector<1x256x128xbf16>
    %43 = vector.shape_cast %42 : vector<1x256x128xbf16> to vector<256x128xbf16>
    %cst_23 = arith.constant dense<0.000000e+00> : vector<128x128xf32>
    %44 = tpu.matmul %41, %43, %cst_23 {dimension_numbers = #tpu.dot_dimension_numbers<[1], [0], [0], [1], [0, 0, 1, 1], [], []>} : vector<128x256xbf16>, vector<256x128xbf16>, vector<128x128xf32> -> vector<128x128xf32>
    %45 = arith.addf %38, %44 : vector<128x128xf32>
    %46 = vector.extract_strided_slice %9 {offsets = [1280, 0], sizes = [128, 128], strides = [1, 1]} : vector<2048x128xbf16> to vector<128x128xbf16>
    %47 = vector.extract_strided_slice %9 {offsets = [1408, 0], sizes = [128, 128], strides = [1, 1]} : vector<2048x128xbf16> to vector<128x128xbf16>
    %48 = tpu.concatenate %46, %47 in 1 : vector<128x128xbf16>, vector<128x128xbf16> -> vector<128x256xbf16>
    %c5 = arith.constant 5 : index
    %c0_24 = arith.constant 0 : index
    %c0_25 = arith.constant 0 : index
    %49 = vector.load %arg4[%c5, %c0_24, %c0_25] : memref<8x256x128xbf16, #tpu.memory_space<vmem>>, vector<1x256x128xbf16>
    %50 = vector.shape_cast %49 : vector<1x256x128xbf16> to vector<256x128xbf16>
    %cst_26 = arith.constant dense<0.000000e+00> : vector<128x128xf32>
    %51 = tpu.matmul %48, %50, %cst_26 {dimension_numbers = #tpu.dot_dimension_numbers<[1], [0], [0], [1], [0, 0, 1, 1], [], []>} : vector<128x256xbf16>, vector<256x128xbf16>, vector<128x128xf32> -> vector<128x128xf32>
    %52 = arith.addf %45, %51 : vector<128x128xf32>
    %53 = vector.extract_strided_slice %9 {offsets = [1536, 0], sizes = [128, 128], strides = [1, 1]} : vector<2048x128xbf16> to vector<128x128xbf16>
    %54 = vector.extract_strided_slice %9 {offsets = [1664, 0], sizes = [128, 128], strides = [1, 1]} : vector<2048x128xbf16> to vector<128x128xbf16>
    %55 = tpu.concatenate %53, %54 in 1 : vector<128x128xbf16>, vector<128x128xbf16> -> vector<128x256xbf16>
    %c6 = arith.constant 6 : index
    %c0_27 = arith.constant 0 : index
    %c0_28 = arith.constant 0 : index
    %56 = vector.load %arg4[%c6, %c0_27, %c0_28] : memref<8x256x128xbf16, #tpu.memory_space<vmem>>, vector<1x256x128xbf16>
    %57 = vector.shape_cast %56 : vector<1x256x128xbf16> to vector<256x128xbf16>
    %cst_29 = arith.constant dense<0.000000e+00> : vector<128x128xf32>
    %58 = tpu.matmul %55, %57, %cst_29 {dimension_numbers = #tpu.dot_dimension_numbers<[1], [0], [0], [1], [0, 0, 1, 1], [], []>} : vector<128x256xbf16>, vector<256x128xbf16>, vector<128x128xf32> -> vector<128x128xf32>
    %59 = arith.addf %52, %58 : vector<128x128xf32>
    %60 = vector.extract_strided_slice %9 {offsets = [1792, 0], sizes = [128, 128], strides = [1, 1]} : vector<2048x128xbf16> to vector<128x128xbf16>
    %61 = vector.extract_strided_slice %9 {offsets = [1920, 0], sizes = [128, 128], strides = [1, 1]} : vector<2048x128xbf16> to vector<128x128xbf16>
    %62 = tpu.concatenate %60, %61 in 1 : vector<128x128xbf16>, vector<128x128xbf16> -> vector<128x256xbf16>
    %c7 = arith.constant 7 : index
    %c0_30 = arith.constant 0 : index
    %c0_31 = arith.constant 0 : index
    %63 = vector.load %arg4[%c7, %c0_30, %c0_31] : memref<8x256x128xbf16, #tpu.memory_space<vmem>>, vector<1x256x128xbf16>
    %64 = vector.shape_cast %63 : vector<1x256x128xbf16> to vector<256x128xbf16>
    %cst_32 = arith.constant dense<0.000000e+00> : vector<128x128xf32>
    %65 = tpu.matmul %62, %64, %cst_32 {dimension_numbers = #tpu.dot_dimension_numbers<[1], [0], [0], [1], [0, 0, 1, 1], [], []>} : vector<128x256xbf16>, vector<256x128xbf16>, vector<128x128xf32> -> vector<128x128xf32>
    %66 = arith.addf %59, %65 : vector<128x128xf32>
    %67 = vector.extract_strided_slice %66 {offsets = [0, 0], sizes = [32, 128], strides = [1, 1]} : vector<128x128xf32> to vector<32x128xf32>
    %cst_33 = arith.constant dense<0.000000e+00> : vector<128xf32>
    %68 = vector.multi_reduction <add>, %67, %cst_33 [0] : vector<32x128xf32> to vector<128xf32>
    %69 = vector.shape_cast %68 : vector<128xf32> to vector<1x128xf32>
    %cst_34 = arith.constant 3.125000e-02 : f32
    %70 = vector.broadcast %cst_34 : f32 to vector<1x128xf32>
    %71 = arith.mulf %69, %70 : vector<1x128xf32>
    %72 = arith.mulf %67, %67 : vector<32x128xf32>
    %cst_35 = arith.constant dense<0.000000e+00> : vector<128xf32>
    %73 = vector.multi_reduction <add>, %72, %cst_35 [0] : vector<32x128xf32> to vector<128xf32>
    %74 = vector.shape_cast %73 : vector<128xf32> to vector<1x128xf32>
    %cst_36 = arith.constant 3.125000e-02 : f32
    %75 = vector.broadcast %cst_36 : f32 to vector<1x128xf32>
    %76 = arith.mulf %74, %75 : vector<1x128xf32>
    %77 = arith.mulf %71, %71 : vector<1x128xf32>
    %78 = arith.subf %76, %77 : vector<1x128xf32>
    %cst_37 = arith.constant 0.000000e+00 : f32
    %79 = vector.broadcast %cst_37 : f32 to vector<1x128xf32>
    %80 = arith.maximumf %78, %79 : vector<1x128xf32>
    %81 = vector.broadcast %71 : vector<1x128xf32> to vector<128x128xf32>
    %82 = arith.subf %66, %81 : vector<128x128xf32>
    %cst_38 = arith.constant 9.99999974E-6 : f32
    %83 = vector.broadcast %cst_38 : f32 to vector<1x128xf32>
    %84 = arith.addf %80, %83 : vector<1x128xf32>
    %85 = math.rsqrt %84 : vector<1x128xf32>
    %86 = vector.broadcast %85 : vector<1x128xf32> to vector<128x128xf32>
    %87 = arith.mulf %82, %86 : vector<128x128xf32>
    %c0_39 = arith.constant 0 : index
    %c0_40 = arith.constant 0 : index
    %88 = vector.load %arg5[%c0_39, %c0_40] : memref<1x128xf32, #tpu.memory_space<vmem>>, vector<1x128xf32>
    %89 = vector.broadcast %88 : vector<1x128xf32> to vector<128x128xf32>
    %90 = arith.mulf %87, %89 : vector<128x128xf32>
    %c0_41 = arith.constant 0 : index
    %c0_42 = arith.constant 0 : index
    %91 = vector.load %arg6[%c0_41, %c0_42] : memref<1x128xf32, #tpu.memory_space<vmem>>, vector<1x128xf32>
    %92 = vector.broadcast %91 : vector<1x128xf32> to vector<128x128xf32>
    %93 = arith.addf %90, %92 : vector<128x128xf32>
    %cst_43 = arith.constant 2.000000e-01 : f32
    %94 = vector.broadcast %cst_43 : f32 to vector<128x128xf32>
    %95 = arith.mulf %94, %93 : vector<128x128xf32>
    %96 = arith.maximumf %93, %95 : vector<128x128xf32>
    %97 = arith.truncf %96 : vector<128x128xf32> to vector<128x128xbf16>
    %c0_44 = arith.constant 0 : index
    %c0_45 = arith.constant 0 : index
    %98 = vector.load %arg7[%c0_44, %c0_45] : memref<512x128xbf16, #tpu.memory_space<vmem>>, vector<512x128xbf16>
    %cst_46 = arith.constant dense<0.000000e+00> : vector<512x128xf32>
    %99 = tpu.matmul %98, %97, %cst_46 {dimension_numbers = #tpu.dot_dimension_numbers<[1], [0], [0], [1], [0, 0, 1, 1], [], []>} : vector<512x128xbf16>, vector<128x128xbf16>, vector<512x128xf32> -> vector<512x128xf32>
    %100 = arith.truncf %99 : vector<512x128xf32> to vector<512x128xbf16>
    %cst_47 = arith.constant 0.000000e+00 : f32
    %101 = vector.broadcast %cst_47 : f32 to vector<32x128xf32>
    %102 = vector.extract_strided_slice %100 {offsets = [0, 0], sizes = [32, 128], strides = [1, 1]} : vector<512x128xbf16> to vector<32x128xbf16>
    %103 = vector.extract_strided_slice %100 {offsets = [32, 0], sizes = [32, 128], strides = [1, 1]} : vector<512x128xbf16> to vector<32x128xbf16>
    %104 = tpu.concatenate %102, %103 in 1 : vector<32x128xbf16>, vector<32x128xbf16> -> vector<32x256xbf16>
    %c0_48 = arith.constant 0 : index
    %c0_49 = arith.constant 0 : index
    %c0_50 = arith.constant 0 : index
    %105 = vector.load %arg8[%c0_48, %c0_49, %c0_50] : memref<8x256x128xbf16, #tpu.memory_space<vmem>>, vector<1x256x128xbf16>
    %106 = vector.shape_cast %105 : vector<1x256x128xbf16> to vector<256x128xbf16>
    %cst_51 = arith.constant dense<0.000000e+00> : vector<32x128xf32>
    %107 = tpu.matmul %104, %106, %cst_51 {dimension_numbers = #tpu.dot_dimension_numbers<[1], [0], [0], [1], [0, 0, 1, 1], [], []>} : vector<32x256xbf16>, vector<256x128xbf16>, vector<32x128xf32> -> vector<32x128xf32>
    %108 = arith.addf %101, %107 : vector<32x128xf32>
    %109 = vector.extract_strided_slice %100 {offsets = [64, 0], sizes = [32, 128], strides = [1, 1]} : vector<512x128xbf16> to vector<32x128xbf16>
    %110 = vector.extract_strided_slice %100 {offsets = [96, 0], sizes = [32, 128], strides = [1, 1]} : vector<512x128xbf16> to vector<32x128xbf16>
    %111 = tpu.concatenate %109, %110 in 1 : vector<32x128xbf16>, vector<32x128xbf16> -> vector<32x256xbf16>
    %c1_52 = arith.constant 1 : index
    %c0_53 = arith.constant 0 : index
    %c0_54 = arith.constant 0 : index
    %112 = vector.load %arg8[%c1_52, %c0_53, %c0_54] : memref<8x256x128xbf16, #tpu.memory_space<vmem>>, vector<1x256x128xbf16>
    %113 = vector.shape_cast %112 : vector<1x256x128xbf16> to vector<256x128xbf16>
    %cst_55 = arith.constant dense<0.000000e+00> : vector<32x128xf32>
    %114 = tpu.matmul %111, %113, %cst_55 {dimension_numbers = #tpu.dot_dimension_numbers<[1], [0], [0], [1], [0, 0, 1, 1], [], []>} : vector<32x256xbf16>, vector<256x128xbf16>, vector<32x128xf32> -> vector<32x128xf32>
    %115 = arith.addf %108, %114 : vector<32x128xf32>
    %116 = vector.extract_strided_slice %100 {offsets = [128, 0], sizes = [32, 128], strides = [1, 1]} : vector<512x128xbf16> to vector<32x128xbf16>
    %117 = vector.extract_strided_slice %100 {offsets = [160, 0], sizes = [32, 128], strides = [1, 1]} : vector<512x128xbf16> to vector<32x128xbf16>
    %118 = tpu.concatenate %116, %117 in 1 : vector<32x128xbf16>, vector<32x128xbf16> -> vector<32x256xbf16>
    %c2_56 = arith.constant 2 : index
    %c0_57 = arith.constant 0 : index
    %c0_58 = arith.constant 0 : index
    %119 = vector.load %arg8[%c2_56, %c0_57, %c0_58] : memref<8x256x128xbf16, #tpu.memory_space<vmem>>, vector<1x256x128xbf16>
    %120 = vector.shape_cast %119 : vector<1x256x128xbf16> to vector<256x128xbf16>
    %cst_59 = arith.constant dense<0.000000e+00> : vector<32x128xf32>
    %121 = tpu.matmul %118, %120, %cst_59 {dimension_numbers = #tpu.dot_dimension_numbers<[1], [0], [0], [1], [0, 0, 1, 1], [], []>} : vector<32x256xbf16>, vector<256x128xbf16>, vector<32x128xf32> -> vector<32x128xf32>
    %122 = arith.addf %115, %121 : vector<32x128xf32>
    %123 = vector.extract_strided_slice %100 {offsets = [192, 0], sizes = [32, 128], strides = [1, 1]} : vector<512x128xbf16> to vector<32x128xbf16>
    %124 = vector.extract_strided_slice %100 {offsets = [224, 0], sizes = [32, 128], strides = [1, 1]} : vector<512x128xbf16> to vector<32x128xbf16>
    %125 = tpu.concatenate %123, %124 in 1 : vector<32x128xbf16>, vector<32x128xbf16> -> vector<32x256xbf16>
    %c3_60 = arith.constant 3 : index
    %c0_61 = arith.constant 0 : index
    %c0_62 = arith.constant 0 : index
    %126 = vector.load %arg8[%c3_60, %c0_61, %c0_62] : memref<8x256x128xbf16, #tpu.memory_space<vmem>>, vector<1x256x128xbf16>
    %127 = vector.shape_cast %126 : vector<1x256x128xbf16> to vector<256x128xbf16>
    %cst_63 = arith.constant dense<0.000000e+00> : vector<32x128xf32>
    %128 = tpu.matmul %125, %127, %cst_63 {dimension_numbers = #tpu.dot_dimension_numbers<[1], [0], [0], [1], [0, 0, 1, 1], [], []>} : vector<32x256xbf16>, vector<256x128xbf16>, vector<32x128xf32> -> vector<32x128xf32>
    %129 = arith.addf %122, %128 : vector<32x128xf32>
    %130 = vector.extract_strided_slice %100 {offsets = [256, 0], sizes = [32, 128], strides = [1, 1]} : vector<512x128xbf16> to vector<32x128xbf16>
    %131 = vector.extract_strided_slice %100 {offsets = [288, 0], sizes = [32, 128], strides = [1, 1]} : vector<512x128xbf16> to vector<32x128xbf16>
    %132 = tpu.concatenate %130, %131 in 1 : vector<32x128xbf16>, vector<32x128xbf16> -> vector<32x256xbf16>
    %c4_64 = arith.constant 4 : index
    %c0_65 = arith.constant 0 : index
    %c0_66 = arith.constant 0 : index
    %133 = vector.load %arg8[%c4_64, %c0_65, %c0_66] : memref<8x256x128xbf16, #tpu.memory_space<vmem>>, vector<1x256x128xbf16>
    %134 = vector.shape_cast %133 : vector<1x256x128xbf16> to vector<256x128xbf16>
    %cst_67 = arith.constant dense<0.000000e+00> : vector<32x128xf32>
    %135 = tpu.matmul %132, %134, %cst_67 {dimension_numbers = #tpu.dot_dimension_numbers<[1], [0], [0], [1], [0, 0, 1, 1], [], []>} : vector<32x256xbf16>, vector<256x128xbf16>, vector<32x128xf32> -> vector<32x128xf32>
    %136 = arith.addf %129, %135 : vector<32x128xf32>
    %137 = vector.extract_strided_slice %100 {offsets = [320, 0], sizes = [32, 128], strides = [1, 1]} : vector<512x128xbf16> to vector<32x128xbf16>
    %138 = vector.extract_strided_slice %100 {offsets = [352, 0], sizes = [32, 128], strides = [1, 1]} : vector<512x128xbf16> to vector<32x128xbf16>
    %139 = tpu.concatenate %137, %138 in 1 : vector<32x128xbf16>, vector<32x128xbf16> -> vector<32x256xbf16>
    %c5_68 = arith.constant 5 : index
    %c0_69 = arith.constant 0 : index
    %c0_70 = arith.constant 0 : index
    %140 = vector.load %arg8[%c5_68, %c0_69, %c0_70] : memref<8x256x128xbf16, #tpu.memory_space<vmem>>, vector<1x256x128xbf16>
    %141 = vector.shape_cast %140 : vector<1x256x128xbf16> to vector<256x128xbf16>
    %cst_71 = arith.constant dense<0.000000e+00> : vector<32x128xf32>
    %142 = tpu.matmul %139, %141, %cst_71 {dimension_numbers = #tpu.dot_dimension_numbers<[1], [0], [0], [1], [0, 0, 1, 1], [], []>} : vector<32x256xbf16>, vector<256x128xbf16>, vector<32x128xf32> -> vector<32x128xf32>
    %143 = arith.addf %136, %142 : vector<32x128xf32>
    %144 = vector.extract_strided_slice %100 {offsets = [384, 0], sizes = [32, 128], strides = [1, 1]} : vector<512x128xbf16> to vector<32x128xbf16>
    %145 = vector.extract_strided_slice %100 {offsets = [416, 0], sizes = [32, 128], strides = [1, 1]} : vector<512x128xbf16> to vector<32x128xbf16>
    %146 = tpu.concatenate %144, %145 in 1 : vector<32x128xbf16>, vector<32x128xbf16> -> vector<32x256xbf16>
    %c6_72 = arith.constant 6 : index
    %c0_73 = arith.constant 0 : index
    %c0_74 = arith.constant 0 : index
    %147 = vector.load %arg8[%c6_72, %c0_73, %c0_74] : memref<8x256x128xbf16, #tpu.memory_space<vmem>>, vector<1x256x128xbf16>
    %148 = vector.shape_cast %147 : vector<1x256x128xbf16> to vector<256x128xbf16>
    %cst_75 = arith.constant dense<0.000000e+00> : vector<32x128xf32>
    %149 = tpu.matmul %146, %148, %cst_75 {dimension_numbers = #tpu.dot_dimension_numbers<[1], [0], [0], [1], [0, 0, 1, 1], [], []>} : vector<32x256xbf16>, vector<256x128xbf16>, vector<32x128xf32> -> vector<32x128xf32>
    %150 = arith.addf %143, %149 : vector<32x128xf32>
    %151 = vector.extract_strided_slice %100 {offsets = [448, 0], sizes = [32, 128], strides = [1, 1]} : vector<512x128xbf16> to vector<32x128xbf16>
    %152 = vector.extract_strided_slice %100 {offsets = [480, 0], sizes = [32, 128], strides = [1, 1]} : vector<512x128xbf16> to vector<32x128xbf16>
    %153 = tpu.concatenate %151, %152 in 1 : vector<32x128xbf16>, vector<32x128xbf16> -> vector<32x256xbf16>
    %c7_76 = arith.constant 7 : index
    %c0_77 = arith.constant 0 : index
    %c0_78 = arith.constant 0 : index
    %154 = vector.load %arg8[%c7_76, %c0_77, %c0_78] : memref<8x256x128xbf16, #tpu.memory_space<vmem>>, vector<1x256x128xbf16>
    %155 = vector.shape_cast %154 : vector<1x256x128xbf16> to vector<256x128xbf16>
    %cst_79 = arith.constant dense<0.000000e+00> : vector<32x128xf32>
    %156 = tpu.matmul %153, %155, %cst_79 {dimension_numbers = #tpu.dot_dimension_numbers<[1], [0], [0], [1], [0, 0, 1, 1], [], []>} : vector<32x256xbf16>, vector<256x128xbf16>, vector<32x128xf32> -> vector<32x128xf32>
    %157 = arith.addf %150, %156 : vector<32x128xf32>
    %158 = vector.extract_strided_slice %157 {offsets = [0, 0], sizes = [8, 128], strides = [1, 1]} : vector<32x128xf32> to vector<8x128xf32>
    %cst_80 = arith.constant dense<0.000000e+00> : vector<128xf32>
    %159 = vector.multi_reduction <add>, %158, %cst_80 [0] : vector<8x128xf32> to vector<128xf32>
    %160 = vector.shape_cast %159 : vector<128xf32> to vector<1x128xf32>
    %cst_81 = arith.constant 1.250000e-01 : f32
    %161 = vector.broadcast %cst_81 : f32 to vector<1x128xf32>
    %162 = arith.mulf %160, %161 : vector<1x128xf32>
    %163 = arith.mulf %158, %158 : vector<8x128xf32>
    %cst_82 = arith.constant dense<0.000000e+00> : vector<128xf32>
    %164 = vector.multi_reduction <add>, %163, %cst_82 [0] : vector<8x128xf32> to vector<128xf32>
    %165 = vector.shape_cast %164 : vector<128xf32> to vector<1x128xf32>
    %cst_83 = arith.constant 1.250000e-01 : f32
    %166 = vector.broadcast %cst_83 : f32 to vector<1x128xf32>
    %167 = arith.mulf %165, %166 : vector<1x128xf32>
    %168 = arith.mulf %162, %162 : vector<1x128xf32>
    %169 = arith.subf %167, %168 : vector<1x128xf32>
    %cst_84 = arith.constant 0.000000e+00 : f32
    %170 = vector.broadcast %cst_84 : f32 to vector<1x128xf32>
    %171 = arith.maximumf %169, %170 : vector<1x128xf32>
    %172 = vector.broadcast %162 : vector<1x128xf32> to vector<32x128xf32>
    %173 = arith.subf %157, %172 : vector<32x128xf32>
    %cst_85 = arith.constant 9.99999974E-6 : f32
    %174 = vector.broadcast %cst_85 : f32 to vector<1x128xf32>
    %175 = arith.addf %171, %174 : vector<1x128xf32>
    %176 = math.rsqrt %175 : vector<1x128xf32>
    %177 = vector.broadcast %176 : vector<1x128xf32> to vector<32x128xf32>
    %178 = arith.mulf %173, %177 : vector<32x128xf32>
    %c0_86 = arith.constant 0 : index
    %c0_87 = arith.constant 0 : index
    %179 = vector.load %arg9[%c0_86, %c0_87] : memref<1x128xf32, #tpu.memory_space<vmem>>, vector<1x128xf32>
    %180 = vector.broadcast %179 : vector<1x128xf32> to vector<32x128xf32>
    %181 = arith.mulf %178, %180 : vector<32x128xf32>
    %c0_88 = arith.constant 0 : index
    %c0_89 = arith.constant 0 : index
    %182 = vector.load %arg10[%c0_88, %c0_89] : memref<1x128xf32, #tpu.memory_space<vmem>>, vector<1x128xf32>
    %183 = vector.broadcast %182 : vector<1x128xf32> to vector<32x128xf32>
    %184 = arith.addf %181, %183 : vector<32x128xf32>
    %cst_90 = arith.constant 2.000000e-01 : f32
    %185 = vector.broadcast %cst_90 : f32 to vector<32x128xf32>
    %186 = arith.mulf %185, %184 : vector<32x128xf32>
    %187 = arith.maximumf %184, %186 : vector<32x128xf32>
    %188 = arith.truncf %187 : vector<32x128xf32> to vector<32x128xbf16>
    %c0_91 = arith.constant 0 : index
    %c0_92 = arith.constant 0 : index
    %189 = vector.load %arg11[%c0_91, %c0_92] : memref<32x32xbf16, #tpu.memory_space<vmem>>, vector<32x32xbf16>
    %cst_93 = arith.constant dense<0.000000e+00> : vector<32x128xf32>
    %190 = tpu.matmul %189, %188, %cst_93 {dimension_numbers = #tpu.dot_dimension_numbers<[1], [0], [0], [1], [0, 0, 1, 1], [], []>} : vector<32x32xbf16>, vector<32x128xbf16>, vector<32x128xf32> -> vector<32x128xf32>
    %191 = arith.truncf %190 : vector<32x128xf32> to vector<32x128xbf16>
    %cst_94 = arith.constant 0.000000e+00 : f32
    %192 = vector.broadcast %cst_94 : f32 to vector<8x128xf32>
    %193 = vector.extract_strided_slice %191 {offsets = [0, 0], sizes = [8, 128], strides = [1, 1]} : vector<32x128xbf16> to vector<8x128xbf16>
    %194 = vector.extract_strided_slice %191 {offsets = [8, 0], sizes = [8, 128], strides = [1, 1]} : vector<32x128xbf16> to vector<8x128xbf16>
    %195 = tpu.concatenate %193, %194 in 1 : vector<8x128xbf16>, vector<8x128xbf16> -> vector<8x256xbf16>
    %c0_95 = arith.constant 0 : index
    %c0_96 = arith.constant 0 : index
    %c0_97 = arith.constant 0 : index
    %196 = vector.load %arg12[%c0_95, %c0_96, %c0_97] : memref<2x256x128xbf16, #tpu.memory_space<vmem>>, vector<1x256x128xbf16>
    %197 = vector.shape_cast %196 : vector<1x256x128xbf16> to vector<256x128xbf16>
    %cst_98 = arith.constant dense<0.000000e+00> : vector<8x128xf32>
    %198 = tpu.matmul %195, %197, %cst_98 {dimension_numbers = #tpu.dot_dimension_numbers<[1], [0], [0], [1], [0, 0, 1, 1], [], []>} : vector<8x256xbf16>, vector<256x128xbf16>, vector<8x128xf32> -> vector<8x128xf32>
    %199 = arith.addf %192, %198 : vector<8x128xf32>
    %200 = vector.extract_strided_slice %191 {offsets = [16, 0], sizes = [8, 128], strides = [1, 1]} : vector<32x128xbf16> to vector<8x128xbf16>
    %201 = vector.extract_strided_slice %191 {offsets = [24, 0], sizes = [8, 128], strides = [1, 1]} : vector<32x128xbf16> to vector<8x128xbf16>
    %202 = tpu.concatenate %200, %201 in 1 : vector<8x128xbf16>, vector<8x128xbf16> -> vector<8x256xbf16>
    %c1_99 = arith.constant 1 : index
    %c0_100 = arith.constant 0 : index
    %c0_101 = arith.constant 0 : index
    %203 = vector.load %arg12[%c1_99, %c0_100, %c0_101] : memref<2x256x128xbf16, #tpu.memory_space<vmem>>, vector<1x256x128xbf16>
    %204 = vector.shape_cast %203 : vector<1x256x128xbf16> to vector<256x128xbf16>
    %cst_102 = arith.constant dense<0.000000e+00> : vector<8x128xf32>
    %205 = tpu.matmul %202, %204, %cst_102 {dimension_numbers = #tpu.dot_dimension_numbers<[1], [0], [0], [1], [0, 0, 1, 1], [], []>} : vector<8x256xbf16>, vector<256x128xbf16>, vector<8x128xf32> -> vector<8x128xf32>
    %206 = arith.addf %199, %205 : vector<8x128xf32>
    %cst_103 = arith.constant 0.000000e+00 : f32
    %207 = vector.broadcast %cst_103 : f32 to vector<8x128xf32>
    %208 = arith.subf %207, %206 : vector<8x128xf32>
    %209 = math.exp %208 : vector<8x128xf32>
    %cst_104 = arith.constant 1.000000e+00 : f32
    %210 = vector.broadcast %cst_104 : f32 to vector<8x128xf32>
    %211 = arith.addf %210, %209 : vector<8x128xf32>
    %212 = tpu.reciprocal %211 {approx = true} : vector<8x128xf32> -> vector<8x128xf32>
    %c0_105 = arith.constant 0 : index
    %c0_106 = arith.constant 0 : index
    %213 = vector.load %arg13[%c0_105, %c0_106] : memref<8x128xf32, #tpu.memory_space<vmem>>, vector<8x128xf32>
    tpu.vector_store %arg13[%c0_105, %c0_106], %212 {strides = array<i32>} : memref<8x128xf32, #tpu.memory_space<vmem>>, vector<8x128xf32>,
    return
  }
  func.func @transform_0(%arg0: i32) -> (i32, i32) {
    %c0_i32 = arith.constant 0 : i32
    %c0_i32_0 = arith.constant 0 : i32
    %c0_i32_1 = arith.constant 0 : i32
    return %c0_i32, %c0_i32_0 : i32, i32
  }
  func.func @transform_1(%arg0: i32) -> (i32, i32) {
    %c0_i32 = arith.constant 0 : i32
    %c0_i32_0 = arith.constant 0 : i32
    %c0_i32_1 = arith.constant 0 : i32
    return %c0_i32, %c0_i32_0 : i32, i32
  }
  func.func @transform_2(%arg0: i32) -> (i32, i32) {
    %c0_i32 = arith.constant 0 : i32
    %c0_i32_0 = arith.constant 0 : i32
    %c0_i32_1 = arith.constant 0 : i32
    return %c0_i32, %c0_i32_0 : i32, i32
  }
  func.func @transform_3(%arg0: i32) -> (i32, i32, i32) {
    %c0_i32 = arith.constant 0 : i32
    %c0_i32_0 = arith.constant 0 : i32
    %c0_i32_1 = arith.constant 0 : i32
    %c0_i32_2 = arith.constant 0 : i32
    return %c0_i32, %c0_i32_0, %c0_i32_1 : i32, i32, i32
  }
  func.func @transform_4(%arg0: i32) -> (i32, i32) {
    %c0_i32 = arith.constant 0 : i32
    %c0_i32_0 = arith.constant 0 : i32
    %c0_i32_1 = arith.constant 0 : i32
    return %c0_i32, %c0_i32_0 : i32, i32
  }
  func.func @transform_5(%arg0: i32) -> (i32, i32) {
    %c0_i32 = arith.constant 0 : i32
    %c0_i32_0 = arith.constant 0 : i32
    %c0_i32_1 = arith.constant 0 : i32
    return %c0_i32, %c0_i32_0 : i32, i32
  }
  func.func @transform_6(%arg0: i32) -> (i32, i32) {
    %c0_i32 = arith.constant 0 : i32
    %c0_i32_0 = arith.constant 0 : i32
    %c0_i32_1 = arith.constant 0 : i32
    return %c0_i32, %c0_i32_0 : i32, i32
  }
  func.func @transform_7(%arg0: i32) -> (i32, i32, i32) {
    %c0_i32 = arith.constant 0 : i32
    %c0_i32_0 = arith.constant 0 : i32
    %c0_i32_1 = arith.constant 0 : i32
    %c0_i32_2 = arith.constant 0 : i32
    return %c0_i32, %c0_i32_0, %c0_i32_1 : i32, i32, i32
  }
  func.func @transform_8(%arg0: i32) -> (i32, i32) {
    %c0_i32 = arith.constant 0 : i32
    %c0_i32_0 = arith.constant 0 : i32
    %c0_i32_1 = arith.constant 0 : i32
    return %c0_i32, %c0_i32_0 : i32, i32
  }
  func.func @transform_9(%arg0: i32) -> (i32, i32) {
    %c0_i32 = arith.constant 0 : i32
    %c0_i32_0 = arith.constant 0 : i32
    %c0_i32_1 = arith.constant 0 : i32
    return %c0_i32, %c0_i32_0 : i32, i32
  }
  func.func @transform_10(%arg0: i32) -> (i32, i32) {
    %c0_i32 = arith.constant 0 : i32
    %c0_i32_0 = arith.constant 0 : i32
    %c0_i32_1 = arith.constant 0 : i32
    return %c0_i32, %c0_i32_0 : i32, i32
  }
  func.func @transform_11(%arg0: i32) -> (i32, i32, i32) {
    %c0_i32 = arith.constant 0 : i32
    %c0_i32_0 = arith.constant 0 : i32
    %c0_i32_1 = arith.constant 0 : i32
    %c0_i32_2 = arith.constant 0 : i32
    return %c0_i32, %c0_i32_0, %c0_i32_1 : i32, i32, i32
  }
  func.func @transform_12(%arg0: i32) -> (i32, i32) {
    %c0_i32 = arith.constant 0 : i32
    %c0_i32_0 = arith.constant 0 : i32
    %c0_i32_1 = arith.constant 0 : i32
    return %c0_i32, %c0_i32_0 : i32, i32
  }
}

</mosaic_0001>

<bundles_post_ra>
// kernel: discriminator_forward.1
= control target key start
LH: loop header
LB: loop body
LE: loop exit
PB: predicated region body
PF: predicated region fallthrough
CT: control target
= control target key end

     0   :  { %17 = vsyncpa [#allocation3], 0  ;;  %s16773_s0 = inlined_call_operand.vmem [shape: bf16[512,128], index: 0, kind: input, shape index: {}]   ;;  %s16774_s1 = inlined_call_operand.hbm [shape: bf16[128,128], index: 1, kind: input, shape index: {}]   ;;  %s16775_s2 = inlined_call_operand.hbm [shape: bf16[2048,512], index: 2, kind: input, shape index: {}]   ;;  %s16776_s3 = inlined_call_operand.hbm [shape: bf16[8,256,128], index: 3, kind: input, shape index: {}]   ;;  %s16777_s4 = inlined_call_operand.hbm [shape: f32[1,128], index: 4, kind: input, shape index: {}]   ;;  %s16778_s5 = inlined_call_operand.hbm [shape: f32[1,128], index: 5, kind: input, shape index: {}]   ;;  %s16779_s6 = inlined_call_operand.hbm [shape: bf16[512,128], index: 6, kind: input, shape index: {}]   ;;  %s16780_s7 = inlined_call_operand.hbm [shape: bf16[8,256,128], index: 7, kind: input, shape index: {}]   ;;  %s16781_s8 = inlined_call_operand.hbm [shape: f32[1,128], index: 8, kind: input, shape index: {}]   ;;  %s16782_s9 = inlined_call_operand.hbm [shape: f32[1,128], index: 9, kind: input, shape index: {}]   ;;  %s16783_s10 = inlined_call_operand.hbm [shape: bf16[32,32], index: 10, kind: input, shape index: {}]   ;;  %s16784_s11 = inlined_call_operand.hbm [shape: bf16[2,256,128], index: 11, kind: input, shape index: {}]   ;;  %s16785_s12 = inlined_call_operand.vmem [shape: f32[8,128], index: 12, kind: output, shape index: {}]  }
   0x1   :  { %18 = vsyncpa [#allocation5], 0 }
   0x2   :  { %19 = vsyncpa [#allocation8], 0 }
   0x3   :  { %20 = vsyncpa [#allocation11], 0 }
   0x4   :  { %21 = vsyncpa [#allocation14], 0 }
   0x5   :  { %22 = vsyncpa [#allocation17], 0  ;;  %s14513_s21 = smov [#allocation4]   ;;  %s14259_s25 = scalar_lea.hbm %s16775_s2, 65536 }
   0x6   :  { %s42_s22 = sshll.u32 %s14513_s21, 4  ;;  %p14260_p0 = scmp.ne.s32.totalorder %s16775_s2, %s14259_s25  ;;  %s43_s22 = int_to_ptr.vmem [resolvable:$true] %s42_s22 }
   0x7   :  { %p14263_p1 = scmp.lt.u32.totalorder %s14259_s25, %s16775_s2 }
   0x9   :  { %p14265_p2 = pnand %p14263_p1, %p14260_p0 }
   0xb   :  { %14268 = shalt.err (!%p14265_p2)
}
   0xc   :  { %s14269_s30 = scalar_lea.vmem %s43_s22, 65536  ;;  %p14274_p4 = scmp.lt.s32.totalorder %s43_s22, %s43_s22 }
   0xd   :  { %p14270_p3 = scmp.ne.s32.totalorder %s43_s22, %s14269_s30  ;;  %p14275_p5 = scmp.lt.s32.totalorder %s14269_s30, %s14269_s30 }
   0xf   :  { %p14276_p6 = por %p14275_p5, %p14274_p4 }
  0x11   :  { %p14277_p7 = pnand %p14276_p6, %p14270_p3 }
  0x13   :  { %14280 = shalt.err (!%p14277_p7)
}
  0x14   :  { %s14514_s13 = smov 256   ;;  %s14515_s14 = smov 16  }
  0x15   :  { %48 = dma.hbm_to_vmem [thread:$0]  %s16775_s2, 65536, %s43_s22, [#allocation5], %s14514_s13, %s14514_s13, %s14515_s14  }
  0x16   :  { %s14516_s17 = smov [#allocation7]   ;;  %s14281_s21 = scalar_lea.hbm %s16777_s4, 16 }
  0x17   :  { %s67_s18 = sshll.u32 %s14516_s17, 4  ;;  %p14282_p8 = scmp.ne.s32.totalorder %s16777_s4, %s14281_s21  ;;  %s68_s18 = int_to_ptr.vmem [resolvable:$true] %s67_s18 }
  0x18   :  { %p14285_p9 = scmp.lt.u32.totalorder %s14281_s21, %s16777_s4 }
  0x1a   :  { %p14287_p10 = pnand %p14285_p9, %p14282_p8 }
  0x1c   :  { %14290 = shalt.err (!%p14287_p10)
}
  0x1d   :  { %s14291_s27 = scalar_lea.vmem %s68_s18, 16  ;;  %s14295_s2 = scalar_lea.vmem %s68_s18, 32 }
  0x1e   :  { %p14292_p11 = scmp.ne.s32.totalorder %s68_s18, %s14291_s27  ;;  %p14296_p12 = scmp.lt.s32.totalorder %s68_s18, %s68_s18 }
  0x1f   :  { %p14297_p13 = scmp.lt.s32.totalorder %s14295_s2, %s14291_s27 }
  0x21   :  { %p14298_p0 = por %p14297_p13, %p14296_p12 }
  0x23   :  { %p14299_p1 = pnand %p14298_p0, %p14292_p11 }
  0x25   :  { %14302 = shalt.err (!%p14299_p1)
}
  0x26   :  { %70 = dma.hbm_to_vmem [thread:$0]  %s16777_s4, 16, %s68_s18, [#allocation8]  }
  0x27   :  { %s14517_s29 = smov [#allocation10]   ;;  %s14518_s13 = smov [#allocation13]  }
  0x28   :  { %s86_s30 = sshll.u32 %s14517_s29, 4  ;;  %s111_s14 = sshll.u32 %s14518_s13, 4  ;;  %s87_s30 = int_to_ptr.vmem [resolvable:$true] %s86_s30  ;;  %s14618_s14 = int_to_ptr.vmem [resolvable:$true] %s111_s14 }
  0x29   :  { %s14303_s17 = scalar_lea.hbm %s16779_s6, 4096 }
  0x2a   :  { %p14304_p2 = scmp.ne.s32.totalorder %s16779_s6, %s14303_s17  ;;  %p14307_p3 = scmp.lt.u32.totalorder %s14303_s17, %s16779_s6 }
  0x2c   :  { %p14309_p4 = pnand %p14307_p3, %p14304_p2 }
  0x2e   :  { %14312 = shalt.err (!%p14309_p4)
}
  0x2f   :  { %s14313_s4 = scalar_lea.vmem %s87_s30, 4096  ;;  %p14318_p6 = scmp.lt.s32.totalorder %s87_s30, %s87_s30 }
  0x30   :  { %p14314_p5 = scmp.ne.s32.totalorder %s87_s30, %s14313_s4  ;;  %p14319_p7 = scmp.lt.s32.totalorder %s14313_s4, %s14313_s4 }
  0x32   :  { %p14320_p8 = por %p14319_p7, %p14318_p6 }
  0x34   :  { %p14321_p9 = pnand %p14320_p8, %p14314_p5 }
  0x36   :  { %14324 = shalt.err (!%p14321_p9)
}
  0x37   :  { %s14519_s18 = smov 64   ;;  %s14520_s24 = smov 4  }
  0x38   :  { %92 = dma.hbm_to_vmem [thread:$0]  %s16779_s6, 4096, %s87_s30, [#allocation11], %s14519_s18, %s14519_s18, %s14520_s24  }
  0x39   :  { %s14325_s22 = scalar_lea.hbm %s16781_s8, 16 }
  0x3a   :  { %p14326_p10 = scmp.ne.s32.totalorder %s16781_s8, %s14325_s22  ;;  %p14329_p11 = scmp.lt.u32.totalorder %s14325_s22, %s16781_s8 }
  0x3c   :  { %p14331_p12 = pnand %p14329_p11, %p14326_p10 }
  0x3e   :  { %14334 = shalt.err (!%p14331_p12)
}
  0x3f   :  { %s14335_s16 = scalar_lea.vmem %s14618_s14, 16  ;;  %s14339_s6 = scalar_lea.vmem %s14618_s14, 32 }
  0x40   :  { %p14336_p13 = scmp.ne.s32.totalorder %s14618_s14, %s14335_s16  ;;  %p14340_p0 = scmp.lt.s32.totalorder %s14618_s14, %s14618_s14 }
  0x41   :  { %p14341_p1 = scmp.lt.s32.totalorder %s14339_s6, %s14335_s16 }
  0x43   :  { %p14342_p2 = por %p14341_p1, %p14340_p0 }
  0x45   :  { %p14343_p3 = pnand %p14342_p2, %p14336_p13 }
  0x47   :  { %14346 = shalt.err (!%p14343_p3)
}
  0x48   :  { %114 = dma.hbm_to_vmem [thread:$0]  %s16781_s8, 16, %s14618_s14, [#allocation14]  }
  0x49   :  { %s14521_s19 = smov [#allocation16]   ;;  %s14522_s21 = smov [#allocation2]  }
  0x4a   :  { %s130_s20 = sshll.u32 %s14521_s19, 4  ;;  %s30_s23 = sshll.u32 %s14522_s21, 4  ;;  %s131_s20 = int_to_ptr.vmem [resolvable:$true] %s130_s20  ;;  %s14653_s23 = int_to_ptr.vmem [resolvable:$true] %s30_s23 }
  0x4b   :  { %s14347_s26 = scalar_lea.hbm %s16783_s10, 256 }
  0x4c   :  { %p14348_p4 = scmp.ne.s32.totalorder %s16783_s10, %s14347_s26  ;;  %p14351_p5 = scmp.lt.u32.totalorder %s14347_s26, %s16783_s10 }
  0x4e   :  { %p14353_p6 = pnand %p14351_p5, %p14348_p4 }
  0x50   :  { %14356 = shalt.err (!%p14353_p6)
}
  0x51   :  { %s14357_s8 = scalar_lea.vmem %s131_s20, 256  ;;  %p14362_p8 = scmp.lt.s32.totalorder %s131_s20, %s131_s20 }
  0x52   :  { %p14358_p7 = scmp.ne.s32.totalorder %s131_s20, %s14357_s8  ;;  %p14363_p9 = scmp.lt.s32.totalorder %s14357_s8, %s14357_s8 }
  0x54   :  { %p14364_p10 = por %p14363_p9, %p14362_p8 }
  0x56   :  { %p14365_p11 = pnand %p14364_p10, %p14358_p7 }
  0x58   :  { %14368 = shalt.err (!%p14365_p11)
}
  0x59   :  { %136 = dma.hbm_to_vmem [thread:$0]  %s16783_s10, 256, %s131_s20, [#allocation17], %s14519_s18, %s14519_s18, %s14520_s24  }
  0x5a   :  { %s14369_s16 = scalar_lea.hbm %s16774_s1, 1024 }
  0x5b   :  { %p14370_p12 = scmp.ne.s32.totalorder %s16774_s1, %s14369_s16  ;;  %p14373_p13 = scmp.lt.u32.totalorder %s14369_s16, %s16774_s1 }
  0x5d   :  { %p14375_p0 = pnand %p14373_p13, %p14370_p12 }
  0x5f   :  { %14378 = shalt.err (!%p14375_p0)
}
  0x60   :  { %s14379_s21 = scalar_lea.vmem %s14653_s23, 1024  ;;  %p14384_p2 = scmp.lt.s32.totalorder %s14653_s23, %s14653_s23 }
  0x61   :  { %p14380_p1 = scmp.ne.s32.totalorder %s14653_s23, %s14379_s21  ;;  %p14385_p3 = scmp.lt.s32.totalorder %s14379_s21, %s14379_s21 }
  0x63   :  { %p14386_p4 = por %p14385_p3, %p14384_p2 }
  0x65   :  { %p14387_p5 = pnand %p14386_p4, %p14380_p1 }
  0x67   :  { %14390 = shalt.err (!%p14387_p5)
}
  0x68   :  { %36 = dma.hbm_to_vmem [thread:$0]  %s16774_s1, 1024, %s14653_s23, [#allocation3], %s14519_s18, %s14519_s18, %s14520_s24  }
  0x69   :  { %s14523_s4 = smov [#allocation6]   ;;  %s14524_s26 = smov [#allocation9]  }
  0x6a   :  { %s54_s25 = sshll.u32 %s14523_s4, 4  ;;  %s77_s27 = sshll.u32 %s14524_s26, 4  ;;  %s55_s25 = int_to_ptr.vmem [resolvable:$true] %s54_s25  ;;  %s78_s27 = int_to_ptr.vmem [resolvable:$true] %s77_s27 }
  0x6b   :  { %s14391_s28 = scalar_lea.hbm %s16776_s3, 16384 }
  0x6c   :  { %p14392_p6 = scmp.ne.s32.totalorder %s16776_s3, %s14391_s28  ;;  %p14395_p7 = scmp.lt.u32.totalorder %s14391_s28, %s16776_s3 }
  0x6e   :  { %p14397_p8 = pnand %p14395_p7, %p14392_p6 }
  0x70   :  { %14400 = shalt.err (!%p14397_p8)
}
  0x71   :  { %s14401_s1 = scalar_lea.vmem %s55_s25, 16384  ;;  %p14406_p10 = scmp.lt.s32.totalorder %s55_s25, %s55_s25 }
  0x72   :  { %p14402_p9 = scmp.ne.s32.totalorder %s55_s25, %s14401_s1  ;;  %p14407_p11 = scmp.lt.s32.totalorder %s14401_s1, %s14401_s1 }
  0x74   :  { %p14408_p12 = por %p14407_p11, %p14406_p10 }
  0x76   :  { %p14409_p13 = pnand %p14408_p12, %p14402_p9 }
  0x78   :  { %14412 = shalt.err (!%p14409_p13)
}
  0x79   :  { %60 = dma.hbm_to_vmem [thread:$0]  %s16776_s3, 16384, %s55_s25, [#allocation5], %s14519_s18, %s14519_s18, %s14520_s24  }
  0x7a   :  { %s14413_s30 = scalar_lea.hbm %s16778_s5, 16 }
  0x7b   :  { %p14414_p0 = scmp.ne.s32.totalorder %s16778_s5, %s14413_s30  ;;  %p14417_p1 = scmp.lt.u32.totalorder %s14413_s30, %s16778_s5 }
  0x7d   :  { %p14419_p2 = pnand %p14417_p1, %p14414_p0 }
  0x7f   :  { %14422 = shalt.err (!%p14419_p2)
}
  0x80   :  { %s14423_s20 = scalar_lea.vmem %s78_s27, 16  ;;  %s14427_s4 = scalar_lea.vmem %s78_s27, 32 }
  0x81   :  { %p14424_p3 = scmp.ne.s32.totalorder %s78_s27, %s14423_s20  ;;  %p14428_p4 = scmp.lt.s32.totalorder %s78_s27, %s78_s27 }
  0x82   :  { %p14429_p5 = scmp.lt.s32.totalorder %s14427_s4, %s14423_s20 }
  0x84   :  { %p14430_p6 = por %p14429_p5, %p14428_p4 }
  0x86   :  { %p14431_p7 = pnand %p14430_p6, %p14424_p3 }
  0x88   :  { %14434 = shalt.err (!%p14431_p7)
}
  0x89   :  { %80 = dma.hbm_to_vmem [thread:$0]  %s16778_s5, 16, %s78_s27, [#allocation8]  }
  0x8a   :  { %s14525_s26 = smov [#allocation12]   ;;  %s14526_s22 = smov [#allocation15]  }
  0x8b   :  { %s98_s2 = sshll.u32 %s14525_s26, 4  ;;  %s121_s28 = sshll.u32 %s14526_s22, 4  ;;  %s99_s2 = int_to_ptr.vmem [resolvable:$true] %s98_s2  ;;  %s122_s28 = int_to_ptr.vmem [resolvable:$true] %s121_s28 }
  0x8c   :  { %s14435_s29 = scalar_lea.hbm %s16780_s7, 16384 }
  0x8d   :  { %p14436_p8 = scmp.ne.s32.totalorder %s16780_s7, %s14435_s29  ;;  %p14439_p9 = scmp.lt.u32.totalorder %s14435_s29, %s16780_s7 }
  0x8f   :  { %p14441_p10 = pnand %p14439_p9, %p14436_p8 }
  0x91   :  { %14444 = shalt.err (!%p14441_p10)
}
  0x92   :  { %s14445_s5 = scalar_lea.vmem %s99_s2, 16384  ;;  %p14450_p12 = scmp.lt.s32.totalorder %s99_s2, %s99_s2 }
  0x93   :  { %p14446_p11 = scmp.ne.s32.totalorder %s99_s2, %s14445_s5  ;;  %p14451_p13 = scmp.lt.s32.totalorder %s14445_s5, %s14445_s5 }
  0x95   :  { %p14452_p0 = por %p14451_p13, %p14450_p12 }
  0x97   :  { %p14453_p1 = pnand %p14452_p0, %p14446_p11 }
  0x99   :  { %14456 = shalt.err (!%p14453_p1)
}
  0x9a   :  { %104 = dma.hbm_to_vmem [thread:$0]  %s16780_s7, 16384, %s99_s2, [#allocation11], %s14519_s18, %s14519_s18, %s14520_s24  }
  0x9b   :  { %s14457_s17 = scalar_lea.hbm %s16782_s9, 16 }
  0x9c   :  { %p14458_p2 = scmp.ne.s32.totalorder %s16782_s9, %s14457_s17  ;;  %p14461_p3 = scmp.lt.u32.totalorder %s14457_s17, %s16782_s9 }
  0x9e   :  { %p14463_p4 = pnand %p14461_p3, %p14458_p2 }
  0xa0   :  { %14466 = shalt.err (!%p14463_p4)
}
  0xa1   :  { %s14467_s4 = scalar_lea.vmem %s122_s28, 16  ;;  %s14471_s3 = scalar_lea.vmem %s122_s28, 32 }
  0xa2   :  { %p14468_p5 = scmp.ne.s32.totalorder %s122_s28, %s14467_s4  ;;  %p14472_p6 = scmp.lt.s32.totalorder %s122_s28, %s122_s28 }
  0xa3   :  { %p14473_p7 = scmp.lt.s32.totalorder %s14471_s3, %s14467_s4 }
  0xa5   :  { %p14474_p8 = por %p14473_p7, %p14472_p6 }
  0xa7   :  { %p14475_p9 = pnand %p14474_p8, %p14468_p5 }
  0xa9   :  { %14478 = shalt.err (!%p14475_p9)
}
  0xaa   :  { %124 = dma.hbm_to_vmem [thread:$0]  %s16782_s9, 16, %s122_s28, [#allocation14]  }
  0xab   :  { %s14527_s26 = smov [#allocation18]   ;;  %s14479_s14 = scalar_lea.hbm %s16784_s11, 4096 }
  0xac   :  { %s142_s2 = sshll.u32 %s14527_s26, 4  ;;  %p14480_p10 = scmp.ne.s32.totalorder %s16784_s11, %s14479_s14  ;;  %s143_s2 = int_to_ptr.vmem [resolvable:$true] %s142_s2 }
  0xad   :  { %p14483_p11 = scmp.lt.u32.totalorder %s14479_s14, %s16784_s11 }
  0xaf   :  { %p14485_p12 = pnand %p14483_p11, %p14480_p10 }
  0xb1   :  { %14488 = shalt.err (!%p14485_p12)
}
  0xb2   :  { %s14489_s15 = scalar_lea.vmem %s143_s2, 4096  ;;  %p14494_p0 = scmp.lt.s32.totalorder %s143_s2, %s143_s2 }
  0xb3   :  { %p14490_p13 = scmp.ne.s32.totalorder %s143_s2, %s14489_s15  ;;  %p14495_p1 = scmp.lt.s32.totalorder %s14489_s15, %s14489_s15 }
  0xb5   :  { %p14496_p2 = por %p14495_p1, %p14494_p0 }
  0xb7   :  { %p14497_p3 = pnand %p14496_p2, %p14490_p13 }
  0xb9   :  { %14500 = shalt.err (!%p14497_p3)
}
  0xba   :  { %148 = dma.hbm_to_vmem [thread:$0]  %s16784_s11, 4096, %s143_s2, [#allocation17], %s14519_s18, %s14519_s18, %s14520_s24  }
  0xbb   :  { %14501 = dma.done.wait [#allocation3], 1024  }
  0xbc   :  { %14502 = vsyncadd [#allocation3], 4294966272 }
  0xbd   :  { %14503 = dma.done.wait [#allocation5], 81920  }
  0xbe   :  { %14504 = vsyncadd [#allocation5], 4294885376 }
  0xbf   :  { %14505 = dma.done.wait [#allocation8], 32  }
  0xc0   :  { %14506 = vsyncadd [#allocation8], 4294967264 }
  0xc1   :  { %14507 = dma.done.wait [#allocation11], 20480  }
  0xc2   :  { %14508 = vsyncadd [#allocation11], 4294946816 }
  0xc3   :  { %14509 = dma.done.wait [#allocation14], 32  }
  0xc4   :  { %14510 = vsyncadd [#allocation14], 4294967264 }
  0xc5   :  { %14511 = dma.done.wait [#allocation17], 4352  }
  0xc6   :  { %14512 = vsyncadd [#allocation17], 4294962944  ;;  %v13121_v0 = vld [vmem:[#allocation2] sm:$0xff]   ;;  %v13122_v1 = vld [vmem:[#allocation2 + $0x8] sm:$0xff]   ;;  %v14528_v29 = vmov 0   ;;  %vm10414_vm0 = vcmask 261120  }
  0xc7   :  { %12575 = vmatprep.subr.bf16.mxu0 %v13121_v0  ;;  %v13123_v2 = vld [vmem:[#allocation2 + $0x10] sm:$0xff]   ;;  %v13124_v3 = vld [vmem:[#allocation2 + $0x18] sm:$0xff]   ;;  %v13129_v4 = vld [vmem:[%s16773_s0] sm:$0xff]   ;;  %12743 = vmatprep.subr.bf16.mxu1 %v14528_v29 }
  0xc8   :  { %12576 = vmatpush3.bf16.msra.mxu0 %v13121_v0  ;;  %12591 = vmatprep.mubr.bf16.mxu0 %v13129_v4  ;;  %v13125_v5 = vld [vmem:[#allocation2 + $0x20] sm:$0xff]   ;;  %v13126_v6 = vld [vmem:[#allocation2 + $0x28] sm:$0xff]   ;;  %v13127_v7 = vld [vmem:[#allocation2 + $0x30] sm:$0xff]  }
  0xc9   :  { %12577 = vmatprep.subr.bf16.mxu0 %v13122_v1  ;;  %v13128_v8 = vld [vmem:[#allocation2 + $0x38] sm:$0xff]   ;;  %v13130_v9 = vld [vmem:[%s16773_s0 + $0x8] sm:$0xff]   ;;  %v13131_v10 = vld [vmem:[%s16773_s0 + $0x10] sm:$0xff]  }
  0xca   :  { %v13132_v11 = vld [vmem:[%s16773_s0 + $0x18] sm:$0xff]   ;;  %v13133_v12 = vld [vmem:[%s16773_s0 + $0x20] sm:$0xff]   ;;  %v13134_v13 = vld [vmem:[%s16773_s0 + $0x28] sm:$0xff]  }
  0xcb   :  { %v13135_v14 = vld [vmem:[%s16773_s0 + $0x30] sm:$0xff]   ;;  %v13136_v15 = vld [vmem:[%s16773_s0 + $0x38] sm:$0xff]   ;;  %v13137_v16 = vld [vmem:[%s16773_s0 + $0x40] sm:$0xff]  }
  0xcc   :  { %12578 = vmatpush3.bf16.msra.mxu0 %v13122_v1  ;;  %v13138_v17 = vld [vmem:[%s16773_s0 + $0x48] sm:$0xff]   ;;  %v13139_v18 = vld [vmem:[%s16773_s0 + $0x50] sm:$0xff]   ;;  %v13140_v19 = vld [vmem:[%s16773_s0 + $0x58] sm:$0xff]  }
  0xcd   :  { %12579 = vmatprep.subr.bf16.mxu0 %v13123_v2  ;;  %v13141_v20 = vld [vmem:[%s16773_s0 + $0x60] sm:$0xff]   ;;  %v13142_v21 = vld [vmem:[%s16773_s0 + $0x68] sm:$0xff]   ;;  %v13143_v22 = vld [vmem:[%s16773_s0 + $0x70] sm:$0xff]  }
  0xce   :  { %v13144_v23 = vld [vmem:[%s16773_s0 + $0x78] sm:$0xff]   ;;  %v13145_v24 = vld [vmem:[%s16773_s0 + $0x80] sm:$0xff]   ;;  %v13146_v25 = vld [vmem:[%s16773_s0 + $0x88] sm:$0xff]  }
  0xcf   :  { %v13147_v26 = vld [vmem:[%s16773_s0 + $0x90] sm:$0xff]   ;;  %v13148_v27 = vld [vmem:[%s16773_s0 + $0x98] sm:$0xff]   ;;  %v13149_v28 = vld [vmem:[%s16773_s0 + $0xa0] sm:$0xff]  }
  0xd0   :  { %12580 = vmatpush3.bf16.msra.mxu0 %v13123_v2  ;;  %v13150_v30 = vld [vmem:[%s16773_s0 + $0xa8] sm:$0xff]   ;;  %v13153_v31 = vld [vmem:[#allocation4 + $0x7c4] ss:$16 sps:$4 sm:$0xff]   ;;  %v13155_v33 = vld [vmem:[%s16773_s0 + $0xb8] sm:$0xff]  }
  0xd1   :  { %12581 = vmatprep.subr.bf16.mxu0 %v13124_v3  ;;  %v13154_v32 = vld [vmem:[%s16773_s0 + $0xb0] sm:$0xff]   ;;  %4552 = vmatprep.mubr.bf16.mxu1 %v13153_v31  ;;  %v13180_v51 = vld [vmem:[%s16773_s0 + $0xc0] sm:$0xff]   ;;  %v13181_v52 = vld [vmem:[%s16773_s0 + $0xc8] sm:$0xff]  }
  0xd4   :  { %12582 = vmatpush3.bf16.msra.mxu0 %v13124_v3 }
  0xd5   :  { %12583 = vmatprep.subr.bf16.mxu0 %v13125_v5 }
  0xd8   :  { %12584 = vmatpush3.bf16.msra.mxu0 %v13125_v5 }
  0xd9   :  { %12585 = vmatprep.subr.bf16.mxu0 %v13126_v6 }
  0xdc   :  { %12586 = vmatpush3.bf16.msra.mxu0 %v13126_v6 }
  0xdd   :  { %12587 = vmatprep.subr.bf16.mxu0 %v13127_v7 }
  0xe0   :  { %12588 = vmatpush3.bf16.msra.mxu0 %v13127_v7 }
  0xe1   :  { %12589 = vmatprep.subr.bf16.mxu0 %v13128_v8 }
  0xe4   :  { %12590 = vmatpush3.bf16.msra.mxu0 %v13128_v8 }
  0xe5   :  { %4024 = vmatprep.subr.bf16.mxu0 %v14528_v29 }
  0xe7   :  { %12592 = vmatmul.mubr.bf16.vlgmr.msra.gmra.mrb[0].mxu0 %v13130_v9 }
  0xe8   :  { %12595 = vmatprep.mubr.bf16.mxu0 %v13131_v10 }
  0xef   :  { %12596 = vmatmul.mubr.bf16.gmra.mrb[4].mxu0 %v13132_v11 }
  0xf0   :  { %12599 = vmatprep.mubr.bf16.mxu0 %v13133_v12 }
  0xf7   :  { %12600 = vmatmul.mubr.bf16.gmra.mrb[8].mxu0 %v13134_v13 }
  0xf8   :  { %12603 = vmatprep.mubr.bf16.mxu0 %v13135_v14 }
  0xff   :  { %12604 = vmatmul.mubr.bf16.gmra.mrb[12].mxu0 %v13136_v15 }
 0x100   :  { %12607 = vmatprep.mubr.bf16.mxu0 %v13137_v16 }
 0x107   :  { %12608 = vmatmul.mubr.bf16.gmra.mrb[16].mxu0 %v13138_v17 }
 0x108   :  { %12611 = vmatprep.mubr.bf16.mxu0 %v13139_v18 }
 0x10f   :  { %12612 = vmatmul.mubr.bf16.gmra.mrb[20].mxu0 %v13140_v19 }
 0x110   :  { %12615 = vmatprep.mubr.bf16.mxu0 %v13141_v20 }
 0x117   :  { %12616 = vmatmul.mubr.bf16.gmra.mrb[24].mxu0 %v13142_v21 }
 0x118   :  { %12619 = vmatprep.mubr.bf16.mxu0 %v13143_v22 }
 0x11f   :  { %12620 = vmatmul.mubr.bf16.gmra.mrb[28].mxu0 %v13144_v23 }
 0x120   :  { %12623 = vmatprep.mubr.bf16.mxu0 %v13145_v24 }
 0x127   :  { %12624 = vmatmul.mubr.bf16.gmra.mrb[32].mxu0 %v13146_v25 }
 0x128   :  { %12627 = vmatprep.mubr.bf16.mxu0 %v13147_v26 }
 0x12f   :  { %12628 = vmatmul.mubr.bf16.gmra.mrb[36].mxu0 %v13148_v27 }
 0x130   :  { %12631 = vmatprep.mubr.bf16.mxu0 %v13149_v28 }
 0x137   :  { %12632 = vmatmul.mubr.bf16.gmra.mrb[40].mxu0 %v13150_v30 }
 0x138   :  { %12635 = vmatprep.mubr.bf16.mxu0 %v13154_v32 }
 0x13f   :  { %12636 = vmatmul.mubr.bf16.gmra.mrb[44].mxu0 %v13155_v33 }
 0x140   :  { %12639 = vmatprep.mubr.bf16.mxu0 %v13180_v51 }
 0x147   :  { %12640 = vmatmul.mubr.bf16.gmra.mrb[48].mxu0 %v13181_v52 }
 0x1ba   :  { %v12593_v34 = vpop.f32.mrb[0].mxu0 }
 0x1bb   :  { %v794_v35 = vmul.f32 0.2, %v12593_v34  ;;  %v537_v36 = vpop.f32.mrb[1].mxu0 }
 0x1bc   :  { %v792_v37 = vmul.f32 0.2, %v537_v36  ;;  %v12594_v38 = vpop.f32.mrb[2].mxu0 }
 0x1bd   :  { %v795_v39 = vmul.f32 0.2, %v12594_v38  ;;  %v540_v40 = vpop.f32.mrb[3].mxu0  ;;  %v858_v42 = vmax.f32 %v12593_v34, %v794_v35 }
 0x1be   :  { %v793_v41 = vmul.f32 0.2, %v540_v40  ;;  %v856_v44 = vmax.f32 %v537_v36, %v792_v37 }
 0x1bf   :  { %v859_v43 = vmax.f32 %v12594_v38, %v795_v39 }
 0x1c0   :  { %v857_v45 = vmax.f32 %v540_v40, %v793_v41 }
 0x1c1   :  { %v921_v46 = vpack.c.bf16 %v859_v43, %v858_v42 }
 0x1c2   :  { %v12597_v47 = vpop.f32.mrb[4].mxu0  ;;  %v920_v48 = vpack.c.bf16 %v857_v45, %v856_v44 }
 0x1c3   :  { %v798_v49 = vmul.f32 0.2, %v12597_v47  ;;  %v553_v50 = vpop.f32.mrb[5].mxu0 }
 0x1c4   :  { %v796_v53 = vmul.f32 0.2, %v553_v50  ;;  %v12598_v54 = vpop.f32.mrb[6].mxu0  ;;  %4025 = vmatpush1.bf16.msra.mxu0 %v920_v48  ;;  %12759 = vmatpush1.bf16.msra.mxu1 %v920_v48 }
 0x1c5   :  { %v799_v55 = vmul.f32 0.2, %v12598_v54  ;;  %v556_v56 = vpop.f32.mrb[7].mxu0  ;;  %4026 = vmatprep.subr.bf16.mxu0 %v14528_v29  ;;  %12744 = vmatprep.subr.bf16.mxu1 %v14528_v29  ;;  %v862_v58 = vmax.f32 %v12597_v47, %v798_v49 }
 0x1c6   :  { %v797_v57 = vmul.f32 0.2, %v556_v56  ;;  %v860_v60 = vmax.f32 %v553_v50, %v796_v53 }
 0x1c7   :  { %v863_v59 = vmax.f32 %v12598_v54, %v799_v55 }
 0x1c8   :  { %v861_v61 = vmax.f32 %v556_v56, %v797_v57  ;;  %4027 = vmatpush1.bf16.msra.mxu0 %v921_v46  ;;  %12760 = vmatpush1.bf16.msra.mxu1 %v921_v46 }
 0x1c9   :  { %4028 = vmatprep.subr.bf16.mxu0 %v14528_v29  ;;  %12745 = vmatprep.subr.bf16.mxu1 %v14528_v29  ;;  %v923_v62 = vpack.c.bf16 %v863_v59, %v862_v58 }
 0x1ca   :  { %v12601_v63 = vpop.f32.mrb[8].mxu0  ;;  %v922_v0 = vpack.c.bf16 %v861_v61, %v860_v60 }
 0x1cb   :  { %v802_v1 = vmul.f32 0.2, %v12601_v63  ;;  %v569_v2 = vpop.f32.mrb[9].mxu0 }
 0x1cc   :  { %v800_v3 = vmul.f32 0.2, %v569_v2  ;;  %v12602_v4 = vpop.f32.mrb[10].mxu0  ;;  %4029 = vmatpush1.bf16.msra.mxu0 %v922_v0  ;;  %12761 = vmatpush1.bf16.msra.mxu1 %v922_v0 }
 0x1cd   :  { %v803_v5 = vmul.f32 0.2, %v12602_v4  ;;  %v572_v6 = vpop.f32.mrb[11].mxu0  ;;  %4030 = vmatprep.subr.bf16.mxu0 %v14528_v29  ;;  %12746 = vmatprep.subr.bf16.mxu1 %v14528_v29  ;;  %v866_v8 = vmax.f32 %v12601_v63, %v802_v1 }
 0x1ce   :  { %v801_v7 = vmul.f32 0.2, %v572_v6  ;;  %v864_v10 = vmax.f32 %v569_v2, %v800_v3 }
 0x1cf   :  { %v867_v9 = vmax.f32 %v12602_v4, %v803_v5 }
 0x1d0   :  { %v865_v11 = vmax.f32 %v572_v6, %v801_v7  ;;  %4031 = vmatpush1.bf16.msra.mxu0 %v923_v62  ;;  %12762 = vmatpush1.bf16.msra.mxu1 %v923_v62 }
 0x1d1   :  { %4032 = vmatprep.subr.bf16.mxu0 %v14528_v29  ;;  %12747 = vmatprep.subr.bf16.mxu1 %v14528_v29  ;;  %v925_v12 = vpack.c.bf16 %v867_v9, %v866_v8 }
 0x1d2   :  { %v12605_v13 = vpop.f32.mrb[12].mxu0  ;;  %v924_v14 = vpack.c.bf16 %v865_v11, %v864_v10 }
 0x1d3   :  { %v806_v15 = vmul.f32 0.2, %v12605_v13  ;;  %v585_v16 = vpop.f32.mrb[13].mxu0 }
 0x1d4   :  { %v804_v17 = vmul.f32 0.2, %v585_v16  ;;  %v12606_v18 = vpop.f32.mrb[14].mxu0  ;;  %4033 = vmatpush1.bf16.msra.mxu0 %v924_v14  ;;  %12763 = vmatpush1.bf16.msra.mxu1 %v924_v14 }
 0x1d5   :  { %v807_v19 = vmul.f32 0.2, %v12606_v18  ;;  %v588_v20 = vpop.f32.mrb[15].mxu0  ;;  %4034 = vmatprep.subr.bf16.mxu0 %v14528_v29  ;;  %12748 = vmatprep.subr.bf16.mxu1 %v14528_v29  ;;  %v870_v22 = vmax.f32 %v12605_v13, %v806_v15 }
 0x1d6   :  { %v805_v21 = vmul.f32 0.2, %v588_v20  ;;  %v868_v24 = vmax.f32 %v585_v16, %v804_v17 }
 0x1d7   :  { %v871_v23 = vmax.f32 %v12606_v18, %v807_v19 }
 0x1d8   :  { %v869_v25 = vmax.f32 %v588_v20, %v805_v21  ;;  %4035 = vmatpush1.bf16.msra.mxu0 %v925_v12  ;;  %12764 = vmatpush1.bf16.msra.mxu1 %v925_v12 }
 0x1d9   :  { %4036 = vmatprep.subr.bf16.mxu0 %v14528_v29  ;;  %12749 = vmatprep.subr.bf16.mxu1 %v14528_v29  ;;  %v927_v26 = vpack.c.bf16 %v871_v23, %v870_v22 }
 0x1da   :  { %v12609_v27 = vpop.f32.mrb[16].mxu0  ;;  %v926_v28 = vpack.c.bf16 %v869_v25, %v868_v24 }
 0x1db   :  { %v810_v30 = vmul.f32 0.2, %v12609_v27  ;;  %v601_v31 = vpop.f32.mrb[17].mxu0 }
 0x1dc   :  { %v808_v32 = vmul.f32 0.2, %v601_v31  ;;  %v12610_v33 = vpop.f32.mrb[18].mxu0  ;;  %4037 = vmatpush1.bf16.msra.mxu0 %v926_v28  ;;  %12765 = vmatpush1.bf16.msra.mxu1 %v926_v28 }
 0x1dd   :  { %v811_v34 = vmul.f32 0.2, %v12610_v33  ;;  %v604_v35 = vpop.f32.mrb[19].mxu0  ;;  %4038 = vmatprep.subr.bf16.mxu0 %v14528_v29  ;;  %12750 = vmatprep.subr.bf16.mxu1 %v14528_v29  ;;  %v874_v37 = vmax.f32 %v12609_v27, %v810_v30 }
 0x1de   :  { %v809_v36 = vmul.f32 0.2, %v604_v35  ;;  %v872_v39 = vmax.f32 %v601_v31, %v808_v32  ;;  %v13156_v31 = vld [vmem:[#allocation4 + $0x7e4] ss:$16 sps:$4 sm:$0xff]  }
 0x1df   :  { %v875_v38 = vmax.f32 %v12610_v33, %v811_v34 }
 0x1e0   :  { %v873_v40 = vmax.f32 %v604_v35, %v809_v36  ;;  %4039 = vmatpush1.bf16.msra.mxu0 %v927_v26  ;;  %12766 = vmatpush1.bf16.msra.mxu1 %v927_v26  ;;  %v13151_v26 = vld [vmem:[#allocation4 + $0x7c0] ss:$16 sps:$4 sm:$0xff]  }
 0x1e1   :  { %4040 = vmatprep.subr.bf16.mxu0 %v14528_v29  ;;  %12751 = vmatprep.subr.bf16.mxu1 %v14528_v29  ;;  %v929_v41 = vpack.c.bf16 %v875_v38, %v874_v37 }
 0x1e2   :  { %v12613_v42 = vpop.f32.mrb[20].mxu0  ;;  %v928_v43 = vpack.c.bf16 %v873_v40, %v872_v39 }
 0x1e3   :  { %v814_v44 = vmul.f32 0.2, %v12613_v42  ;;  %v617_v45 = vpop.f32.mrb[21].mxu0 }
 0x1e4   :  { %v812_v46 = vmul.f32 0.2, %v617_v45  ;;  %v12614_v47 = vpop.f32.mrb[22].mxu0  ;;  %4041 = vmatpush1.bf16.msra.mxu0 %v928_v43  ;;  %12767 = vmatpush1.bf16.msra.mxu1 %v928_v43 }
 0x1e5   :  { %v815_v48 = vmul.f32 0.2, %v12614_v47  ;;  %v620_v49 = vpop.f32.mrb[23].mxu0  ;;  %4042 = vmatprep.subr.bf16.mxu0 %v14528_v29  ;;  %12752 = vmatprep.subr.bf16.mxu1 %v14528_v29  ;;  %v878_v51 = vmax.f32 %v12613_v42, %v814_v44  ;;  %v13207_v42 = vld [vmem:[%s16773_s0 + $0xd8] sm:$0xff]  }
 0x1e6   :  { %v813_v50 = vmul.f32 0.2, %v620_v49  ;;  %v876_v53 = vmax.f32 %v617_v45, %v812_v46  ;;  %v13158_v45 = vld [vmem:[#allocation4 + $0x7e0] ss:$16 sps:$4 sm:$0xff]  }
 0x1e7   :  { %v879_v52 = vmax.f32 %v12614_v47, %v815_v48 }
 0x1e8   :  { %v877_v54 = vmax.f32 %v620_v49, %v813_v50  ;;  %4043 = vmatpush1.bf16.msra.mxu0 %v929_v41  ;;  %12768 = vmatpush1.bf16.msra.mxu1 %v929_v41  ;;  %v13206_v41 = vld [vmem:[%s16773_s0 + $0xd0] sm:$0xff]  }
 0x1e9   :  { %4044 = vmatprep.subr.bf16.mxu0 %v14528_v29  ;;  %12753 = vmatprep.subr.bf16.mxu1 %v14528_v29  ;;  %v931_v55 = vpack.c.bf16 %v879_v52, %v878_v51  ;;  %v13159_v49 = vld [vmem:[#allocation4 + $0x804] ss:$16 sps:$4 sm:$0xff]  }
 0x1ea   :  { %v12617_v56 = vpop.f32.mrb[24].mxu0  ;;  %v930_v57 = vpack.c.bf16 %v877_v54, %v876_v53  ;;  %12643 = vmatprep.mubr.bf16.mxu0 %v13206_v41 }
 0x1eb   :  { %v818_v58 = vmul.f32 0.2, %v12617_v56  ;;  %v633_v59 = vpop.f32.mrb[25].mxu0  ;;  %12644 = vmatmul.mubr.bf16.gmra.mrb[52].mxu0 %v13207_v42 }
 0x1ec   :  { %v816_v60 = vmul.f32 0.2, %v633_v59  ;;  %v12618_v61 = vpop.f32.mrb[26].mxu0  ;;  %4045 = vmatpush1.bf16.msra.mxu0 %v930_v57  ;;  %12769 = vmatpush1.bf16.msra.mxu1 %v930_v57  ;;  %v13162_v57 = vld [vmem:[#allocation4 + $0x824] ss:$16 sps:$4 sm:$0xff]  }
 0x1ed   :  { %v819_v62 = vmul.f32 0.2, %v12618_v61  ;;  %v636_v63 = vpop.f32.mrb[27].mxu0  ;;  %4046 = vmatprep.subr.bf16.mxu0 %v14528_v29  ;;  %12754 = vmatprep.subr.bf16.mxu1 %v14528_v29  ;;  %v882_v1 = vmax.f32 %v12617_v56, %v818_v58  ;;  %v13161_v56 = vld [vmem:[#allocation4 + $0x800] ss:$16 sps:$4 sm:$0xff]  }
 0x1ee   :  { %v817_v0 = vmul.f32 0.2, %v636_v63  ;;  %v880_v3 = vmax.f32 %v633_v59, %v816_v60  ;;  %v13164_v58 = vld [vmem:[#allocation4 + $0x820] ss:$16 sps:$4 sm:$0xff]   ;;  %v13165_v59 = vld [vmem:[#allocation4 + $0x844] ss:$16 sps:$4 sm:$0xff]  }
 0x1ef   :  { %v883_v2 = vmax.f32 %v12618_v61, %v819_v62 }
 0x1f0   :  { %v881_v4 = vmax.f32 %v636_v63, %v817_v0  ;;  %4047 = vmatpush1.bf16.msra.mxu0 %v931_v55  ;;  %12770 = vmatpush1.bf16.msra.mxu1 %v931_v55 }
 0x1f1   :  { %4048 = vmatprep.subr.bf16.mxu0 %v14528_v29  ;;  %12755 = vmatprep.subr.bf16.mxu1 %v14528_v29  ;;  %v933_v5 = vpack.c.bf16 %v883_v2, %v882_v1  ;;  %v13167_v1 = vld [vmem:[#allocation4 + $0x840] ss:$16 sps:$4 sm:$0xff]  }
 0x1f2   :  { %v12621_v6 = vpop.f32.mrb[28].mxu0  ;;  %v932_v7 = vpack.c.bf16 %v881_v4, %v880_v3  ;;  %v13168_v4 = vld [vmem:[#allocation4 + $0x864] ss:$16 sps:$4 sm:$0xff]  }
 0x1f3   :  { %v822_v8 = vmul.f32 0.2, %v12621_v6  ;;  %v649_v9 = vpop.f32.mrb[29].mxu0 }
 0x1f4   :  { %v820_v10 = vmul.f32 0.2, %v649_v9  ;;  %v12622_v11 = vpop.f32.mrb[30].mxu0  ;;  %4049 = vmatpush1.bf16.msra.mxu0 %v932_v7  ;;  %12771 = vmatpush1.bf16.msra.mxu1 %v932_v7 }
 0x1f5   :  { %v823_v12 = vmul.f32 0.2, %v12622_v11  ;;  %v652_v13 = vpop.f32.mrb[31].mxu0  ;;  %4050 = vmatprep.subr.bf16.mxu0 %v14528_v29  ;;  %12756 = vmatprep.subr.bf16.mxu1 %v14528_v29  ;;  %v886_v15 = vmax.f32 %v12621_v6, %v822_v8 }
 0x1f6   :  { %v821_v14 = vmul.f32 0.2, %v652_v13  ;;  %v884_v17 = vmax.f32 %v649_v9, %v820_v10 }
 0x1f7   :  { %v887_v16 = vmax.f32 %v12622_v11, %v823_v12  ;;  %v13170_v12 = vld [vmem:[#allocation4 + $0x860] ss:$16 sps:$4 sm:$0xff]  }
 0x1f8   :  { %v885_v18 = vmax.f32 %v652_v13, %v821_v14  ;;  %4051 = vmatpush1.bf16.msra.mxu0 %v933_v5  ;;  %12772 = vmatpush1.bf16.msra.mxu1 %v933_v5  ;;  %v13171_v13 = vld [vmem:[#allocation4 + $0x884] ss:$16 sps:$4 sm:$0xff]   ;;  %v13173_v14 = vld [vmem:[#allocation4 + $0x880] ss:$16 sps:$4 sm:$0xff]  }
 0x1f9   :  { %4052 = vmatprep.subr.bf16.mxu0 %v14528_v29  ;;  %12757 = vmatprep.subr.bf16.mxu1 %v14528_v29  ;;  %v935_v19 = vpack.c.bf16 %v887_v16, %v886_v15  ;;  %v13174_v15 = vld [vmem:[#allocation4 + $0x8a4] ss:$16 sps:$4 sm:$0xff]   ;;  %v13176_v16 = vld [vmem:[#allocation4 + $0x8a0] ss:$16 sps:$4 sm:$0xff]  }
 0x1fa   :  { %v934_v20 = vpack.c.bf16 %v885_v18, %v884_v17  ;;  %v12625_v21 = vpop.f32.mrb[32].mxu0  ;;  %v13177_v17 = vld [vmem:[#allocation4 + $0x8c4] ss:$16 sps:$4 sm:$0xff]   ;;  %v13179_v18 = vld [vmem:[#allocation4 + $0x8c0] ss:$16 sps:$4 sm:$0xff]  }
 0x1fb   :  { %v826_v22 = vmul.f32 0.2, %v12625_v21  ;;  %v665_v23 = vpop.f32.mrb[33].mxu0 }
 0x1fc   :  { %4053 = vmatpush1.bf16.msra.mxu0 %v934_v20  ;;  %12773 = vmatpush1.bf16.msra.mxu1 %v934_v20  ;;  %v824_v24 = vmul.f32 0.2, %v665_v23  ;;  %v12626_v25 = vpop.f32.mrb[34].mxu0  ;;  %v13232_v20 = vld [vmem:[%s16773_s0 + $0xe0] sm:$0xff]  }
 0x1fd   :  { %4054 = vmatprep.subr.bf16.mxu0 %v14528_v29  ;;  %12758 = vmatprep.subr.bf16.mxu1 %v14528_v29  ;;  %v890_v27 = vmax.f32 %v12625_v21, %v826_v22  ;;  %v827_v28 = vmul.f32 0.2, %v12626_v25  ;;  %v668_v30 = vpop.f32.mrb[35].mxu0  ;;  %v13233_v21 = vld [vmem:[%s16773_s0 + $0xe8] sm:$0xff]   ;;  %v13184_v22 = vld [vmem:[#allocation4 + $0x8e0] ss:$16 sps:$4 sm:$0xff]  }
 0x1fe   :  { %v888_v32 = vmax.f32 %v665_v23, %v824_v24  ;;  %v825_v33 = vmul.f32 0.2, %v668_v30  ;;  %12647 = vmatprep.mubr.bf16.mxu0 %v13232_v20  ;;  %v13185_v23 = vld [vmem:[#allocation4 + $0x904] ss:$16 sps:$4 sm:$0xff]   ;;  %v13187_v24 = vld [vmem:[#allocation4 + $0x900] ss:$16 sps:$4 sm:$0xff]  }
 0x1ff   :  { %v891_v34 = vmax.f32 %v12626_v25, %v827_v28  ;;  %12648 = vmatmul.mubr.bf16.gmra.mrb[56].mxu0 %v13233_v21  ;;  %v13188_v25 = vld [vmem:[#allocation4 + $0x924] ss:$16 sps:$4 sm:$0xff]   ;;  %v13236_v21 = vld [vmem:[#allocation4 + $0xae0] ss:$16 sps:$4 sm:$0xff]  }
 0x200   :  { %4055 = vmatpush1.bf16.msra.mxu0 %v935_v19  ;;  %12774 = vmatpush1.bf16.msra.mxu1 %v935_v19  ;;  %v889_v35 = vmax.f32 %v668_v30, %v825_v33  ;;  %v13182_v19 = vld [vmem:[#allocation4 + $0x8e4] ss:$16 sps:$4 sm:$0xff]  }
 0x201   :  { %5081 = vmatprep.subr.bf16.mxu1 %v14528_v29  ;;  %v937_v36 = vpack.c.bf16 %v891_v34, %v890_v27  ;;  %v13191_v27 = vld [vmem:[#allocation4 + $0x944] ss:$16 sps:$4 sm:$0xff]  }
 0x202   :  { %v936_v37 = vpack.c.bf16 %v889_v35, %v888_v32  ;;  %v12629_v38 = vpop.f32.mrb[36].mxu0  ;;  %v13234_v20 = vld [vmem:[#allocation4 + $0xae4] ss:$16 sps:$4 sm:$0xff]  }
 0x203   :  { %4553 = vmatmul.mubr.bf16.vlgmr.msra.gmra.mrb[0].mxu1 %v13151_v26  ;;  %v830_v39 = vmul.f32 0.2, %v12629_v38  ;;  %v681_v40 = vpop.f32.mrb[37].mxu0  ;;  %v13190_v26 = vld [vmem:[#allocation4 + $0x920] ss:$16 sps:$4 sm:$0xff]  }
 0x204   :  { %4560 = vmatprep.mubr.bf16.mxu1 %v13156_v31  ;;  %5082 = vmatpush1.bf16.msra.mxu1 %v936_v37  ;;  %v828_v43 = vmul.f32 0.2, %v681_v40  ;;  %v12630_v44 = vpop.f32.mrb[38].mxu0 }
 0x205   :  { %5083 = vmatprep.subr.bf16.mxu1 %v14528_v29  ;;  %v894_v46 = vmax.f32 %v12629_v38, %v830_v39  ;;  %v831_v47 = vmul.f32 0.2, %v12630_v44  ;;  %v684_v48 = vpop.f32.mrb[39].mxu0  ;;  %v13193_v38 = vld [vmem:[#allocation4 + $0x940] ss:$16 sps:$4 sm:$0xff]  }
 0x206   :  { %v892_v50 = vmax.f32 %v681_v40, %v828_v43  ;;  %v829_v51 = vmul.f32 0.2, %v684_v48  ;;  %v13194_v39 = vld [vmem:[#allocation4 + $0x964] ss:$16 sps:$4 sm:$0xff]  }
 0x207   :  { %v895_v52 = vmax.f32 %v12630_v44, %v831_v47  ;;  %v13199_v47 = vld [vmem:[#allocation4 + $0x980] ss:$16 sps:$4 sm:$0xff]  }
 0x208   :  { %5084 = vmatpush1.bf16.msra.mxu1 %v937_v36  ;;  %v893_v53 = vmax.f32 %v684_v48, %v829_v51  ;;  %v13200_v48 = vld [vmem:[#allocation4 + $0x9a4] ss:$16 sps:$4 sm:$0xff]   ;;  %v13205_v51 = vld [vmem:[#allocation4 + $0x9c0] ss:$16 sps:$4 sm:$0xff]  }
 0x209   :  { %5085 = vmatprep.subr.bf16.mxu1 %v14528_v29  ;;  %v939_v54 = vpack.c.bf16 %v895_v52, %v894_v46  ;;  %v13197_v46 = vld [vmem:[#allocation4 + $0x984] ss:$16 sps:$4 sm:$0xff]  }
 0x20a   :  { %v938_v55 = vpack.c.bf16 %v893_v53, %v892_v50  ;;  %v12633_v60 = vpop.f32.mrb[40].mxu0  ;;  %v13203_v50 = vld [vmem:[#allocation4 + $0x9c4] ss:$16 sps:$4 sm:$0xff]  }
 0x20b   :  { %4561 = vmatmul.mubr.bf16.gmra.mrb[4].mxu1 %v13158_v45  ;;  %v834_v61 = vmul.f32 0.2, %v12633_v60  ;;  %v697_v62 = vpop.f32.mrb[41].mxu0  ;;  %v13196_v45 = vld [vmem:[#allocation4 + $0x960] ss:$16 sps:$4 sm:$0xff]  }
 0x20c   :  { %4568 = vmatprep.mubr.bf16.mxu1 %v13159_v49  ;;  %5086 = vmatpush1.bf16.msra.mxu1 %v938_v55  ;;  %v832_v63 = vmul.f32 0.2, %v697_v62  ;;  %v12634_v0 = vpop.f32.mrb[42].mxu0  ;;  %v13202_v49 = vld [vmem:[#allocation4 + $0x9a0] ss:$16 sps:$4 sm:$0xff]  }
 0x20d   :  { %5087 = vmatprep.subr.bf16.mxu1 %v14528_v29  ;;  %v835_v2 = vmul.f32 0.2, %v12634_v0  ;;  %v700_v3 = vpop.f32.mrb[43].mxu0  ;;  %v898_v7 = vmax.f32 %v12633_v60, %v834_v61  ;;  %v13208_v52 = vld [vmem:[#allocation4 + $0x9e4] ss:$16 sps:$4 sm:$0xff]  }
 0x20e   :  { %v896_v5 = vmax.f32 %v697_v62, %v832_v63  ;;  %v833_v6 = vmul.f32 0.2, %v700_v3  ;;  %v13260_v53 = vld [vmem:[%s16773_s0 + $0xf0] sm:$0xff]  }
 0x20f   :  { %v899_v8 = vmax.f32 %v12634_v0, %v835_v2  ;;  %v13211_v55 = vld [vmem:[#allocation4 + $0xa04] ss:$16 sps:$4 sm:$0xff]   ;;  %12651 = vmatprep.mubr.bf16.mxu0 %v13260_v53  ;;  %v13219_v2 = vld [vmem:[#allocation4 + $0xa40] ss:$16 sps:$4 sm:$0xff]  }
 0x210   :  { %5088 = vmatpush1.bf16.msra.mxu1 %v939_v54  ;;  %v897_v9 = vmax.f32 %v700_v3, %v833_v6  ;;  %v13210_v54 = vld [vmem:[#allocation4 + $0x9e0] ss:$16 sps:$4 sm:$0xff]   ;;  %v13217_v60 = vld [vmem:[#allocation4 + $0xa44] ss:$16 sps:$4 sm:$0xff]  }
 0x211   :  { %5089 = vmatprep.subr.bf16.mxu1 %v14528_v29  ;;  %v941_v11 = vpack.c.bf16 %v899_v8, %v898_v7  ;;  %v13263_v53 = vld [vmem:[#allocation4 + $0xc04] ss:$16 sps:$4 sm:$0xff]  }
 0x212   :  { %v940_v10 = vpack.c.bf16 %v897_v9, %v896_v5  ;;  %v12637_v28 = vpop.f32.mrb[44].mxu0  ;;  %v13220_v9 = vld [vmem:[#allocation4 + $0xa64] ss:$16 sps:$4 sm:$0xff]  }
 0x213   :  { %4569 = vmatmul.mubr.bf16.gmra.mrb[8].mxu1 %v13161_v56  ;;  %v713_v30 = vpop.f32.mrb[45].mxu0  ;;  %v838_v33 = vmul.f32 0.2, %v12637_v28  ;;  %v13262_v56 = vld [vmem:[%s16773_s0 + $0xf8] sm:$0xff]  }
 0x214   :  { %4576 = vmatprep.mubr.bf16.mxu1 %v13162_v57  ;;  %5090 = vmatpush1.bf16.msra.mxu1 %v940_v10  ;;  %v836_v31 = vmul.f32 0.2, %v713_v30  ;;  %v12638_v32 = vpop.f32.mrb[46].mxu0  ;;  %v13213_v57 = vld [vmem:[#allocation4 + $0xa00] ss:$16 sps:$4 sm:$0xff]  }
 0x215   :  { %5091 = vmatprep.subr.bf16.mxu1 %v14528_v29  ;;  %v839_v34 = vmul.f32 0.2, %v12638_v32  ;;  %v716_v35 = vpop.f32.mrb[47].mxu0  ;;  %v902_v41 = vmax.f32 %v12637_v28, %v838_v33  ;;  %12652 = vmatmul.mubr.bf16.gmra.mrb[60].mxu0 %v13262_v56  ;;  %v13268_v56 = vld [vmem:[#allocation4 + $0xc20] ss:$16 sps:$4 sm:$0xff]  }
 0x216   :  { %v900_v36 = vmax.f32 %v713_v30, %v836_v31  ;;  %v837_v37 = vmul.f32 0.2, %v716_v35 }
 0x217   :  { %v903_v42 = vmax.f32 %v12638_v32, %v839_v34 }
 0x218   :  { %5092 = vmatpush1.bf16.msra.mxu1 %v941_v11  ;;  %v901_v40 = vmax.f32 %v716_v35, %v837_v37 }
 0x219   :  { %5093 = vmatprep.subr.bf16.mxu1 %v14528_v29  ;;  %v943_v44 = vpack.c.bf16 %v903_v42, %v902_v41 }
 0x21a   :  { %v942_v43 = vpack.c.bf16 %v901_v40, %v900_v36  ;;  %v12641_v61 = vpop.f32.mrb[48].mxu0  ;;  %v13245_v36 = vld [vmem:[#allocation4 + $0xb40] ss:$16 sps:$4 sm:$0xff]   ;;  %v13246_v40 = vld [vmem:[#allocation4 + $0xb64] ss:$16 sps:$4 sm:$0xff]  }
 0x21b   :  { %4577 = vmatmul.mubr.bf16.gmra.mrb[12].mxu1 %v13164_v58  ;;  %v13214_v58 = vld [vmem:[#allocation4 + $0xa24] ss:$16 sps:$4 sm:$0xff]   ;;  %v842_v62 = vmul.f32 0.2, %v12641_v61  ;;  %v729_v63 = vpop.f32.mrb[49].mxu0 }
 0x21c   :  { %4584 = vmatprep.mubr.bf16.mxu1 %v13165_v59  ;;  %5094 = vmatpush1.bf16.msra.mxu1 %v942_v43  ;;  %v13216_v59 = vld [vmem:[#allocation4 + $0xa20] ss:$16 sps:$4 sm:$0xff]   ;;  %v840_v0 = vmul.f32 0.2, %v729_v63 }
 0x21d   :  { %5095 = vmatprep.subr.bf16.mxu1 %v14528_v29  ;;  %v906_v6 = vmax.f32 %v12641_v61, %v842_v62 }
 0x21e   :  { %v904_v7 = vmax.f32 %v729_v63, %v840_v0  ;;  %v13271_v63 = vld [vmem:[#allocation4 + $0xc40] ss:$16 sps:$4 sm:$0xff]  }
 0x220   :  { %5096 = vmatpush1.bf16.msra.mxu1 %v943_v44  ;;  %v13248_v44 = vld [vmem:[#allocation4 + $0xb60] ss:$16 sps:$4 sm:$0xff]  }
 0x221   :  { %5097 = vmatprep.subr.bf16.mxu1 %v14528_v29 }
 0x223   :  { %4585 = vmatmul.mubr.bf16.gmra.mrb[16].mxu1 %v13167_v1  ;;  %v12642_v1 = vpop.f32.mrb[50].mxu0 }
 0x224   :  { %4592 = vmatprep.mubr.bf16.mxu1 %v13168_v4  ;;  %v843_v3 = vmul.f32 0.2, %v12642_v1  ;;  %v732_v4 = vpop.f32.mrb[51].mxu0 }
 0x225   :  { %v841_v5 = vmul.f32 0.2, %v732_v4 }
 0x226   :  { %v907_v8 = vmax.f32 %v12642_v1, %v843_v3 }
 0x227   :  { %v905_v10 = vmax.f32 %v732_v4, %v841_v5 }
 0x229   :  { %v944_v11 = vpack.c.bf16 %v905_v10, %v904_v7  ;;  %v13274_v7 = vld [vmem:[#allocation4 + $0xc60] ss:$16 sps:$4 sm:$0xff]   ;;  %v13275_v10 = vld [vmem:[#allocation4 + $0xc84] ss:$16 sps:$4 sm:$0xff]  }
 0x22b   :  { %4593 = vmatmul.mubr.bf16.gmra.mrb[20].mxu1 %v13170_v12  ;;  %v945_v12 = vpack.c.bf16 %v907_v8, %v906_v6 }
 0x22c   :  { %4600 = vmatprep.mubr.bf16.mxu1 %v13171_v13  ;;  %5098 = vmatpush1.bf16.msra.mxu1 %v944_v11  ;;  %v13222_v13 = vld [vmem:[#allocation4 + $0xa60] ss:$16 sps:$4 sm:$0xff]  }
 0x22d   :  { %5099 = vmatprep.subr.bf16.mxu1 %v14528_v29 }
 0x230   :  { %5100 = vmatpush1.bf16.msra.mxu1 %v945_v12  ;;  %v13277_v12 = vld [vmem:[#allocation4 + $0xc80] ss:$16 sps:$4 sm:$0xff]  }
 0x231   :  { %5101 = vmatprep.subr.bf16.mxu1 %v14528_v29 }
 0x233   :  { %4601 = vmatmul.mubr.bf16.gmra.mrb[24].mxu1 %v13173_v14  ;;  %v13223_v14 = vld [vmem:[#allocation4 + $0xa84] ss:$16 sps:$4 sm:$0xff]  }
 0x234   :  { %4608 = vmatprep.mubr.bf16.mxu1 %v13174_v15  ;;  %v13225_v15 = vld [vmem:[#allocation4 + $0xa80] ss:$16 sps:$4 sm:$0xff]  }
 0x23b   :  { %4609 = vmatmul.mubr.bf16.gmra.mrb[28].mxu1 %v13176_v16  ;;  %v13226_v16 = vld [vmem:[#allocation4 + $0xaa4] ss:$16 sps:$4 sm:$0xff]  }
 0x23c   :  { %4616 = vmatprep.mubr.bf16.mxu1 %v13177_v17  ;;  %v13228_v17 = vld [vmem:[#allocation4 + $0xaa0] ss:$16 sps:$4 sm:$0xff]  }
 0x243   :  { %4617 = vmatmul.mubr.bf16.gmra.mrb[32].mxu1 %v13179_v18  ;;  %v13229_v18 = vld [vmem:[#allocation4 + $0xac4] ss:$16 sps:$4 sm:$0xff]  }
 0x244   :  { %4624 = vmatprep.mubr.bf16.mxu1 %v13182_v19  ;;  %v13231_v19 = vld [vmem:[#allocation4 + $0xac0] ss:$16 sps:$4 sm:$0xff]  }
 0x24b   :  { %4625 = vmatmul.mubr.bf16.gmra.mrb[36].mxu1 %v13184_v22  ;;  %v13237_v22 = vld [vmem:[#allocation4 + $0xb04] ss:$16 sps:$4 sm:$0xff]  }
 0x24c   :  { %4632 = vmatprep.mubr.bf16.mxu1 %v13185_v23  ;;  %v13239_v23 = vld [vmem:[#allocation4 + $0xb00] ss:$16 sps:$4 sm:$0xff]  }
 0x253   :  { %4633 = vmatmul.mubr.bf16.gmra.mrb[40].mxu1 %v13187_v24  ;;  %v13240_v24 = vld [vmem:[#allocation4 + $0xb24] ss:$16 sps:$4 sm:$0xff]  }
 0x254   :  { %4640 = vmatprep.mubr.bf16.mxu1 %v13188_v25  ;;  %v13242_v25 = vld [vmem:[#allocation4 + $0xb20] ss:$16 sps:$4 sm:$0xff]  }
 0x25b   :  { %4641 = vmatmul.mubr.bf16.gmra.mrb[44].mxu1 %v13190_v26  ;;  %v13243_v26 = vld [vmem:[#allocation4 + $0xb44] ss:$16 sps:$4 sm:$0xff]  }
 0x25c   :  { %4648 = vmatprep.mubr.bf16.mxu1 %v13191_v27 }
 0x263   :  { %4649 = vmatmul.mubr.bf16.gmra.mrb[48].mxu1 %v13193_v38 }
 0x264   :  { %4656 = vmatprep.mubr.bf16.mxu1 %v13194_v39 }
 0x26b   :  { %4657 = vmatmul.mubr.bf16.gmra.mrb[52].mxu1 %v13196_v45  ;;  %v13249_v45 = vld [vmem:[#allocation4 + $0xb84] ss:$16 sps:$4 sm:$0xff]  }
 0x26c   :  { %4664 = vmatprep.mubr.bf16.mxu1 %v13197_v46  ;;  %v13251_v46 = vld [vmem:[#allocation4 + $0xb80] ss:$16 sps:$4 sm:$0xff]  }
 0x273   :  { %4665 = vmatmul.mubr.bf16.gmra.mrb[56].mxu1 %v13199_v47  ;;  %v13252_v47 = vld [vmem:[#allocation4 + $0xba4] ss:$16 sps:$4 sm:$0xff]  }
 0x274   :  { %4672 = vmatprep.mubr.bf16.mxu1 %v13200_v48  ;;  %v13254_v48 = vld [vmem:[#allocation4 + $0xba0] ss:$16 sps:$4 sm:$0xff]  }
 0x27b   :  { %4673 = vmatmul.mubr.bf16.gmra.mrb[60].mxu1 %v13202_v49  ;;  %v13255_v49 = vld [vmem:[#allocation4 + $0xbc4] ss:$16 sps:$4 sm:$0xff]  }
 0x27c   :  { %4680 = vmatprep.mubr.bf16.mxu1 %v13203_v50  ;;  %v13257_v50 = vld [vmem:[#allocation4 + $0xbc0] ss:$16 sps:$4 sm:$0xff]  }
 0x283   :  { %4681 = vmatmul.mubr.bf16.gmra.mrb[64].mxu1 %v13205_v51  ;;  %v13258_v51 = vld [vmem:[#allocation4 + $0xbe4] ss:$16 sps:$4 sm:$0xff]  }
 0x284   :  { %4688 = vmatprep.mubr.bf16.mxu1 %v13208_v52  ;;  %v13261_v52 = vld [vmem:[#allocation4 + $0xbe0] ss:$16 sps:$4 sm:$0xff]  }
 0x28b   :  { %4689 = vmatmul.mubr.bf16.gmra.mrb[68].mxu1 %v13210_v54  ;;  %v13265_v54 = vld [vmem:[#allocation4 + $0xc00] ss:$16 sps:$4 sm:$0xff]  }
 0x28c   :  { %4696 = vmatprep.mubr.bf16.mxu1 %v13211_v55  ;;  %v13266_v55 = vld [vmem:[#allocation4 + $0xc24] ss:$16 sps:$4 sm:$0xff]  }
 0x293   :  { %4697 = vmatmul.mubr.bf16.gmra.mrb[72].mxu1 %v13213_v57  ;;  %v13269_v57 = vld [vmem:[#allocation4 + $0xc44] ss:$16 sps:$4 sm:$0xff]  }
 0x294   :  { %4704 = vmatprep.mubr.bf16.mxu1 %v13214_v58 }
 0x29b   :  { %4705 = vmatmul.mubr.bf16.gmra.mrb[76].mxu1 %v13216_v59 }
 0x29c   :  { %4712 = vmatprep.mubr.bf16.mxu1 %v13217_v60 }
 0x2a3   :  { %4713 = vmatmul.mubr.bf16.gmra.mrb[80].mxu1 %v13219_v2  ;;  %v13272_v2 = vld [vmem:[#allocation4 + $0xc64] ss:$16 sps:$4 sm:$0xff]  }
 0x2a4   :  { %4720 = vmatprep.mubr.bf16.mxu1 %v13220_v9 }
 0x2ab   :  { %4721 = vmatmul.mubr.bf16.gmra.mrb[84].mxu1 %v13222_v13  ;;  %v13278_v13 = vld [vmem:[#allocation4 + $0xca4] ss:$16 sps:$4 sm:$0xff]  }
 0x2ac   :  { %4728 = vmatprep.mubr.bf16.mxu1 %v13223_v14  ;;  %v13280_v14 = vld [vmem:[#allocation4 + $0xca0] ss:$16 sps:$4 sm:$0xff]  }
 0x2b3   :  { %4729 = vmatmul.mubr.bf16.gmra.mrb[88].mxu1 %v13225_v15  ;;  %v13281_v15 = vld [vmem:[#allocation4 + $0xcc4] ss:$16 sps:$4 sm:$0xff]  }
 0x2b4   :  { %4736 = vmatprep.mubr.bf16.mxu1 %v13226_v16  ;;  %v13329_v16 = vld [vmem:[#allocation4] ss:$16 sps:$4 sm:$0xff]  }
 0x2bb   :  { %4737 = vmatmul.mubr.bf16.gmra.mrb[92].mxu1 %v13228_v17  ;;  %v13331_v17 = vld [vmem:[#allocation4 + $0x4] ss:$16 sps:$4 sm:$0xff]  }
 0x2bc   :  { %4744 = vmatprep.mubr.bf16.mxu1 %v13229_v18  ;;  %4056 = vmatprep.mubr.bf16.mxu0 %v13331_v17  ;;  %v13283_v18 = vld [vmem:[#allocation4 + $0xcc0] ss:$16 sps:$4 sm:$0xff]   ;;  %v13320_v17 = vld [vmem:[#allocation4 + $0xe64] ss:$16 sps:$4 sm:$0xff]  }
 0x2bd   :  { %4057 = vmatmul.mubr.bf16.vlgmr.msra.gmra.mrb[64].mxu0 %v13329_v16  ;;  %v13319_v16 = vld [vmem:[#allocation4 + $0xe40] ss:$16 sps:$4 sm:$0xff]  }
 0x2be   :  { %v12645_v27 = vpop.f32.mrb[52].mxu0 }
 0x2bf   :  { %v846_v28 = vmul.f32 0.2, %v12645_v27  ;;  %v745_v30 = vpop.f32.mrb[53].mxu0 }
 0x2c0   :  { %v844_v31 = vmul.f32 0.2, %v745_v30  ;;  %v12646_v32 = vpop.f32.mrb[54].mxu0 }
 0x2c1   :  { %v847_v33 = vmul.f32 0.2, %v12646_v32  ;;  %v748_v34 = vpop.f32.mrb[55].mxu0  ;;  %v910_v37 = vmax.f32 %v12645_v27, %v846_v28  ;;  %v13290_v27 = vld [vmem:[#allocation4 + $0xd24] ss:$16 sps:$4 sm:$0xff]  }
 0x2c2   :  { %v845_v35 = vmul.f32 0.2, %v748_v34  ;;  %v908_v38 = vmax.f32 %v745_v30, %v844_v31  ;;  %v13347_v28 = vld [vmem:[#allocation4 + $0x64] ss:$16 sps:$4 sm:$0xff]   ;;  %v13349_v30 = vld [vmem:[#allocation4 + $0x60] ss:$16 sps:$4 sm:$0xff]  }
 0x2c3   :  { %4745 = vmatmul.mubr.bf16.gmra.mrb[96].mxu1 %v13231_v19  ;;  %v911_v39 = vmax.f32 %v12646_v32, %v847_v33  ;;  %v13284_v19 = vld [vmem:[#allocation4 + $0xce4] ss:$16 sps:$4 sm:$0xff]   ;;  %v13292_v31 = vld [vmem:[#allocation4 + $0xd20] ss:$16 sps:$4 sm:$0xff]  }
 0x2c4   :  { %4752 = vmatprep.mubr.bf16.mxu1 %v13234_v20  ;;  %v909_v41 = vmax.f32 %v748_v34, %v845_v35  ;;  %v13335_v20 = vld [vmem:[#allocation4 + $0x24] ss:$16 sps:$4 sm:$0xff]   ;;  %v13355_v34 = vld [vmem:[#allocation4 + $0x80] ss:$16 sps:$4 sm:$0xff]  }
 0x2c5   :  { %v947_v43 = vpack.c.bf16 %v911_v39, %v910_v37  ;;  %4064 = vmatprep.mubr.bf16.mxu0 %v13335_v20  ;;  %v13293_v32 = vld [vmem:[#allocation4 + $0xd44] ss:$16 sps:$4 sm:$0xff]   ;;  %v13295_v35 = vld [vmem:[#allocation4 + $0xd40] ss:$16 sps:$4 sm:$0xff]  }
 0x2c6   :  { %v946_v42 = vpack.c.bf16 %v909_v41, %v908_v38  ;;  %v13353_v33 = vld [vmem:[#allocation4 + $0x84] ss:$16 sps:$4 sm:$0xff]   ;;  %v13322_v20 = vld [vmem:[#allocation4 + $0xe60] ss:$16 sps:$4 sm:$0xff]  }
 0x2c8   :  { %5102 = vmatpush1.bf16.msra.mxu1 %v946_v42 }
 0x2c9   :  { %5103 = vmatprep.subr.bf16.mxu1 %v14528_v29 }
 0x2cb   :  { %4753 = vmatmul.mubr.bf16.gmra.mrb[100].mxu1 %v13236_v21  ;;  %v13337_v21 = vld [vmem:[#allocation4 + $0x20] ss:$16 sps:$4 sm:$0xff]  }
 0x2cc   :  { %4760 = vmatprep.mubr.bf16.mxu1 %v13237_v22  ;;  %5104 = vmatpush1.bf16.msra.mxu1 %v947_v43  ;;  %v13286_v22 = vld [vmem:[#allocation4 + $0xce0] ss:$16 sps:$4 sm:$0xff]  }
 0x2cd   :  { %5105 = vmatprep.subr.bf16.mxu1 %v14528_v29  ;;  %4065 = vmatmul.mubr.bf16.gmra.mrb[68].mxu0 %v13337_v21  ;;  %v13323_v21 = vld [vmem:[#allocation4 + $0xe84] ss:$16 sps:$4 sm:$0xff]  }
 0x2d2   :  { %v12649_v58 = vpop.f32.mrb[56].mxu0 }
 0x2d3   :  { %4761 = vmatmul.mubr.bf16.gmra.mrb[104].mxu1 %v13239_v23  ;;  %v761_v59 = vpop.f32.mrb[57].mxu0  ;;  %v850_v4 = vmul.f32 0.2, %v12649_v58  ;;  %v13287_v23 = vld [vmem:[#allocation4 + $0xd04] ss:$16 sps:$4 sm:$0xff]  }
 0x2d4   :  { %4768 = vmatprep.mubr.bf16.mxu1 %v13240_v24  ;;  %v848_v60 = vmul.f32 0.2, %v761_v59  ;;  %v12650_v61 = vpop.f32.mrb[58].mxu0  ;;  %v13341_v24 = vld [vmem:[#allocation4 + $0x44] ss:$16 sps:$4 sm:$0xff]  }
 0x2d5   :  { %v764_v62 = vpop.f32.mrb[59].mxu0  ;;  %v851_v5 = vmul.f32 0.2, %v12650_v61  ;;  %v914_v8 = vmax.f32 %v12649_v58, %v850_v4  ;;  %4072 = vmatprep.mubr.bf16.mxu0 %v13341_v24  ;;  %v13302_v58 = vld [vmem:[#allocation4 + $0xda4] ss:$16 sps:$4 sm:$0xff]  }
 0x2d6   :  { %v912_v0 = vmax.f32 %v761_v59, %v848_v60  ;;  %v849_v1 = vmul.f32 0.2, %v764_v62  ;;  %v13371_v59 = vld [vmem:[#allocation4 + $0xe4] ss:$16 sps:$4 sm:$0xff]   ;;  %v13373_v60 = vld [vmem:[#allocation4 + $0xe0] ss:$16 sps:$4 sm:$0xff]  }
 0x2d7   :  { %v915_v9 = vmax.f32 %v12650_v61, %v851_v5  ;;  %v13304_v61 = vld [vmem:[#allocation4 + $0xda0] ss:$16 sps:$4 sm:$0xff]   ;;  %v13311_v5 = vld [vmem:[#allocation4 + $0xe04] ss:$16 sps:$4 sm:$0xff]  }
 0x2d8   :  { %v913_v3 = vmax.f32 %v764_v62, %v849_v1  ;;  %v13305_v62 = vld [vmem:[#allocation4 + $0xdc4] ss:$16 sps:$4 sm:$0xff]   ;;  %v13310_v4 = vld [vmem:[#allocation4 + $0xde0] ss:$16 sps:$4 sm:$0xff]  }
 0x2d9   :  { %v949_v11 = vpack.c.bf16 %v915_v9, %v914_v8  ;;  %v13308_v1 = vld [vmem:[#allocation4 + $0xde4] ss:$16 sps:$4 sm:$0xff]   ;;  %v13313_v8 = vld [vmem:[#allocation4 + $0xe00] ss:$16 sps:$4 sm:$0xff]  }
 0x2da   :  { %v948_v6 = vpack.c.bf16 %v913_v3, %v912_v0  ;;  %v13307_v0 = vld [vmem:[#allocation4 + $0xdc0] ss:$16 sps:$4 sm:$0xff]   ;;  %v13314_v9 = vld [vmem:[#allocation4 + $0xe24] ss:$16 sps:$4 sm:$0xff]  }
 0x2db   :  { %4769 = vmatmul.mubr.bf16.gmra.mrb[108].mxu1 %v13242_v25  ;;  %v13343_v25 = vld [vmem:[#allocation4 + $0x40] ss:$16 sps:$4 sm:$0xff]  }
 0x2dc   :  { %4776 = vmatprep.mubr.bf16.mxu1 %v13243_v26  ;;  %5106 = vmatpush1.bf16.msra.mxu1 %v948_v6  ;;  %v13289_v26 = vld [vmem:[#allocation4 + $0xd00] ss:$16 sps:$4 sm:$0xff]   ;;  %v13389_v6 = vld [vmem:[#allocation4 + $0x144] ss:$16 sps:$4 sm:$0xff]  }
 0x2dd   :  { %5107 = vmatprep.subr.bf16.mxu1 %v14528_v29  ;;  %4073 = vmatmul.mubr.bf16.gmra.mrb[72].mxu0 %v13343_v25  ;;  %v13385_v3 = vld [vmem:[#allocation4 + $0x120] ss:$16 sps:$4 sm:$0xff]   ;;  %v13326_v25 = vld [vmem:[#allocation4 + $0xea4] ss:$16 sps:$4 sm:$0xff]  }
 0x2de   :  { %4080 = vmatprep.mubr.bf16.mxu0 %v13347_v28  ;;  %v13325_v24 = vld [vmem:[#allocation4 + $0xe80] ss:$16 sps:$4 sm:$0xff]  }
 0x2df   :  { %v13328_v28 = vld [vmem:[#allocation4 + $0xea0] ss:$16 sps:$4 sm:$0xff]  }
 0x2e0   :  { %5108 = vmatpush1.bf16.msra.mxu1 %v949_v11  ;;  %v13397_v11 = vld [vmem:[#allocation4 + $0x160] ss:$16 sps:$4 sm:$0xff]  }
 0x2e1   :  { %5109 = vmatprep.subr.bf16.mxu1 %v14528_v29 }
 0x2e3   :  { %4777 = vmatmul.mubr.bf16.gmra.mrb[112].mxu1 %v13245_v36  ;;  %v13296_v36 = vld [vmem:[#allocation4 + $0xd64] ss:$16 sps:$4 sm:$0xff]  }
 0x2e4   :  { %4784 = vmatprep.mubr.bf16.mxu1 %v13246_v40 }
 0x2e5   :  { %4081 = vmatmul.mubr.bf16.gmra.mrb[76].mxu0 %v13349_v30  ;;  %v13332_v30 = vld [vmem:[#allocation4 + $0xec4] ss:$16 sps:$4 sm:$0xff]  }
 0x2e6   :  { %4088 = vmatprep.mubr.bf16.mxu0 %v13353_v33  ;;  %v13334_v33 = vld [vmem:[#allocation4 + $0xec0] ss:$16 sps:$4 sm:$0xff]  }
 0x2e8   :  { %v12653_v37 = vpop.f32.mrb[60].mxu0 }
 0x2e9   :  { %v777_v38 = vpop.f32.mrb[61].mxu0  ;;  %v854_v39 = vmul.f32 0.2, %v12653_v37 }
 0x2ea   :  { %v852_v40 = vmul.f32 0.2, %v777_v38  ;;  %v12654_v41 = vpop.f32.mrb[62].mxu0 }
 0x2eb   :  { %4785 = vmatmul.mubr.bf16.gmra.mrb[116].mxu1 %v13248_v44  ;;  %v855_v42 = vmul.f32 0.2, %v12654_v41  ;;  %v780_v43 = vpop.f32.mrb[63].mxu0  ;;  %v13359_v44 = vld [vmem:[#allocation4 + $0xa4] ss:$16 sps:$4 sm:$0xff]  }
 0x2ec   :  { %4792 = vmatprep.mubr.bf16.mxu1 %v13249_v45  ;;  %v916_v45 = vmax.f32 %v777_v38, %v852_v40  ;;  %v13344_v38 = vld [vmem:[#allocation4 + $0xf04] ss:$16 sps:$4 sm:$0xff]   ;;  %v13439_v40 = vld [vmem:[#allocation4 + $0x240] ss:$16 sps:$4 sm:$0xff]  }
 0x2ed   :  { %4089 = vmatmul.mubr.bf16.gmra.mrb[80].mxu0 %v13355_v34  ;;  %v13338_v34 = vld [vmem:[#allocation4 + $0xee4] ss:$16 sps:$4 sm:$0xff]  }
 0x2ee   :  { %4096 = vmatprep.mubr.bf16.mxu0 %v13359_v44  ;;  %v13445_v44 = vld [vmem:[#allocation4 + $0x260] ss:$16 sps:$4 sm:$0xff]  }
 0x2f3   :  { %4793 = vmatmul.mubr.bf16.gmra.mrb[120].mxu1 %v13251_v46  ;;  %v853_v46 = vmul.f32 0.2, %v780_v43 }
 0x2f4   :  { %4800 = vmatprep.mubr.bf16.mxu1 %v13252_v47  ;;  %v13361_v47 = vld [vmem:[#allocation4 + $0xa0] ss:$16 sps:$4 sm:$0xff]  }
 0x2f5   :  { %4097 = vmatmul.mubr.bf16.gmra.mrb[84].mxu0 %v13361_v47  ;;  %v13449_v47 = vld [vmem:[#allocation4 + $0x284] ss:$16 sps:$4 sm:$0xff]  }
 0x2fb   :  { %4801 = vmatmul.mubr.bf16.gmra.mrb[124].mxu1 %v13254_v48  ;;  %v917_v48 = vmax.f32 %v780_v43, %v853_v46  ;;  %v13443_v43 = vld [vmem:[#allocation4 + $0x264] ss:$16 sps:$4 sm:$0xff]  }
 0x2fc   :  { %4808 = vmatprep.mubr.bf16.mxu1 %v13255_v49  ;;  %v13298_v49 = vld [vmem:[#allocation4 + $0xd60] ss:$16 sps:$4 sm:$0xff]   ;;  %v13356_v46 = vld [vmem:[#allocation4 + $0xf44] ss:$16 sps:$4 sm:$0xff]  }
 0x303   :  { %4809 = vmatmul.mubr.bf16.gmra.mrb[128].mxu1 %v13257_v50  ;;  %v918_v50 = vmax.f32 %v12653_v37, %v854_v39  ;;  %v13340_v37 = vld [vmem:[#allocation4 + $0xee0] ss:$16 sps:$4 sm:$0xff]   ;;  %v13437_v39 = vld [vmem:[#allocation4 + $0x244] ss:$16 sps:$4 sm:$0xff]  }
 0x304   :  { %4816 = vmatprep.mubr.bf16.mxu1 %v13258_v51  ;;  %v919_v51 = vmax.f32 %v12654_v41, %v855_v42  ;;  %v13346_v41 = vld [vmem:[#allocation4 + $0xf00] ss:$16 sps:$4 sm:$0xff]   ;;  %v13350_v42 = vld [vmem:[#allocation4 + $0xf24] ss:$16 sps:$4 sm:$0xff]  }
 0x30b   :  { %4817 = vmatmul.mubr.bf16.gmra.mrb[132].mxu1 %v13261_v52  ;;  %v13299_v52 = vld [vmem:[#allocation4 + $0xd84] ss:$16 sps:$4 sm:$0xff]  }
 0x30c   :  { %4824 = vmatprep.mubr.bf16.mxu1 %v13263_v53  ;;  %v950_v53 = vpack.c.bf16 %v917_v48, %v916_v45  ;;  %v13352_v45 = vld [vmem:[#allocation4 + $0xf20] ss:$16 sps:$4 sm:$0xff]  }
 0x30d   :  { %v13451_v48 = vld [vmem:[#allocation4 + $0x280] ss:$16 sps:$4 sm:$0xff]  }
 0x30e   :  { %5110 = vmatpush1.bf16.msra.mxu1 %v950_v53  ;;  %v13364_v53 = vld [vmem:[#allocation4 + $0xf60] ss:$16 sps:$4 sm:$0xff]  }
 0x30f   :  { %5111 = vmatprep.subr.bf16.mxu1 %v14528_v29  ;;  %v13379_v29 = vld [vmem:[#allocation4 + $0x100] ss:$16 sps:$4 sm:$0xff]  }
 0x313   :  { %4825 = vmatmul.mubr.bf16.gmra.mrb[136].mxu1 %v13265_v54  ;;  %v13365_v54 = vld [vmem:[#allocation4 + $0xc4] ss:$16 sps:$4 sm:$0xff]  }
 0x314   :  { %4832 = vmatprep.mubr.bf16.mxu1 %v13266_v55  ;;  %v951_v55 = vpack.c.bf16 %v919_v51, %v918_v50  ;;  %4104 = vmatprep.mubr.bf16.mxu0 %v13365_v54  ;;  %v13362_v50 = vld [vmem:[#allocation4 + $0xf64] ss:$16 sps:$4 sm:$0xff]  }
 0x315   :  { %v13455_v51 = vld [vmem:[#allocation4 + $0x2a4] ss:$16 sps:$4 sm:$0xff]  }
 0x316   :  { %5112 = vmatpush1.bf16.msra.mxu1 %v951_v55  ;;  %v13368_v54 = vld [vmem:[#allocation4 + $0xf84] ss:$16 sps:$4 sm:$0xff]  }
 0x317   :  { %v13461_v55 = vld [vmem:[#allocation4 + $0x2c4] ss:$16 sps:$4 sm:$0xff]  }
 0x31b   :  { %4833 = vmatmul.mubr.bf16.gmra.mrb[140].mxu1 %v13268_v56  ;;  %v13367_v56 = vld [vmem:[#allocation4 + $0xc0] ss:$16 sps:$4 sm:$0xff]  }
 0x31c   :  { %4840 = vmatprep.mubr.bf16.mxu1 %v13269_v57  ;;  %4105 = vmatmul.mubr.bf16.gmra.mrb[88].mxu0 %v13367_v56  ;;  %v13301_v57 = vld [vmem:[#allocation4 + $0xd80] ss:$16 sps:$4 sm:$0xff]  }
 0x31d   :  { %4112 = vmatprep.mubr.bf16.mxu0 %v13371_v59  ;;  %v13463_v56 = vld [vmem:[#allocation4 + $0x2c0] ss:$16 sps:$4 sm:$0xff]   ;;  %v13467_v59 = vld [vmem:[#allocation4 + $0x2e4] ss:$16 sps:$4 sm:$0xff]  }
 0x323   :  { %4841 = vmatmul.mubr.bf16.gmra.mrb[144].mxu1 %v13271_v63  ;;  %v13377_v63 = vld [vmem:[#allocation4 + $0x104] ss:$16 sps:$4 sm:$0xff]  }
 0x324   :  { %4848 = vmatprep.mubr.bf16.mxu1 %v13272_v2  ;;  %4113 = vmatmul.mubr.bf16.gmra.mrb[92].mxu0 %v13373_v60  ;;  %v13383_v2 = vld [vmem:[#allocation4 + $0x124] ss:$16 sps:$4 sm:$0xff]   ;;  %v13469_v60 = vld [vmem:[#allocation4 + $0x2e0] ss:$16 sps:$4 sm:$0xff]  }
 0x325   :  { %4120 = vmatprep.mubr.bf16.mxu0 %v13377_v63  ;;  %v13473_v63 = vld [vmem:[#allocation4 + $0x304] ss:$16 sps:$4 sm:$0xff]  }
 0x32b   :  { %4849 = vmatmul.mubr.bf16.gmra.mrb[148].mxu1 %v13274_v7  ;;  %v13391_v7 = vld [vmem:[#allocation4 + $0x140] ss:$16 sps:$4 sm:$0xff]  }
 0x32c   :  { %4856 = vmatprep.mubr.bf16.mxu1 %v13275_v10  ;;  %4121 = vmatmul.mubr.bf16.gmra.mrb[96].mxu0 %v13379_v29  ;;  %v13395_v10 = vld [vmem:[#allocation4 + $0x164] ss:$16 sps:$4 sm:$0xff]   ;;  %v13475_v29 = vld [vmem:[#allocation4 + $0x300] ss:$16 sps:$4 sm:$0xff]  }
 0x32d   :  { %4128 = vmatprep.mubr.bf16.mxu0 %v13383_v2  ;;  %v13380_v2 = vld [vmem:[#allocation4 + $0xfc0] ss:$16 sps:$4 sm:$0xff]  }
 0x333   :  { %4857 = vmatmul.mubr.bf16.gmra.mrb[152].mxu1 %v13277_v12  ;;  %v13316_v12 = vld [vmem:[#allocation4 + $0xe20] ss:$16 sps:$4 sm:$0xff]  }
 0x334   :  { %4864 = vmatprep.mubr.bf16.mxu1 %v13278_v13  ;;  %4129 = vmatmul.mubr.bf16.gmra.mrb[100].mxu0 %v13385_v3  ;;  %v13317_v13 = vld [vmem:[#allocation4 + $0xe44] ss:$16 sps:$4 sm:$0xff]  }
 0x335   :  { %4136 = vmatprep.mubr.bf16.mxu0 %v13389_v6  ;;  %v13479_v6 = vld [vmem:[#allocation4 + $0x324] ss:$16 sps:$4 sm:$0xff]  }
 0x33b   :  { %4865 = vmatmul.mubr.bf16.gmra.mrb[156].mxu1 %v13280_v14  ;;  %v13401_v14 = vld [vmem:[#allocation4 + $0x184] ss:$16 sps:$4 sm:$0xff]  }
 0x33c   :  { %4872 = vmatprep.mubr.bf16.mxu1 %v13281_v15  ;;  %4137 = vmatmul.mubr.bf16.gmra.mrb[104].mxu0 %v13391_v7  ;;  %v13403_v15 = vld [vmem:[#allocation4 + $0x180] ss:$16 sps:$4 sm:$0xff]  }
 0x33d   :  { %4144 = vmatprep.mubr.bf16.mxu0 %v13395_v10  ;;  %v13481_v7 = vld [vmem:[#allocation4 + $0x320] ss:$16 sps:$4 sm:$0xff]  }
 0x33e   :  { %v13386_v10 = vld [vmem:[#allocation4 + $0xfe0] ss:$16 sps:$4 sm:$0xff]  }
 0x343   :  { %4873 = vmatmul.mubr.bf16.gmra.mrb[160].mxu1 %v13283_v18  ;;  %v13407_v18 = vld [vmem:[#allocation4 + $0x1a4] ss:$16 sps:$4 sm:$0xff]  }
 0x344   :  { %4880 = vmatprep.mubr.bf16.mxu1 %v13284_v19  ;;  %4145 = vmatmul.mubr.bf16.gmra.mrb[108].mxu0 %v13397_v11  ;;  %v13409_v19 = vld [vmem:[#allocation4 + $0x1a0] ss:$16 sps:$4 sm:$0xff]  }
 0x345   :  { %4152 = vmatprep.mubr.bf16.mxu0 %v13401_v14  ;;  %v13485_v14 = vld [vmem:[#allocation4 + $0x344] ss:$16 sps:$4 sm:$0xff]  }
 0x34b   :  { %4881 = vmatmul.mubr.bf16.gmra.mrb[164].mxu1 %v13286_v22  ;;  %v13413_v22 = vld [vmem:[#allocation4 + $0x1c4] ss:$16 sps:$4 sm:$0xff]  }
 0x34c   :  { %4888 = vmatprep.mubr.bf16.mxu1 %v13287_v23  ;;  %4153 = vmatmul.mubr.bf16.gmra.mrb[112].mxu0 %v13403_v15  ;;  %v13415_v23 = vld [vmem:[#allocation4 + $0x1c0] ss:$16 sps:$4 sm:$0xff]  }
 0x34d   :  { %4160 = vmatprep.mubr.bf16.mxu0 %v13407_v18  ;;  %v13487_v15 = vld [vmem:[#allocation4 + $0x340] ss:$16 sps:$4 sm:$0xff]   ;;  %v13392_v18 = vld [vmem:[#allocation4 + $0x8] ss:$16 sps:$4 sm:$0xff]  }
 0x353   :  { %4889 = vmatmul.mubr.bf16.gmra.mrb[168].mxu1 %v13289_v26  ;;  %v13419_v26 = vld [vmem:[#allocation4 + $0x1e4] ss:$16 sps:$4 sm:$0xff]  }
 0x354   :  { %4896 = vmatprep.mubr.bf16.mxu1 %v13290_v27  ;;  %4161 = vmatmul.mubr.bf16.gmra.mrb[116].mxu0 %v13409_v19  ;;  %v13421_v27 = vld [vmem:[#allocation4 + $0x1e0] ss:$16 sps:$4 sm:$0xff]  }
 0x355   :  { %4168 = vmatprep.mubr.bf16.mxu0 %v13413_v22  ;;  %v13491_v22 = vld [vmem:[#allocation4 + $0x364] ss:$16 sps:$4 sm:$0xff]  }
 0x35b   :  { %4897 = vmatmul.mubr.bf16.gmra.mrb[172].mxu1 %v13292_v31  ;;  %v13425_v31 = vld [vmem:[#allocation4 + $0x204] ss:$16 sps:$4 sm:$0xff]  }
 0x35c   :  { %4904 = vmatprep.mubr.bf16.mxu1 %v13293_v32  ;;  %4169 = vmatmul.mubr.bf16.gmra.mrb[120].mxu0 %v13415_v23  ;;  %v13427_v32 = vld [vmem:[#allocation4 + $0x200] ss:$16 sps:$4 sm:$0xff]  }
 0x35d   :  { %4176 = vmatprep.mubr.bf16.mxu0 %v13419_v26  ;;  %v13493_v23 = vld [vmem:[#allocation4 + $0x360] ss:$16 sps:$4 sm:$0xff]   ;;  %v13398_v26 = vld [vmem:[#allocation4 + $0x28] ss:$16 sps:$4 sm:$0xff]  }
 0x363   :  { %4905 = vmatmul.mubr.bf16.gmra.mrb[176].mxu1 %v13295_v35  ;;  %v13431_v35 = vld [vmem:[#allocation4 + $0x224] ss:$16 sps:$4 sm:$0xff]  }
 0x364   :  { %4912 = vmatprep.mubr.bf16.mxu1 %v13296_v36  ;;  %4177 = vmatmul.mubr.bf16.gmra.mrb[124].mxu0 %v13421_v27  ;;  %v13433_v36 = vld [vmem:[#allocation4 + $0x220] ss:$16 sps:$4 sm:$0xff]  }
 0x365   :  { %4184 = vmatprep.mubr.bf16.mxu0 %v13425_v31  ;;  %v13497_v31 = vld [vmem:[#allocation4 + $0x384] ss:$16 sps:$4 sm:$0xff]  }
 0x36b   :  { %4913 = vmatmul.mubr.bf16.gmra.mrb[180].mxu1 %v13298_v49  ;;  %v13358_v49 = vld [vmem:[#allocation4 + $0xf40] ss:$16 sps:$4 sm:$0xff]  }
 0x36c   :  { %4920 = vmatprep.mubr.bf16.mxu1 %v13299_v52  ;;  %4185 = vmatmul.mubr.bf16.gmra.mrb[128].mxu0 %v13427_v32  ;;  %v13457_v52 = vld [vmem:[#allocation4 + $0x2a0] ss:$16 sps:$4 sm:$0xff]  }
 0x36d   :  { %4192 = vmatprep.mubr.bf16.mxu0 %v13431_v35  ;;  %v13499_v32 = vld [vmem:[#allocation4 + $0x380] ss:$16 sps:$4 sm:$0xff]   ;;  %v13404_v35 = vld [vmem:[#allocation4 + $0x48] ss:$16 sps:$4 sm:$0xff]  }
 0x373   :  { %4921 = vmatmul.mubr.bf16.gmra.mrb[184].mxu1 %v13301_v57  ;;  %v13370_v57 = vld [vmem:[#allocation4 + $0xf80] ss:$16 sps:$4 sm:$0xff]  }
 0x374   :  { %4928 = vmatprep.mubr.bf16.mxu1 %v13302_v58  ;;  %4193 = vmatmul.mubr.bf16.gmra.mrb[132].mxu0 %v13433_v36  ;;  %v13374_v58 = vld [vmem:[#allocation4 + $0xfa4] ss:$16 sps:$4 sm:$0xff]  }
 0x375   :  { %4200 = vmatprep.mubr.bf16.mxu0 %v13437_v39  ;;  %v13503_v39 = vld [vmem:[#allocation4 + $0x3a4] ss:$16 sps:$4 sm:$0xff]  }
 0x37b   :  { %4929 = vmatmul.mubr.bf16.gmra.mrb[188].mxu1 %v13304_v61  ;;  %v13376_v61 = vld [vmem:[#allocation4 + $0xfa0] ss:$16 sps:$4 sm:$0xff]  }
 0x37c   :  { %4936 = vmatprep.mubr.bf16.mxu1 %v13305_v62  ;;  %4201 = vmatmul.mubr.bf16.gmra.mrb[136].mxu0 %v13439_v40  ;;  %v13382_v62 = vld [vmem:[#allocation4 + $0xfc4] ss:$16 sps:$4 sm:$0xff]   ;;  %v13505_v40 = vld [vmem:[#allocation4 + $0x3a0] ss:$16 sps:$4 sm:$0xff]  }
 0x37d   :  { %4208 = vmatprep.mubr.bf16.mxu0 %v13443_v43  ;;  %v13410_v43 = vld [vmem:[#allocation4 + $0x68] ss:$16 sps:$4 sm:$0xff]  }
 0x383   :  { %4937 = vmatmul.mubr.bf16.gmra.mrb[192].mxu1 %v13307_v0 }
 0x384   :  { %4944 = vmatprep.mubr.bf16.mxu1 %v13308_v1  ;;  %4209 = vmatmul.mubr.bf16.gmra.mrb[140].mxu0 %v13445_v44 }
 0x385   :  { %4216 = vmatprep.mubr.bf16.mxu0 %v13449_v47  ;;  %v13509_v47 = vld [vmem:[#allocation4 + $0x3c4] ss:$16 sps:$4 sm:$0xff]  }
 0x38b   :  { %4945 = vmatmul.mubr.bf16.gmra.mrb[196].mxu1 %v13310_v4  ;;  %v13388_v4 = vld [vmem:[#allocation4 + $0xfe4] ss:$16 sps:$4 sm:$0xff]  }
 0x38c   :  { %4952 = vmatprep.mubr.bf16.mxu1 %v13311_v5  ;;  %4217 = vmatmul.mubr.bf16.gmra.mrb[144].mxu0 %v13451_v48  ;;  %v13511_v48 = vld [vmem:[#allocation4 + $0x3c0] ss:$16 sps:$4 sm:$0xff]  }
 0x38d   :  { %4224 = vmatprep.mubr.bf16.mxu0 %v13455_v51  ;;  %v13416_v51 = vld [vmem:[#allocation4 + $0x88] ss:$16 sps:$4 sm:$0xff]  }
 0x393   :  { %4953 = vmatmul.mubr.bf16.gmra.mrb[200].mxu1 %v13313_v8 }
 0x394   :  { %4960 = vmatprep.mubr.bf16.mxu1 %v13314_v9  ;;  %4225 = vmatmul.mubr.bf16.gmra.mrb[148].mxu0 %v13457_v52 }
 0x395   :  { %4232 = vmatprep.mubr.bf16.mxu0 %v13461_v55  ;;  %v13515_v55 = vld [vmem:[#allocation4 + $0x3e4] ss:$16 sps:$4 sm:$0xff]  }
 0x39b   :  { %4961 = vmatmul.mubr.bf16.gmra.mrb[204].mxu1 %v13316_v12  ;;  %v13394_v12 = vld [vmem:[#allocation4 + $0xc] ss:$16 sps:$4 sm:$0xff]  }
 0x39c   :  { %4968 = vmatprep.mubr.bf16.mxu1 %v13317_v13  ;;  %4233 = vmatmul.mubr.bf16.gmra.mrb[152].mxu0 %v13463_v56  ;;  %v13517_v56 = vld [vmem:[#allocation4 + $0x3e0] ss:$16 sps:$4 sm:$0xff]  }
 0x39d   :  { %4240 = vmatprep.mubr.bf16.mxu0 %v13467_v59  ;;  %v13422_v59 = vld [vmem:[#allocation4 + $0xa8] ss:$16 sps:$4 sm:$0xff]  }
 0x3a3   :  { %4969 = vmatmul.mubr.bf16.gmra.mrb[208].mxu1 %v13319_v16 }
 0x3a4   :  { %4976 = vmatprep.mubr.bf16.mxu1 %v13320_v17  ;;  %4241 = vmatmul.mubr.bf16.gmra.mrb[156].mxu0 %v13469_v60 }
 0x3a5   :  { %4248 = vmatprep.mubr.bf16.mxu0 %v13473_v63  ;;  %v13521_v63 = vld [vmem:[#allocation4 + $0x404] ss:$16 sps:$4 sm:$0xff]  }
 0x3ab   :  { %4977 = vmatmul.mubr.bf16.gmra.mrb[212].mxu1 %v13322_v20  ;;  %v13400_v20 = vld [vmem:[#allocation4 + $0x2c] ss:$16 sps:$4 sm:$0xff]  }
 0x3ac   :  { %4984 = vmatprep.mubr.bf16.mxu1 %v13323_v21  ;;  %4249 = vmatmul.mubr.bf16.gmra.mrb[160].mxu0 %v13475_v29  ;;  %v13523_v29 = vld [vmem:[#allocation4 + $0x400] ss:$16 sps:$4 sm:$0xff]  }
 0x3ad   :  { %4256 = vmatprep.mubr.bf16.mxu0 %v13479_v6  ;;  %v13436_v6 = vld [vmem:[#allocation4 + $0xec] ss:$16 sps:$4 sm:$0xff]  }
 0x3b3   :  { %4985 = vmatmul.mubr.bf16.gmra.mrb[216].mxu1 %v13325_v24 }
 0x3b4   :  { %4992 = vmatprep.mubr.bf16.mxu1 %v13326_v25  ;;  %4257 = vmatmul.mubr.bf16.gmra.mrb[164].mxu0 %v13481_v7 }
 0x3b5   :  { %4264 = vmatprep.mubr.bf16.mxu0 %v13485_v14  ;;  %v13434_v14 = vld [vmem:[#allocation4 + $0xe8] ss:$16 sps:$4 sm:$0xff]  }
 0x3bb   :  { %4993 = vmatmul.mubr.bf16.gmra.mrb[220].mxu1 %v13328_v28  ;;  %v13406_v28 = vld [vmem:[#allocation4 + $0x4c] ss:$16 sps:$4 sm:$0xff]  }
 0x3bc   :  { %5000 = vmatprep.mubr.bf16.mxu1 %v13332_v30  ;;  %4265 = vmatmul.mubr.bf16.gmra.mrb[168].mxu0 %v13487_v15 }
 0x3bd   :  { %4272 = vmatprep.mubr.bf16.mxu0 %v13491_v22 }
 0x3c3   :  { %5001 = vmatmul.mubr.bf16.gmra.mrb[224].mxu1 %v13334_v33 }
 0x3c4   :  { %5008 = vmatprep.mubr.bf16.mxu1 %v13338_v34  ;;  %4273 = vmatmul.mubr.bf16.gmra.mrb[172].mxu0 %v13493_v23 }
 0x3c5   :  { %4280 = vmatprep.mubr.bf16.mxu0 %v13497_v31  ;;  %v13539_v31 = vld [vmem:[#allocation4 + $0x464] ss:$16 sps:$4 sm:$0xff]  }
 0x3cb   :  { %5009 = vmatmul.mubr.bf16.gmra.mrb[228].mxu1 %v13340_v37  ;;  %v13412_v37 = vld [vmem:[#allocation4 + $0x6c] ss:$16 sps:$4 sm:$0xff]  }
 0x3cc   :  { %5016 = vmatprep.mubr.bf16.mxu1 %v13344_v38  ;;  %4281 = vmatmul.mubr.bf16.gmra.mrb[176].mxu0 %v13499_v32  ;;  %v13541_v32 = vld [vmem:[#allocation4 + $0x460] ss:$16 sps:$4 sm:$0xff]  }
 0x3cd   :  { %4288 = vmatprep.mubr.bf16.mxu0 %v13503_v39  ;;  %v13454_v39 = vld [vmem:[#allocation4 + $0x14c] ss:$16 sps:$4 sm:$0xff]  }
 0x3d3   :  { %5017 = vmatmul.mubr.bf16.gmra.mrb[232].mxu1 %v13346_v41 }
 0x3d4   :  { %5024 = vmatprep.mubr.bf16.mxu1 %v13350_v42  ;;  %4289 = vmatmul.mubr.bf16.gmra.mrb[180].mxu0 %v13505_v40 }
 0x3d5   :  { %4296 = vmatprep.mubr.bf16.mxu0 %v13509_v47  ;;  %v13452_v47 = vld [vmem:[#allocation4 + $0x148] ss:$16 sps:$4 sm:$0xff]  }
 0x3db   :  { %5025 = vmatmul.mubr.bf16.gmra.mrb[236].mxu1 %v13352_v45  ;;  %v13418_v45 = vld [vmem:[#allocation4 + $0x8c] ss:$16 sps:$4 sm:$0xff]  }
 0x3dc   :  { %5032 = vmatprep.mubr.bf16.mxu1 %v13356_v46  ;;  %4297 = vmatmul.mubr.bf16.gmra.mrb[184].mxu0 %v13511_v48 }
 0x3dd   :  { %4304 = vmatprep.mubr.bf16.mxu0 %v13515_v55  ;;  %v13553_v55 = vld [vmem:[#allocation4 + $0x4a0] ss:$16 sps:$4 sm:$0xff]  }
 0x3e3   :  { %5033 = vmatmul.mubr.bf16.gmra.mrb[240].mxu1 %v13358_v49 }
 0x3e4   :  { %5040 = vmatprep.mubr.bf16.mxu1 %v13362_v50  ;;  %4305 = vmatmul.mubr.bf16.gmra.mrb[188].mxu0 %v13517_v56 }
 0x3e5   :  { %4312 = vmatprep.mubr.bf16.mxu0 %v13521_v63 }
 0x3eb   :  { %5041 = vmatmul.mubr.bf16.gmra.mrb[244].mxu1 %v13364_v53  ;;  %v13424_v53 = vld [vmem:[#allocation4 + $0xac] ss:$16 sps:$4 sm:$0xff]  }
 0x3ec   :  { %5048 = vmatprep.mubr.bf16.mxu1 %v13368_v54  ;;  %4313 = vmatmul.mubr.bf16.gmra.mrb[192].mxu0 %v13523_v29  ;;  %v13466_v29 = vld [vmem:[#allocation4 + $0x18c] ss:$16 sps:$4 sm:$0xff]  }
 0x3f3   :  { %5049 = vmatmul.mubr.bf16.gmra.mrb[248].mxu1 %v13370_v57 }
 0x3f4   :  { %5056 = vmatprep.mubr.bf16.mxu1 %v13374_v58 }
 0x3fb   :  { %5057 = vmatmul.mubr.bf16.gmra.mrb[252].mxu1 %v13376_v61  ;;  %v13430_v61 = vld [vmem:[#allocation4 + $0xcc] ss:$16 sps:$4 sm:$0xff]  }
 0x3fc   :  { %5064 = vmatprep.mubr.bf16.mxu1 %v13382_v62 }
 0x3fe   :  { %v14903_v0 = vpop.f32.mrb[148].mxu1 }
 0x3ff   :  { %16808 = vst [vmem:[#allocation25_spill] sm:$0xff] %v14903_v0  ;;  %v4852_v1 = vpop.f32.mrb[149].mxu1  ;;  %v13715_v0 = vld [vmem:[#allocation6 + $0xf8] sm:$0xff]  }
 0x400   :  { %v14905_v3 = vpop.f32.mrb[150].mxu1 }
 0x401   :  { %16809 = vst [vmem:[#allocation26_spill] sm:$0xff] %v14905_v3  ;;  %v4855_v5 = vpop.f32.mrb[151].mxu1 }
 0x403   :  { %5065 = vmatmul.mubr.bf16.gmra.mrb[148].mxu1 %v13380_v2 }
 0x404   :  { %5072 = vmatprep.mubr.bf16.mxu1 %v13388_v4  ;;  %v13428_v4 = vld [vmem:[#allocation4 + $0xc8] ss:$16 sps:$4 sm:$0xff]  }
 0x406   :  { %v14907_v8 = vpop.f32.mrb[152].mxu1 }
 0x407   :  { %16810 = vst [vmem:[#allocation27_spill] sm:$0xff] %v14907_v8  ;;  %v4860_v9 = vpop.f32.mrb[153].mxu1  ;;  %v13705_v8 = vld [vmem:[#allocation6 + $0xe8] sm:$0xff]  }
 0x408   :  { %v14909_v11 = vpop.f32.mrb[154].mxu1  ;;  %v13527_v9 = vld [vmem:[#allocation4 + $0x424] ss:$16 sps:$4 sm:$0xff]  }
 0x409   :  { %16811 = vst [vmem:[#allocation28_spill] sm:$0xff] %v14909_v11  ;;  %v4863_v13 = vpop.f32.mrb[155].mxu1  ;;  %4320 = vmatprep.mubr.bf16.mxu0 %v13527_v9  ;;  %v13559_v9 = vld [vmem:[#allocation4 + $0x4c0] ss:$16 sps:$4 sm:$0xff]  }
 0x40b   :  { %5073 = vmatmul.mubr.bf16.gmra.mrb[152].mxu1 %v13386_v10  ;;  %v13529_v10 = vld [vmem:[#allocation4 + $0x420] ss:$16 sps:$4 sm:$0xff]  }
 0x40c   :  { %5113 = vmatprep.mubr.bf16.mxu1 %v13394_v12  ;;  %4321 = vmatmul.mubr.bf16.gmra.mrb[196].mxu0 %v13529_v10 }
 0x40e   :  { %v14911_v16 = vpop.f32.mrb[156].mxu1 }
 0x40f   :  { %16812 = vst [vmem:[#allocation29_spill] sm:$0xff] %v14911_v16  ;;  %v4868_v17 = vpop.f32.mrb[157].mxu1 }
 0x410   :  { %v14913_v19 = vpop.f32.mrb[158].mxu1  ;;  %v13442_v17 = vld [vmem:[#allocation4 + $0x10c] ss:$16 sps:$4 sm:$0xff]  }
 0x411   :  { %16813 = vst [vmem:[#allocation30_spill] sm:$0xff] %v14913_v19  ;;  %v4871_v21 = vpop.f32.mrb[159].mxu1  ;;  %v13695_v19 = vld [vmem:[#allocation6 + $0xd8] sm:$0xff]  }
 0x412   :  { %v13535_v21 = vld [vmem:[#allocation4 + $0x440] ss:$16 sps:$4 sm:$0xff]  }
 0x413   :  { %5114 = vmatmul.mubr.bf16.vlgmr.msra.gmra.mrb[156].mxu1 %v13392_v18 }
 0x414   :  { %5121 = vmatprep.mubr.bf16.mxu1 %v13400_v20  ;;  %v13533_v20 = vld [vmem:[#allocation4 + $0x444] ss:$16 sps:$4 sm:$0xff]  }
 0x415   :  { %4328 = vmatprep.mubr.bf16.mxu0 %v13533_v20 }
 0x416   :  { %v14915_v24 = vpop.f32.mrb[160].mxu1  ;;  %4329 = vmatmul.mubr.bf16.gmra.mrb[200].mxu0 %v13535_v21  ;;  %v13472_v21 = vld [vmem:[#allocation4 + $0x1ac] ss:$16 sps:$4 sm:$0xff]  }
 0x417   :  { %16814 = vst [vmem:[#allocation31_spill] sm:$0xff] %v14915_v24  ;;  %v4876_v25 = vpop.f32.mrb[161].mxu1  ;;  %4336 = vmatprep.mubr.bf16.mxu0 %v13539_v31  ;;  %v13565_v31 = vld [vmem:[#allocation4 + $0x4e0] ss:$16 sps:$4 sm:$0xff]  }
 0x418   :  { %v14917_v27 = vpop.f32.mrb[162].mxu1  ;;  %v13440_v25 = vld [vmem:[#allocation4 + $0x108] ss:$16 sps:$4 sm:$0xff]  }
 0x419   :  { %16815 = vst [vmem:[#allocation32_spill] sm:$0xff] %v14917_v27  ;;  %v4879_v30 = vpop.f32.mrb[163].mxu1 }
 0x41b   :  { %5122 = vmatmul.mubr.bf16.gmra.mrb[160].mxu1 %v13398_v26 }
 0x41c   :  { %5129 = vmatprep.mubr.bf16.mxu1 %v13406_v28  ;;  %v13448_v28 = vld [vmem:[#allocation4 + $0x12c] ss:$16 sps:$4 sm:$0xff]  }
 0x41e   :  { %v14919_v33 = vpop.f32.mrb[164].mxu1  ;;  %4337 = vmatmul.mubr.bf16.gmra.mrb[204].mxu0 %v13541_v32 }
 0x41f   :  { %16816 = vst [vmem:[#allocation33_spill] sm:$0xff] %v14919_v33  ;;  %v4884_v34 = vpop.f32.mrb[165].mxu1  ;;  %v13584_v33 = vld [vmem:[#allocation4 + $0x408] ss:$16 sps:$4 sm:$0xff]  }
 0x420   :  { %v14921_v36 = vpop.f32.mrb[166].mxu1 }
 0x421   :  { %16817 = vst [vmem:[#allocation34_spill] sm:$0xff] %v14921_v36  ;;  %v4887_v38 = vpop.f32.mrb[167].mxu1 }
 0x423   :  { %5130 = vmatmul.mubr.bf16.gmra.mrb[164].mxu1 %v13404_v35 }
 0x424   :  { %5137 = vmatprep.mubr.bf16.mxu1 %v13412_v37  ;;  %v13446_v37 = vld [vmem:[#allocation4 + $0x128] ss:$16 sps:$4 sm:$0xff]  }
 0x426   :  { %v14923_v41 = vpop.f32.mrb[168].mxu1 }
 0x427   :  { %16818 = vst [vmem:[#allocation35_spill] sm:$0xff] %v14923_v41  ;;  %v4892_v42 = vpop.f32.mrb[169].mxu1  ;;  %v13578_v41 = vld [vmem:[#allocation4 + $0x3e8] ss:$16 sps:$4 sm:$0xff]  }
 0x428   :  { %v14925_v44 = vpop.f32.mrb[170].mxu1  ;;  %v13545_v42 = vld [vmem:[#allocation4 + $0x484] ss:$16 sps:$4 sm:$0xff]  }
 0x429   :  { %16819 = vst [vmem:[#allocation36_spill] sm:$0xff] %v14925_v44  ;;  %v4895_v46 = vpop.f32.mrb[171].mxu1  ;;  %4344 = vmatprep.mubr.bf16.mxu0 %v13545_v42 }
 0x42b   :  { %5138 = vmatmul.mubr.bf16.gmra.mrb[168].mxu1 %v13410_v43  ;;  %v13547_v43 = vld [vmem:[#allocation4 + $0x480] ss:$16 sps:$4 sm:$0xff]  }
 0x42c   :  { %5145 = vmatprep.mubr.bf16.mxu1 %v13418_v45  ;;  %4345 = vmatmul.mubr.bf16.gmra.mrb[208].mxu0 %v13547_v43  ;;  %v13478_v43 = vld [vmem:[#allocation4 + $0x1cc] ss:$16 sps:$4 sm:$0xff]  }
 0x42e   :  { %v14927_v49 = vpop.f32.mrb[172].mxu1 }
 0x42f   :  { %16820 = vst [vmem:[#allocation37_spill] sm:$0xff] %v14927_v49  ;;  %v4900_v50 = vpop.f32.mrb[173].mxu1  ;;  %v13572_v49 = vld [vmem:[#allocation4 + $0x3c8] ss:$16 sps:$4 sm:$0xff]  }
 0x430   :  { %v14929_v52 = vpop.f32.mrb[174].mxu1  ;;  %v13460_v50 = vld [vmem:[#allocation4 + $0x16c] ss:$16 sps:$4 sm:$0xff]  }
 0x431   :  { %16821 = vst [vmem:[#allocation38_spill] sm:$0xff] %v14929_v52  ;;  %v4903_v54 = vpop.f32.mrb[175].mxu1 }
 0x432   :  { %v14955_v54 = vpop.f32.mrb[64].mxu0 }
 0x433   :  { %5146 = vmatmul.mubr.bf16.gmra.mrb[172].mxu1 %v13416_v51  ;;  %v4060_v56 = vpop.f32.mrb[65].mxu0 }
 0x434   :  { %5153 = vmatprep.mubr.bf16.mxu1 %v13424_v53  ;;  %v13551_v53 = vld [vmem:[#allocation4 + $0x4a4] ss:$16 sps:$4 sm:$0xff]  }
 0x435   :  { %4352 = vmatprep.mubr.bf16.mxu0 %v13551_v53  ;;  %v13571_v53 = vld [vmem:[#allocation4 + $0x500] ss:$16 sps:$4 sm:$0xff]  }
 0x436   :  { %v14931_v57 = vpop.f32.mrb[176].mxu1  ;;  %4353 = vmatmul.mubr.bf16.gmra.mrb[212].mxu0 %v13553_v55 }
 0x437   :  { %16822 = vst [vmem:[#allocation39_spill] sm:$0xff] %v14931_v57  ;;  %v4908_v58 = vpop.f32.mrb[177].mxu1  ;;  %v13566_v57 = vld [vmem:[#allocation4 + $0x3a8] ss:$16 sps:$4 sm:$0xff]  }
 0x438   :  { %v14933_v60 = vpop.f32.mrb[178].mxu1 }
 0x439   :  { %16823 = vst [vmem:[#allocation40_spill] sm:$0xff] %v14933_v60  ;;  %v4911_v62 = vpop.f32.mrb[179].mxu1 }
 0x43a   :  { %v14959_v62 = vpop.f32.mrb[66].mxu0 }
 0x43b   :  { %5154 = vmatmul.mubr.bf16.gmra.mrb[176].mxu1 %v13422_v59 }
 0x43c   :  { %5161 = vmatprep.mubr.bf16.mxu1 %v13430_v61  ;;  %v13458_v61 = vld [vmem:[#allocation4 + $0x168] ss:$16 sps:$4 sm:$0xff]  }
 0x43e   :  { %v14935_v1 = vpop.f32.mrb[180].mxu1 }
 0x43f   :  { %16824 = vst [vmem:[#allocation41_spill] sm:$0xff] %v14935_v1  ;;  %v4916_v2 = vpop.f32.mrb[181].mxu1  ;;  %v13560_v1 = vld [vmem:[#allocation4 + $0x388] ss:$16 sps:$4 sm:$0xff]  }
 0x440   :  { %v14937_v5 = vpop.f32.mrb[182].mxu1  ;;  %v4063_v2 = vpop.f32.mrb[67].mxu0 }
 0x441   :  { %16825 = vst [vmem:[#allocation42_spill] sm:$0xff] %v14937_v5  ;;  %v4919_v7 = vpop.f32.mrb[183].mxu1 }
 0x442   :  { %v14963_v7 = vpop.f32.mrb[68].mxu0 }
 0x443   :  { %5162 = vmatmul.mubr.bf16.gmra.mrb[180].mxu1 %v13428_v4  ;;  %v4068_v10 = vpop.f32.mrb[69].mxu0 }
 0x444   :  { %5169 = vmatprep.mubr.bf16.mxu1 %v13436_v6  ;;  %v13557_v6 = vld [vmem:[#allocation4 + $0x4c4] ss:$16 sps:$4 sm:$0xff]  }
 0x445   :  { %4360 = vmatprep.mubr.bf16.mxu0 %v13557_v6  ;;  %v13575_v10 = vld [vmem:[#allocation4 + $0x524] ss:$16 sps:$4 sm:$0xff]  }
 0x446   :  { %v14939_v12 = vpop.f32.mrb[184].mxu1  ;;  %4361 = vmatmul.mubr.bf16.gmra.mrb[216].mxu0 %v13559_v9 }
 0x447   :  { %16826 = vst [vmem:[#allocation43_spill] sm:$0xff] %v14939_v12  ;;  %v4924_v13 = vpop.f32.mrb[185].mxu1  ;;  %v13651_v12 = vld [vmem:[#allocation4 + $0x6a0] ss:$16 sps:$4 sm:$0xff]  }
 0x448   :  { %v14941_v15 = vpop.f32.mrb[186].mxu1 }
 0x449   :  { %16827 = vst [vmem:[#allocation44_spill] sm:$0xff] %v14941_v15  ;;  %v4927_v18 = vpop.f32.mrb[187].mxu1 }
 0x44a   :  { %v14967_v18 = vpop.f32.mrb[70].mxu0 }
 0x44b   :  { %5170 = vmatmul.mubr.bf16.gmra.mrb[184].mxu1 %v13434_v14 }
 0x44c   :  { %5177 = vmatprep.mubr.bf16.mxu1 %v13442_v17  ;;  %v13464_v17 = vld [vmem:[#allocation4 + $0x188] ss:$16 sps:$4 sm:$0xff]  }
 0x44e   :  { %v14943_v22 = vpop.f32.mrb[188].mxu1 }
 0x44f   :  { %16828 = vst [vmem:[#allocation45_spill] sm:$0xff] %v14943_v22  ;;  %v4932_v23 = vpop.f32.mrb[189].mxu1  ;;  %v13646_v22 = vld [vmem:[#allocation4 + $0x684] ss:$16 sps:$4 sm:$0xff]  }
 0x450   :  { %v14945_v26 = vpop.f32.mrb[190].mxu1  ;;  %v4071_v23 = vpop.f32.mrb[71].mxu0 }
 0x451   :  { %16829 = vst [vmem:[#allocation46_spill] sm:$0xff] %v14945_v26  ;;  %v4935_v30 = vpop.f32.mrb[191].mxu1  ;;  %v13644_v26 = vld [vmem:[#allocation4 + $0x680] ss:$16 sps:$4 sm:$0xff]  }
 0x452   :  { %v14971_v30 = vpop.f32.mrb[72].mxu0 }
 0x453   :  { %5178 = vmatmul.mubr.bf16.gmra.mrb[188].mxu1 %v13440_v25  ;;  %v4076_v32 = vpop.f32.mrb[73].mxu0 }
 0x454   :  { %5185 = vmatprep.mubr.bf16.mxu1 %v13448_v28  ;;  %v13563_v28 = vld [vmem:[#allocation4 + $0x4e4] ss:$16 sps:$4 sm:$0xff]  }
 0x455   :  { %4368 = vmatprep.mubr.bf16.mxu0 %v13563_v28  ;;  %v13482_v28 = vld [vmem:[#allocation4 + $0x1e8] ss:$16 sps:$4 sm:$0xff]  }
 0x456   :  { %v14947_v34 = vpop.f32.mrb[192].mxu1  ;;  %4369 = vmatmul.mubr.bf16.gmra.mrb[220].mxu0 %v13565_v31 }
 0x457   :  { %16830 = vst [vmem:[#allocation47_spill] sm:$0xff] %v14947_v34  ;;  %v4940_v35 = vpop.f32.mrb[193].mxu1 }
 0x458   :  { %v14949_v38 = vpop.f32.mrb[194].mxu1 }
 0x459   :  { %16831 = vst [vmem:[#allocation48_spill] sm:$0xff] %v14949_v38  ;;  %v4943_v40 = vpop.f32.mrb[195].mxu1  ;;  %v13639_v38 = vld [vmem:[#allocation4 + $0x664] ss:$16 sps:$4 sm:$0xff]  }
 0x45a   :  { %v14975_v40 = vpop.f32.mrb[74].mxu0 }
 0x45b   :  { %5186 = vmatmul.mubr.bf16.gmra.mrb[192].mxu1 %v13446_v37 }
 0x45c   :  { %5193 = vmatprep.mubr.bf16.mxu1 %v13454_v39  ;;  %v13470_v39 = vld [vmem:[#allocation4 + $0x1a8] ss:$16 sps:$4 sm:$0xff]  }
 0x45e   :  { %v14951_v45 = vpop.f32.mrb[196].mxu1 }
 0x45f   :  { %16832 = vst [vmem:[#allocation49_spill] sm:$0xff] %v14951_v45  ;;  %v4948_v46 = vpop.f32.mrb[197].mxu1 }
 0x460   :  { %v14953_v48 = vpop.f32.mrb[198].mxu1  ;;  %v4079_v46 = vpop.f32.mrb[75].mxu0 }
 0x461   :  { %16833 = vst [vmem:[#allocation50_spill] sm:$0xff] %v14953_v48  ;;  %v4951_v51 = vpop.f32.mrb[199].mxu1  ;;  %v13581_v46 = vld [vmem:[#allocation4 + $0x544] ss:$16 sps:$4 sm:$0xff]  }
 0x462   :  { %v14979_v51 = vpop.f32.mrb[76].mxu0  ;;  %v13633_v48 = vld [vmem:[#allocation4 + $0x644] ss:$16 sps:$4 sm:$0xff]  }
 0x463   :  { %5194 = vmatmul.mubr.bf16.gmra.mrb[196].mxu1 %v13452_v47  ;;  %v4084_v55 = vpop.f32.mrb[77].mxu0 }
 0x464   :  { %5201 = vmatprep.mubr.bf16.mxu1 %v13460_v50  ;;  %v13569_v50 = vld [vmem:[#allocation4 + $0x504] ss:$16 sps:$4 sm:$0xff]  }
 0x465   :  { %4376 = vmatprep.mubr.bf16.mxu0 %v13569_v50  ;;  %v13583_v50 = vld [vmem:[#allocation4 + $0x540] ss:$16 sps:$4 sm:$0xff]  }
 0x466   :  { %v14957_v58 = vpop.f32.mrb[200].mxu1  ;;  %4377 = vmatmul.mubr.bf16.gmra.mrb[224].mxu0 %v13571_v53 }
 0x467   :  { %16834 = vst [vmem:[#allocation51_spill] sm:$0xff] %v14957_v58  ;;  %v4956_v59 = vpop.f32.mrb[201].mxu1  ;;  %4384 = vmatprep.mubr.bf16.mxu0 %v13575_v10 }
 0x468   :  { %v14961_v63 = vpop.f32.mrb[202].mxu1 }
 0x469   :  { %16835 = vst [vmem:[#allocation52_spill] sm:$0xff] %v14961_v63  ;;  %v4959_v4 = vpop.f32.mrb[203].mxu1  ;;  %v13627_v63 = vld [vmem:[#allocation4 + $0x624] ss:$16 sps:$4 sm:$0xff]  }
 0x46a   :  { %v13484_v4 = vld [vmem:[#allocation4 + $0x1ec] ss:$16 sps:$4 sm:$0xff]  }
 0x46b   :  { %5202 = vmatmul.mubr.bf16.gmra.mrb[200].mxu1 %v13458_v61  ;;  %v13476_v61 = vld [vmem:[#allocation4 + $0x1c8] ss:$16 sps:$4 sm:$0xff]  }
 0x46c   :  { %5209 = vmatprep.mubr.bf16.mxu1 %v13466_v29  ;;  %v14983_v29 = vpop.f32.mrb[78].mxu0 }
 0x46d   :  { %v4087_v6 = vpop.f32.mrb[79].mxu0 }
 0x46e   :  { %v14965_v13 = vpop.f32.mrb[204].mxu1 }
 0x46f   :  { %16836 = vst [vmem:[#allocation53_spill] sm:$0xff] %v14965_v13  ;;  %v4964_v14 = vpop.f32.mrb[205].mxu1 }
 0x470   :  { %v14969_v20 = vpop.f32.mrb[206].mxu1  ;;  %v14987_v14 = vpop.f32.mrb[80].mxu0 }
 0x471   :  { %16837 = vst [vmem:[#allocation54_spill] sm:$0xff] %v14969_v20  ;;  %v4967_v25 = vpop.f32.mrb[207].mxu1  ;;  %v13621_v20 = vld [vmem:[#allocation4 + $0x604] ss:$16 sps:$4 sm:$0xff]  }
 0x473   :  { %5210 = vmatmul.mubr.bf16.gmra.mrb[204].mxu1 %v13464_v17  ;;  %v13577_v17 = vld [vmem:[#allocation4 + $0x520] ss:$16 sps:$4 sm:$0xff]  }
 0x474   :  { %5217 = vmatprep.mubr.bf16.mxu1 %v13472_v21  ;;  %v4092_v21 = vpop.f32.mrb[81].mxu0  ;;  %4385 = vmatmul.mubr.bf16.gmra.mrb[228].mxu0 %v13577_v17 }
 0x475   :  { %v14991_v31 = vpop.f32.mrb[82].mxu0  ;;  %4392 = vmatprep.mubr.bf16.mxu0 %v13581_v46  ;;  %v13587_v21 = vld [vmem:[#allocation4 + $0x564] ss:$16 sps:$4 sm:$0xff]   ;;  %v13494_v46 = vld [vmem:[#allocation4 + $0x228] ss:$16 sps:$4 sm:$0xff]  }
 0x476   :  { %v14973_v35 = vpop.f32.mrb[208].mxu1 }
 0x477   :  { %16838 = vst [vmem:[#allocation55_spill] sm:$0xff] %v14973_v35  ;;  %v4972_v37 = vpop.f32.mrb[209].mxu1  ;;  %v13615_v35 = vld [vmem:[#allocation4 + $0x5e0] ss:$16 sps:$4 sm:$0xff]  }
 0x478   :  { %v14977_v42 = vpop.f32.mrb[210].mxu1  ;;  %v13490_v37 = vld [vmem:[#allocation4 + $0x20c] ss:$16 sps:$4 sm:$0xff]  }
 0x479   :  { %16839 = vst [vmem:[#allocation56_spill] sm:$0xff] %v14977_v42  ;;  %v4975_v47 = vpop.f32.mrb[211].mxu1 }
 0x47b   :  { %5218 = vmatmul.mubr.bf16.gmra.mrb[208].mxu1 %v13470_v39  ;;  %v4095_v39 = vpop.f32.mrb[83].mxu0 }
 0x47c   :  { %5225 = vmatprep.mubr.bf16.mxu1 %v13478_v43  ;;  %v14995_v47 = vpop.f32.mrb[84].mxu0  ;;  %4393 = vmatmul.mubr.bf16.gmra.mrb[232].mxu0 %v13583_v50 }
 0x47d   :  { %v4100_v53 = vpop.f32.mrb[85].mxu0  ;;  %4400 = vmatprep.mubr.bf16.mxu0 %v13587_v21 }
 0x47e   :  { %v14981_v56 = vpop.f32.mrb[212].mxu1 }
 0x47f   :  { %16840 = vst [vmem:[#allocation57_spill] sm:$0xff] %v14981_v56  ;;  %v4980_v59 = vpop.f32.mrb[213].mxu1  ;;  %v13609_v56 = vld [vmem:[#allocation4 + $0x5c0] ss:$16 sps:$4 sm:$0xff]  }
 0x480   :  { %v14985_v2 = vpop.f32.mrb[214].mxu1 }
 0x481   :  { %16841 = vst [vmem:[#allocation58_spill] sm:$0xff] %v14985_v2  ;;  %v4983_v9 = vpop.f32.mrb[215].mxu1 }
 0x482   :  { %v13496_v9 = vld [vmem:[#allocation4 + $0x22c] ss:$16 sps:$4 sm:$0xff]  }
 0x483   :  { %5226 = vmatmul.mubr.bf16.gmra.mrb[212].mxu1 %v13476_v61  ;;  %v13488_v61 = vld [vmem:[#allocation4 + $0x208] ss:$16 sps:$4 sm:$0xff]  }
 0x484   :  { %5233 = vmatprep.mubr.bf16.mxu1 %v13484_v4  ;;  %v14999_v4 = vpop.f32.mrb[86].mxu0 }
 0x485   :  { %v4103_v10 = vpop.f32.mrb[87].mxu0 }
 0x486   :  { %v14989_v23 = vpop.f32.mrb[216].mxu1 }
 0x487   :  { %16842 = vst [vmem:[#allocation59_spill] sm:$0xff] %v14989_v23  ;;  %v4988_v25 = vpop.f32.mrb[217].mxu1  ;;  %v13506_v23 = vld [vmem:[#allocation4 + $0x268] ss:$16 sps:$4 sm:$0xff]  }
 0x488   :  { %v14993_v32 = vpop.f32.mrb[218].mxu1  ;;  %v15003_v25 = vpop.f32.mrb[88].mxu0 }
 0x489   :  { %16843 = vst [vmem:[#allocation60_spill] sm:$0xff] %v14993_v32  ;;  %v4991_v43 = vpop.f32.mrb[219].mxu1 }
 0x48b   :  { %5234 = vmatmul.mubr.bf16.gmra.mrb[216].mxu1 %v13482_v28  ;;  %v13589_v28 = vld [vmem:[#allocation4 + $0x560] ss:$16 sps:$4 sm:$0xff]  }
 0x48c   :  { %5241 = vmatprep.mubr.bf16.mxu1 %v13490_v37  ;;  %v4108_v37 = vpop.f32.mrb[89].mxu0  ;;  %4401 = vmatmul.mubr.bf16.gmra.mrb[236].mxu0 %v13589_v28 }
 0x48d   :  { %v15007_v50 = vpop.f32.mrb[90].mxu0  ;;  %v13500_v37 = vld [vmem:[#allocation4 + $0x248] ss:$16 sps:$4 sm:$0xff]  }
 0x48e   :  { %v14997_v55 = vpop.f32.mrb[220].mxu1  ;;  %v4111_v10 = vpop.f32.mrb[91].mxu0 }
 0x48f   :  { %16844 = vst [vmem:[#allocation61_spill] sm:$0xff] %v14997_v55  ;;  %v4996_v59 = vpop.f32.mrb[221].mxu1  ;;  %v13595_v55 = vld [vmem:[#allocation4 + $0x580] ss:$16 sps:$4 sm:$0xff]   ;;  %v13508_v10 = vld [vmem:[#allocation4 + $0x26c] ss:$16 sps:$4 sm:$0xff]  }
 0x490   :  { %v15001_v6 = vpop.f32.mrb[222].mxu1  ;;  %v13502_v59 = vld [vmem:[#allocation4 + $0x24c] ss:$16 sps:$4 sm:$0xff]  }
 0x491   :  { %16845 = vst [vmem:[#allocation62_spill] sm:$0xff] %v15001_v6  ;;  %v4999_v17 = vpop.f32.mrb[223].mxu1  ;;  %v15011_v6 = vpop.f32.mrb[92].mxu0 }
 0x493   :  { %5242 = vmatmul.mubr.bf16.gmra.mrb[220].mxu1 %v13488_v61  ;;  %v13593_v61 = vld [vmem:[#allocation4 + $0x584] ss:$16 sps:$4 sm:$0xff]  }
 0x494   :  { %5249 = vmatprep.mubr.bf16.mxu1 %v13496_v9  ;;  %v4116_v9 = vpop.f32.mrb[93].mxu0  ;;  %4408 = vmatprep.mubr.bf16.mxu0 %v13593_v61  ;;  %v13603_v61 = vld [vmem:[#allocation4 + $0x5a0] ss:$16 sps:$4 sm:$0xff]  }
 0x495   :  { %4409 = vmatmul.mubr.bf16.gmra.mrb[240].mxu0 %v13595_v55  ;;  %v15015_v32 = vpop.f32.mrb[94].mxu0 }
 0x496   :  { %v15005_v39 = vpop.f32.mrb[224].mxu1 }
 0x497   :  { %16846 = vst [vmem:[#allocation63_spill] sm:$0xff] %v15005_v39  ;;  %v5004_v43 = vpop.f32.mrb[225].mxu1  ;;  %v13597_v39 = vld [vmem:[#allocation6 + $0x80] sm:$0xff]  }
 0x498   :  { %v15009_v53 = vpop.f32.mrb[226].mxu1  ;;  %v13596_v43 = vld [vmem:[#allocation6 + $0xc0] sm:$0xff]  }
 0x499   :  { %16847 = vst [vmem:[#allocation64_spill] sm:$0xff] %v15009_v53  ;;  %v5007_v17 = vpop.f32.mrb[227].mxu1  ;;  %11751 = vmatprep.subr.bf16.mxu0 %v13596_v43 }
 0x49a   :  { %11752 = vmatpush3.bf16.msra.mxu0 %v13597_v39 }
 0x49b   :  { %5250 = vmatmul.mubr.bf16.gmra.mrb[224].mxu1 %v13494_v46  ;;  %v4119_v46 = vpop.f32.mrb[95].mxu0 }
 0x49c   :  { %5257 = vmatprep.mubr.bf16.mxu1 %v13502_v59  ;;  %v13601_v59 = vld [vmem:[#allocation4 + $0x5a4] ss:$16 sps:$4 sm:$0xff]   ;;  %v15019_v9 = vpop.f32.mrb[96].mxu0  ;;  %v13514_v46 = vld [vmem:[#allocation4 + $0x28c] ss:$16 sps:$4 sm:$0xff]  }
 0x49d   :  { %v4124_v55 = vpop.f32.mrb[97].mxu0  ;;  %4416 = vmatprep.mubr.bf16.mxu0 %v13601_v59 }
 0x49e   :  { %v15013_v21 = vpop.f32.mrb[228].mxu1  ;;  %4417 = vmatmul.mubr.bf16.gmra.mrb[244].mxu0 %v13603_v61  ;;  %v15023_v2 = vpop.f32.mrb[98].mxu0  ;;  %v13512_v61 = vld [vmem:[#allocation4 + $0x288] ss:$16 sps:$4 sm:$0xff]  }
 0x49f   :  { %16848 = vst [vmem:[#allocation65_spill] sm:$0xff] %v15013_v21  ;;  %v5012_v28 = vpop.f32.mrb[229].mxu1  ;;  %v4127_v43 = vpop.f32.mrb[99].mxu0 }
 0x4a0   :  { %v15017_v53 = vpop.f32.mrb[230].mxu1 }
 0x4a1   :  { %16849 = vst [vmem:[#allocation66_spill] sm:$0xff] %v15017_v53  ;;  %v5015_v17 = vpop.f32.mrb[231].mxu1 }
 0x4a2   :  { %v15027_v17 = vpop.f32.mrb[100].mxu0 }
 0x4a3   :  { %5258 = vmatmul.mubr.bf16.gmra.mrb[228].mxu1 %v13500_v37  ;;  %v13607_v37 = vld [vmem:[#allocation4 + $0x5c4] ss:$16 sps:$4 sm:$0xff]  }
 0x4a4   :  { %5265 = vmatprep.mubr.bf16.mxu1 %v13508_v10  ;;  %v4132_v10 = vpop.f32.mrb[101].mxu0  ;;  %4424 = vmatprep.mubr.bf16.mxu0 %v13607_v37 }
 0x4a5   :  { %v15031_v55 = vpop.f32.mrb[102].mxu0  ;;  %v13518_v10 = vld [vmem:[#allocation4 + $0x2a8] ss:$16 sps:$4 sm:$0xff]  }
 0x4a6   :  { %v15021_v28 = vpop.f32.mrb[232].mxu1  ;;  %4425 = vmatmul.mubr.bf16.gmra.mrb[248].mxu0 %v13609_v56  ;;  %v4135_v43 = vpop.f32.mrb[103].mxu0 }
 0x4a7   :  { %16850 = vst [vmem:[#allocation67_spill] sm:$0xff] %v15021_v28  ;;  %v5020_v21 = vpop.f32.mrb[233].mxu1  ;;  %v15035_v42 = vpop.f32.mrb[104].mxu0 }
 0x4a8   :  { %v15025_v53 = vpop.f32.mrb[234].mxu1 }
 0x4a9   :  { %16851 = vst [vmem:[#allocation68_spill] sm:$0xff] %v15025_v53  ;;  %v5023_v39 = vpop.f32.mrb[235].mxu1  ;;  %v13520_v53 = vld [vmem:[#allocation4 + $0x2ac] ss:$16 sps:$4 sm:$0xff]  }
 0x4ab   :  { %5266 = vmatmul.mubr.bf16.gmra.mrb[232].mxu1 %v13506_v23  ;;  %v13613_v23 = vld [vmem:[#allocation4 + $0x5e4] ss:$16 sps:$4 sm:$0xff]  }
 0x4ac   :  { %5273 = vmatprep.mubr.bf16.mxu1 %v13514_v46  ;;  %v4140_v46 = vpop.f32.mrb[105].mxu0  ;;  %4432 = vmatprep.mubr.bf16.mxu0 %v13613_v23 }
 0x4ad   :  { %v13524_v46 = vld [vmem:[#allocation4 + $0x2c8] ss:$16 sps:$4 sm:$0xff]  }
 0x4ae   :  { %v15029_v59 = vpop.f32.mrb[236].mxu1  ;;  %4433 = vmatmul.mubr.bf16.gmra.mrb[252].mxu0 %v13615_v35 }
 0x4af   :  { %16852 = vst [vmem:[#allocation69_spill] sm:$0xff] %v15029_v59  ;;  %v5028_v21 = vpop.f32.mrb[237].mxu1  ;;  %4440 = vmatprep.mubr.bf16.mxu0 %v13621_v20 }
 0x4b0   :  { %v15033_v28 = vpop.f32.mrb[238].mxu1  ;;  %v15039_v21 = vpop.f32.mrb[106].mxu0 }
 0x4b1   :  { %16853 = vst [vmem:[#allocation70_spill] sm:$0xff] %v15033_v28  ;;  %v5031_v39 = vpop.f32.mrb[239].mxu1  ;;  %v13526_v28 = vld [vmem:[#allocation4 + $0x2cc] ss:$16 sps:$4 sm:$0xff]   ;;  %v4143_v43 = vpop.f32.mrb[107].mxu0 }
 0x4b2   :  { %v15043_v13 = vpop.f32.mrb[108].mxu0 }
 0x4b3   :  { %5274 = vmatmul.mubr.bf16.gmra.mrb[236].mxu1 %v13512_v61  ;;  %v13619_v61 = vld [vmem:[#allocation4 + $0x600] ss:$16 sps:$4 sm:$0xff]  }
 0x4b4   :  { %5281 = vmatprep.mubr.bf16.mxu1 %v13520_v53  ;;  %v4148_v53 = vpop.f32.mrb[109].mxu0 }
 0x4b5   :  { %v13530_v53 = vld [vmem:[#allocation4 + $0x2e8] ss:$16 sps:$4 sm:$0xff]  }
 0x4b6   :  { %v15037_v37 = vpop.f32.mrb[240].mxu1  ;;  %4441 = vmatmul.mubr.bf16.gmra.mrb[0].mxu0 %v13619_v61 }
 0x4b7   :  { %16854 = vst [vmem:[#allocation71_spill] sm:$0xff] %v15037_v37  ;;  %v5036_v56 = vpop.f32.mrb[241].mxu1  ;;  %4448 = vmatprep.mubr.bf16.mxu0 %v13627_v63 }
 0x4b8   :  { %v15041_v59 = vpop.f32.mrb[242].mxu1  ;;  %v15047_v56 = vpop.f32.mrb[110].mxu0 }
 0x4b9   :  { %16855 = vst [vmem:[#allocation72_spill] sm:$0xff] %v15041_v59  ;;  %v5039_v39 = vpop.f32.mrb[243].mxu1  ;;  %v13532_v59 = vld [vmem:[#allocation4 + $0x2ec] ss:$16 sps:$4 sm:$0xff]   ;;  %v4151_v43 = vpop.f32.mrb[111].mxu0 }
 0x4ba   :  { %v15051_v58 = vpop.f32.mrb[112].mxu0 }
 0x4bb   :  { %5282 = vmatmul.mubr.bf16.gmra.mrb[240].mxu1 %v13518_v10  ;;  %v13625_v10 = vld [vmem:[#allocation4 + $0x620] ss:$16 sps:$4 sm:$0xff]  }
 0x4bc   :  { %5289 = vmatprep.mubr.bf16.mxu1 %v13526_v28  ;;  %v4156_v28 = vpop.f32.mrb[113].mxu0 }
 0x4bd   :  { %v13536_v28 = vld [vmem:[#allocation4 + $0x308] ss:$16 sps:$4 sm:$0xff]  }
 0x4be   :  { %v15045_v23 = vpop.f32.mrb[244].mxu1  ;;  %4449 = vmatmul.mubr.bf16.gmra.mrb[4].mxu0 %v13625_v10 }
 0x4bf   :  { %16856 = vst [vmem:[#allocation73_spill] sm:$0xff] %v15045_v23  ;;  %v5044_v35 = vpop.f32.mrb[245].mxu1  ;;  %4456 = vmatprep.mubr.bf16.mxu0 %v13633_v48 }
 0x4c0   :  { %v15049_v37 = vpop.f32.mrb[246].mxu1  ;;  %v15055_v35 = vpop.f32.mrb[114].mxu0 }
 0x4c1   :  { %16857 = vst [vmem:[#allocation74_spill] sm:$0xff] %v15049_v37  ;;  %v5047_v39 = vpop.f32.mrb[247].mxu1  ;;  %v13538_v37 = vld [vmem:[#allocation4 + $0x30c] ss:$16 sps:$4 sm:$0xff]   ;;  %v4159_v43 = vpop.f32.mrb[115].mxu0 }
 0x4c2   :  { %v15059_v45 = vpop.f32.mrb[116].mxu0 }
 0x4c3   :  { %5290 = vmatmul.mubr.bf16.gmra.mrb[244].mxu1 %v13524_v46  ;;  %v13631_v46 = vld [vmem:[#allocation4 + $0x640] ss:$16 sps:$4 sm:$0xff]  }
 0x4c4   :  { %5297 = vmatprep.mubr.bf16.mxu1 %v13532_v59  ;;  %v4164_v59 = vpop.f32.mrb[117].mxu0 }
 0x4c5   :  { %v13542_v59 = vld [vmem:[#allocation4 + $0x328] ss:$16 sps:$4 sm:$0xff]  }
 0x4c6   :  { %v15053_v20 = vpop.f32.mrb[248].mxu1  ;;  %4457 = vmatmul.mubr.bf16.gmra.mrb[8].mxu0 %v13631_v46 }
 0x4c7   :  { %16858 = vst [vmem:[#allocation75_spill] sm:$0xff] %v15053_v20  ;;  %v5052_v61 = vpop.f32.mrb[249].mxu1  ;;  %4464 = vmatprep.mubr.bf16.mxu0 %v13639_v38  ;;  %v13647_v38 = vld [vmem:[#allocation6 + $0x88] sm:$0xff]  }
 0x4c8   :  { %v15057_v23 = vpop.f32.mrb[250].mxu1  ;;  %v15063_v61 = vpop.f32.mrb[118].mxu0 }
 0x4c9   :  { %16859 = vst [vmem:[#allocation76_spill] sm:$0xff] %v15057_v23  ;;  %v5055_v39 = vpop.f32.mrb[251].mxu1  ;;  %v13544_v23 = vld [vmem:[#allocation4 + $0x32c] ss:$16 sps:$4 sm:$0xff]   ;;  %v4167_v43 = vpop.f32.mrb[119].mxu0 }
 0x4ca   :  { %v15067_v34 = vpop.f32.mrb[120].mxu0 }
 0x4cb   :  { %5298 = vmatmul.mubr.bf16.gmra.mrb[248].mxu1 %v13530_v53  ;;  %v13637_v53 = vld [vmem:[#allocation4 + $0x660] ss:$16 sps:$4 sm:$0xff]  }
 0x4cc   :  { %5305 = vmatprep.mubr.bf16.mxu1 %v13538_v37  ;;  %v4172_v37 = vpop.f32.mrb[121].mxu0 }
 0x4ce   :  { %v15061_v63 = vpop.f32.mrb[252].mxu1  ;;  %4465 = vmatmul.mubr.bf16.gmra.mrb[12].mxu0 %v13637_v53 }
 0x4cf   :  { %16860 = vst [vmem:[#allocation77_spill] sm:$0xff] %v15061_v63  ;;  %v5060_v10 = vpop.f32.mrb[253].mxu1  ;;  %4472 = vmatprep.mubr.bf16.mxu0 %v13646_v22 }
 0x4d0   :  { %v15065_v20 = vpop.f32.mrb[254].mxu1  ;;  %v15071_v10 = vpop.f32.mrb[122].mxu0 }
 0x4d1   :  { %16861 = vst [vmem:[#allocation78_spill] sm:$0xff] %v15065_v20  ;;  %v5063_v39 = vpop.f32.mrb[255].mxu1  ;;  %v13550_v20 = vld [vmem:[#allocation4 + $0x34c] ss:$16 sps:$4 sm:$0xff]   ;;  %v4175_v43 = vpop.f32.mrb[123].mxu0 }
 0x4d2   :  { %v15075_v15 = vpop.f32.mrb[124].mxu0 }
 0x4d3   :  { %5306 = vmatmul.mubr.bf16.gmra.mrb[252].mxu1 %v13536_v28  ;;  %v13643_v28 = vld [vmem:[#allocation6 + $0xc8] sm:$0xff]  }
 0x4d4   :  { %5313 = vmatprep.mubr.bf16.mxu1 %v13544_v23  ;;  %v4180_v23 = vpop.f32.mrb[125].mxu0  ;;  %11753 = vmatprep.subr.bf16.mxu0 %v13643_v28 }
 0x4d5   :  { %11754 = vmatpush3.bf16.msra.mxu0 %v13647_v38  ;;  %v13554_v23 = vld [vmem:[#allocation4 + $0x368] ss:$16 sps:$4 sm:$0xff]  }
 0x4d6   :  { %v15069_v48 = vpop.f32.mrb[148].mxu1  ;;  %4473 = vmatmul.mubr.bf16.gmra.mrb[16].mxu0 %v13644_v26 }
 0x4d7   :  { %16862 = vst [vmem:[#allocation79_spill] sm:$0xff] %v15069_v48  ;;  %v5068_v46 = vpop.f32.mrb[149].mxu1 }
 0x4d8   :  { %v15073_v63 = vpop.f32.mrb[150].mxu1  ;;  %v13548_v46 = vld [vmem:[#allocation4 + $0x348] ss:$16 sps:$4 sm:$0xff]  }
 0x4d9   :  { %16863 = vst [vmem:[#allocation80_spill] sm:$0xff] %v15073_v63  ;;  %v5071_v39 = vpop.f32.mrb[151].mxu1  ;;  %v15079_v63 = vpop.f32.mrb[126].mxu0 }
 0x4da   :  { %v4183_v39 = vpop.f32.mrb[127].mxu0 }
 0x4db   :  { %5314 = vmatmul.mubr.bf16.gmra.mrb[148].mxu1 %v13542_v59  ;;  %v13556_v59 = vld [vmem:[#allocation4 + $0x36c] ss:$16 sps:$4 sm:$0xff]   ;;  %v15083_v5 = vpop.f32.mrb[128].mxu0 }
 0x4dc   :  { %5321 = vmatprep.mubr.bf16.mxu1 %v13550_v20  ;;  %v13653_v20 = vld [vmem:[#allocation4 + $0x6a4] ss:$16 sps:$4 sm:$0xff]   ;;  %v4188_v22 = vpop.f32.mrb[129].mxu0  ;;  %v13562_v39 = vld [vmem:[#allocation4 + $0x38c] ss:$16 sps:$4 sm:$0xff]  }
 0x4dd   :  { %4480 = vmatprep.mubr.bf16.mxu0 %v13653_v20  ;;  %v13657_v20 = vld [vmem:[#allocation4 + $0x6c0] ss:$16 sps:$4 sm:$0xff]   ;;  %v13659_v22 = vld [vmem:[#allocation4 + $0x6c4] ss:$16 sps:$4 sm:$0xff]  }
 0x4de   :  { %v15077_v53 = vpop.f32.mrb[152].mxu1  ;;  %4481 = vmatmul.mubr.bf16.gmra.mrb[20].mxu0 %v13651_v12 }
 0x4df   :  { %16864 = vst [vmem:[#allocation81_spill] sm:$0xff] %v15077_v53  ;;  %v5076_v37 = vpop.f32.mrb[153].mxu1  ;;  %4488 = vmatprep.mubr.bf16.mxu0 %v13659_v22  ;;  %v13663_v22 = vld [vmem:[#allocation4 + $0x6e0] ss:$16 sps:$4 sm:$0xff]  }
 0x4e0   :  { %v15081_v43 = vpop.f32.mrb[154].mxu1  ;;  %v15088_v37 = vpop.f32.mrb[130].mxu0 }
 0x4e1   :  { %16865 = vst [vmem:[#allocation82_spill] sm:$0xff] %v15081_v43  ;;  %v5079_v48 = vpop.f32.mrb[155].mxu1 }
 0x4e2   :  { %v4191_v48 = vpop.f32.mrb[131].mxu0 }
 0x4e3   :  { %5322 = vmatmul.mubr.bf16.gmra.mrb[152].mxu1 %v13548_v46 }
 0x4e4   :  { %5329 = vmatprep.mubr.bf16.mxu1 %v13556_v59 }
 0x4e6   :  { %v5115_v28 = vpop.f32.mrb[156].mxu1  ;;  %4489 = vmatmul.mubr.bf16.gmra.mrb[24].mxu0 %v13657_v20 }
 0x4e7   :  { %v15086_v38 = vadd.f32 %v5115_v28, %v14955_v54  ;;  %v5117_v26 = vpop.f32.mrb[157].mxu1  ;;  %v15095_v54 = vpop.f32.mrb[132].mxu0 }
 0x4e8   :  { %v5118_v43 = vpop.f32.mrb[158].mxu1  ;;  %v4196_v28 = vpop.f32.mrb[133].mxu0 }
 0x4e9   :  { %v15091_v46 = vadd.f32 %v5118_v43, %v14959_v62  ;;  %v5120_v53 = vpop.f32.mrb[159].mxu1  ;;  %v15100_v62 = vpop.f32.mrb[134].mxu0  ;;  %v13568_v43 = vld [vmem:[#allocation4 + $0x3ac] ss:$16 sps:$4 sm:$0xff]   ;;  %v13665_v28 = vld [vmem:[#allocation4 + $0x6e4] ss:$16 sps:$4 sm:$0xff]  }
 0x4ea   :  { %v4199_v59 = vpop.f32.mrb[135].mxu0  ;;  %4496 = vmatprep.mubr.bf16.mxu0 %v13665_v28  ;;  %v13669_v28 = vld [vmem:[#allocation4 + $0x700] ss:$16 sps:$4 sm:$0xff]  }
 0x4eb   :  { %5330 = vmatmul.mubr.bf16.gmra.mrb[156].mxu1 %v13554_v23 }
 0x4ec   :  { %5337 = vmatprep.mubr.bf16.mxu1 %v13562_v39 }
 0x4ee   :  { %v5123_v12 = vpop.f32.mrb[160].mxu1  ;;  %4497 = vmatmul.mubr.bf16.gmra.mrb[28].mxu0 %v13663_v22 }
 0x4ef   :  { %v15098_v26 = vadd.f32 %v5123_v12, %v14963_v7  ;;  %v5125_v48 = vpop.f32.mrb[161].mxu1  ;;  %v15107_v7 = vpop.f32.mrb[136].mxu0 }
 0x4f0   :  { %v5126_v53 = vpop.f32.mrb[162].mxu1  ;;  %v4204_v12 = vpop.f32.mrb[137].mxu0 }
 0x4f1   :  { %v15103_v23 = vadd.f32 %v5126_v53, %v14967_v18  ;;  %v5128_v60 = vpop.f32.mrb[163].mxu1  ;;  %v15112_v18 = vpop.f32.mrb[138].mxu0  ;;  %v13574_v53 = vld [vmem:[#allocation4 + $0x3cc] ss:$16 sps:$4 sm:$0xff]   ;;  %v13671_v12 = vld [vmem:[#allocation4 + $0x704] ss:$16 sps:$4 sm:$0xff]  }
 0x4f2   :  { %v4207_v39 = vpop.f32.mrb[139].mxu0  ;;  %4504 = vmatprep.mubr.bf16.mxu0 %v13671_v12  ;;  %v13675_v12 = vld [vmem:[#allocation4 + $0x720] ss:$16 sps:$4 sm:$0xff]  }
 0x4f3   :  { %5338 = vmatmul.mubr.bf16.gmra.mrb[160].mxu1 %v13560_v1 }
 0x4f4   :  { %5345 = vmatprep.mubr.bf16.mxu1 %v13568_v43 }
 0x4f6   :  { %v5131_v20 = vpop.f32.mrb[164].mxu1  ;;  %4505 = vmatmul.mubr.bf16.gmra.mrb[32].mxu0 %v13669_v28 }
 0x4f7   :  { %v15110_v48 = vadd.f32 %v5131_v20, %v14971_v30  ;;  %v5133_v59 = vpop.f32.mrb[165].mxu1  ;;  %v15119_v30 = vpop.f32.mrb[140].mxu0 }
 0x4f8   :  { %v5134_v60 = vpop.f32.mrb[166].mxu1  ;;  %v4212_v20 = vpop.f32.mrb[141].mxu0 }
 0x4f9   :  { %16866 = vst [vmem:[#allocation83_spill] sm:$0xff] %v15110_v48  ;;  %v15115_v1 = vadd.f32 %v5134_v60, %v14975_v40  ;;  %v5136_v52 = vpop.f32.mrb[167].mxu1  ;;  %v15124_v40 = vpop.f32.mrb[142].mxu0  ;;  %v13580_v60 = vld [vmem:[#allocation4 + $0x3ec] ss:$16 sps:$4 sm:$0xff]  }
 0x4fa   :  { %v4215_v43 = vpop.f32.mrb[143].mxu0  ;;  %v13677_v20 = vld [vmem:[#allocation4 + $0x724] ss:$16 sps:$4 sm:$0xff]   ;;  %v13719_v48 = vld [vmem:[#allocation4 + $0x68c] ss:$16 sps:$4 sm:$0xff]  }
 0x4fb   :  { %16867 = vst [vmem:[#allocation84_spill] sm:$0xff] %v15115_v1  ;;  %5346 = vmatmul.mubr.bf16.gmra.mrb[164].mxu1 %v13566_v57  ;;  %4512 = vmatprep.mubr.bf16.mxu0 %v13677_v20  ;;  %v13681_v20 = vld [vmem:[#allocation4 + $0x740] ss:$16 sps:$4 sm:$0xff]  }
 0x4fc   :  { %5353 = vmatprep.mubr.bf16.mxu1 %v13574_v53 }
 0x4fe   :  { %v5139_v22 = vpop.f32.mrb[168].mxu1  ;;  %4513 = vmatmul.mubr.bf16.gmra.mrb[36].mxu0 %v13675_v12 }
 0x4ff   :  { %v15122_v59 = vadd.f32 %v5139_v22, %v14979_v51  ;;  %v5141_v39 = vpop.f32.mrb[169].mxu1  ;;  %v15131_v51 = vpop.f32.mrb[144].mxu0 }
 0x500   :  { %v5142_v52 = vpop.f32.mrb[170].mxu1  ;;  %v4220_v22 = vpop.f32.mrb[145].mxu0 }
 0x501   :  { %16868 = vst [vmem:[#allocation85_spill] sm:$0xff] %v15122_v59  ;;  %v15127_v57 = vadd.f32 %v5142_v52, %v14983_v29  ;;  %v5144_v44 = vpop.f32.mrb[171].mxu1  ;;  %v15136_v29 = vpop.f32.mrb[146].mxu0  ;;  %v13586_v52 = vld [vmem:[#allocation4 + $0x40c] ss:$16 sps:$4 sm:$0xff]  }
 0x502   :  { %v4223_v53 = vpop.f32.mrb[147].mxu0  ;;  %v13683_v22 = vld [vmem:[#allocation4 + $0x744] ss:$16 sps:$4 sm:$0xff]   ;;  %v13666_v59 = vld [vmem:[#allocation4 + $0x5a8] ss:$16 sps:$4 sm:$0xff]  }
 0x503   :  { %16869 = vst [vmem:[#allocation86_spill] sm:$0xff] %v15127_v57  ;;  %5354 = vmatmul.mubr.bf16.gmra.mrb[168].mxu1 %v13572_v49  ;;  %4520 = vmatprep.mubr.bf16.mxu0 %v13683_v22  ;;  %v13687_v22 = vld [vmem:[#allocation4 + $0x760] ss:$16 sps:$4 sm:$0xff]  }
 0x504   :  { %5361 = vmatprep.mubr.bf16.mxu1 %v13580_v60 }
 0x506   :  { %v5147_v28 = vpop.f32.mrb[172].mxu1  ;;  %4521 = vmatmul.mubr.bf16.gmra.mrb[40].mxu0 %v13681_v20 }
 0x507   :  { %v15134_v39 = vadd.f32 %v5147_v28, %v14987_v14  ;;  %v5149_v43 = vpop.f32.mrb[173].mxu1  ;;  %v15143_v14 = vpop.f32.mrb[148].mxu0 }
 0x508   :  { %v5150_v44 = vpop.f32.mrb[174].mxu1  ;;  %v4228_v28 = vpop.f32.mrb[149].mxu0 }
 0x509   :  { %16870 = vst [vmem:[#allocation87_spill] sm:$0xff] %v15134_v39  ;;  %v15139_v49 = vadd.f32 %v5150_v44, %v14991_v31  ;;  %v5152_v36 = vpop.f32.mrb[175].mxu1  ;;  %v15148_v31 = vpop.f32.mrb[150].mxu0  ;;  %v13592_v44 = vld [vmem:[#allocation4 + $0x42c] ss:$16 sps:$4 sm:$0xff]  }
 0x50a   :  { %v4231_v60 = vpop.f32.mrb[151].mxu0  ;;  %v13689_v28 = vld [vmem:[#allocation4 + $0x764] ss:$16 sps:$4 sm:$0xff]  }
 0x50b   :  { %16871 = vst [vmem:[#allocation88_spill] sm:$0xff] %v15139_v49  ;;  %5362 = vmatmul.mubr.bf16.gmra.mrb[172].mxu1 %v13578_v41  ;;  %4528 = vmatprep.mubr.bf16.mxu0 %v13689_v28 }
 0x50c   :  { %5369 = vmatprep.mubr.bf16.mxu1 %v13586_v52  ;;  %v13600_v52 = vld [vmem:[#allocation4 + $0x44c] ss:$16 sps:$4 sm:$0xff]  }
 0x50e   :  { %v5155_v12 = vpop.f32.mrb[176].mxu1  ;;  %4529 = vmatmul.mubr.bf16.gmra.mrb[44].mxu0 %v13687_v22 }
 0x50f   :  { %v15146_v43 = vadd.f32 %v5155_v12, %v14995_v47  ;;  %v5157_v53 = vpop.f32.mrb[177].mxu1  ;;  %v15155_v47 = vpop.f32.mrb[152].mxu0  ;;  %v13690_v12 = vld [vmem:[#allocation6 + $0xd0] sm:$0xff]  }
 0x510   :  { %v5158_v36 = vpop.f32.mrb[178].mxu1  ;;  %v4236_v20 = vpop.f32.mrb[153].mxu0  ;;  %v13691_v53 = vld [vmem:[#allocation6 + $0x90] sm:$0xff]   ;;  %11755 = vmatprep.subr.bf16.mxu0 %v13690_v12 }
 0x511   :  { %16872 = vst [vmem:[#allocation89_spill] sm:$0xff] %v15146_v43  ;;  %v15151_v41 = vadd.f32 %v5158_v36, %v14999_v4  ;;  %v5160_v27 = vpop.f32.mrb[179].mxu1  ;;  %v15160_v36 = vpop.f32.mrb[154].mxu0  ;;  %11756 = vmatpush3.bf16.msra.mxu0 %v13691_v53  ;;  %v13696_v20 = vld [vmem:[#allocation6 + $0x98] sm:$0xff]   ;;  %v13699_v12 = vld [vmem:[#allocation4 + $0x784] ss:$16 sps:$4 sm:$0xff]  }
 0x512   :  { %v13590_v27 = vld [vmem:[#allocation4 + $0x428] ss:$16 sps:$4 sm:$0xff]   ;;  %v4239_v16 = vpop.f32.mrb[155].mxu0  ;;  %11757 = vmatprep.subr.bf16.mxu0 %v13695_v19  ;;  %4536 = vmatprep.mubr.bf16.mxu0 %v13699_v12 }
 0x513   :  { %16873 = vst [vmem:[#allocation90_spill] sm:$0xff] %v15151_v41  ;;  %5370 = vmatmul.mubr.bf16.gmra.mrb[176].mxu1 %v13584_v33  ;;  %v15167_v22 = vpop.f32.mrb[156].mxu0  ;;  %v13701_v16 = vld [vmem:[#allocation6 + $0xa0] sm:$0xff]   ;;  %v13628_v43 = vld [vmem:[#allocation4 + $0x4e8] ss:$16 sps:$4 sm:$0xff]  }
 0x514   :  { %5377 = vmatprep.mubr.bf16.mxu1 %v13592_v44  ;;  %v4244_v53 = vpop.f32.mrb[157].mxu0 }
 0x515   :  { %11758 = vmatpush3.bf16.msra.mxu0 %v13696_v20  ;;  %v13706_v53 = vld [vmem:[#allocation6 + $0xa8] sm:$0xff]  }
 0x516   :  { %v5163_v24 = vpop.f32.mrb[180].mxu1 }
 0x517   :  { %v15158_v60 = vadd.f32 %v5163_v24, %v15003_v25  ;;  %v5165_v4 = vpop.f32.mrb[181].mxu1  ;;  %v13697_v25 = vld [vmem:[#allocation4 + $0x780] ss:$16 sps:$4 sm:$0xff]   ;;  %v13606_v24 = vld [vmem:[#allocation4 + $0x46c] ss:$16 sps:$4 sm:$0xff]  }
 0x518   :  { %v5166_v33 = vpop.f32.mrb[182].mxu1  ;;  %v13700_v4 = vld [vmem:[#allocation6 + $0xe0] sm:$0xff]   ;;  %4537 = vmatmul.mubr.bf16.gmra.mrb[48].mxu0 %v13697_v25 }
 0x519   :  { %16874 = vst [vmem:[#allocation91_spill] sm:$0xff] %v15158_v60  ;;  %v15163_v44 = vadd.f32 %v5166_v33, %v15007_v50  ;;  %v5168_v28 = vpop.f32.mrb[183].mxu1  ;;  %11759 = vmatprep.subr.bf16.mxu0 %v13700_v4  ;;  %v13598_v33 = vld [vmem:[#allocation4 + $0x448] ss:$16 sps:$4 sm:$0xff]   ;;  %v13709_v4 = vld [vmem:[#allocation4 + $0x7a4] ss:$16 sps:$4 sm:$0xff]  }
 0x51a   :  { %v15172_v28 = vpop.f32.mrb[158].mxu0  ;;  %11760 = vmatpush3.bf16.msra.mxu0 %v13701_v16  ;;  %4544 = vmatprep.mubr.bf16.mxu0 %v13709_v4  ;;  %v13622_v60 = vld [vmem:[#allocation4 + $0x4c8] ss:$16 sps:$4 sm:$0xff]  }
 0x51b   :  { %16875 = vst [vmem:[#allocation92_spill] sm:$0xff] %v15163_v44  ;;  %5378 = vmatmul.mubr.bf16.gmra.mrb[180].mxu1 %v13590_v27  ;;  %11761 = vmatprep.subr.bf16.mxu0 %v13705_v8 }
 0x51c   :  { %5385 = vmatprep.mubr.bf16.mxu1 %v13600_v52  ;;  %v4247_v52 = vpop.f32.mrb[159].mxu0 }
 0x51d   :  { %v15179_v25 = vpop.f32.mrb[160].mxu0  ;;  %v13711_v52 = vld [vmem:[#allocation6 + $0xb0] sm:$0xff]  }
 0x51e   :  { %v5171_v11 = vpop.f32.mrb[184].mxu1  ;;  %11762 = vmatpush3.bf16.msra.mxu0 %v13706_v53  ;;  %v4252_v16 = vpop.f32.mrb[161].mxu0 }
 0x51f   :  { %v15170_v50 = vadd.f32 %v5171_v11, %v15011_v6  ;;  %v5173_v19 = vpop.f32.mrb[185].mxu1  ;;  %v13707_v6 = vld [vmem:[#allocation4 + $0x7a0] ss:$16 sps:$4 sm:$0xff]   ;;  %v13612_v11 = vld [vmem:[#allocation4 + $0x48c] ss:$16 sps:$4 sm:$0xff]  }
 0x520   :  { %v5174_v27 = vpop.f32.mrb[186].mxu1  ;;  %v13710_v19 = vld [vmem:[#allocation6 + $0xf0] sm:$0xff]   ;;  %4545 = vmatmul.mubr.bf16.gmra.mrb[52].mxu0 %v13707_v6  ;;  %v13716_v16 = vld [vmem:[#allocation6 + $0xb8] sm:$0xff]  }
 0x521   :  { %16876 = vst [vmem:[#allocation93_spill] sm:$0xff] %v15170_v50  ;;  %v15175_v20 = vadd.f32 %v5174_v27, %v15015_v32  ;;  %v5176_v12 = vpop.f32.mrb[187].mxu1  ;;  %11763 = vmatprep.subr.bf16.mxu0 %v13710_v19  ;;  %v13604_v27 = vld [vmem:[#allocation4 + $0x468] ss:$16 sps:$4 sm:$0xff]  }
 0x522   :  { %v15184_v12 = vpop.f32.mrb[162].mxu0  ;;  %11764 = vmatpush3.bf16.msra.mxu0 %v13711_v52  ;;  %v13616_v50 = vld [vmem:[#allocation4 + $0x4a8] ss:$16 sps:$4 sm:$0xff]  }
 0x523   :  { %16877 = vst [vmem:[#allocation94_spill] sm:$0xff] %v15175_v20  ;;  %5386 = vmatmul.mubr.bf16.gmra.mrb[184].mxu1 %v13598_v33  ;;  %11765 = vmatprep.subr.bf16.mxu0 %v13715_v0 }
 0x524   :  { %5393 = vmatprep.mubr.bf16.mxu1 %v13606_v24  ;;  %v4255_v24 = vpop.f32.mrb[163].mxu0 }
 0x525   :  { %v13610_v24 = vld [vmem:[#allocation4 + $0x488] ss:$16 sps:$4 sm:$0xff]  }
 0x526   :  { %v5179_v3 = vpop.f32.mrb[188].mxu1  ;;  %11766 = vmatpush3.bf16.msra.mxu0 %v13716_v16 }
 0x527   :  { %v15182_v32 = vadd.f32 %v5179_v3, %v15019_v9  ;;  %v5181_v8 = vpop.f32.mrb[189].mxu1  ;;  %v15191_v9 = vpop.f32.mrb[164].mxu0 }
 0x528   :  { %v5182_v33 = vpop.f32.mrb[190].mxu1  ;;  %v4260_v19 = vpop.f32.mrb[165].mxu0 }
 0x529   :  { %v15187_v53 = vadd.f32 %v5182_v33, %v15023_v2  ;;  %v5184_v4 = vpop.f32.mrb[191].mxu1  ;;  %v15196_v2 = vpop.f32.mrb[166].mxu0 }
 0x52a   :  { %v13618_v4 = vld [vmem:[#allocation4 + $0x4ac] ss:$16 sps:$4 sm:$0xff]   ;;  %v4263_v0 = vpop.f32.mrb[167].mxu0 }
 0x52b   :  { %5394 = vmatmul.mubr.bf16.gmra.mrb[188].mxu1 %v13604_v27  ;;  %v15203_v16 = vpop.f32.mrb[168].mxu0 }
 0x52c   :  { %5401 = vmatprep.mubr.bf16.mxu1 %v13612_v11 }
 0x52e   :  { %v5187_v6 = vpop.f32.mrb[192].mxu1 }
 0x52f   :  { %v15194_v52 = vadd.f32 %v5187_v6, %v15027_v17  ;;  %v5189_v8 = vpop.f32.mrb[193].mxu1  ;;  %v4268_v6 = vpop.f32.mrb[169].mxu0 }
 0x530   :  { %v5190_v33 = vpop.f32.mrb[194].mxu1  ;;  %v15208_v20 = vpop.f32.mrb[170].mxu0 }
 0x531   :  { %v15199_v27 = vadd.f32 %v5190_v33, %v15031_v55  ;;  %v5192_v3 = vpop.f32.mrb[195].mxu1  ;;  %v13624_v55 = vld [vmem:[#allocation4 + $0x4cc] ss:$16 sps:$4 sm:$0xff]   ;;  %v4271_v33 = vpop.f32.mrb[171].mxu0 }
 0x532   :  { %v15215_v6 = vpop.f32.mrb[172].mxu0 }
 0x533   :  { %5402 = vmatmul.mubr.bf16.gmra.mrb[192].mxu1 %v13610_v24 }
 0x534   :  { %5409 = vmatprep.mubr.bf16.mxu1 %v13618_v4 }
 0x536   :  { %v5195_v17 = vpop.f32.mrb[196].mxu1 }
 0x537   :  { %v15206_v19 = vadd.f32 %v5195_v17, %v15035_v42  ;;  %v5197_v8 = vpop.f32.mrb[197].mxu1  ;;  %v4276_v17 = vpop.f32.mrb[173].mxu0 }
 0x538   :  { %v5198_v0 = vpop.f32.mrb[198].mxu1  ;;  %v15220_v44 = vpop.f32.mrb[174].mxu0 }
 0x539   :  { %v15211_v3 = vadd.f32 %v5198_v0, %v15039_v21  ;;  %v5200_v24 = vpop.f32.mrb[199].mxu1  ;;  %v13630_v21 = vld [vmem:[#allocation4 + $0x4ec] ss:$16 sps:$4 sm:$0xff]   ;;  %v4279_v0 = vpop.f32.mrb[175].mxu0 }
 0x53a   :  { %v15227_v17 = vpop.f32.mrb[176].mxu0 }
 0x53b   :  { %5410 = vmatmul.mubr.bf16.gmra.mrb[196].mxu1 %v13616_v50 }
 0x53c   :  { %5417 = vmatprep.mubr.bf16.mxu1 %v13624_v55 }
 0x53e   :  { %v5203_v42 = vpop.f32.mrb[200].mxu1 }
 0x53f   :  { %v15218_v8 = vadd.f32 %v5203_v42, %v15043_v13  ;;  %v5205_v11 = vpop.f32.mrb[201].mxu1  ;;  %v4284_v42 = vpop.f32.mrb[177].mxu0 }
 0x540   :  { %v5206_v33 = vpop.f32.mrb[202].mxu1  ;;  %v15232_v41 = vpop.f32.mrb[178].mxu0  ;;  %v13729_v42 = vld [vmem:[#allocation6 + $0x40] sm:$0xff]  }
 0x541   :  { %16878 = vst [vmem:[#allocation95_spill] sm:$0xff] %v15218_v8  ;;  %v15223_v50 = vadd.f32 %v5206_v33, %v15047_v56  ;;  %v5208_v24 = vpop.f32.mrb[203].mxu1  ;;  %v13636_v56 = vld [vmem:[#allocation4 + $0x50c] ss:$16 sps:$4 sm:$0xff]   ;;  %v4287_v33 = vpop.f32.mrb[179].mxu0  ;;  %11815 = vmatprep.subr.bf16.mxu0 %v13729_v42 }
 0x542   :  { %v15239_v55 = vpop.f32.mrb[180].mxu0  ;;  %v13634_v33 = vld [vmem:[#allocation4 + $0x508] ss:$16 sps:$4 sm:$0xff]  }
 0x543   :  { %16879 = vst [vmem:[#allocation96_spill] sm:$0xff] %v15223_v50  ;;  %5418 = vmatmul.mubr.bf16.gmra.mrb[200].mxu1 %v13622_v60  ;;  %v13672_v8 = vld [vmem:[#allocation4 + $0x5c8] ss:$16 sps:$4 sm:$0xff]  }
 0x544   :  { %5425 = vmatprep.mubr.bf16.mxu1 %v13630_v21 }
 0x546   :  { %v5211_v13 = vpop.f32.mrb[204].mxu1 }
 0x547   :  { %v15230_v11 = vadd.f32 %v5211_v13, %v15051_v58  ;;  %v5213_v4 = vpop.f32.mrb[205].mxu1 }
 0x548   :  { %v5214_v0 = vpop.f32.mrb[206].mxu1  ;;  %v4292_v4 = vpop.f32.mrb[181].mxu0 }
 0x549   :  { %16880 = vst [vmem:[#allocation97_spill] sm:$0xff] %v15230_v11  ;;  %v15235_v60 = vadd.f32 %v5214_v0, %v15055_v35  ;;  %v5216_v24 = vpop.f32.mrb[207].mxu1  ;;  %v15244_v49 = vpop.f32.mrb[182].mxu0  ;;  %v13642_v0 = vld [vmem:[#allocation4 + $0x52c] ss:$16 sps:$4 sm:$0xff]  }
 0x54a   :  { %v13640_v11 = vld [vmem:[#allocation4 + $0x528] ss:$16 sps:$4 sm:$0xff]  }
 0x54b   :  { %16881 = vst [vmem:[#allocation98_spill] sm:$0xff] %v15235_v60  ;;  %5426 = vmatmul.mubr.bf16.gmra.mrb[204].mxu1 %v13628_v43  ;;  %v4295_v43 = vpop.f32.mrb[183].mxu0 }
 0x54c   :  { %5433 = vmatprep.mubr.bf16.mxu1 %v13636_v56  ;;  %v15251_v42 = vpop.f32.mrb[184].mxu0 }
 0x54e   :  { %v5219_v58 = vpop.f32.mrb[208].mxu1 }
 0x54f   :  { %v15242_v13 = vadd.f32 %v5219_v58, %v15059_v45  ;;  %v5221_v39 = vpop.f32.mrb[209].mxu1  ;;  %v4300_v58 = vpop.f32.mrb[185].mxu0 }
 0x550   :  { %v5222_v35 = vpop.f32.mrb[210].mxu1  ;;  %v15256_v60 = vpop.f32.mrb[186].mxu0 }
 0x551   :  { %16882 = vst [vmem:[#allocation99_spill] sm:$0xff] %v15242_v13  ;;  %v15247_v24 = vadd.f32 %v5222_v35, %v15063_v61  ;;  %v5224_v56 = vpop.f32.mrb[211].mxu1  ;;  %v13650_v61 = vld [vmem:[#allocation4 + $0x54c] ss:$16 sps:$4 sm:$0xff]   ;;  %v4303_v35 = vpop.f32.mrb[187].mxu0 }
 0x552   :  { %v15263_v58 = vpop.f32.mrb[188].mxu0  ;;  %v13648_v13 = vld [vmem:[#allocation4 + $0x548] ss:$16 sps:$4 sm:$0xff]  }
 0x553   :  { %16883 = vst [vmem:[#allocation100_spill] sm:$0xff] %v15247_v24  ;;  %5434 = vmatmul.mubr.bf16.gmra.mrb[208].mxu1 %v13634_v33 }
 0x554   :  { %5441 = vmatprep.mubr.bf16.mxu1 %v13642_v0 }
 0x556   :  { %v5227_v45 = vpop.f32.mrb[212].mxu1 }
 0x557   :  { %v15254_v39 = vadd.f32 %v5227_v45, %v15067_v34  ;;  %v5229_v4 = vpop.f32.mrb[213].mxu1  ;;  %v4308_v45 = vpop.f32.mrb[189].mxu0 }
 0x558   :  { %v5230_v43 = vpop.f32.mrb[214].mxu1  ;;  %v15268_v24 = vpop.f32.mrb[190].mxu0 }
 0x559   :  { %16884 = vst [vmem:[#allocation101_spill] sm:$0xff] %v15254_v39  ;;  %v15259_v33 = vadd.f32 %v5230_v43, %v15071_v10  ;;  %v5232_v56 = vpop.f32.mrb[215].mxu1  ;;  %v13656_v10 = vld [vmem:[#allocation4 + $0x56c] ss:$16 sps:$4 sm:$0xff]   ;;  %v4311_v43 = vpop.f32.mrb[191].mxu0 }
 0x55a   :  { %v15275_v45 = vpop.f32.mrb[192].mxu0  ;;  %v13654_v39 = vld [vmem:[#allocation4 + $0x568] ss:$16 sps:$4 sm:$0xff]  }
 0x55b   :  { %16885 = vst [vmem:[#allocation102_spill] sm:$0xff] %v15259_v33  ;;  %5442 = vmatmul.mubr.bf16.gmra.mrb[212].mxu1 %v13640_v11 }
 0x55c   :  { %5449 = vmatprep.mubr.bf16.mxu1 %v13650_v61 }
 0x55e   :  { %v5235_v34 = vpop.f32.mrb[216].mxu1 }
 0x55f   :  { %v15266_v4 = vadd.f32 %v5235_v34, %v15075_v15  ;;  %v5237_v21 = vpop.f32.mrb[217].mxu1  ;;  %v4316_v34 = vpop.f32.mrb[193].mxu0 }
 0x560   :  { %v5238_v35 = vpop.f32.mrb[218].mxu1  ;;  %v15280_v33 = vpop.f32.mrb[194].mxu0 }
 0x561   :  { %16886 = vst [vmem:[#allocation103_spill] sm:$0xff] %v15266_v4  ;;  %v15271_v11 = vadd.f32 %v5238_v35, %v15079_v63  ;;  %v5240_v56 = vpop.f32.mrb[219].mxu1  ;;  %v13662_v63 = vld [vmem:[#allocation4 + $0x58c] ss:$16 sps:$4 sm:$0xff]   ;;  %v4319_v35 = vpop.f32.mrb[195].mxu0 }
 0x562   :  { %v15287_v61 = vpop.f32.mrb[196].mxu0  ;;  %v13660_v4 = vld [vmem:[#allocation4 + $0x588] ss:$16 sps:$4 sm:$0xff]  }
 0x563   :  { %16887 = vst [vmem:[#allocation104_spill] sm:$0xff] %v15271_v11  ;;  %5450 = vmatmul.mubr.bf16.gmra.mrb[216].mxu1 %v13648_v13 }
 0x564   :  { %5457 = vmatprep.mubr.bf16.mxu1 %v13656_v10 }
 0x566   :  { %v5243_v15 = vpop.f32.mrb[220].mxu1 }
 0x567   :  { %v15278_v21 = vadd.f32 %v5243_v15, %v15083_v5  ;;  %v5245_v0 = vpop.f32.mrb[221].mxu1  ;;  %v4324_v5 = vpop.f32.mrb[197].mxu0 }
 0x568   :  { %v5246_v43 = vpop.f32.mrb[222].mxu1  ;;  %v15292_v11 = vpop.f32.mrb[198].mxu0 }
 0x569   :  { %v15283_v13 = vadd.f32 %v5246_v43, %v15088_v37  ;;  %v5248_v56 = vpop.f32.mrb[223].mxu1  ;;  %v13668_v37 = vld [vmem:[#allocation4 + $0x5ac] ss:$16 sps:$4 sm:$0xff]   ;;  %v4327_v43 = vpop.f32.mrb[199].mxu0 }
 0x56b   :  { %5458 = vmatmul.mubr.bf16.gmra.mrb[220].mxu1 %v13654_v39 }
 0x56c   :  { %5465 = vmatprep.mubr.bf16.mxu1 %v13662_v63  ;;  %v15299_v63 = vpop.f32.mrb[200].mxu0 }
 0x56e   :  { %v5251_v15 = vpop.f32.mrb[224].mxu1 }
 0x56f   :  { %v15290_v0 = vadd.f32 %v5251_v15, %v15095_v54  ;;  %v5253_v34 = vpop.f32.mrb[225].mxu1  ;;  %v4332_v54 = vpop.f32.mrb[201].mxu0 }
 0x570   :  { %v5254_v35 = vpop.f32.mrb[226].mxu1  ;;  %v15304_v57 = vpop.f32.mrb[202].mxu0 }
 0x571   :  { %v15295_v56 = vadd.f32 %v5254_v35, %v15100_v62  ;;  %v5256_v10 = vpop.f32.mrb[227].mxu1  ;;  %v13674_v62 = vld [vmem:[#allocation4 + $0x5cc] ss:$16 sps:$4 sm:$0xff]   ;;  %v4335_v35 = vpop.f32.mrb[203].mxu0 }
 0x573   :  { %5466 = vmatmul.mubr.bf16.gmra.mrb[224].mxu1 %v13660_v4 }
 0x574   :  { %5473 = vmatprep.mubr.bf16.mxu1 %v13668_v37  ;;  %v15311_v37 = vpop.f32.mrb[204].mxu0 }
 0x575   :  { %16888 = vst [vmem:[#allocation105_spill] sm:$0xff] %v15311_v37 }
 0x576   :  { %v5259_v5 = vpop.f32.mrb[228].mxu1 }
 0x577   :  { %v15302_v15 = vadd.f32 %v5259_v5, %v15107_v7  ;;  %v5261_v34 = vpop.f32.mrb[229].mxu1  ;;  %v4340_v7 = vpop.f32.mrb[205].mxu0 }
 0x578   :  { %v5262_v43 = vpop.f32.mrb[230].mxu1  ;;  %v15316_v50 = vpop.f32.mrb[206].mxu0 }
 0x579   :  { %v15307_v10 = vadd.f32 %v5262_v43, %v15112_v18  ;;  %v5264_v39 = vpop.f32.mrb[231].mxu1  ;;  %16889 = vst [vmem:[#allocation106_spill] sm:$0xff] %v15316_v50  ;;  %v13680_v18 = vld [vmem:[#allocation4 + $0x5ec] ss:$16 sps:$4 sm:$0xff]   ;;  %v4343_v43 = vpop.f32.mrb[207].mxu0 }
 0x57a   :  { %v13678_v50 = vld [vmem:[#allocation4 + $0x5e8] ss:$16 sps:$4 sm:$0xff]  }
 0x57b   :  { %5474 = vmatmul.mubr.bf16.gmra.mrb[228].mxu1 %v13666_v59 }
 0x57c   :  { %5481 = vmatprep.mubr.bf16.mxu1 %v13674_v62  ;;  %v15323_v62 = vpop.f32.mrb[208].mxu0 }
 0x57d   :  { %16890 = vst [vmem:[#allocation107_spill] sm:$0xff] %v15323_v62 }
 0x57e   :  { %v5267_v54 = vpop.f32.mrb[232].mxu1 }
 0x57f   :  { %v15314_v5 = vadd.f32 %v5267_v54, %v15119_v30  ;;  %v5269_v34 = vpop.f32.mrb[233].mxu1  ;;  %v4348_v30 = vpop.f32.mrb[209].mxu0 }
 0x580   :  { %v5270_v35 = vpop.f32.mrb[234].mxu1  ;;  %v15328_v37 = vpop.f32.mrb[210].mxu0 }
 0x581   :  { %v15319_v39 = vadd.f32 %v5270_v35, %v15124_v40  ;;  %v5272_v4 = vpop.f32.mrb[235].mxu1  ;;  %16891 = vst [vmem:[#allocation108_spill] sm:$0xff] %v15328_v37  ;;  %v13686_v40 = vld [vmem:[#allocation4 + $0x60c] ss:$16 sps:$4 sm:$0xff]   ;;  %v4351_v35 = vpop.f32.mrb[211].mxu0 }
 0x582   :  { %v13684_v37 = vld [vmem:[#allocation4 + $0x608] ss:$16 sps:$4 sm:$0xff]  }
 0x583   :  { %5482 = vmatmul.mubr.bf16.gmra.mrb[232].mxu1 %v13672_v8 }
 0x584   :  { %5489 = vmatprep.mubr.bf16.mxu1 %v13680_v18  ;;  %v15335_v18 = vpop.f32.mrb[212].mxu0 }
 0x585   :  { %16892 = vst [vmem:[#allocation109_spill] sm:$0xff] %v15335_v18 }
 0x586   :  { %v5275_v7 = vpop.f32.mrb[236].mxu1 }
 0x587   :  { %v15326_v54 = vadd.f32 %v5275_v7, %v15131_v51  ;;  %v5277_v34 = vpop.f32.mrb[237].mxu1  ;;  %v4356_v51 = vpop.f32.mrb[213].mxu0 }
 0x588   :  { %v5278_v43 = vpop.f32.mrb[238].mxu1  ;;  %v15340_v62 = vpop.f32.mrb[214].mxu0 }
 0x589   :  { %v15331_v4 = vadd.f32 %v5278_v43, %v15136_v29  ;;  %v5280_v59 = vpop.f32.mrb[239].mxu1  ;;  %16893 = vst [vmem:[#allocation110_spill] sm:$0xff] %v15340_v62  ;;  %v13694_v29 = vld [vmem:[#allocation4 + $0x62c] ss:$16 sps:$4 sm:$0xff]   ;;  %v4359_v43 = vpop.f32.mrb[215].mxu0 }
 0x58a   :  { %v13692_v62 = vld [vmem:[#allocation4 + $0x628] ss:$16 sps:$4 sm:$0xff]  }
 0x58b   :  { %5490 = vmatmul.mubr.bf16.gmra.mrb[236].mxu1 %v13678_v50 }
 0x58c   :  { %5497 = vmatprep.mubr.bf16.mxu1 %v13686_v40  ;;  %v15347_v40 = vpop.f32.mrb[216].mxu0 }
 0x58d   :  { %16894 = vst [vmem:[#allocation111_spill] sm:$0xff] %v15347_v40 }
 0x58e   :  { %v5283_v30 = vpop.f32.mrb[240].mxu1 }
 0x58f   :  { %v15338_v7 = vadd.f32 %v5283_v30, %v15143_v14  ;;  %v5285_v34 = vpop.f32.mrb[241].mxu1  ;;  %v4364_v14 = vpop.f32.mrb[217].mxu0 }
 0x590   :  { %v5286_v35 = vpop.f32.mrb[242].mxu1  ;;  %v15352_v18 = vpop.f32.mrb[218].mxu0 }
 0x591   :  { %v15343_v59 = vadd.f32 %v5286_v35, %v15148_v31  ;;  %v5288_v8 = vpop.f32.mrb[243].mxu1  ;;  %16895 = vst [vmem:[#allocation112_spill] sm:$0xff] %v15352_v18  ;;  %v13704_v31 = vld [vmem:[#allocation4 + $0x64c] ss:$16 sps:$4 sm:$0xff]   ;;  %v4367_v35 = vpop.f32.mrb[219].mxu0 }
 0x592   :  { %v13702_v18 = vld [vmem:[#allocation4 + $0x648] ss:$16 sps:$4 sm:$0xff]  }
 0x593   :  { %5498 = vmatmul.mubr.bf16.gmra.mrb[240].mxu1 %v13684_v37 }
 0x594   :  { %5505 = vmatprep.mubr.bf16.mxu1 %v13694_v29  ;;  %v15359_v29 = vpop.f32.mrb[220].mxu0 }
 0x595   :  { %16896 = vst [vmem:[#allocation113_spill] sm:$0xff] %v15359_v29 }
 0x596   :  { %v5291_v51 = vpop.f32.mrb[244].mxu1 }
 0x597   :  { %v15350_v30 = vadd.f32 %v5291_v51, %v15155_v47  ;;  %v5293_v34 = vpop.f32.mrb[245].mxu1  ;;  %v4372_v47 = vpop.f32.mrb[221].mxu0 }
 0x598   :  { %v5294_v43 = vpop.f32.mrb[246].mxu1  ;;  %v15364_v40 = vpop.f32.mrb[222].mxu0 }
 0x599   :  { %v15355_v8 = vadd.f32 %v5294_v43, %v15160_v36  ;;  %v5296_v50 = vpop.f32.mrb[247].mxu1  ;;  %16897 = vst [vmem:[#allocation114_spill] sm:$0xff] %v15364_v40  ;;  %v13714_v36 = vld [vmem:[#allocation4 + $0x66c] ss:$16 sps:$4 sm:$0xff]   ;;  %v4375_v43 = vpop.f32.mrb[223].mxu0 }
 0x59a   :  { %v13712_v40 = vld [vmem:[#allocation4 + $0x668] ss:$16 sps:$4 sm:$0xff]  }
 0x59b   :  { %5506 = vmatmul.mubr.bf16.gmra.mrb[244].mxu1 %v13692_v62 }
 0x59c   :  { %5513 = vmatprep.mubr.bf16.mxu1 %v13704_v31  ;;  %v15371_v31 = vpop.f32.mrb[224].mxu0 }
 0x59e   :  { %v5299_v14 = vpop.f32.mrb[248].mxu1 }
 0x59f   :  { %v15362_v51 = vadd.f32 %v5299_v14, %v15167_v22  ;;  %v5301_v34 = vpop.f32.mrb[249].mxu1  ;;  %v4380_v22 = vpop.f32.mrb[225].mxu0 }
 0x5a0   :  { %v5302_v35 = vpop.f32.mrb[250].mxu1  ;;  %v15374_v29 = vpop.f32.mrb[226].mxu0 }
 0x5a1   :  { %v15367_v50 = vadd.f32 %v5302_v35, %v15172_v28  ;;  %v5304_v37 = vpop.f32.mrb[251].mxu1  ;;  %16898 = vst [vmem:[#allocation115_spill] sm:$0xff] %v15374_v29  ;;  %v4383_v28 = vpop.f32.mrb[227].mxu0  ;;  %v13717_v29 = vld [vmem:[#allocation4 + $0x688] ss:$16 sps:$4 sm:$0xff]  }
 0x5a2   :  { %v15377_v1 = vpop.f32.mrb[228].mxu0 }
 0x5a3   :  { %5514 = vmatmul.mubr.bf16.gmra.mrb[248].mxu1 %v13702_v18  ;;  %v13730_v18 = vld [vmem:[#allocation6] sm:$0xff]   ;;  %v4388_v22 = vpop.f32.mrb[229].mxu0 }
 0x5a4   :  { %5521 = vmatprep.mubr.bf16.mxu1 %v13714_v36  ;;  %v13734_v36 = vld [vmem:[#allocation6 + $0x48] sm:$0xff]  }
 0x5a6   :  { %v5307_v47 = vpop.f32.mrb[252].mxu1 }
 0x5a7   :  { %v5308_v14 = vadd.f32 %v5307_v47, %v15179_v25  ;;  %v5309_v34 = vpop.f32.mrb[253].mxu1  ;;  %v16899_v47 = vpack.c.bf16 %v15283_v13, %v15278_v21 }
 0x5a8   :  { %v5310_v43 = vpop.f32.mrb[254].mxu1 }
 0x5a9   :  { %v5311_v37 = vadd.f32 %v5310_v43, %v15184_v12  ;;  %v5312_v35 = vpop.f32.mrb[255].mxu1  ;;  %v13735_v12 = vld [vmem:[#allocation6 + $0x8] sm:$0xff]  }
 0x5aa   :  { %v13722_v43 = vld [vmem:[#allocation4 + $0x6ac] ss:$16 sps:$4 sm:$0xff]  }
 0x5ab   :  { %5522 = vmatmul.mubr.bf16.gmra.mrb[252].mxu1 %v13712_v40  ;;  %v6162_v62 = vpack.c.bf16 %v5311_v37, %v5308_v14  ;;  %v15383_v40 = vpop.f32.mrb[230].mxu0 }
 0x5ac   :  { %5529 = vmatprep.mubr.bf16.mxu1 %v13719_v48  ;;  %v13736_v48 = vld [vmem:[#allocation6 + $0x50] sm:$0xff]   ;;  %v4391_v37 = vpop.f32.mrb[231].mxu0 }
 0x5ad   :  { %6459 = vmatprep.mubr.bf16.mxu0 %v6162_v62  ;;  %v15386_v22 = vpop.f32.mrb[232].mxu0  ;;  %v13742_v37 = vld [vmem:[#allocation6 + $0x18] sm:$0xff]  }
 0x5ae   :  { %v5315_v25 = vpop.f32.mrb[148].mxu1  ;;  %6460 = vmatmul.mubr.bf16.vlgmr.msra.gmra.mrb[56].mxu0 %v16899_v47  ;;  %v4396_v21 = vpop.f32.mrb[233].mxu0 }
 0x5af   :  { %v5316_v34 = vadd.f32 %v5315_v25, %v15191_v9  ;;  %v5317_v28 = vpop.f32.mrb[149].mxu1  ;;  %11816 = vmatpush3.bf16.msra.mxu0 %v13730_v18  ;;  %v13737_v9 = vld [vmem:[#allocation6 + $0x10] sm:$0xff]   ;;  %v15388_v25 = vpop.f32.mrb[234].mxu0  ;;  %v13741_v18 = vld [vmem:[#allocation6 + $0x58] sm:$0xff]  }
 0x5b0   :  { %v5318_v14 = vpop.f32.mrb[150].mxu1  ;;  %11817 = vmatprep.subr.bf16.mxu0 %v13734_v36  ;;  %v4399_v47 = vpop.f32.mrb[235].mxu0 }
 0x5b1   :  { %v5319_v62 = vadd.f32 %v5318_v14, %v15196_v2  ;;  %v5320_v35 = vpop.f32.mrb[151].mxu1  ;;  %v15390_v36 = vpop.f32.mrb[236].mxu0  ;;  %v16901_v2 = vpack.c.bf16 %v15295_v56, %v15290_v0 }
 0x5b2   :  { %16900 = vst [vmem:[#allocation116_spill] sm:$0xff] %v15390_v36  ;;  %v4404_v14 = vpop.f32.mrb[237].mxu0  ;;  %v13743_v35 = vld [vmem:[#allocation6 + $0x60] sm:$0xff]  }
 0x5b3   :  { %5530 = vmatmul.mubr.bf16.gmra.mrb[148].mxu1 %v13717_v29  ;;  %v6163_v13 = vpack.c.bf16 %v5319_v62, %v5316_v34  ;;  %11818 = vmatpush3.bf16.msra.mxu0 %v13735_v12  ;;  %v13720_v12 = vld [vmem:[#allocation4 + $0x6a8] ss:$16 sps:$4 sm:$0xff]   ;;  %v15396_v62 = vpop.f32.mrb[238].mxu0 }
 0x5b4   :  { %5537 = vmatprep.mubr.bf16.mxu1 %v13722_v43  ;;  %11819 = vmatprep.subr.bf16.mxu0 %v13736_v48  ;;  %v13725_v48 = vld [vmem:[#allocation4 + $0x6cc] ss:$16 sps:$4 sm:$0xff]   ;;  %v4407_v21 = vpop.f32.mrb[239].mxu0 }
 0x5b5   :  { %6467 = vmatprep.mubr.bf16.mxu0 %v6163_v13  ;;  %v15399_v36 = vpop.f32.mrb[240].mxu0 }
 0x5b6   :  { %v5323_v28 = vpop.f32.mrb[152].mxu1  ;;  %6468 = vmatmul.mubr.bf16.gmra.mrb[60].mxu0 %v16901_v2  ;;  %v4412_v0 = vpop.f32.mrb[241].mxu0 }
 0x5b7   :  { %v5324_v29 = vadd.f32 %v5323_v28, %v15203_v16  ;;  %v5325_v34 = vpop.f32.mrb[153].mxu1  ;;  %11820 = vmatpush3.bf16.msra.mxu0 %v13737_v9  ;;  %v13744_v16 = vld [vmem:[#allocation6 + $0x20] sm:$0xff]   ;;  %v15401_v28 = vpop.f32.mrb[242].mxu0  ;;  %v13748_v9 = vld [vmem:[#allocation6 + $0x68] sm:$0xff]  }
 0x5b8   :  { %v5326_v43 = vpop.f32.mrb[154].mxu1  ;;  %11821 = vmatprep.subr.bf16.mxu0 %v13741_v18  ;;  %v4415_v2 = vpop.f32.mrb[243].mxu0 }
 0x5b9   :  { %v5327_v13 = vadd.f32 %v5326_v43, %v15208_v20  ;;  %v5328_v47 = vpop.f32.mrb[155].mxu1  ;;  %v15403_v18 = vpop.f32.mrb[244].mxu0  ;;  %v16902_v20 = vpack.c.bf16 %v15307_v10, %v15302_v15  ;;  %v13749_v43 = vld [vmem:[#allocation6 + $0x28] sm:$0xff]  }
 0x5ba   :  { %v4420_v34 = vpop.f32.mrb[245].mxu0 }
 0x5bb   :  { %5538 = vmatmul.mubr.bf16.gmra.mrb[152].mxu1 %v13720_v12  ;;  %v6164_v56 = vpack.c.bf16 %v5327_v13, %v5324_v29  ;;  %11822 = vmatpush3.bf16.msra.mxu0 %v13742_v37  ;;  %v13723_v37 = vld [vmem:[#allocation4 + $0x6c8] ss:$16 sps:$4 sm:$0xff]   ;;  %v15409_v21 = vpop.f32.mrb[246].mxu0  ;;  %v13750_v13 = vld [vmem:[#allocation6 + $0x70] sm:$0xff]  }
 0x5bc   :  { %5545 = vmatprep.mubr.bf16.mxu1 %v13725_v48  ;;  %11823 = vmatprep.subr.bf16.mxu0 %v13743_v35  ;;  %v13728_v35 = vld [vmem:[#allocation4 + $0x6ec] ss:$16 sps:$4 sm:$0xff]   ;;  %v4423_v47 = vpop.f32.mrb[247].mxu0 }
 0x5bd   :  { %6475 = vmatprep.mubr.bf16.mxu0 %v6164_v56  ;;  %v15412_v2 = vpop.f32.mrb[248].mxu0 }
 0x5be   :  { %v5331_v14 = vpop.f32.mrb[156].mxu1  ;;  %6476 = vmatmul.mubr.bf16.gmra.mrb[64].mxu0 %v16902_v20  ;;  %v4428_v15 = vpop.f32.mrb[249].mxu0 }
 0x5bf   :  { %v5332_v12 = vadd.f32 %v5331_v14, %v15215_v6  ;;  %v5333_v29 = vpop.f32.mrb[157].mxu1  ;;  %11824 = vmatpush3.bf16.msra.mxu0 %v13744_v16  ;;  %v13751_v6 = vld [vmem:[#allocation6 + $0x30] sm:$0xff]   ;;  %v15414_v14 = vpop.f32.mrb[250].mxu0  ;;  %v13755_v16 = vld [vmem:[#allocation6 + $0x78] sm:$0xff]  }
 0x5c0   :  { %v5334_v48 = vpop.f32.mrb[158].mxu1  ;;  %11825 = vmatprep.subr.bf16.mxu0 %v13748_v9  ;;  %v4431_v20 = vpop.f32.mrb[251].mxu0 }
 0x5c1   :  { %v5335_v0 = vadd.f32 %v5334_v48, %v15220_v44  ;;  %v5336_v56 = vpop.f32.mrb[159].mxu1  ;;  %v15416_v9 = vpop.f32.mrb[252].mxu0  ;;  %v16903_v44 = vpack.c.bf16 %v15319_v39, %v15314_v5  ;;  %v13756_v48 = vld [vmem:[#allocation6 + $0x38] sm:$0xff]  }
 0x5c2   :  { %v4436_v29 = vpop.f32.mrb[253].mxu0 }
 0x5c3   :  { %5546 = vmatmul.mubr.bf16.gmra.mrb[156].mxu1 %v13723_v37  ;;  %v6165_v10 = vpack.c.bf16 %v5335_v0, %v5332_v12  ;;  %11826 = vmatpush3.bf16.msra.mxu0 %v13749_v43  ;;  %v13726_v43 = vld [vmem:[#allocation4 + $0x6e8] ss:$16 sps:$4 sm:$0xff]   ;;  %v15422_v47 = vpop.f32.mrb[254].mxu0  ;;  %v13769_v0 = vld [vmem:[#allocation6 + $0x140] sm:$0xff]  }
 0x5c4   :  { %5553 = vmatprep.mubr.bf16.mxu1 %v13728_v35  ;;  %11827 = vmatprep.subr.bf16.mxu0 %v13750_v13  ;;  %v13733_v13 = vld [vmem:[#allocation4 + $0x70c] ss:$16 sps:$4 sm:$0xff]   ;;  %v4439_v56 = vpop.f32.mrb[255].mxu0 }
 0x5c5   :  { %6483 = vmatprep.mubr.bf16.mxu0 %v6165_v10  ;;  %v15425_v20 = vpop.f32.mrb[0].mxu0 }
 0x5c6   :  { %v5339_v34 = vpop.f32.mrb[160].mxu1  ;;  %6484 = vmatmul.mubr.bf16.gmra.mrb[68].mxu0 %v16903_v44  ;;  %v4444_v5 = vpop.f32.mrb[1].mxu0  ;;  %v16904_v44 = vpack.c.bf16 %v15331_v4, %v15326_v54 }
 0x5c7   :  { %v5340_v37 = vadd.f32 %v5339_v34, %v15227_v17  ;;  %v5341_v12 = vpop.f32.mrb[161].mxu1  ;;  %11828 = vmatpush3.bf16.msra.mxu0 %v13751_v6  ;;  %v15427_v17 = vpop.f32.mrb[2].mxu0 }
 0x5c8   :  { %v5342_v35 = vpop.f32.mrb[162].mxu1  ;;  %11829 = vmatprep.subr.bf16.mxu0 %v13755_v16  ;;  %v4447_v6 = vpop.f32.mrb[3].mxu0 }
 0x5c9   :  { %v5343_v15 = vadd.f32 %v5342_v35, %v15232_v41  ;;  %v5344_v10 = vpop.f32.mrb[163].mxu1  ;;  %v15429_v34 = vpop.f32.mrb[4].mxu0  ;;  %v13740_v35 = vld [vmem:[#allocation4 + $0x72c] ss:$16 sps:$4 sm:$0xff]   ;;  %v16905_v6 = vpack.c.bf16 %v15343_v59, %v15338_v7 }
 0x5ca   :  { %v4452_v41 = vpop.f32.mrb[5].mxu0 }
 0x5cb   :  { %5554 = vmatmul.mubr.bf16.gmra.mrb[160].mxu1 %v13726_v43  ;;  %v6166_v39 = vpack.c.bf16 %v5343_v15, %v5340_v37  ;;  %11830 = vmatpush3.bf16.msra.mxu0 %v13756_v48  ;;  %v13731_v43 = vld [vmem:[#allocation4 + $0x708] ss:$16 sps:$4 sm:$0xff]   ;;  %v15435_v37 = vpop.f32.mrb[6].mxu0 }
 0x5cc   :  { %5561 = vmatprep.mubr.bf16.mxu1 %v13733_v13  ;;  %11879 = vmatprep.subr.bf16.mxu0 %v13769_v0  ;;  %v4455_v13 = vpop.f32.mrb[7].mxu0  ;;  %v13738_v41 = vld [vmem:[#allocation4 + $0x728] ss:$16 sps:$4 sm:$0xff]  }
 0x5cd   :  { %6491 = vmatprep.mubr.bf16.mxu0 %v6166_v39  ;;  %v15438_v15 = vpop.f32.mrb[8].mxu0 }
 0x5ce   :  { %v5347_v16 = vpop.f32.mrb[164].mxu1  ;;  %6492 = vmatmul.mubr.bf16.gmra.mrb[72].mxu0 %v16904_v44  ;;  %v4460_v10 = vpop.f32.mrb[9].mxu0 }
 0x5cf   :  { %v5348_v29 = vadd.f32 %v5347_v16, %v15239_v55  ;;  %v5349_v12 = vpop.f32.mrb[165].mxu1  ;;  %v15440_v54 = vpop.f32.mrb[10].mxu0 }
 0x5d0   :  { %v5350_v48 = vpop.f32.mrb[166].mxu1  ;;  %v4463_v4 = vpop.f32.mrb[11].mxu0 }
 0x5d1   :  { %v5351_v0 = vadd.f32 %v5350_v48, %v15244_v49  ;;  %v5352_v56 = vpop.f32.mrb[167].mxu1  ;;  %v15442_v55 = vpop.f32.mrb[12].mxu0  ;;  %v16906_v4 = vpack.c.bf16 %v15355_v8, %v15350_v30 }
 0x5d2   :  { %v4468_v16 = vpop.f32.mrb[13].mxu0 }
 0x5d3   :  { %5562 = vmatmul.mubr.bf16.gmra.mrb[164].mxu1 %v13731_v43  ;;  %v6167_v5 = vpack.c.bf16 %v5351_v0, %v5348_v29  ;;  %v15448_v12 = vpop.f32.mrb[14].mxu0  ;;  %v13747_v43 = vld [vmem:[#allocation4 + $0x74c] ss:$16 sps:$4 sm:$0xff]   ;;  %v13745_v16 = vld [vmem:[#allocation4 + $0x748] ss:$16 sps:$4 sm:$0xff]  }
 0x5d4   :  { %5569 = vmatprep.mubr.bf16.mxu1 %v13740_v35  ;;  %v4471_v48 = vpop.f32.mrb[15].mxu0 }
 0x5d5   :  { %6499 = vmatprep.mubr.bf16.mxu0 %v6167_v5  ;;  %v15451_v0 = vpop.f32.mrb[16].mxu0 }
 0x5d6   :  { %v5355_v39 = vpop.f32.mrb[168].mxu1  ;;  %6500 = vmatmul.mubr.bf16.gmra.mrb[76].mxu0 %v16905_v6  ;;  %v4476_v56 = vpop.f32.mrb[17].mxu0 }
 0x5d7   :  { %v5356_v49 = vadd.f32 %v5355_v39, %v15251_v42  ;;  %v5357_v44 = vpop.f32.mrb[169].mxu1  ;;  %v15453_v7 = vpop.f32.mrb[18].mxu0 }
 0x5d8   :  { %v5358_v29 = vpop.f32.mrb[170].mxu1  ;;  %v4479_v59 = vpop.f32.mrb[19].mxu0 }
 0x5d9   :  { %v5359_v35 = vadd.f32 %v5358_v29, %v15256_v60  ;;  %v5360_v13 = vpop.f32.mrb[171].mxu1  ;;  %v15455_v42 = vpop.f32.mrb[20].mxu0  ;;  %v16907_v59 = vpack.c.bf16 %v15367_v50, %v15362_v51 }
 0x5da   :  { %v4484_v39 = vpop.f32.mrb[21].mxu0 }
 0x5db   :  { %5570 = vmatmul.mubr.bf16.gmra.mrb[168].mxu1 %v13738_v41  ;;  %v6168_v10 = vpack.c.bf16 %v5359_v35, %v5356_v49  ;;  %v15461_v44 = vpop.f32.mrb[22].mxu0  ;;  %v13754_v41 = vld [vmem:[#allocation4 + $0x76c] ss:$16 sps:$4 sm:$0xff]   ;;  %v16908_v39 = vpack.c.bf16 %v15187_v53, %v15182_v32 }
 0x5dc   :  { %5577 = vmatprep.mubr.bf16.mxu1 %v13747_v43  ;;  %v4487_v29 = vpop.f32.mrb[23].mxu0  ;;  %v13773_v53 = vld [vmem:[#allocation6 + $0x148] sm:$0xff]  }
 0x5dd   :  { %6507 = vmatprep.mubr.bf16.mxu0 %v6168_v10  ;;  %v15464_v35 = vpop.f32.mrb[24].mxu0 }
 0x5de   :  { %v5363_v5 = vpop.f32.mrb[172].mxu1  ;;  %6508 = vmatmul.mubr.bf16.gmra.mrb[80].mxu0 %v16906_v4  ;;  %v4492_v13 = vpop.f32.mrb[25].mxu0 }
 0x5df   :  { %v5364_v60 = vadd.f32 %v5363_v5, %v15263_v58  ;;  %v5365_v6 = vpop.f32.mrb[173].mxu1  ;;  %v15466_v30 = vpop.f32.mrb[26].mxu0 }
 0x5e0   :  { %v5366_v49 = vpop.f32.mrb[174].mxu1  ;;  %v4495_v8 = vpop.f32.mrb[27].mxu0 }
 0x5e1   :  { %v5367_v43 = vadd.f32 %v5366_v49, %v15268_v24  ;;  %v5368_v48 = vpop.f32.mrb[175].mxu1  ;;  %v15468_v58 = vpop.f32.mrb[28].mxu0  ;;  %v13759_v49 = vld [vmem:[#allocation4 + $0x78c] ss:$16 sps:$4 sm:$0xff]  }
 0x5e2   :  { %v4500_v5 = vpop.f32.mrb[29].mxu0  ;;  %v13770_v48 = vld [vmem:[#allocation6 + $0x100] sm:$0xff]  }
 0x5e3   :  { %5578 = vmatmul.mubr.bf16.gmra.mrb[172].mxu1 %v13745_v16  ;;  %v6169_v56 = vpack.c.bf16 %v5367_v43, %v5364_v60  ;;  %v13752_v60 = vld [vmem:[#allocation4 + $0x768] ss:$16 sps:$4 sm:$0xff]   ;;  %v15479_v6 = vpop.f32.mrb[30].mxu0 }
 0x5e4   :  { %5585 = vmatprep.mubr.bf16.mxu1 %v13754_v41  ;;  %v4503_v41 = vpop.f32.mrb[31].mxu0 }
 0x5e5   :  { %6515 = vmatprep.mubr.bf16.mxu0 %v6169_v56  ;;  %v15484_v50 = vpop.f32.mrb[32].mxu0  ;;  %v13762_v41 = vld [vmem:[#allocation4 + $0x7ac] ss:$16 sps:$4 sm:$0xff]  }
 0x5e6   :  { %v5371_v10 = vpop.f32.mrb[176].mxu1  ;;  %6516 = vmatmul.mubr.bf16.gmra.mrb[84].mxu0 %v16907_v59  ;;  %v4508_v43 = vpop.f32.mrb[33].mxu0 }
 0x5e7   :  { %v15474_v24 = vadd.f32 %v5371_v10, %v15275_v45  ;;  %v5373_v4 = vpop.f32.mrb[177].mxu1  ;;  %6652 = vmatprep.mubr.bf16.mxu0 %v16908_v39  ;;  %v15488_v32 = vpop.f32.mrb[34].mxu0  ;;  %v13757_v39 = vld [vmem:[#allocation4 + $0x788] ss:$16 sps:$4 sm:$0xff]  }
 0x5e8   :  { %v5374_v16 = vpop.f32.mrb[178].mxu1  ;;  %16909 = vst [vmem:[#allocation117_spill] sm:$0xff] %v15488_v32  ;;  %v4511_v13 = vpop.f32.mrb[35].mxu0  ;;  %v16912_v4 = vpack.c.bf16 %v15199_v27, %v15194_v52  ;;  %v13777_v27 = vld [vmem:[#allocation6 + $0x110] sm:$0xff]   ;;  %v13834_v32 = vld [vmem:[#allocation6 + $0x180] sm:$0xff]  }
 0x5e9   :  { %v15482_v29 = vadd.f32 %v5374_v16, %v15280_v33  ;;  %v5376_v51 = vpop.f32.mrb[179].mxu1  ;;  %v15490_v56 = vpop.f32.mrb[36].mxu0  ;;  %v16911_v33 = vpack.c.bf16 %v15091_v46, %v15086_v38 }
 0x5ea   :  { %16910 = vst [vmem:[#allocation118_spill] sm:$0xff] %v15490_v56  ;;  %v4516_v10 = vpop.f32.mrb[37].mxu0  ;;  %v13776_v51 = vld [vmem:[#allocation6 + $0x150] sm:$0xff]   ;;  %v16967_v56 = vld [vmem:[#allocation115_spill] sm:$0xff] }
 0x5eb   :  { %5586 = vmatmul.mubr.bf16.gmra.mrb[176].mxu1 %v13752_v60  ;;  %v13775_v60 = vld [vmem:[#allocation6 + $0x108] sm:$0xff]   ;;  %v15501_v16 = vpop.f32.mrb[38].mxu0  ;;  %v16917_v10 = vpack.c.bf16 %v15103_v23, %v15098_v26 }
 0x5ec   :  { %5593 = vmatprep.mubr.bf16.mxu1 %v13759_v49  ;;  %16913 = vst [vmem:[#allocation119_spill] sm:$0xff] %v15501_v16  ;;  %v4519_v38 = vpop.f32.mrb[39].mxu0  ;;  %v16963_v16 = vld [vmem:[#allocation114_spill] sm:$0xff] }
 0x5ed   :  { %v15506_v43 = vpop.f32.mrb[40].mxu0 }
 0x5ee   :  { %v5379_v8 = vpop.f32.mrb[180].mxu1  ;;  %6653 = vmatmul.mubr.bf16.vlgmr.msra.gmra.mrb[88].mxu0 %v16911_v33  ;;  %16914 = vst [vmem:[#allocation120_spill] sm:$0xff] %v15506_v43  ;;  %v4524_v13 = vpop.f32.mrb[41].mxu0 }
 0x5ef   :  { %v15496_v59 = vadd.f32 %v5379_v8, %v15287_v61  ;;  %v5381_v5 = vpop.f32.mrb[181].mxu1  ;;  %6660 = vmatprep.mubr.bf16.mxu0 %v16912_v4  ;;  %11880 = vmatpush3.bf16.msra.mxu0 %v13770_v48  ;;  %v15510_v48 = vpop.f32.mrb[42].mxu0  ;;  %v13783_v13 = vld [vmem:[#allocation6 + $0x160] sm:$0xff]  }
 0x5f0   :  { %v5382_v49 = vpop.f32.mrb[182].mxu1  ;;  %11881 = vmatprep.subr.bf16.mxu0 %v13773_v53  ;;  %16915 = vst [vmem:[#allocation121_spill] sm:$0xff] %v15510_v48  ;;  %v13780_v53 = vld [vmem:[#allocation6 + $0x158] sm:$0xff]   ;;  %v4527_v8 = vpop.f32.mrb[43].mxu0  ;;  %v16955_v48 = vld [vmem:[#allocation112_spill] sm:$0xff] }
 0x5f1   :  { %v15504_v46 = vadd.f32 %v5382_v49, %v15292_v11  ;;  %v5384_v61 = vpop.f32.mrb[183].mxu1  ;;  %v15512_v33 = vpop.f32.mrb[44].mxu0  ;;  %v13760_v49 = vld [vmem:[#allocation4 + $0x7a8] ss:$16 sps:$4 sm:$0xff]  }
 0x5f2   :  { %16916 = vst [vmem:[#allocation122_spill] sm:$0xff] %v15512_v33  ;;  %v4532_v5 = vpop.f32.mrb[45].mxu0  ;;  %v13763_v61 = vld [vmem:[#allocation4 + $0x7cc] ss:$16 sps:$4 sm:$0xff]  }
 0x5f3   :  { %5594 = vmatmul.mubr.bf16.gmra.mrb[180].mxu1 %v13757_v39  ;;  %11882 = vmatpush3.bf16.msra.mxu0 %v13775_v60  ;;  %v16918_v60 = vpack.c.bf16 %v15211_v3, %v15206_v19  ;;  %v13784_v3 = vld [vmem:[#allocation6 + $0x120] sm:$0xff]   ;;  %v16928_v19 = vld [vmem:[#allocation95_spill] sm:$0xff] }
 0x5f4   :  { %5601 = vmatprep.mubr.bf16.mxu1 %v13762_v41  ;;  %11883 = vmatprep.subr.bf16.mxu0 %v13776_v51  ;;  %v13782_v41 = vld [vmem:[#allocation6 + $0x118] sm:$0xff]   ;;  %v15523_v51 = vpop.f32.mrb[46].mxu0 }
 0x5f5   :  { %16919 = vst [vmem:[#allocation123_spill] sm:$0xff] %v15523_v51  ;;  %v4535_v26 = vpop.f32.mrb[47].mxu0 }
 0x5f6   :  { %v5387_v11 = vpop.f32.mrb[184].mxu1  ;;  %6661 = vmatmul.mubr.bf16.gmra.mrb[92].mxu0 %v16917_v10  ;;  %v15528_v8 = vpop.f32.mrb[48].mxu0 }
 0x5f7   :  { %v15518_v4 = vadd.f32 %v5387_v11, %v15299_v63  ;;  %v5389_v39 = vpop.f32.mrb[185].mxu1  ;;  %6668 = vmatprep.mubr.bf16.mxu0 %v16918_v60  ;;  %11884 = vmatpush3.bf16.msra.mxu0 %v13777_v27  ;;  %16920 = vst [vmem:[#allocation124_spill] sm:$0xff] %v15528_v8  ;;  %v4540_v11 = vpop.f32.mrb[49].mxu0  ;;  %v16924_v60 = vld [vmem:[#allocation83_spill] sm:$0xff] }
 0x5f8   :  { %v5390_v38 = vpop.f32.mrb[186].mxu1  ;;  %11885 = vmatprep.subr.bf16.mxu0 %v13780_v53  ;;  %v15532_v27 = vpop.f32.mrb[50].mxu0  ;;  %v13787_v53 = vld [vmem:[#allocation6 + $0x168] sm:$0xff]   ;;  %v16923_v39 = vld [vmem:[#allocation84_spill] sm:$0xff] }
 0x5f9   :  { %v15526_v23 = vadd.f32 %v5390_v38, %v15304_v57  ;;  %v5392_v63 = vpop.f32.mrb[187].mxu1  ;;  %16921 = vst [vmem:[#allocation125_spill] sm:$0xff] %v15532_v27  ;;  %v4543_v10 = vpop.f32.mrb[51].mxu0  ;;  %v16925_v38 = vpack.c.bf16 %v16923_v39, %v16924_v60  ;;  %v13790_v27 = vld [vmem:[#allocation6 + $0x170] sm:$0xff]   ;;  %v16931_v60 = vld [vmem:[#allocation106_spill] sm:$0xff] }
 0x5fa   :  { %v15534_v5 = vpop.f32.mrb[52].mxu0  ;;  %v16926_v63 = vld [vmem:[#allocation105_spill] sm:$0xff] }
 0x5fb   :  { %5602 = vmatmul.mubr.bf16.gmra.mrb[184].mxu1 %v13760_v49  ;;  %11886 = vmatpush3.bf16.msra.mxu0 %v13782_v41  ;;  %16922 = vst [vmem:[#allocation126_spill] sm:$0xff] %v15534_v5  ;;  %v4548_v26 = vpop.f32.mrb[53].mxu0  ;;  %v16927_v41 = vld [vmem:[#allocation96_spill] sm:$0xff]  ;;  %v13766_v5 = vld [vmem:[#allocation4 + $0x7ec] ss:$16 sps:$4 sm:$0xff]  }
 0x5fc   :  { %5609 = vmatprep.mubr.bf16.mxu1 %v13763_v61  ;;  %11887 = vmatprep.subr.bf16.mxu0 %v13783_v13  ;;  %v16929_v52 = vpack.c.bf16 %v16927_v41, %v16928_v19  ;;  %v13765_v61 = vld [vmem:[#allocation4 + $0x7c8] ss:$16 sps:$4 sm:$0xff]   ;;  %v15545_v10 = vpop.f32.mrb[54].mxu0 }
 0x5fd   :  { %v13789_v13 = vld [vmem:[#allocation6 + $0x128] sm:$0xff]   ;;  %16930 = vst [vmem:[#allocation84_spill] sm:$0xff] %v15545_v10  ;;  %v4551_v39 = vpop.f32.mrb[55].mxu0  ;;  %v13794_v19 = vld [vmem:[#allocation6 + $0x178] sm:$0xff]  }
 0x5fe   :  { %v5395_v57 = vpop.f32.mrb[188].mxu1  ;;  %6669 = vmatmul.mubr.bf16.gmra.mrb[96].mxu0 %v16925_v38  ;;  %v13768_v26 = vld [vmem:[#allocation4 + $0x7e8] ss:$16 sps:$4 sm:$0xff]  }
 0x5ff   :  { %v15540_v11 = vadd.f32 %v5395_v57, %v16926_v63  ;;  %v5397_v49 = vpop.f32.mrb[189].mxu1  ;;  %6676 = vmatprep.mubr.bf16.mxu0 %v16929_v52  ;;  %11888 = vmatpush3.bf16.msra.mxu0 %v13784_v3  ;;  %v13791_v52 = vld [vmem:[#allocation6 + $0x130] sm:$0xff]   ;;  %v16932_v63 = vld [vmem:[#allocation86_spill] sm:$0xff] }
 0x600   :  { %v5398_v45 = vpop.f32.mrb[190].mxu1  ;;  %11889 = vmatprep.subr.bf16.mxu0 %v13787_v53  ;;  %v16933_v49 = vld [vmem:[#allocation85_spill] sm:$0xff]  ;;  %v16935_v53 = vld [vmem:[#allocation107_spill] sm:$0xff] }
 0x601   :  { %v15548_v38 = vadd.f32 %v5398_v45, %v16931_v60  ;;  %v5400_v57 = vpop.f32.mrb[191].mxu1  ;;  %v16934_v41 = vpack.c.bf16 %v16932_v63, %v16933_v49  ;;  %v16936_v60 = vld [vmem:[#allocation98_spill] sm:$0xff] }
 0x602   :  { %v16937_v57 = vld [vmem:[#allocation97_spill] sm:$0xff] }
 0x603   :  { %5610 = vmatmul.mubr.bf16.gmra.mrb[0].mxu1 %v13765_v61  ;;  %11890 = vmatpush3.bf16.msra.mxu0 %v13789_v13  ;;  %v16938_v10 = vpack.c.bf16 %v16936_v60, %v16937_v57  ;;  %v13796_v61 = vld [vmem:[#allocation6 + $0x138] sm:$0xff]   ;;  %v16944_v60 = vld [vmem:[#allocation100_spill] sm:$0xff]  ;;  %v16945_v57 = vld [vmem:[#allocation99_spill] sm:$0xff] }
 0x604   :  { %5617 = vmatprep.mubr.bf16.mxu1 %v13766_v5  ;;  %11891 = vmatprep.subr.bf16.mxu0 %v13790_v27  ;;  %v13771_v5 = vld [vmem:[#allocation4 + $0x80c] ss:$16 sps:$4 sm:$0xff]   ;;  %v16939_v27 = vld [vmem:[#allocation108_spill] sm:$0xff] }
 0x606   :  { %v5403_v3 = vpop.f32.mrb[192].mxu1  ;;  %6677 = vmatmul.mubr.bf16.gmra.mrb[100].mxu0 %v16934_v41  ;;  %v16940_v41 = vld [vmem:[#allocation88_spill] sm:$0xff] }
 0x607   :  { %v15556_v39 = vadd.f32 %v5403_v3, %v16935_v53  ;;  %v5405_v45 = vpop.f32.mrb[193].mxu1  ;;  %6684 = vmatprep.mubr.bf16.mxu0 %v16938_v10  ;;  %11892 = vmatpush3.bf16.msra.mxu0 %v13791_v52  ;;  %v13833_v3 = vld [vmem:[#allocation6 + $0x1c0] sm:$0xff]   ;;  %v16941_v10 = vld [vmem:[#allocation87_spill] sm:$0xff]  ;;  %v16943_v52 = vld [vmem:[#allocation109_spill] sm:$0xff] }
 0x608   :  { %v5406_v13 = vpop.f32.mrb[194].mxu1  ;;  %11893 = vmatprep.subr.bf16.mxu0 %v13794_v19  ;;  %v16942_v53 = vpack.c.bf16 %v16940_v41, %v16941_v10  ;;  %v16949_v10 = vld [vmem:[#allocation89_spill] sm:$0xff] }
 0x609   :  { %v15562_v8 = vadd.f32 %v5406_v13, %v16939_v27  ;;  %v5408_v51 = vpop.f32.mrb[195].mxu1  ;;  %v13774_v13 = vld [vmem:[#allocation4 + $0x808] ss:$16 sps:$4 sm:$0xff]  }
 0x60a   :  { %v16946_v51 = vpack.c.bf16 %v16944_v60, %v16945_v57  ;;  %v16952_v57 = vld [vmem:[#allocation102_spill] sm:$0xff] }
 0x60b   :  { %5618 = vmatmul.mubr.bf16.gmra.mrb[4].mxu1 %v13768_v26  ;;  %11894 = vmatpush3.bf16.msra.mxu0 %v13796_v61  ;;  %v13778_v26 = vld [vmem:[#allocation4 + $0x82c] ss:$16 sps:$4 sm:$0xff]   ;;  %v16947_v61 = vld [vmem:[#allocation110_spill] sm:$0xff] }
 0x60c   :  { %5625 = vmatprep.mubr.bf16.mxu1 %v13771_v5  ;;  %11943 = vmatprep.subr.bf16.mxu0 %v13833_v3 }
 0x60e   :  { %v5411_v49 = vpop.f32.mrb[196].mxu1  ;;  %6685 = vmatmul.mubr.bf16.gmra.mrb[104].mxu0 %v16942_v53 }
 0x60f   :  { %v15570_v45 = vadd.f32 %v5411_v49, %v16943_v52  ;;  %v5413_v19 = vpop.f32.mrb[197].mxu1  ;;  %6692 = vmatprep.mubr.bf16.mxu0 %v16946_v51  ;;  %v16948_v49 = vld [vmem:[#allocation90_spill] sm:$0xff]  ;;  %v16951_v52 = vld [vmem:[#allocation111_spill] sm:$0xff]  ;;  %v16953_v51 = vld [vmem:[#allocation101_spill] sm:$0xff] }
 0x610   :  { %v5414_v27 = vpop.f32.mrb[198].mxu1  ;;  %v16950_v53 = vpack.c.bf16 %v16948_v49, %v16949_v10  ;;  %v16954_v33 = vpack.c.bf16 %v16952_v57, %v16953_v51  ;;  %v16957_v10 = vld [vmem:[#allocation91_spill] sm:$0xff]  ;;  %v16960_v57 = vld [vmem:[#allocation104_spill] sm:$0xff] }
 0x611   :  { %v15576_v5 = vadd.f32 %v5414_v27, %v16947_v61  ;;  %v5416_v63 = vpop.f32.mrb[199].mxu1  ;;  %v13781_v27 = vld [vmem:[#allocation4 + $0x828] ss:$16 sps:$4 sm:$0xff]   ;;  %v13785_v61 = vld [vmem:[#allocation4 + $0x84c] ss:$16 sps:$4 sm:$0xff]  }
 0x612   :  { %v16961_v51 = vld [vmem:[#allocation103_spill] sm:$0xff] }
 0x613   :  { %5626 = vmatmul.mubr.bf16.gmra.mrb[8].mxu1 %v13774_v13  ;;  %v16962_v43 = vpack.c.bf16 %v16960_v57, %v16961_v51  ;;  %v13797_v51 = vld [vmem:[#allocation4 + $0x88c] ss:$16 sps:$4 sm:$0xff]  }
 0x614   :  { %5633 = vmatprep.mubr.bf16.mxu1 %v13778_v26 }
 0x616   :  { %v5419_v3 = vpop.f32.mrb[200].mxu1  ;;  %6693 = vmatmul.mubr.bf16.gmra.mrb[108].mxu0 %v16950_v53 }
 0x617   :  { %v15584_v19 = vadd.f32 %v5419_v3, %v16951_v52  ;;  %v5421_v60 = vpop.f32.mrb[201].mxu1  ;;  %6700 = vmatprep.mubr.bf16.mxu0 %v16954_v33  ;;  %v16956_v3 = vld [vmem:[#allocation92_spill] sm:$0xff]  ;;  %v16959_v52 = vld [vmem:[#allocation113_spill] sm:$0xff] }
 0x618   :  { %v5422_v63 = vpop.f32.mrb[202].mxu1  ;;  %v16958_v53 = vpack.c.bf16 %v16956_v3, %v16957_v10  ;;  %v16965_v10 = vld [vmem:[#allocation93_spill] sm:$0xff] }
 0x619   :  { %v15590_v41 = vadd.f32 %v5422_v63, %v16955_v48  ;;  %v5424_v13 = vpop.f32.mrb[203].mxu1  ;;  %v13788_v48 = vld [vmem:[#allocation4 + $0x848] ss:$16 sps:$4 sm:$0xff]  }
 0x61a   :  { %v13792_v13 = vld [vmem:[#allocation4 + $0x86c] ss:$16 sps:$4 sm:$0xff]  }
 0x61b   :  { %5634 = vmatmul.mubr.bf16.gmra.mrb[12].mxu1 %v13781_v27 }
 0x61c   :  { %5641 = vmatprep.mubr.bf16.mxu1 %v13785_v61 }
 0x61e   :  { %v5427_v49 = vpop.f32.mrb[204].mxu1  ;;  %6701 = vmatmul.mubr.bf16.gmra.mrb[112].mxu0 %v16958_v53 }
 0x61f   :  { %v15598_v60 = vadd.f32 %v5427_v49, %v16959_v52  ;;  %v5429_v33 = vpop.f32.mrb[205].mxu1  ;;  %6708 = vmatprep.mubr.bf16.mxu0 %v16962_v43  ;;  %v16964_v49 = vld [vmem:[#allocation94_spill] sm:$0xff] }
 0x620   :  { %v5430_v63 = vpop.f32.mrb[206].mxu1  ;;  %v16966_v53 = vpack.c.bf16 %v16964_v49, %v16965_v10  ;;  %v13795_v33 = vld [vmem:[#allocation4 + $0x868] ss:$16 sps:$4 sm:$0xff]   ;;  %v16968_v49 = vpack.c.bf16 %v15482_v29, %v15474_v24  ;;  %v16969_v29 = vpack.c.bf16 %v15504_v46, %v15496_v59  ;;  %v16970_v46 = vpack.c.bf16 %v15526_v23, %v15518_v4 }
 0x621   :  { %v15604_v26 = vadd.f32 %v5430_v63, %v16963_v16  ;;  %v5432_v27 = vpop.f32.mrb[207].mxu1  ;;  %v13799_v10 = vld [vmem:[#allocation4 + $0x888] ss:$16 sps:$4 sm:$0xff]  }
 0x622   :  { %v13844_v24 = vld [vmem:[#allocation6 + $0x1d8] sm:$0xff]   ;;  %v13851_v59 = vld [vmem:[#allocation6 + $0x1e8] sm:$0xff]  }
 0x623   :  { %v6177_v61 = vpack.c.bf16 %v15604_v26, %v15598_v60  ;;  %5642 = vmatmul.mubr.bf16.gmra.mrb[16].mxu1 %v13788_v48  ;;  %v13837_v48 = vld [vmem:[#allocation6 + $0x1c8] sm:$0xff]   ;;  %v13858_v4 = vld [vmem:[#allocation6 + $0x1f8] sm:$0xff]  }
 0x624   :  { %5649 = vmatprep.mubr.bf16.mxu1 %v13792_v13 }
 0x626   :  { %v5435_v3 = vpop.f32.mrb[208].mxu1  ;;  %6709 = vmatmul.mubr.bf16.gmra.mrb[116].mxu0 %v16966_v53  ;;  %v13839_v53 = vld [vmem:[#allocation6 + $0x188] sm:$0xff]  }
 0x627   :  { %v5436_v52 = vadd.f32 %v5435_v3, %v15371_v31  ;;  %v5437_v43 = vpop.f32.mrb[209].mxu1 }
 0x628   :  { %v5438_v57 = vpop.f32.mrb[210].mxu1 }
 0x629   :  { %v5439_v16 = vadd.f32 %v5438_v57, %v16967_v56  ;;  %v5440_v63 = vpop.f32.mrb[211].mxu1  ;;  %v13800_v56 = vld [vmem:[#allocation4 + $0x8ac] ss:$16 sps:$4 sm:$0xff]  }
 0x62b   :  { %5650 = vmatmul.mubr.bf16.gmra.mrb[20].mxu1 %v13795_v33  ;;  %v6178_v27 = vpack.c.bf16 %v5439_v16, %v5436_v52  ;;  %v13840_v33 = vld [vmem:[#allocation6 + $0x1d0] sm:$0xff]  }
 0x62c   :  { %5657 = vmatprep.mubr.bf16.mxu1 %v13797_v51  ;;  %v13841_v16 = vld [vmem:[#allocation6 + $0x190] sm:$0xff]  }
 0x62d   :  { %6878 = vmatprep.mubr.bf16.mxu0 %v6178_v27  ;;  %v13802_v27 = vld [vmem:[#allocation4 + $0x8a8] ss:$16 sps:$4 sm:$0xff]  }
 0x62e   :  { %v5443_v13 = vpop.f32.mrb[212].mxu1  ;;  %6879 = vmatmul.mubr.bf16.vlgmr.msra.gmra.mrb[120].mxu0 %v16968_v49  ;;  %v13847_v49 = vld [vmem:[#allocation6 + $0x1e0] sm:$0xff]  }
 0x62f   :  { %v5444_v31 = vadd.f32 %v5443_v13, %v15377_v1  ;;  %v5445_v3 = vpop.f32.mrb[213].mxu1  ;;  %11944 = vmatpush3.bf16.msra.mxu0 %v13834_v32  ;;  %v13803_v13 = vld [vmem:[#allocation4 + $0x8cc] ss:$16 sps:$4 sm:$0xff]  }
 0x630   :  { %v5446_v43 = vpop.f32.mrb[214].mxu1  ;;  %11945 = vmatprep.subr.bf16.mxu0 %v13837_v48 }
 0x631   :  { %v5447_v52 = vadd.f32 %v5446_v43, %v15383_v40  ;;  %v5448_v57 = vpop.f32.mrb[215].mxu1  ;;  %v13846_v40 = vld [vmem:[#allocation6 + $0x198] sm:$0xff]   ;;  %v16971_v43 = vld [vmem:[#allocation116_spill] sm:$0xff] }
 0x633   :  { %5658 = vmatmul.mubr.bf16.gmra.mrb[24].mxu1 %v13799_v10  ;;  %v6179_v51 = vpack.c.bf16 %v5447_v52, %v5444_v31  ;;  %11946 = vmatpush3.bf16.msra.mxu0 %v13839_v53  ;;  %v13848_v53 = vld [vmem:[#allocation6 + $0x1a0] sm:$0xff]   ;;  %v13805_v52 = vld [vmem:[#allocation4 + $0x8c8] ss:$16 sps:$4 sm:$0xff]  }
 0x634   :  { %5665 = vmatprep.mubr.bf16.mxu1 %v13800_v56  ;;  %11947 = vmatprep.subr.bf16.mxu0 %v13840_v33 }
 0x635   :  { %6886 = vmatprep.mubr.bf16.mxu0 %v6179_v51  ;;  %v13806_v51 = vld [vmem:[#allocation4 + $0x8ec] ss:$16 sps:$4 sm:$0xff]  }
 0x636   :  { %v5451_v1 = vpop.f32.mrb[216].mxu1  ;;  %6887 = vmatmul.mubr.bf16.gmra.mrb[124].mxu0 %v16969_v29 }
 0x637   :  { %v5452_v32 = vadd.f32 %v5451_v1, %v15386_v22  ;;  %v5453_v63 = vpop.f32.mrb[217].mxu1  ;;  %11948 = vmatpush3.bf16.msra.mxu0 %v13841_v16  ;;  %v13854_v16 = vld [vmem:[#allocation6 + $0x1f0] sm:$0xff]  }
 0x638   :  { %v5454_v48 = vpop.f32.mrb[218].mxu1  ;;  %11949 = vmatprep.subr.bf16.mxu0 %v13844_v24  ;;  %v16972_v63 = vpack.c.bf16 %v15548_v38, %v15540_v11  ;;  %v16973_v11 = vpack.c.bf16 %v15562_v8, %v15556_v39 }
 0x639   :  { %v5455_v31 = vadd.f32 %v5454_v48, %v15388_v25  ;;  %v5456_v3 = vpop.f32.mrb[219].mxu1  ;;  %v13853_v25 = vld [vmem:[#allocation6 + $0x1a8] sm:$0xff]  }
 0x63a   :  { %v13808_v48 = vld [vmem:[#allocation4 + $0x8e8] ss:$16 sps:$4 sm:$0xff]  }
 0x63b   :  { %5666 = vmatmul.mubr.bf16.gmra.mrb[28].mxu1 %v13802_v27  ;;  %v6180_v10 = vpack.c.bf16 %v5455_v31, %v5452_v32  ;;  %11950 = vmatpush3.bf16.msra.mxu0 %v13846_v40  ;;  %v13855_v32 = vld [vmem:[#allocation6 + $0x1b0] sm:$0xff]  }
 0x63c   :  { %5673 = vmatprep.mubr.bf16.mxu1 %v13803_v13  ;;  %11951 = vmatprep.subr.bf16.mxu0 %v13847_v49  ;;  %v13809_v49 = vld [vmem:[#allocation4 + $0x90c] ss:$16 sps:$4 sm:$0xff]  }
 0x63d   :  { %6894 = vmatprep.mubr.bf16.mxu0 %v6180_v10 }
 0x63e   :  { %v5459_v22 = vpop.f32.mrb[220].mxu1  ;;  %6895 = vmatmul.mubr.bf16.gmra.mrb[128].mxu0 %v16970_v46  ;;  %v13812_v46 = vld [vmem:[#allocation4 + $0x92c] ss:$16 sps:$4 sm:$0xff]  }
 0x63f   :  { %v5460_v56 = vadd.f32 %v5459_v22, %v16971_v43  ;;  %v5461_v33 = vpop.f32.mrb[221].mxu1  ;;  %11952 = vmatpush3.bf16.msra.mxu0 %v13848_v53 }
 0x640   :  { %v5462_v57 = vpop.f32.mrb[222].mxu1  ;;  %11953 = vmatprep.subr.bf16.mxu0 %v13851_v59  ;;  %v13811_v59 = vld [vmem:[#allocation4 + $0x908] ss:$16 sps:$4 sm:$0xff]  }
 0x641   :  { %v5463_v24 = vadd.f32 %v5462_v57, %v15396_v62  ;;  %v5464_v1 = vpop.f32.mrb[223].mxu1  ;;  %v13860_v62 = vld [vmem:[#allocation6 + $0x1b8] sm:$0xff]  }
 0x642   :  { %v13815_v57 = vld [vmem:[#allocation4 + $0x94c] ss:$16 sps:$4 sm:$0xff]   ;;  %v16975_v1 = vpack.c.bf16 %v15590_v41, %v15584_v19  ;;  %v13820_v19 = vld [vmem:[#allocation4 + $0x968] ss:$16 sps:$4 sm:$0xff]  }
 0x643   :  { %5674 = vmatmul.mubr.bf16.gmra.mrb[32].mxu1 %v13805_v52  ;;  %v6181_v29 = vpack.c.bf16 %v5463_v24, %v5460_v56  ;;  %11954 = vmatpush3.bf16.msra.mxu0 %v13853_v25  ;;  %v16974_v52 = vpack.c.bf16 %v15576_v5, %v15570_v45 }
 0x644   :  { %5681 = vmatprep.mubr.bf16.mxu1 %v13806_v51  ;;  %11955 = vmatprep.subr.bf16.mxu0 %v13854_v16 }
 0x645   :  { %6902 = vmatprep.mubr.bf16.mxu0 %v6181_v29 }
 0x646   :  { %v5467_v23 = vpop.f32.mrb[224].mxu1  ;;  %6903 = vmatmul.mubr.bf16.gmra.mrb[132].mxu0 %v16972_v63 }
 0x647   :  { %v5468_v27 = vadd.f32 %v5467_v23, %v15399_v36  ;;  %v5469_v40 = vpop.f32.mrb[225].mxu1  ;;  %11956 = vmatpush3.bf16.msra.mxu0 %v13855_v32  ;;  %v13818_v32 = vld [vmem:[#allocation4 + $0x96c] ss:$16 sps:$4 sm:$0xff]  }
 0x648   :  { %v5470_v13 = vpop.f32.mrb[226].mxu1  ;;  %11957 = vmatprep.subr.bf16.mxu0 %v13858_v4  ;;  %v13821_v40 = vld [vmem:[#allocation4 + $0x98c] ss:$16 sps:$4 sm:$0xff]  }
 0x649   :  { %v5471_v31 = vadd.f32 %v5470_v13, %v15401_v28  ;;  %v5472_v3 = vpop.f32.mrb[227].mxu1 }
 0x64b   :  { %5682 = vmatmul.mubr.bf16.gmra.mrb[36].mxu1 %v13808_v48  ;;  %v6182_v10 = vpack.c.bf16 %v5471_v31, %v5468_v27  ;;  %11958 = vmatpush3.bf16.msra.mxu0 %v13860_v62 }
 0x64c   :  { %5689 = vmatprep.mubr.bf16.mxu1 %v13809_v49  ;;  %v13824_v49 = vld [vmem:[#allocation4 + $0x9ac] ss:$16 sps:$4 sm:$0xff]  }
 0x64d   :  { %6910 = vmatprep.mubr.bf16.mxu0 %v6182_v10 }
 0x64e   :  { %v5475_v53 = vpop.f32.mrb[228].mxu1  ;;  %6911 = vmatmul.mubr.bf16.gmra.mrb[136].mxu0 %v16973_v11 }
 0x64f   :  { %v5476_v36 = vadd.f32 %v5475_v53, %v15403_v18  ;;  %v5477_v38 = vpop.f32.mrb[229].mxu1  ;;  %v13814_v18 = vld [vmem:[#allocation4 + $0x928] ss:$16 sps:$4 sm:$0xff]  }
 0x650   :  { %v5478_v22 = vpop.f32.mrb[230].mxu1  ;;  %v13827_v38 = vld [vmem:[#allocation4 + $0x9cc] ss:$16 sps:$4 sm:$0xff]  }
 0x651   :  { %v5479_v43 = vadd.f32 %v5478_v22, %v15409_v21  ;;  %v5480_v28 = vpop.f32.mrb[231].mxu1 }
 0x653   :  { %5690 = vmatmul.mubr.bf16.gmra.mrb[40].mxu1 %v13811_v59  ;;  %v6183_v56 = vpack.c.bf16 %v5479_v43, %v5476_v36 }
 0x654   :  { %5697 = vmatprep.mubr.bf16.mxu1 %v13812_v46 }
 0x655   :  { %6918 = vmatprep.mubr.bf16.mxu0 %v6183_v56 }
 0x656   :  { %v5483_v33 = vpop.f32.mrb[232].mxu1  ;;  %6919 = vmatmul.mubr.bf16.gmra.mrb[140].mxu0 %v16974_v52 }
 0x657   :  { %v5484_v8 = vadd.f32 %v5483_v33, %v15412_v2  ;;  %v5485_v39 = vpop.f32.mrb[233].mxu1  ;;  %v13817_v2 = vld [vmem:[#allocation4 + $0x948] ss:$16 sps:$4 sm:$0xff]   ;;  %v13830_v33 = vld [vmem:[#allocation4 + $0x9ec] ss:$16 sps:$4 sm:$0xff]  }
 0x658   :  { %v5486_v25 = vpop.f32.mrb[234].mxu1 }
 0x659   :  { %v5487_v51 = vadd.f32 %v5486_v25, %v15414_v14  ;;  %v5488_v16 = vpop.f32.mrb[235].mxu1 }
 0x65b   :  { %5698 = vmatmul.mubr.bf16.gmra.mrb[44].mxu1 %v13814_v18  ;;  %v6184_v21 = vpack.c.bf16 %v5487_v51, %v5484_v8 }
 0x65c   :  { %5705 = vmatprep.mubr.bf16.mxu1 %v13815_v57 }
 0x65d   :  { %6926 = vmatprep.mubr.bf16.mxu0 %v6184_v21 }
 0x65e   :  { %v5491_v24 = vpop.f32.mrb[236].mxu1  ;;  %6927 = vmatmul.mubr.bf16.gmra.mrb[144].mxu0 %v16975_v1 }
 0x65f   :  { %v5492_v45 = vadd.f32 %v5491_v24, %v15416_v9  ;;  %v5493_v5 = vpop.f32.mrb[237].mxu1  ;;  %v13832_v24 = vld [vmem:[#allocation4 + $0x9e8] ss:$16 sps:$4 sm:$0xff]  }
 0x660   :  { %v5494_v29 = vpop.f32.mrb[238].mxu1 }
 0x661   :  { %v5495_v4 = vadd.f32 %v5494_v29, %v15422_v47  ;;  %v5496_v23 = vpop.f32.mrb[239].mxu1 }
 0x663   :  { %5706 = vmatmul.mubr.bf16.gmra.mrb[48].mxu1 %v13817_v2  ;;  %v6185_v14 = vpack.c.bf16 %v5495_v4, %v5492_v45  ;;  %v13835_v45 = vld [vmem:[#allocation4 + $0xa0c] ss:$16 sps:$4 sm:$0xff]   ;;  %v13897_v4 = vld [vmem:[#allocation6 + $0x240] sm:$0xff]  }
 0x664   :  { %5713 = vmatprep.mubr.bf16.mxu1 %v13818_v32  ;;  %12007 = vmatprep.subr.bf16.mxu0 %v13897_v4 }
 0x665   :  { %6934 = vmatprep.mubr.bf16.mxu0 %v6185_v14 }
 0x666   :  { %v5499_v63 = vpop.f32.mrb[240].mxu1  ;;  %6935 = vmatmul.mubr.bf16.gmra.mrb[148].mxu0 %v6177_v61 }
 0x667   :  { %v15652_v41 = vadd.f32 %v5499_v63, %v15425_v20  ;;  %v5501_v9 = vpop.f32.mrb[241].mxu1  ;;  %v13823_v20 = vld [vmem:[#allocation4 + $0x988] ss:$16 sps:$4 sm:$0xff]  }
 0x668   :  { %v5502_v27 = vpop.f32.mrb[242].mxu1 }
 0x669   :  { %v15655_v48 = vadd.f32 %v5502_v27, %v15427_v17  ;;  %v5504_v47 = vpop.f32.mrb[243].mxu1 }
 0x66b   :  { %v6186_v62 = vpack.c.bf16 %v15655_v48, %v15652_v41  ;;  %5714 = vmatmul.mubr.bf16.gmra.mrb[52].mxu1 %v13820_v19 }
 0x66c   :  { %5721 = vmatprep.mubr.bf16.mxu1 %v13821_v40  ;;  %v13838_v40 = vld [vmem:[#allocation4 + $0xa08] ss:$16 sps:$4 sm:$0xff]  }
 0x66e   :  { %v5507_v13 = vpop.f32.mrb[244].mxu1 }
 0x66f   :  { %v15660_v26 = vadd.f32 %v5507_v13, %v15429_v34  ;;  %v5509_v60 = vpop.f32.mrb[245].mxu1  ;;  %v13826_v34 = vld [vmem:[#allocation4 + $0x9a8] ss:$16 sps:$4 sm:$0xff]   ;;  %v13842_v13 = vld [vmem:[#allocation4 + $0xa2c] ss:$16 sps:$4 sm:$0xff]  }
 0x670   :  { %v5510_v61 = vpop.f32.mrb[246].mxu1 }
 0x671   :  { %v15663_v31 = vadd.f32 %v5510_v61, %v15435_v37  ;;  %v5512_v3 = vpop.f32.mrb[247].mxu1 }
 0x673   :  { %v6187_v17 = vpack.c.bf16 %v15663_v31, %v15660_v26  ;;  %5722 = vmatmul.mubr.bf16.gmra.mrb[56].mxu1 %v13823_v20 }
 0x674   :  { %5729 = vmatprep.mubr.bf16.mxu1 %v13824_v49 }
 0x676   :  { %v5515_v10 = vpop.f32.mrb[248].mxu1 }
 0x677   :  { %v15668_v53 = vadd.f32 %v5515_v10, %v15438_v15  ;;  %v5517_v11 = vpop.f32.mrb[249].mxu1  ;;  %v13829_v15 = vld [vmem:[#allocation4 + $0x9c8] ss:$16 sps:$4 sm:$0xff]  }
 0x678   :  { %v5518_v36 = vpop.f32.mrb[250].mxu1 }
 0x679   :  { %v15671_v59 = vadd.f32 %v5518_v36, %v15440_v54  ;;  %v5520_v22 = vpop.f32.mrb[251].mxu1 }
 0x67a   :  { %v13845_v22 = vld [vmem:[#allocation4 + $0xa28] ss:$16 sps:$4 sm:$0xff]  }
 0x67b   :  { %v6188_v37 = vpack.c.bf16 %v15671_v59, %v15668_v53  ;;  %5730 = vmatmul.mubr.bf16.gmra.mrb[60].mxu1 %v13826_v34  ;;  %v13919_v59 = vld [vmem:[#allocation6 + $0x230] sm:$0xff]  }
 0x67c   :  { %5737 = vmatprep.mubr.bf16.mxu1 %v13827_v38 }
 0x67e   :  { %v5523_v46 = vpop.f32.mrb[252].mxu1 }
 0x67f   :  { %v15676_v43 = vadd.f32 %v5523_v46, %v15442_v55  ;;  %v5525_v28 = vpop.f32.mrb[253].mxu1 }
 0x680   :  { %v5526_v56 = vpop.f32.mrb[254].mxu1  ;;  %v13849_v28 = vld [vmem:[#allocation4 + $0xa4c] ss:$16 sps:$4 sm:$0xff]  }
 0x681   :  { %v15679_v52 = vadd.f32 %v5526_v56, %v15448_v12  ;;  %v5528_v8 = vpop.f32.mrb[255].mxu1  ;;  %v11767_v54 = vpop.f32.mrb[56].mxu0 }
 0x682   :  { %v11768_v39 = vpop.f32.mrb[57].mxu0 }
 0x683   :  { %v6189_v18 = vpack.c.bf16 %v15679_v52, %v15676_v43  ;;  %v15683_v25 = vadd.f32 %v11768_v39, %v11767_v54  ;;  %5738 = vmatmul.mubr.bf16.gmra.mrb[64].mxu1 %v13829_v15  ;;  %v11770_v57 = vpop.f32.mrb[58].mxu0 }
 0x684   :  { %v11771_v51 = vpop.f32.mrb[59].mxu0  ;;  %5745 = vmatprep.mubr.bf16.mxu1 %v13830_v33 }
 0x685   :  { %v15685_v55 = vadd.f32 %v11771_v51, %v11770_v57 }
 0x686   :  { %v5531_v16 = vpop.f32.mrb[148].mxu1 }
 0x687   :  { %v15688_v21 = vadd.f32 %v5531_v16, %v15451_v0  ;;  %v5533_v12 = vpop.f32.mrb[149].mxu1 }
 0x688   :  { %v5534_v1 = vpop.f32.mrb[150].mxu1 }
 0x689   :  { %v15691_v5 = vadd.f32 %v5534_v1, %v15453_v7  ;;  %v5536_v2 = vpop.f32.mrb[151].mxu1  ;;  %v11773_v29 = vpop.f32.mrb[60].mxu0 }
 0x68a   :  { %v11774_v32 = vpop.f32.mrb[61].mxu0 }
 0x68b   :  { %v6190_v23 = vpack.c.bf16 %v15691_v5, %v15688_v21  ;;  %v15695_v14 = vadd.f32 %v11774_v32, %v11773_v29  ;;  %5746 = vmatmul.mubr.bf16.gmra.mrb[68].mxu1 %v13832_v24  ;;  %v11776_v63 = vpop.f32.mrb[62].mxu0  ;;  %v13852_v24 = vld [vmem:[#allocation4 + $0xa48] ss:$16 sps:$4 sm:$0xff]  }
 0x68c   :  { %v11777_v0 = vpop.f32.mrb[63].mxu0  ;;  %5753 = vmatprep.mubr.bf16.mxu1 %v13835_v45  ;;  %v13856_v45 = vld [vmem:[#allocation4 + $0xa6c] ss:$16 sps:$4 sm:$0xff]  }
 0x68d   :  { %v15697_v9 = vadd.f32 %v11777_v0, %v11776_v63 }
 0x68e   :  { %v5539_v19 = vpop.f32.mrb[152].mxu1 }
 0x68f   :  { %v15700_v7 = vadd.f32 %v5539_v19, %v15455_v42  ;;  %v5541_v27 = vpop.f32.mrb[153].mxu1 }
 0x690   :  { %v5542_v47 = vpop.f32.mrb[154].mxu1 }
 0x691   :  { %v15703_v60 = vadd.f32 %v5542_v47, %v15461_v44  ;;  %v5544_v20 = vpop.f32.mrb[155].mxu1  ;;  %v11779_v61 = vpop.f32.mrb[64].mxu0 }
 0x692   :  { %v11780_v49 = vpop.f32.mrb[65].mxu0 }
 0x693   :  { %v6191_v3 = vpack.c.bf16 %v15703_v60, %v15700_v7  ;;  %v15707_v10 = vadd.f32 %v11780_v49, %v11779_v61  ;;  %5754 = vmatmul.mubr.bf16.gmra.mrb[72].mxu1 %v13838_v40  ;;  %v11782_v11 = vpop.f32.mrb[66].mxu0  ;;  %v13861_v61 = vld [vmem:[#allocation4 + $0xa8c] ss:$16 sps:$4 sm:$0xff]  }
 0x694   :  { %v11783_v34 = vpop.f32.mrb[67].mxu0  ;;  %5761 = vmatprep.mubr.bf16.mxu1 %v13842_v13  ;;  %v16976_v49 = vld [vmem:[#allocation117_spill] sm:$0xff] }
 0x695   :  { %v15709_v42 = vadd.f32 %v11783_v34, %v11782_v11 }
 0x696   :  { %v5547_v36 = vpop.f32.mrb[156].mxu1 }
 0x697   :  { %v15712_v38 = vadd.f32 %v5547_v36, %v15464_v35  ;;  %v5549_v44 = vpop.f32.mrb[157].mxu1 }
 0x698   :  { %v5550_v46 = vpop.f32.mrb[158].mxu1 }
 0x699   :  { %v15715_v15 = vadd.f32 %v5550_v46, %v15466_v30  ;;  %v5552_v56 = vpop.f32.mrb[159].mxu1  ;;  %v11785_v33 = vpop.f32.mrb[68].mxu0 }
 0x69a   :  { %v11786_v8 = vpop.f32.mrb[69].mxu0  ;;  %v13898_v56 = vld [vmem:[#allocation6 + $0x200] sm:$0xff]  }
 0x69b   :  { %v6192_v54 = vpack.c.bf16 %v15715_v15, %v15712_v38  ;;  %v15719_v39 = vadd.f32 %v11786_v8, %v11785_v33  ;;  %5762 = vmatmul.mubr.bf16.gmra.mrb[76].mxu1 %v13845_v22  ;;  %v11788_v57 = vpop.f32.mrb[70].mxu0  ;;  %v13899_v8 = vld [vmem:[#allocation6 + $0x248] sm:$0xff]  }
 0x69c   :  { %v11789_v51 = vpop.f32.mrb[71].mxu0  ;;  %5769 = vmatprep.mubr.bf16.mxu1 %v13849_v28 }
 0x69d   :  { %v15721_v35 = vadd.f32 %v11789_v51, %v11788_v57  ;;  %v16977_v51 = vld [vmem:[#allocation118_spill] sm:$0xff] }
 0x69e   :  { %v5555_v16 = vpop.f32.mrb[160].mxu1 }
 0x69f   :  { %v15724_v12 = vadd.f32 %v5555_v16, %v15468_v58  ;;  %v5557_v30 = vpop.f32.mrb[161].mxu1 }
 0x6a0   :  { %v5558_v1 = vpop.f32.mrb[162].mxu1 }
 0x6a1   :  { %v15727_v2 = vadd.f32 %v5558_v1, %v15479_v6  ;;  %v5560_v29 = vpop.f32.mrb[163].mxu1  ;;  %v11791_v32 = vpop.f32.mrb[72].mxu0  ;;  %v13859_v6 = vld [vmem:[#allocation4 + $0xa68] ss:$16 sps:$4 sm:$0xff]  }
 0x6a2   :  { %v11792_v4 = vpop.f32.mrb[73].mxu0  ;;  %v13900_v1 = vld [vmem:[#allocation6 + $0x208] sm:$0xff]  }
 0x6a3   :  { %v6193_v63 = vpack.c.bf16 %v15727_v2, %v15724_v12  ;;  %v15731_v0 = vadd.f32 %v11792_v4, %v11791_v32  ;;  %5770 = vmatmul.mubr.bf16.gmra.mrb[80].mxu1 %v13852_v24  ;;  %v11794_v19 = vpop.f32.mrb[74].mxu0  ;;  %v13863_v24 = vld [vmem:[#allocation4 + $0xa88] ss:$16 sps:$4 sm:$0xff]   ;;  %v13864_v29 = vld [vmem:[#allocation4 + $0xaac] ss:$16 sps:$4 sm:$0xff]   ;;  %v13904_v32 = vld [vmem:[#allocation6 + $0x250] sm:$0xff]  }
 0x6a4   :  { %v11795_v27 = vpop.f32.mrb[75].mxu0  ;;  %5777 = vmatprep.mubr.bf16.mxu1 %v13856_v45  ;;  %v16978_v4 = vld [vmem:[#allocation119_spill] sm:$0xff] }
 0x6a5   :  { %v15733_v58 = vadd.f32 %v11795_v27, %v11794_v19 }
 0x6a6   :  { %v5563_v40 = vpop.f32.mrb[164].mxu1 }
 0x6a7   :  { %v5564_v47 = vadd.f32 %v5563_v40, %v15484_v50  ;;  %v5565_v13 = vpop.f32.mrb[165].mxu1 }
 0x6a8   :  { %v5566_v20 = vpop.f32.mrb[166].mxu1 }
 0x6a9   :  { %v5567_v11 = vadd.f32 %v5566_v20, %v16976_v49  ;;  %v5568_v34 = vpop.f32.mrb[167].mxu1  ;;  %v11797_v36 = vpop.f32.mrb[76].mxu0  ;;  %v13906_v20 = vld [vmem:[#allocation6 + $0x258] sm:$0xff]  }
 0x6aa   :  { %v11798_v44 = vpop.f32.mrb[77].mxu0 }
 0x6ab   :  { %v15737_v22 = vadd.f32 %v11798_v44, %v11797_v36  ;;  %5778 = vmatmul.mubr.bf16.gmra.mrb[84].mxu1 %v13859_v6  ;;  %v11800_v46 = vpop.f32.mrb[78].mxu0  ;;  %v6194_v28 = vpack.c.bf16 %v5567_v11, %v5564_v47  ;;  %v16979_v11 = vld [vmem:[#allocation120_spill] sm:$0xff]  ;;  %v13866_v44 = vld [vmem:[#allocation4 + $0xaa8] ss:$16 sps:$4 sm:$0xff]  }
 0x6ac   :  { %v11801_v33 = vpop.f32.mrb[79].mxu0  ;;  %5785 = vmatprep.mubr.bf16.mxu1 %v13861_v61 }
 0x6ad   :  { %v15739_v57 = vadd.f32 %v11801_v33, %v11800_v46  ;;  %7120 = vmatprep.mubr.bf16.mxu0 %v6194_v28  ;;  %v13907_v46 = vld [vmem:[#allocation6 + $0x218] sm:$0xff]   ;;  %v13911_v33 = vld [vmem:[#allocation6 + $0x260] sm:$0xff]  }
 0x6ae   :  { %v5571_v50 = vpop.f32.mrb[168].mxu1  ;;  %7121 = vmatmul.mubr.bf16.vlgmr.msra.gmra.mrb[152].mxu0 %v6186_v62  ;;  %v13905_v62 = vld [vmem:[#allocation6 + $0x210] sm:$0xff]  }
 0x6af   :  { %v5572_v16 = vadd.f32 %v5571_v50, %v16977_v51  ;;  %v5573_v30 = vpop.f32.mrb[169].mxu1  ;;  %12008 = vmatpush3.bf16.msra.mxu0 %v13898_v56  ;;  %v13867_v56 = vld [vmem:[#allocation4 + $0xacc] ss:$16 sps:$4 sm:$0xff]  }
 0x6b0   :  { %v5574_v45 = vpop.f32.mrb[170].mxu1  ;;  %12009 = vmatprep.subr.bf16.mxu0 %v13899_v8  ;;  %v16980_v8 = vld [vmem:[#allocation121_spill] sm:$0xff] }
 0x6b1   :  { %v5575_v19 = vadd.f32 %v5574_v45, %v16978_v4  ;;  %v5576_v27 = vpop.f32.mrb[171].mxu1  ;;  %v11803_v40 = vpop.f32.mrb[80].mxu0  ;;  %v13913_v45 = vld [vmem:[#allocation6 + $0x268] sm:$0xff]   ;;  %v16981_v4 = vld [vmem:[#allocation122_spill] sm:$0xff] }
 0x6b2   :  { %v11804_v47 = vpop.f32.mrb[81].mxu0 }
 0x6b3   :  { %v15746_v13 = vadd.f32 %v11804_v47, %v11803_v40  ;;  %5786 = vmatmul.mubr.bf16.gmra.mrb[88].mxu1 %v13863_v24  ;;  %v11806_v41 = vpop.f32.mrb[82].mxu0  ;;  %v6195_v48 = vpack.c.bf16 %v5575_v19, %v5572_v16  ;;  %12010 = vmatpush3.bf16.msra.mxu0 %v13900_v1  ;;  %v13869_v40 = vld [vmem:[#allocation4 + $0xac8] ss:$16 sps:$4 sm:$0xff]  }
 0x6b4   :  { %v11807_v6 = vpop.f32.mrb[83].mxu0  ;;  %5793 = vmatprep.mubr.bf16.mxu1 %v13864_v29  ;;  %12011 = vmatprep.subr.bf16.mxu0 %v13904_v32  ;;  %v13914_v47 = vld [vmem:[#allocation6 + $0x228] sm:$0xff]  }
 0x6b5   :  { %v15748_v61 = vadd.f32 %v11807_v6, %v11806_v41  ;;  %7128 = vmatprep.mubr.bf16.mxu0 %v6195_v48  ;;  %v13870_v48 = vld [vmem:[#allocation4 + $0xaec] ss:$16 sps:$4 sm:$0xff]  }
 0x6b6   :  { %v5579_v49 = vpop.f32.mrb[172].mxu1  ;;  %7129 = vmatmul.mubr.bf16.gmra.mrb[156].mxu0 %v6187_v17  ;;  %v13912_v17 = vld [vmem:[#allocation6 + $0x220] sm:$0xff]   ;;  %v16982_v6 = vld [vmem:[#allocation123_spill] sm:$0xff] }
 0x6b7   :  { %v5580_v34 = vadd.f32 %v5579_v49, %v16979_v11  ;;  %v5581_v36 = vpop.f32.mrb[173].mxu1  ;;  %12012 = vmatpush3.bf16.msra.mxu0 %v13905_v62  ;;  %v13918_v62 = vld [vmem:[#allocation6 + $0x270] sm:$0xff]  }
 0x6b8   :  { %v5582_v28 = vpop.f32.mrb[174].mxu1  ;;  %12013 = vmatprep.subr.bf16.mxu0 %v13906_v20 }
 0x6b9   :  { %v5583_v50 = vadd.f32 %v5582_v28, %v16980_v8  ;;  %v5584_v51 = vpop.f32.mrb[175].mxu1  ;;  %v11809_v16 = vpop.f32.mrb[84].mxu0 }
 0x6ba   :  { %v11810_v30 = vpop.f32.mrb[85].mxu0 }
 0x6bb   :  { %v15755_v24 = vadd.f32 %v11810_v30, %v11809_v16  ;;  %5794 = vmatmul.mubr.bf16.gmra.mrb[92].mxu1 %v13866_v44  ;;  %v11812_v26 = vpop.f32.mrb[86].mxu0  ;;  %v6196_v31 = vpack.c.bf16 %v5583_v50, %v5580_v34  ;;  %12014 = vmatpush3.bf16.msra.mxu0 %v13907_v46  ;;  %v13920_v46 = vld [vmem:[#allocation6 + $0x278] sm:$0xff]   ;;  %v16983_v50 = vld [vmem:[#allocation124_spill] sm:$0xff] }
 0x6bc   :  { %v11813_v1 = vpop.f32.mrb[87].mxu0  ;;  %5801 = vmatprep.mubr.bf16.mxu1 %v13867_v56  ;;  %12015 = vmatprep.subr.bf16.mxu0 %v13911_v33  ;;  %v13872_v30 = vld [vmem:[#allocation4 + $0xae8] ss:$16 sps:$4 sm:$0xff]  }
 0x6bd   :  { %v15757_v29 = vadd.f32 %v11813_v1, %v11812_v26  ;;  %7136 = vmatprep.mubr.bf16.mxu0 %v6196_v31  ;;  %v13921_v26 = vld [vmem:[#allocation6 + $0x238] sm:$0xff]  }
 0x6be   :  { %v5587_v32 = vpop.f32.mrb[176].mxu1  ;;  %7137 = vmatmul.mubr.bf16.gmra.mrb[160].mxu0 %v6188_v37 }
 0x6bf   :  { %v5588_v19 = vadd.f32 %v5587_v32, %v16981_v4  ;;  %v5589_v27 = vpop.f32.mrb[177].mxu1  ;;  %12016 = vmatpush3.bf16.msra.mxu0 %v13912_v17  ;;  %v13873_v17 = vld [vmem:[#allocation4 + $0xb0c] ss:$16 sps:$4 sm:$0xff]  }
 0x6c0   :  { %v5590_v41 = vpop.f32.mrb[178].mxu1  ;;  %12017 = vmatprep.subr.bf16.mxu0 %v13913_v45 }
 0x6c1   :  { %v5591_v20 = vadd.f32 %v5590_v41, %v16982_v6  ;;  %v5592_v49 = vpop.f32.mrb[179].mxu1  ;;  %v11831_v11 = vpop.f32.mrb[88].mxu0  ;;  %v16985_v41 = vld [vmem:[#allocation126_spill] sm:$0xff]  ;;  %v13875_v6 = vld [vmem:[#allocation4 + $0xb08] ss:$16 sps:$4 sm:$0xff]  }
 0x6c2   :  { %v11832_v34 = vpop.f32.mrb[89].mxu0  ;;  %v13876_v49 = vld [vmem:[#allocation4 + $0xb2c] ss:$16 sps:$4 sm:$0xff]  }
 0x6c3   :  { %v11833_v36 = vadd.f32 %v11832_v34, %v11831_v11  ;;  %5802 = vmatmul.mubr.bf16.gmra.mrb[96].mxu1 %v13869_v40  ;;  %v11834_v44 = vpop.f32.mrb[90].mxu0  ;;  %v6197_v53 = vpack.c.bf16 %v5591_v20, %v5588_v19  ;;  %12018 = vmatpush3.bf16.msra.mxu0 %v13914_v47  ;;  %v16986_v11 = vld [vmem:[#allocation84_spill] sm:$0xff] }
 0x6c4   :  { %v11835_v37 = vpop.f32.mrb[91].mxu0  ;;  %5809 = vmatprep.mubr.bf16.mxu1 %v13870_v48  ;;  %12019 = vmatprep.subr.bf16.mxu0 %v13918_v62 }
 0x6c5   :  { %v15765_v28 = vadd.f32 %v11833_v36, %v15683_v25  ;;  %v11836_v56 = vadd.f32 %v11835_v37, %v11834_v44  ;;  %7144 = vmatprep.mubr.bf16.mxu0 %v6197_v53  ;;  %v16984_v25 = vld [vmem:[#allocation125_spill] sm:$0xff] }
 0x6c6   :  { %v5595_v33 = vpop.f32.mrb[180].mxu1  ;;  %7145 = vmatmul.mubr.bf16.gmra.mrb[164].mxu0 %v6189_v18 }
 0x6c7   :  { %v15771_v8 = vadd.f32 %v11836_v56, %v15685_v55  ;;  %v5596_v51 = vadd.f32 %v5595_v33, %v16983_v50  ;;  %v5597_v16 = vpop.f32.mrb[181].mxu1  ;;  %12020 = vmatpush3.bf16.msra.mxu0 %v13919_v59  ;;  %v13878_v33 = vld [vmem:[#allocation4 + $0xb28] ss:$16 sps:$4 sm:$0xff]  }
 0x6c8   :  { %v5598_v31 = vpop.f32.mrb[182].mxu1  ;;  %12021 = vmatprep.subr.bf16.mxu0 %v13920_v46 }
 0x6c9   :  { %v5599_v1 = vadd.f32 %v5598_v31, %v16984_v25  ;;  %v5600_v45 = vpop.f32.mrb[183].mxu1  ;;  %v11837_v32 = vpop.f32.mrb[92].mxu0 }
 0x6ca   :  { %v11838_v4 = vpop.f32.mrb[93].mxu0  ;;  %v13881_v45 = vld [vmem:[#allocation4 + $0xb48] ss:$16 sps:$4 sm:$0xff]  }
 0x6cb   :  { %v11839_v19 = vadd.f32 %v11838_v4, %v11837_v32  ;;  %5810 = vmatmul.mubr.bf16.gmra.mrb[100].mxu1 %v13872_v30  ;;  %v11840_v43 = vpop.f32.mrb[94].mxu0  ;;  %v6198_v52 = vpack.c.bf16 %v5599_v1, %v5596_v51  ;;  %12022 = vmatpush3.bf16.msra.mxu0 %v13921_v26  ;;  %v13879_v51 = vld [vmem:[#allocation4 + $0xb4c] ss:$16 sps:$4 sm:$0xff]  }
 0x6cc   :  { %v11841_v18 = vpop.f32.mrb[95].mxu0  ;;  %5817 = vmatprep.mubr.bf16.mxu1 %v13873_v17  ;;  %v13882_v4 = vld [vmem:[#allocation4 + $0xb6c] ss:$16 sps:$4 sm:$0xff]  }
 0x6cd   :  { %v15776_v55 = vadd.f32 %v11839_v19, %v15695_v14  ;;  %v11842_v27 = vadd.f32 %v11841_v18, %v11840_v43  ;;  %7152 = vmatprep.mubr.bf16.mxu0 %v6198_v52 }
 0x6ce   :  { %v5603_v40 = vpop.f32.mrb[184].mxu1  ;;  %7153 = vmatmul.mubr.bf16.gmra.mrb[168].mxu0 %v6190_v23 }
 0x6cf   :  { %v15782_v47 = vadd.f32 %v11842_v27, %v15697_v9  ;;  %v5604_v48 = vadd.f32 %v5603_v40, %v16985_v41  ;;  %v5605_v62 = vpop.f32.mrb[185].mxu1 }
 0x6d0   :  { %v5606_v20 = vpop.f32.mrb[186].mxu1 }
 0x6d1   :  { %v5607_v34 = vadd.f32 %v5606_v20, %v16986_v11  ;;  %v5608_v14 = vpop.f32.mrb[187].mxu1  ;;  %v11843_v36 = vpop.f32.mrb[96].mxu0 }
 0x6d2   :  { %v11844_v44 = vpop.f32.mrb[97].mxu0 }
 0x6d3   :  { %v11845_v53 = vadd.f32 %v11844_v44, %v11843_v36  ;;  %5818 = vmatmul.mubr.bf16.gmra.mrb[104].mxu1 %v13875_v6  ;;  %v11846_v59 = vpop.f32.mrb[98].mxu0  ;;  %v6199_v37 = vpack.c.bf16 %v5607_v34, %v5604_v48  ;;  %v13884_v48 = vld [vmem:[#allocation4 + $0xb68] ss:$16 sps:$4 sm:$0xff]   ;;  %v13885_v6 = vld [vmem:[#allocation4 + $0xb8c] ss:$16 sps:$4 sm:$0xff]  }
 0x6d4   :  { %v11847_v21 = vpop.f32.mrb[99].mxu0  ;;  %5825 = vmatprep.mubr.bf16.mxu1 %v13876_v49 }
 0x6d5   :  { %v15787_v5 = vadd.f32 %v11845_v53, %v15707_v10  ;;  %v11848_v23 = vadd.f32 %v11847_v21, %v11846_v59  ;;  %7160 = vmatprep.mubr.bf16.mxu0 %v6199_v37  ;;  %v13887_v53 = vld [vmem:[#allocation4 + $0xb88] ss:$16 sps:$4 sm:$0xff]   ;;  %v13888_v37 = vld [vmem:[#allocation4 + $0xbac] ss:$16 sps:$4 sm:$0xff]  }
 0x6d6   :  { %v5611_v9 = vpop.f32.mrb[0].mxu1  ;;  %7161 = vmatmul.mubr.bf16.gmra.mrb[172].mxu0 %v6191_v3 }
 0x6d7   :  { %v15793_v46 = vadd.f32 %v11848_v23, %v15709_v42  ;;  %v5613_v56 = vpop.f32.mrb[1].mxu1 }
 0x6d8   :  { %v5614_v50 = vpop.f32.mrb[2].mxu1 }
 0x6d9   :  { %v6200_v16 = vpack.c.bf16 %v5614_v50, %v5611_v9  ;;  %v5616_v30 = vpop.f32.mrb[3].mxu1  ;;  %v11849_v26 = vpop.f32.mrb[100].mxu0 }
 0x6da   :  { %v11850_v31 = vpop.f32.mrb[101].mxu0 }
 0x6db   :  { %v11851_v10 = vadd.f32 %v11850_v31, %v11849_v26  ;;  %5826 = vmatmul.mubr.bf16.gmra.mrb[108].mxu1 %v13878_v33  ;;  %v11852_v17 = vpop.f32.mrb[102].mxu0  ;;  %7168 = vmatprep.mubr.bf16.mxu0 %v6200_v16  ;;  %v13890_v31 = vld [vmem:[#allocation4 + $0xba8] ss:$16 sps:$4 sm:$0xff]  }
 0x6dc   :  { %v11853_v25 = vpop.f32.mrb[103].mxu0  ;;  %5833 = vmatprep.mubr.bf16.mxu1 %v13879_v51 }
 0x6dd   :  { %v15796_v7 = vadd.f32 %v11851_v10, %v15719_v39  ;;  %v11854_v60 = vadd.f32 %v11853_v25, %v11852_v17  ;;  %v13891_v17 = vld [vmem:[#allocation4 + $0xbcc] ss:$16 sps:$4 sm:$0xff]  }
 0x6de   :  { %v5619_v3 = vpop.f32.mrb[4].mxu1  ;;  %7169 = vmatmul.mubr.bf16.gmra.mrb[176].mxu0 %v6192_v54 }
 0x6df   :  { %v15802_v42 = vadd.f32 %v11854_v60, %v15721_v35  ;;  %v5621_v1 = vpop.f32.mrb[5].mxu1 }
 0x6e0   :  { %v5622_v32 = vpop.f32.mrb[6].mxu1 }
 0x6e1   :  { %v6201_v19 = vpack.c.bf16 %v5622_v32, %v5619_v3  ;;  %v5624_v43 = vpop.f32.mrb[7].mxu1  ;;  %v11855_v52 = vpop.f32.mrb[104].mxu0 }
 0x6e2   :  { %v11856_v18 = vpop.f32.mrb[105].mxu0 }
 0x6e3   :  { %v11857_v27 = vadd.f32 %v11856_v18, %v11855_v52  ;;  %5834 = vmatmul.mubr.bf16.gmra.mrb[112].mxu1 %v13881_v45  ;;  %v11858_v39 = vpop.f32.mrb[106].mxu0  ;;  %7176 = vmatprep.mubr.bf16.mxu0 %v6201_v19  ;;  %v13893_v18 = vld [vmem:[#allocation4 + $0xbc8] ss:$16 sps:$4 sm:$0xff]  }
 0x6e4   :  { %v11859_v40 = vpop.f32.mrb[107].mxu0  ;;  %5841 = vmatprep.mubr.bf16.mxu1 %v13882_v4 }
 0x6e5   :  { %v15805_v38 = vadd.f32 %v11857_v27, %v15731_v0  ;;  %v11860_v15 = vadd.f32 %v11859_v40, %v11858_v39  ;;  %v13894_v39 = vld [vmem:[#allocation4 + $0xbec] ss:$16 sps:$4 sm:$0xff]  }
 0x6e6   :  { %v15807_v54 = vpop.f32.mrb[8].mxu1  ;;  %7177 = vmatmul.mubr.bf16.gmra.mrb[180].mxu0 %v6193_v63 }
 0x6e7   :  { %v15813_v35 = vadd.f32 %v11860_v15, %v15733_v58  ;;  %v5629_v41 = vpop.f32.mrb[9].mxu1 }
 0x6e8   :  { %v15815_v62 = vpop.f32.mrb[10].mxu1 }
 0x6e9   :  { %v6202_v20 = vpack.c.bf16 %v15815_v62, %v15807_v54  ;;  %v5632_v0 = vpop.f32.mrb[11].mxu1  ;;  %v11861_v49 = vpop.f32.mrb[108].mxu0 }
 0x6ea   :  { %v11862_v11 = vpop.f32.mrb[109].mxu0 }
 0x6eb   :  { %v11863_v34 = vadd.f32 %v11862_v11, %v11861_v49  ;;  %5842 = vmatmul.mubr.bf16.gmra.mrb[116].mxu1 %v13884_v48  ;;  %v11864_v14 = vpop.f32.mrb[110].mxu0 }
 0x6ec   :  { %v11865_v36 = vpop.f32.mrb[111].mxu0  ;;  %5849 = vmatprep.mubr.bf16.mxu1 %v13885_v6 }
 0x6ed   :  { %v15820_v12 = vadd.f32 %v11863_v34, %v15737_v22  ;;  %v11866_v2 = vadd.f32 %v11865_v36, %v11864_v14  ;;  %v13896_v36 = vld [vmem:[#allocation4 + $0xbe8] ss:$16 sps:$4 sm:$0xff]  }
 0x6ee   :  { %v15822_v63 = vpop.f32.mrb[12].mxu1 }
 0x6ef   :  { %v15825_v58 = vadd.f32 %v11866_v2, %v15739_v57  ;;  %v5637_v44 = vpop.f32.mrb[13].mxu1 }
 0x6f0   :  { %v15827_v59 = vpop.f32.mrb[14].mxu1  ;;  %v13901_v44 = vld [vmem:[#allocation4 + $0xc0c] ss:$16 sps:$4 sm:$0xff]  }
 0x6f1   :  { %v6203_v21 = vpack.c.bf16 %v15827_v59, %v15822_v63  ;;  %v5640_v23 = vpop.f32.mrb[15].mxu1  ;;  %v11867_v9 = vpop.f32.mrb[112].mxu0 }
 0x6f2   :  { %v11868_v56 = vpop.f32.mrb[113].mxu0 }
 0x6f3   :  { %v11869_v33 = vadd.f32 %v11868_v56, %v11867_v9  ;;  %5850 = vmatmul.mubr.bf16.gmra.mrb[120].mxu1 %v13887_v53  ;;  %v11870_v22 = vpop.f32.mrb[114].mxu0  ;;  %v13961_v56 = vld [vmem:[#allocation6 + $0x2c0] sm:$0xff]  }
 0x6f4   :  { %v11871_v50 = vpop.f32.mrb[115].mxu0  ;;  %5857 = vmatprep.mubr.bf16.mxu1 %v13888_v37  ;;  %12071 = vmatprep.subr.bf16.mxu0 %v13961_v56 }
 0x6f5   :  { %v15832_v51 = vadd.f32 %v11869_v33, %v15746_v13  ;;  %v11872_v57 = vadd.f32 %v11871_v50, %v11870_v22 }
 0x6f6   :  { %v15834_v16 = vpop.f32.mrb[16].mxu1 }
 0x6f7   :  { %v15837_v30 = vadd.f32 %v11872_v57, %v15748_v61  ;;  %v5645_v26 = vpop.f32.mrb[17].mxu1 }
 0x6f8   :  { %v15839_v10 = vpop.f32.mrb[18].mxu1 }
 0x6f9   :  { %v6204_v25 = vpack.c.bf16 %v15839_v10, %v15834_v16  ;;  %v5648_v60 = vpop.f32.mrb[19].mxu1  ;;  %v11873_v3 = vpop.f32.mrb[116].mxu0  ;;  %v13983_v10 = vld [vmem:[#allocation6 + $0x2b0] sm:$0xff]  }
 0x6fa   :  { %v11874_v1 = vpop.f32.mrb[117].mxu0 }
 0x6fb   :  { %v11875_v45 = vadd.f32 %v11874_v1, %v11873_v3  ;;  %5858 = vmatmul.mubr.bf16.gmra.mrb[124].mxu1 %v13890_v31  ;;  %v11876_v13 = vpop.f32.mrb[118].mxu0  ;;  %v13908_v3 = vld [vmem:[#allocation4 + $0xc2c] ss:$16 sps:$4 sm:$0xff]  }
 0x6fc   :  { %v11877_v32 = vpop.f32.mrb[119].mxu0  ;;  %5865 = vmatprep.mubr.bf16.mxu1 %v13891_v17  ;;  %v13903_v17 = vld [vmem:[#allocation4 + $0xc08] ss:$16 sps:$4 sm:$0xff]  }
 0x6fd   :  { %v15844_v4 = vadd.f32 %v11875_v45, %v15755_v24  ;;  %v11878_v61 = vadd.f32 %v11877_v32, %v11876_v13 }
 0x6fe   :  { %v15846_v19 = vpop.f32.mrb[20].mxu1 }
 0x6ff   :  { %v15849_v43 = vadd.f32 %v11878_v61, %v15757_v29  ;;  %v5653_v52 = vpop.f32.mrb[21].mxu1 }
 0x700   :  { %v15851_v27 = vpop.f32.mrb[22].mxu1 }
 0x701   :  { %v6205_v40 = vpack.c.bf16 %v15851_v27, %v15846_v19  ;;  %v5656_v15 = vpop.f32.mrb[23].mxu1  ;;  %v11895_v41 = vpop.f32.mrb[120].mxu0 }
 0x702   :  { %v11896_v48 = vpop.f32.mrb[121].mxu0 }
 0x703   :  { %v11897_v6 = vadd.f32 %v11896_v48, %v11895_v41  ;;  %5866 = vmatmul.mubr.bf16.gmra.mrb[128].mxu1 %v13893_v18  ;;  %v11898_v24 = vpop.f32.mrb[122].mxu0  ;;  %v13910_v48 = vld [vmem:[#allocation4 + $0xc28] ss:$16 sps:$4 sm:$0xff]  }
 0x704   :  { %v11899_v0 = vpop.f32.mrb[123].mxu0  ;;  %5873 = vmatprep.mubr.bf16.mxu1 %v13894_v39 }
 0x705   :  { %v15856_v49 = vadd.f32 %v11897_v6, %v15765_v28  ;;  %v11900_v29 = vadd.f32 %v11899_v0, %v11898_v24  ;;  %v13915_v24 = vld [vmem:[#allocation4 + $0xc4c] ss:$16 sps:$4 sm:$0xff]  }
 0x706   :  { %v15858_v11 = vpop.f32.mrb[24].mxu1 }
 0x707   :  { %v15861_v34 = vadd.f32 %v11900_v29, %v15771_v8  ;;  %v5661_v14 = vpop.f32.mrb[25].mxu1 }
 0x708   :  { %v15863_v2 = vpop.f32.mrb[26].mxu1 }
 0x709   :  { %v6206_v53 = vpack.c.bf16 %v15863_v2, %v15858_v11  ;;  %v5664_v37 = vpop.f32.mrb[27].mxu1  ;;  %v11901_v23 = vpop.f32.mrb[124].mxu0  ;;  %v13945_v2 = vld [vmem:[#allocation4 + $0xd4c] ss:$16 sps:$4 sm:$0xff]  }
 0x70a   :  { %v11902_v9 = vpop.f32.mrb[125].mxu0 }
 0x70b   :  { %v11903_v28 = vadd.f32 %v11902_v9, %v11901_v23  ;;  %5874 = vmatmul.mubr.bf16.gmra.mrb[132].mxu1 %v13896_v36  ;;  %v11904_v33 = vpop.f32.mrb[126].mxu0 }
 0x70c   :  { %v11905_v22 = vpop.f32.mrb[127].mxu0  ;;  %5881 = vmatprep.mubr.bf16.mxu1 %v13901_v44 }
 0x70d   :  { %v15868_v8 = vadd.f32 %v11903_v28, %v15776_v55  ;;  %v11906_v50 = vadd.f32 %v11905_v22, %v11904_v33  ;;  %v13917_v33 = vld [vmem:[#allocation4 + $0xc48] ss:$16 sps:$4 sm:$0xff]  }
 0x70e   :  { %v15870_v57 = vpop.f32.mrb[28].mxu1 }
 0x70f   :  { %v15873_v26 = vadd.f32 %v11906_v50, %v15782_v47  ;;  %v5669_v31 = vpop.f32.mrb[29].mxu1  ;;  %v13924_v50 = vld [vmem:[#allocation4 + $0xc6c] ss:$16 sps:$4 sm:$0xff]  }
 0x710   :  { %v15875_v60 = vpop.f32.mrb[30].mxu1 }
 0x711   :  { %v6207_v1 = vpack.c.bf16 %v15875_v60, %v15870_v57  ;;  %v5672_v45 = vpop.f32.mrb[31].mxu1  ;;  %v11907_v13 = vpop.f32.mrb[128].mxu0  ;;  %v13948_v60 = vld [vmem:[#allocation4 + $0xd6c] ss:$16 sps:$4 sm:$0xff]  }
 0x712   :  { %v11908_v32 = vpop.f32.mrb[129].mxu0 }
 0x713   :  { %v11909_v61 = vadd.f32 %v11908_v32, %v11907_v13  ;;  %5882 = vmatmul.mubr.bf16.gmra.mrb[136].mxu1 %v13903_v17  ;;  %v11910_v55 = vpop.f32.mrb[130].mxu0 }
 0x714   :  { %v11911_v52 = vpop.f32.mrb[131].mxu0  ;;  %5889 = vmatprep.mubr.bf16.mxu1 %v13908_v3 }
 0x715   :  { %v15880_v18 = vadd.f32 %v11909_v61, %v15787_v5  ;;  %v11912_v47 = vadd.f32 %v11911_v52, %v11910_v55 }
 0x716   :  { %v15882_v39 = vpop.f32.mrb[32].mxu1 }
 0x717   :  { %v15885_v15 = vadd.f32 %v11912_v47, %v15793_v46  ;;  %v5677_v41 = vpop.f32.mrb[33].mxu1 }
 0x718   :  { %v15887_v6 = vpop.f32.mrb[34].mxu1  ;;  %v13922_v41 = vld [vmem:[#allocation4 + $0xc68] ss:$16 sps:$4 sm:$0xff]  }
 0x719   :  { %v6208_v0 = vpack.c.bf16 %v15887_v6, %v15882_v39  ;;  %v5680_v29 = vpop.f32.mrb[35].mxu1  ;;  %v11913_v14 = vpop.f32.mrb[132].mxu0  ;;  %v13946_v39 = vld [vmem:[#allocation4 + $0xd68] ss:$16 sps:$4 sm:$0xff]  }
 0x71a   :  { %v11914_v36 = vpop.f32.mrb[133].mxu0 }
 0x71b   :  { %v11915_v44 = vadd.f32 %v11914_v36, %v11913_v14  ;;  %5890 = vmatmul.mubr.bf16.gmra.mrb[140].mxu1 %v13910_v48  ;;  %v11916_v5 = vpop.f32.mrb[134].mxu0 }
 0x71c   :  { %v11917_v37 = vpop.f32.mrb[135].mxu0  ;;  %5897 = vmatprep.mubr.bf16.mxu1 %v13915_v24  ;;  %v13927_v24 = vld [vmem:[#allocation4 + $0xc8c] ss:$16 sps:$4 sm:$0xff]  }
 0x71d   :  { %v15892_v23 = vadd.f32 %v11915_v44, %v15796_v7  ;;  %v11918_v46 = vadd.f32 %v11917_v37, %v11916_v5  ;;  %v13962_v44 = vld [vmem:[#allocation6 + $0x280] sm:$0xff]   ;;  %v13963_v37 = vld [vmem:[#allocation6 + $0x2c8] sm:$0xff]  }
 0x71e   :  { %v15894_v9 = vpop.f32.mrb[36].mxu1 }
 0x71f   :  { %v15897_v56 = vadd.f32 %v11918_v46, %v15802_v42  ;;  %v5685_v28 = vpop.f32.mrb[37].mxu1 }
 0x720   :  { %v15899_v22 = vpop.f32.mrb[38].mxu1 }
 0x721   :  { %v6209_v31 = vpack.c.bf16 %v15899_v22, %v15894_v9  ;;  %v5688_v17 = vpop.f32.mrb[39].mxu1  ;;  %v11919_v3 = vpop.f32.mrb[136].mxu0  ;;  %v13954_v22 = vld [vmem:[#allocation4 + $0xdac] ss:$16 sps:$4 sm:$0xff]  }
 0x722   :  { %v11920_v45 = vpop.f32.mrb[137].mxu0 }
 0x723   :  { %v11921_v13 = vadd.f32 %v11920_v45, %v11919_v3  ;;  %5898 = vmatmul.mubr.bf16.gmra.mrb[144].mxu1 %v13917_v33  ;;  %v11922_v7 = vpop.f32.mrb[138].mxu0  ;;  %v13968_v3 = vld [vmem:[#allocation6 + $0x2d0] sm:$0xff]  }
 0x724   :  { %v11923_v32 = vpop.f32.mrb[139].mxu0  ;;  %5905 = vmatprep.mubr.bf16.mxu1 %v13924_v50  ;;  %v13964_v50 = vld [vmem:[#allocation6 + $0x288] sm:$0xff]  }
 0x725   :  { %v15904_v61 = vadd.f32 %v11921_v13, %v15805_v38  ;;  %v11924_v42 = vadd.f32 %v11923_v32, %v11922_v7  ;;  %v13925_v7 = vld [vmem:[#allocation4 + $0xc88] ss:$16 sps:$4 sm:$0xff]  }
 0x726   :  { %v5691_v55 = vpop.f32.mrb[40].mxu1 }
 0x727   :  { %v15907_v52 = vadd.f32 %v11924_v42, %v15813_v35  ;;  %v5693_v47 = vpop.f32.mrb[41].mxu1  ;;  %v13930_v42 = vld [vmem:[#allocation4 + $0xcac] ss:$16 sps:$4 sm:$0xff]  }
 0x728   :  { %v5694_v48 = vpop.f32.mrb[42].mxu1  ;;  %v13970_v47 = vld [vmem:[#allocation6 + $0x2d8] sm:$0xff]  }
 0x729   :  { %v6210_v29 = vpack.c.bf16 %v5694_v48, %v5691_v55  ;;  %v5696_v14 = vpop.f32.mrb[43].mxu1  ;;  %v11925_v36 = vpop.f32.mrb[140].mxu0 }
 0x72a   :  { %v11926_v5 = vpop.f32.mrb[141].mxu0  ;;  %v13971_v14 = vld [vmem:[#allocation6 + $0x298] sm:$0xff]  }
 0x72b   :  { %v11927_v46 = vadd.f32 %v11926_v5, %v11925_v36  ;;  %5906 = vmatmul.mubr.bf16.gmra.mrb[188].mxu1 %v13922_v41  ;;  %v11928_v28 = vpop.f32.mrb[142].mxu0  ;;  %7362 = vmatprep.mubr.bf16.mxu0 %v6210_v29 }
 0x72c   :  { %v11929_v38 = vpop.f32.mrb[143].mxu0  ;;  %7363 = vmatmul.mubr.bf16.vlgmr.msra.gmra.mrb[184].mxu0 %v6202_v20  ;;  %5913 = vmatprep.mubr.bf16.mxu1 %v13927_v24  ;;  %v13969_v20 = vld [vmem:[#allocation6 + $0x290] sm:$0xff]  }
 0x72d   :  { %v15913_v35 = vadd.f32 %v11927_v46, %v15820_v12  ;;  %v11930_v33 = vadd.f32 %v11929_v38, %v11928_v28  ;;  %12072 = vmatpush3.bf16.msra.mxu0 %v13962_v44  ;;  %v13975_v44 = vld [vmem:[#allocation6 + $0x2e0] sm:$0xff]   ;;  %v13928_v46 = vld [vmem:[#allocation4 + $0xca8] ss:$16 sps:$4 sm:$0xff]   ;;  %v13933_v38 = vld [vmem:[#allocation4 + $0xccc] ss:$16 sps:$4 sm:$0xff]  }
 0x72e   :  { %v5699_v17 = vpop.f32.mrb[44].mxu1  ;;  %12073 = vmatprep.subr.bf16.mxu0 %v13963_v37 }
 0x72f   :  { %v15916_v45 = vadd.f32 %v11930_v33, %v15825_v58  ;;  %v5701_v13 = vpop.f32.mrb[45].mxu1 }
 0x730   :  { %v5702_v32 = vpop.f32.mrb[46].mxu1 }
 0x731   :  { %v6211_v55 = vpack.c.bf16 %v5702_v32, %v5699_v17  ;;  %v5704_v54 = vpop.f32.mrb[47].mxu1  ;;  %v11931_v62 = vpop.f32.mrb[144].mxu0  ;;  %12074 = vmatpush3.bf16.msra.mxu0 %v13964_v50  ;;  %v13977_v50 = vld [vmem:[#allocation6 + $0x2e8] sm:$0xff]  }
 0x732   :  { %v11932_v12 = vpop.f32.mrb[145].mxu0  ;;  %12075 = vmatprep.subr.bf16.mxu0 %v13968_v3  ;;  %v13978_v32 = vld [vmem:[#allocation6 + $0x2a8] sm:$0xff]  }
 0x733   :  { %v11933_v41 = vadd.f32 %v11932_v12, %v11931_v62  ;;  %5914 = vmatmul.mubr.bf16.gmra.mrb[192].mxu1 %v13925_v7  ;;  %v11934_v48 = vpop.f32.mrb[146].mxu0  ;;  %7370 = vmatprep.mubr.bf16.mxu0 %v6211_v55  ;;  %v13982_v55 = vld [vmem:[#allocation6 + $0x2f0] sm:$0xff]  }
 0x734   :  { %v11935_v24 = vpop.f32.mrb[147].mxu0  ;;  %7371 = vmatmul.mubr.bf16.gmra.mrb[188].mxu0 %v6203_v21  ;;  %5921 = vmatprep.mubr.bf16.mxu1 %v13930_v42  ;;  %v13976_v21 = vld [vmem:[#allocation6 + $0x2a0] sm:$0xff]  }
 0x735   :  { %v15922_v58 = vadd.f32 %v11933_v41, %v15832_v51  ;;  %v11936_v29 = vadd.f32 %v11935_v24, %v11934_v48  ;;  %12076 = vmatpush3.bf16.msra.mxu0 %v13969_v20  ;;  %v13931_v20 = vld [vmem:[#allocation4 + $0xcc8] ss:$16 sps:$4 sm:$0xff]  }
 0x736   :  { %v5707_v36 = vpop.f32.mrb[48].mxu1  ;;  %12077 = vmatprep.subr.bf16.mxu0 %v13970_v47  ;;  %v13936_v47 = vld [vmem:[#allocation4 + $0xcec] ss:$16 sps:$4 sm:$0xff]   ;;  %v13934_v24 = vld [vmem:[#allocation4 + $0xce8] ss:$16 sps:$4 sm:$0xff]  }
 0x737   :  { %v15925_v5 = vadd.f32 %v11936_v29, %v15837_v30  ;;  %v5709_v37 = vpop.f32.mrb[49].mxu1 }
 0x738   :  { %v5710_v28 = vpop.f32.mrb[50].mxu1 }
 0x739   :  { %v6212_v33 = vpack.c.bf16 %v5710_v28, %v5707_v36  ;;  %v5712_v63 = vpop.f32.mrb[51].mxu1  ;;  %v11937_v59 = vpop.f32.mrb[148].mxu0  ;;  %12078 = vmatpush3.bf16.msra.mxu0 %v13971_v14  ;;  %v13939_v14 = vld [vmem:[#allocation4 + $0xd0c] ss:$16 sps:$4 sm:$0xff]  }
 0x73a   :  { %v11938_v51 = vpop.f32.mrb[149].mxu0  ;;  %12079 = vmatprep.subr.bf16.mxu0 %v13975_v44 }
 0x73b   :  { %v11939_v17 = vadd.f32 %v11938_v51, %v11937_v59  ;;  %5922 = vmatmul.mubr.bf16.gmra.mrb[196].mxu1 %v13928_v46  ;;  %v11940_v3 = vpop.f32.mrb[150].mxu0  ;;  %7378 = vmatprep.mubr.bf16.mxu0 %v6212_v33  ;;  %v13942_v46 = vld [vmem:[#allocation4 + $0xd2c] ss:$16 sps:$4 sm:$0xff]   ;;  %v13940_v59 = vld [vmem:[#allocation4 + $0xd28] ss:$16 sps:$4 sm:$0xff]  }
 0x73c   :  { %v11941_v13 = vpop.f32.mrb[151].mxu0  ;;  %7379 = vmatmul.mubr.bf16.gmra.mrb[192].mxu0 %v6204_v25  ;;  %5929 = vmatprep.mubr.bf16.mxu1 %v13933_v38  ;;  %v13984_v25 = vld [vmem:[#allocation6 + $0x2f8] sm:$0xff]  }
 0x73d   :  { %v15931_v30 = vadd.f32 %v11939_v17, %v15844_v4  ;;  %v11942_v7 = vadd.f32 %v11941_v13, %v11940_v3  ;;  %12080 = vmatpush3.bf16.msra.mxu0 %v13976_v21  ;;  %v13985_v4 = vld [vmem:[#allocation6 + $0x2b8] sm:$0xff]  }
 0x73e   :  { %v5715_v42 = vpop.f32.mrb[52].mxu1  ;;  %12081 = vmatprep.subr.bf16.mxu0 %v13977_v50  ;;  %v13943_v17 = vld [vmem:[#allocation4 + $0xd48] ss:$16 sps:$4 sm:$0xff]  }
 0x73f   :  { %v15934_v54 = vadd.f32 %v11942_v7, %v15849_v43  ;;  %v5717_v62 = vpop.f32.mrb[53].mxu1 }
 0x740   :  { %v5718_v12 = vpop.f32.mrb[54].mxu1 }
 0x741   :  { %v6213_v41 = vpack.c.bf16 %v5718_v12, %v5715_v42  ;;  %v5720_v16 = vpop.f32.mrb[55].mxu1  ;;  %12082 = vmatpush3.bf16.msra.mxu0 %v13978_v32 }
 0x742   :  { %12083 = vmatprep.subr.bf16.mxu0 %v13982_v55  ;;  %v13952_v16 = vld [vmem:[#allocation4 + $0xda8] ss:$16 sps:$4 sm:$0xff]  }
 0x743   :  { %5930 = vmatmul.mubr.bf16.gmra.mrb[200].mxu1 %v13931_v20  ;;  %7386 = vmatprep.mubr.bf16.mxu0 %v6213_v41  ;;  %v13949_v20 = vld [vmem:[#allocation4 + $0xd88] ss:$16 sps:$4 sm:$0xff]  }
 0x744   :  { %7387 = vmatmul.mubr.bf16.gmra.mrb[196].mxu0 %v6205_v40  ;;  %5937 = vmatprep.mubr.bf16.mxu1 %v13936_v47  ;;  %v13937_v40 = vld [vmem:[#allocation4 + $0xd08] ss:$16 sps:$4 sm:$0xff]  }
 0x745   :  { %12084 = vmatpush3.bf16.msra.mxu0 %v13983_v10 }
 0x746   :  { %v5723_v43 = vpop.f32.mrb[56].mxu1  ;;  %12085 = vmatprep.subr.bf16.mxu0 %v13984_v25  ;;  %v13957_v25 = vld [vmem:[#allocation4 + $0xdcc] ss:$16 sps:$4 sm:$0xff]  }
 0x747   :  { %v5725_v48 = vpop.f32.mrb[57].mxu1 }
 0x748   :  { %v5726_v29 = vpop.f32.mrb[58].mxu1 }
 0x749   :  { %v6214_v36 = vpack.c.bf16 %v5726_v29, %v5723_v43  ;;  %v5728_v44 = vpop.f32.mrb[59].mxu1  ;;  %12086 = vmatpush3.bf16.msra.mxu0 %v13985_v4  ;;  %v13955_v29 = vld [vmem:[#allocation4 + $0xdc8] ss:$16 sps:$4 sm:$0xff]  }
 0x74b   :  { %5938 = vmatmul.mubr.bf16.gmra.mrb[204].mxu1 %v13934_v24  ;;  %7394 = vmatprep.mubr.bf16.mxu0 %v6214_v36  ;;  %v13960_v36 = vld [vmem:[#allocation4 + $0xdec] ss:$16 sps:$4 sm:$0xff]  }
 0x74c   :  { %7395 = vmatmul.mubr.bf16.gmra.mrb[200].mxu0 %v6206_v53  ;;  %5945 = vmatprep.mubr.bf16.mxu1 %v13939_v14 }
 0x74e   :  { %v5731_v19 = vpop.f32.mrb[60].mxu1 }
 0x74f   :  { %v5733_v27 = vpop.f32.mrb[61].mxu1 }
 0x750   :  { %v5734_v37 = vpop.f32.mrb[62].mxu1 }
 0x751   :  { %v6215_v28 = vpack.c.bf16 %v5734_v37, %v5731_v19  ;;  %v5736_v38 = vpop.f32.mrb[63].mxu1 }
 0x753   :  { %5946 = vmatmul.mubr.bf16.gmra.mrb[208].mxu1 %v13937_v40  ;;  %7402 = vmatprep.mubr.bf16.mxu0 %v6215_v28 }
 0x754   :  { %7403 = vmatmul.mubr.bf16.gmra.mrb[204].mxu0 %v6207_v1  ;;  %5953 = vmatprep.mubr.bf16.mxu1 %v13942_v46 }
 0x756   :  { %v5739_v33 = vpop.f32.mrb[64].mxu1 }
 0x757   :  { %v5741_v63 = vpop.f32.mrb[65].mxu1 }
 0x758   :  { %v5742_v11 = vpop.f32.mrb[66].mxu1 }
 0x759   :  { %v6216_v53 = vpack.c.bf16 %v5742_v11, %v5739_v33  ;;  %v5744_v21 = vpop.f32.mrb[67].mxu1 }
 0x75a   :  { %v13967_v21 = vld [vmem:[#allocation4 + $0xe0c] ss:$16 sps:$4 sm:$0xff]  }
 0x75b   :  { %5954 = vmatmul.mubr.bf16.gmra.mrb[212].mxu1 %v13940_v59  ;;  %7410 = vmatprep.mubr.bf16.mxu0 %v6216_v53 }
 0x75c   :  { %7411 = vmatmul.mubr.bf16.gmra.mrb[208].mxu0 %v6208_v0  ;;  %5961 = vmatprep.mubr.bf16.mxu1 %v13945_v2  ;;  %v13951_v0 = vld [vmem:[#allocation4 + $0xd8c] ss:$16 sps:$4 sm:$0xff]   ;;  %v13958_v2 = vld [vmem:[#allocation4 + $0xde8] ss:$16 sps:$4 sm:$0xff]  }
 0x75e   :  { %v5747_v51 = vpop.f32.mrb[68].mxu1 }
 0x75f   :  { %v5749_v50 = vpop.f32.mrb[69].mxu1 }
 0x760   :  { %v5750_v57 = vpop.f32.mrb[70].mxu1 }
 0x761   :  { %v6217_v1 = vpack.c.bf16 %v5750_v57, %v5747_v51  ;;  %v5752_v3 = vpop.f32.mrb[71].mxu1 }
 0x762   :  { %v14025_v3 = vld [vmem:[#allocation6 + $0x340] sm:$0xff]  }
 0x763   :  { %5962 = vmatmul.mubr.bf16.gmra.mrb[216].mxu1 %v13943_v17  ;;  %7418 = vmatprep.mubr.bf16.mxu0 %v6217_v1 }
 0x764   :  { %7419 = vmatmul.mubr.bf16.gmra.mrb[212].mxu0 %v6209_v31  ;;  %5969 = vmatprep.mubr.bf16.mxu1 %v13948_v60 }
 0x765   :  { %12135 = vmatprep.subr.bf16.mxu0 %v14025_v3 }
 0x766   :  { %v15951_v13 = vpop.f32.mrb[72].mxu1 }
 0x767   :  { %v5757_v7 = vpop.f32.mrb[73].mxu1 }
 0x768   :  { %v15953_v6 = vpop.f32.mrb[74].mxu1 }
 0x769   :  { %v6218_v32 = vpack.c.bf16 %v15953_v6, %v15951_v13  ;;  %v5760_v42 = vpop.f32.mrb[75].mxu1 }
 0x76b   :  { %5970 = vmatmul.mubr.bf16.gmra.mrb[220].mxu1 %v13946_v39 }
 0x76c   :  { %5977 = vmatprep.mubr.bf16.mxu1 %v13951_v0 }
 0x76e   :  { %v15957_v55 = vpop.f32.mrb[76].mxu1 }
 0x76f   :  { %v5765_v62 = vpop.f32.mrb[77].mxu1 }
 0x770   :  { %v15959_v9 = vpop.f32.mrb[78].mxu1  ;;  %v13965_v62 = vld [vmem:[#allocation4 + $0xe08] ss:$16 sps:$4 sm:$0xff]  }
 0x771   :  { %v6219_v31 = vpack.c.bf16 %v15959_v9, %v15957_v55  ;;  %v5768_v12 = vpop.f32.mrb[79].mxu1 }
 0x773   :  { %5978 = vmatmul.mubr.bf16.gmra.mrb[224].mxu1 %v13949_v20 }
 0x774   :  { %5985 = vmatprep.mubr.bf16.mxu1 %v13954_v22  ;;  %v13974_v22 = vld [vmem:[#allocation4 + $0xe2c] ss:$16 sps:$4 sm:$0xff]  }
 0x776   :  { %v15963_v47 = vpop.f32.mrb[80].mxu1 }
 0x777   :  { %v5773_v41 = vpop.f32.mrb[81].mxu1 }
 0x778   :  { %v15965_v10 = vpop.f32.mrb[82].mxu1 }
 0x779   :  { %v6220_v4 = vpack.c.bf16 %v15965_v10, %v15963_v47  ;;  %v5776_v43 = vpop.f32.mrb[83].mxu1  ;;  %v14038_v10 = vld [vmem:[#allocation6 + $0x330] sm:$0xff]  }
 0x77b   :  { %5986 = vmatmul.mubr.bf16.gmra.mrb[228].mxu1 %v13952_v16 }
 0x77c   :  { %5993 = vmatprep.mubr.bf16.mxu1 %v13957_v25 }
 0x77e   :  { %v15969_v48 = vpop.f32.mrb[84].mxu1 }
 0x77f   :  { %v5781_v24 = vpop.f32.mrb[85].mxu1 }
 0x780   :  { %v15971_v14 = vpop.f32.mrb[86].mxu1 }
 0x781   :  { %v6221_v44 = vpack.c.bf16 %v15971_v14, %v15969_v48  ;;  %v5784_v19 = vpop.f32.mrb[87].mxu1  ;;  %v11959_v27 = vpop.f32.mrb[152].mxu0 }
 0x782   :  { %v11960_v40 = vpop.f32.mrb[153].mxu0 }
 0x783   :  { %v11961_v37 = vadd.f32 %v11960_v40, %v11959_v27  ;;  %5994 = vmatmul.mubr.bf16.gmra.mrb[232].mxu1 %v13955_v29  ;;  %v11962_v46 = vpop.f32.mrb[154].mxu0  ;;  %v13972_v40 = vld [vmem:[#allocation4 + $0xe28] ss:$16 sps:$4 sm:$0xff]  }
 0x784   :  { %v11963_v28 = vpop.f32.mrb[155].mxu0  ;;  %6001 = vmatprep.mubr.bf16.mxu1 %v13960_v36 }
 0x785   :  { %v15976_v38 = vadd.f32 %v11961_v37, %v15856_v49  ;;  %v11964_v33 = vadd.f32 %v11963_v28, %v11962_v46  ;;  %v13981_v46 = vld [vmem:[#allocation4 + $0xe4c] ss:$16 sps:$4 sm:$0xff]  }
 0x786   :  { %v15978_v63 = vpop.f32.mrb[88].mxu1 }
 0x787   :  { %v15981_v59 = vadd.f32 %v11964_v33, %v15861_v34  ;;  %v5789_v11 = vpop.f32.mrb[89].mxu1 }
 0x788   :  { %v15983_v53 = vpop.f32.mrb[90].mxu1 }
 0x789   :  { %v6222_v51 = vpack.c.bf16 %v15983_v53, %v15978_v63  ;;  %v5792_v50 = vpop.f32.mrb[91].mxu1  ;;  %v11965_v17 = vpop.f32.mrb[156].mxu0  ;;  %v14009_v53 = vld [vmem:[#allocation4 + $0xf4c] ss:$16 sps:$4 sm:$0xff]  }
 0x78a   :  { %v11966_v57 = vpop.f32.mrb[157].mxu0 }
 0x78b   :  { %v11967_v60 = vadd.f32 %v11966_v57, %v11965_v17  ;;  %6002 = vmatmul.mubr.bf16.gmra.mrb[236].mxu1 %v13958_v2  ;;  %v11968_v49 = vpop.f32.mrb[158].mxu0 }
 0x78c   :  { %v11969_v1 = vpop.f32.mrb[159].mxu0  ;;  %6009 = vmatprep.mubr.bf16.mxu1 %v13967_v21 }
 0x78d   :  { %v15988_v34 = vadd.f32 %v11967_v60, %v15868_v8  ;;  %v11970_v7 = vadd.f32 %v11969_v1, %v11968_v49  ;;  %v13979_v49 = vld [vmem:[#allocation4 + $0xe48] ss:$16 sps:$4 sm:$0xff]  }
 0x78e   :  { %v15990_v39 = vpop.f32.mrb[92].mxu1 }
 0x78f   :  { %v15993_v0 = vadd.f32 %v11970_v7, %v15873_v26  ;;  %v5797_v42 = vpop.f32.mrb[93].mxu1  ;;  %v13988_v7 = vld [vmem:[#allocation4 + $0xe6c] ss:$16 sps:$4 sm:$0xff]  }
 0x790   :  { %v15995_v20 = vpop.f32.mrb[94].mxu1 }
 0x791   :  { %v6223_v12 = vpack.c.bf16 %v15995_v20, %v15990_v39  ;;  %v5800_v41 = vpop.f32.mrb[95].mxu1  ;;  %v11971_v16 = vpop.f32.mrb[160].mxu0  ;;  %v14012_v20 = vld [vmem:[#allocation4 + $0xf6c] ss:$16 sps:$4 sm:$0xff]  }
 0x792   :  { %v11972_v25 = vpop.f32.mrb[161].mxu0 }
 0x793   :  { %v11973_v8 = vadd.f32 %v11972_v25, %v11971_v16  ;;  %6010 = vmatmul.mubr.bf16.gmra.mrb[240].mxu1 %v13965_v62  ;;  %v11974_v43 = vpop.f32.mrb[162].mxu0 }
 0x794   :  { %v11975_v24 = vpop.f32.mrb[163].mxu0  ;;  %6017 = vmatprep.mubr.bf16.mxu1 %v13974_v22 }
 0x795   :  { %v16000_v29 = vadd.f32 %v11973_v8, %v15880_v18  ;;  %v11976_v26 = vadd.f32 %v11975_v24, %v11974_v43 }
 0x796   :  { %v16002_v36 = vpop.f32.mrb[96].mxu1 }
 0x797   :  { %v16005_v19 = vadd.f32 %v11976_v26, %v15885_v15  ;;  %v5805_v27 = vpop.f32.mrb[97].mxu1  ;;  %v13986_v26 = vld [vmem:[#allocation4 + $0xe68] ss:$16 sps:$4 sm:$0xff]  }
 0x798   :  { %v16007_v37 = vpop.f32.mrb[98].mxu1 }
 0x799   :  { %v6224_v28 = vpack.c.bf16 %v16007_v37, %v16002_v36  ;;  %v5808_v33 = vpop.f32.mrb[99].mxu1  ;;  %v11977_v11 = vpop.f32.mrb[164].mxu0  ;;  %v14010_v36 = vld [vmem:[#allocation4 + $0xf68] ss:$16 sps:$4 sm:$0xff]  }
 0x79a   :  { %v11978_v2 = vpop.f32.mrb[165].mxu0 }
 0x79b   :  { %v11979_v21 = vadd.f32 %v11978_v2, %v11977_v11  ;;  %6018 = vmatmul.mubr.bf16.gmra.mrb[244].mxu1 %v13972_v40  ;;  %v11980_v18 = vpop.f32.mrb[166].mxu0 }
 0x79c   :  { %v11981_v50 = vpop.f32.mrb[167].mxu0  ;;  %6025 = vmatprep.mubr.bf16.mxu1 %v13981_v46  ;;  %v13991_v46 = vld [vmem:[#allocation4 + $0xe8c] ss:$16 sps:$4 sm:$0xff]  }
 0x79d   :  { %v11982_v17 = vadd.f32 %v11981_v50, %v11980_v18  ;;  %v16012_v15 = vadd.f32 %v11979_v21, %v15892_v23  ;;  %v14026_v21 = vld [vmem:[#allocation6 + $0x300] sm:$0xff]   ;;  %v14027_v50 = vld [vmem:[#allocation6 + $0x348] sm:$0xff]  }
 0x79e   :  { %v16014_v57 = vpop.f32.mrb[100].mxu1 }
 0x79f   :  { %v5813_v60 = vpop.f32.mrb[101].mxu1  ;;  %v16017_v1 = vadd.f32 %v11982_v17, %v15897_v56 }
 0x7a0   :  { %v16019_v3 = vpop.f32.mrb[102].mxu1 }
 0x7a1   :  { %v6225_v42 = vpack.c.bf16 %v16019_v3, %v16014_v57  ;;  %v5816_v62 = vpop.f32.mrb[103].mxu1  ;;  %v11983_v22 = vpop.f32.mrb[168].mxu0  ;;  %v14018_v3 = vld [vmem:[#allocation4 + $0xfac] ss:$16 sps:$4 sm:$0xff]  }
 0x7a2   :  { %v11984_v41 = vpop.f32.mrb[169].mxu0 }
 0x7a3   :  { %v11985_v16 = vadd.f32 %v11984_v41, %v11983_v22  ;;  %6026 = vmatmul.mubr.bf16.gmra.mrb[248].mxu1 %v13979_v49  ;;  %v11986_v23 = vpop.f32.mrb[170].mxu0  ;;  %v14028_v49 = vld [vmem:[#allocation6 + $0x308] sm:$0xff]   ;;  %v14029_v22 = vld [vmem:[#allocation6 + $0x350] sm:$0xff]  }
 0x7a4   :  { %v11987_v25 = vpop.f32.mrb[171].mxu0  ;;  %6033 = vmatprep.mubr.bf16.mxu1 %v13988_v7 }
 0x7a5   :  { %v11988_v8 = vadd.f32 %v11987_v25, %v11986_v23  ;;  %v16024_v43 = vadd.f32 %v11985_v16, %v15904_v61  ;;  %v13989_v16 = vld [vmem:[#allocation4 + $0xe88] ss:$16 sps:$4 sm:$0xff]  }
 0x7a6   :  { %v5819_v56 = vpop.f32.mrb[104].mxu1 }
 0x7a7   :  { %v5821_v24 = vpop.f32.mrb[105].mxu1  ;;  %v16027_v27 = vadd.f32 %v11988_v8, %v15907_v52  ;;  %v13994_v8 = vld [vmem:[#allocation4 + $0xeac] ss:$16 sps:$4 sm:$0xff]  }
 0x7a8   :  { %v5822_v40 = vpop.f32.mrb[106].mxu1 }
 0x7a9   :  { %v6226_v33 = vpack.c.bf16 %v5822_v40, %v5819_v56  ;;  %v5824_v11 = vpop.f32.mrb[107].mxu1  ;;  %v11989_v2 = vpop.f32.mrb[172].mxu0 }
 0x7aa   :  { %v11990_v18 = vpop.f32.mrb[173].mxu0 }
 0x7ab   :  { %v11991_v17 = vadd.f32 %v11990_v18, %v11989_v2  ;;  %6034 = vmatmul.mubr.bf16.gmra.mrb[252].mxu1 %v13986_v26  ;;  %v11992_v60 = vpop.f32.mrb[174].mxu0  ;;  %7604 = vmatprep.mubr.bf16.mxu0 %v6226_v33  ;;  %v14031_v26 = vld [vmem:[#allocation6 + $0x358] sm:$0xff]  }
 0x7ac   :  { %v11993_v61 = vpop.f32.mrb[175].mxu0  ;;  %7605 = vmatmul.mubr.bf16.vlgmr.msra.gmra.mrb[216].mxu0 %v6218_v32  ;;  %6041 = vmatprep.mubr.bf16.mxu1 %v13991_v46  ;;  %v14030_v32 = vld [vmem:[#allocation6 + $0x310] sm:$0xff]   ;;  %v14032_v33 = vld [vmem:[#allocation6 + $0x318] sm:$0xff]  }
 0x7ad   :  { %v11994_v52 = vadd.f32 %v11993_v61, %v11992_v60  ;;  %12136 = vmatpush3.bf16.msra.mxu0 %v14026_v21  ;;  %v16033_v7 = vadd.f32 %v11991_v17, %v15913_v35  ;;  %v14033_v21 = vld [vmem:[#allocation6 + $0x360] sm:$0xff]   ;;  %v13997_v61 = vld [vmem:[#allocation4 + $0xecc] ss:$16 sps:$4 sm:$0xff]  }
 0x7ae   :  { %v5827_v62 = vpop.f32.mrb[108].mxu1  ;;  %12137 = vmatprep.subr.bf16.mxu0 %v14027_v50  ;;  %v13992_v50 = vld [vmem:[#allocation4 + $0xea8] ss:$16 sps:$4 sm:$0xff]  }
 0x7af   :  { %v5829_v41 = vpop.f32.mrb[109].mxu1  ;;  %v16036_v23 = vadd.f32 %v11994_v52, %v15916_v45 }
 0x7b0   :  { %v5830_v25 = vpop.f32.mrb[110].mxu1 }
 0x7b1   :  { %v6227_v56 = vpack.c.bf16 %v5830_v25, %v5827_v62  ;;  %v5832_v13 = vpop.f32.mrb[111].mxu1  ;;  %v11995_v6 = vpop.f32.mrb[176].mxu0  ;;  %12138 = vmatpush3.bf16.msra.mxu0 %v14028_v49  ;;  %v14035_v62 = vld [vmem:[#allocation6 + $0x368] sm:$0xff]  }
 0x7b2   :  { %v11996_v24 = vpop.f32.mrb[177].mxu0  ;;  %12139 = vmatprep.subr.bf16.mxu0 %v14029_v22 }
 0x7b3   :  { %v11997_v35 = vadd.f32 %v11996_v24, %v11995_v6  ;;  %6042 = vmatmul.mubr.bf16.gmra.mrb[148].mxu1 %v13989_v16  ;;  %v11998_v40 = vpop.f32.mrb[178].mxu0  ;;  %7612 = vmatprep.mubr.bf16.mxu0 %v6227_v56  ;;  %v14036_v16 = vld [vmem:[#allocation6 + $0x328] sm:$0xff]   ;;  %v14037_v56 = vld [vmem:[#allocation6 + $0x370] sm:$0xff]  }
 0x7b4   :  { %v11999_v46 = vpop.f32.mrb[179].mxu0  ;;  %7613 = vmatmul.mubr.bf16.gmra.mrb[220].mxu0 %v6219_v31  ;;  %6049 = vmatprep.mubr.bf16.mxu1 %v13994_v8  ;;  %v14034_v31 = vld [vmem:[#allocation6 + $0x320] sm:$0xff]   ;;  %v13995_v6 = vld [vmem:[#allocation4 + $0xec8] ss:$16 sps:$4 sm:$0xff]  }
 0x7b5   :  { %v12000_v45 = vadd.f32 %v11999_v46, %v11998_v40  ;;  %12140 = vmatpush3.bf16.msra.mxu0 %v14030_v32  ;;  %v16042_v11 = vadd.f32 %v11997_v35, %v15922_v58  ;;  %v13998_v46 = vld [vmem:[#allocation4 + $0xee8] ss:$16 sps:$4 sm:$0xff]  }
 0x7b6   :  { %v5835_v2 = vpop.f32.mrb[112].mxu1  ;;  %12141 = vmatprep.subr.bf16.mxu0 %v14031_v26  ;;  %v14000_v26 = vld [vmem:[#allocation4 + $0xeec] ss:$16 sps:$4 sm:$0xff]  }
 0x7b7   :  { %v5837_v18 = vpop.f32.mrb[113].mxu1  ;;  %v16045_v17 = vadd.f32 %v12000_v45, %v15925_v5 }
 0x7b8   :  { %v5838_v60 = vpop.f32.mrb[114].mxu1 }
 0x7b9   :  { %v6228_v52 = vpack.c.bf16 %v5838_v60, %v5835_v2  ;;  %v5840_v55 = vpop.f32.mrb[115].mxu1  ;;  %v12001_v9 = vpop.f32.mrb[180].mxu0  ;;  %12142 = vmatpush3.bf16.msra.mxu0 %v14032_v33  ;;  %v14003_v33 = vld [vmem:[#allocation4 + $0xf0c] ss:$16 sps:$4 sm:$0xff]  }
 0x7ba   :  { %v12002_v49 = vpop.f32.mrb[181].mxu0  ;;  %12143 = vmatprep.subr.bf16.mxu0 %v14033_v21 }
 0x7bb   :  { %v12003_v58 = vadd.f32 %v12002_v49, %v12001_v9  ;;  %6050 = vmatmul.mubr.bf16.gmra.mrb[152].mxu1 %v13992_v50  ;;  %v12004_v22 = vpop.f32.mrb[182].mxu0  ;;  %7620 = vmatprep.mubr.bf16.mxu0 %v6228_v52  ;;  %v14006_v50 = vld [vmem:[#allocation4 + $0xf2c] ss:$16 sps:$4 sm:$0xff]   ;;  %v14004_v9 = vld [vmem:[#allocation4 + $0xf28] ss:$16 sps:$4 sm:$0xff]  }
 0x7bc   :  { %v12005_v41 = vpop.f32.mrb[183].mxu0  ;;  %7621 = vmatmul.mubr.bf16.gmra.mrb[224].mxu0 %v6220_v4  ;;  %6057 = vmatprep.mubr.bf16.mxu1 %v13997_v61  ;;  %v14039_v4 = vld [vmem:[#allocation6 + $0x378] sm:$0xff]  }
 0x7bd   :  { %v12006_v5 = vadd.f32 %v12005_v41, %v12004_v22  ;;  %12144 = vmatpush3.bf16.msra.mxu0 %v14034_v31  ;;  %v16051_v25 = vadd.f32 %v12003_v58, %v15931_v30  ;;  %v14040_v30 = vld [vmem:[#allocation6 + $0x338] sm:$0xff]  }
 0x7be   :  { %v5843_v8 = vpop.f32.mrb[116].mxu1  ;;  %12145 = vmatprep.subr.bf16.mxu0 %v14035_v62  ;;  %v14007_v58 = vld [vmem:[#allocation4 + $0xf48] ss:$16 sps:$4 sm:$0xff]  }
 0x7bf   :  { %v5845_v13 = vpop.f32.mrb[117].mxu1  ;;  %v16054_v32 = vadd.f32 %v12006_v5, %v15934_v54 }
 0x7c0   :  { %v5846_v24 = vpop.f32.mrb[118].mxu1 }
 0x7c1   :  { %v6229_v35 = vpack.c.bf16 %v5846_v24, %v5843_v8  ;;  %v5848_v47 = vpop.f32.mrb[119].mxu1  ;;  %12146 = vmatpush3.bf16.msra.mxu0 %v14036_v16 }
 0x7c2   :  { %12147 = vmatprep.subr.bf16.mxu0 %v14037_v56  ;;  %v14016_v47 = vld [vmem:[#allocation4 + $0xfa8] ss:$16 sps:$4 sm:$0xff]  }
 0x7c3   :  { %6058 = vmatmul.mubr.bf16.gmra.mrb[156].mxu1 %v13995_v6  ;;  %7628 = vmatprep.mubr.bf16.mxu0 %v6229_v35  ;;  %v14013_v6 = vld [vmem:[#allocation4 + $0xf88] ss:$16 sps:$4 sm:$0xff]  }
 0x7c4   :  { %7629 = vmatmul.mubr.bf16.gmra.mrb[228].mxu0 %v6221_v44  ;;  %6065 = vmatprep.mubr.bf16.mxu1 %v14000_v26  ;;  %v14001_v44 = vld [vmem:[#allocation4 + $0xf08] ss:$16 sps:$4 sm:$0xff]  }
 0x7c5   :  { %12148 = vmatpush3.bf16.msra.mxu0 %v14038_v10 }
 0x7c6   :  { %v5851_v40 = vpop.f32.mrb[120].mxu1  ;;  %12149 = vmatprep.subr.bf16.mxu0 %v14039_v4  ;;  %v14021_v4 = vld [vmem:[#allocation4 + $0xfcc] ss:$16 sps:$4 sm:$0xff]  }
 0x7c7   :  { %v5853_v54 = vpop.f32.mrb[121].mxu1 }
 0x7c8   :  { %v5854_v45 = vpop.f32.mrb[122].mxu1 }
 0x7c9   :  { %v6230_v2 = vpack.c.bf16 %v5854_v45, %v5851_v40  ;;  %v5856_v21 = vpop.f32.mrb[123].mxu1  ;;  %12150 = vmatpush3.bf16.msra.mxu0 %v14040_v30 }
 0x7ca   :  { %v14019_v21 = vld [vmem:[#allocation4 + $0xfc8] ss:$16 sps:$4 sm:$0xff]  }
 0x7cb   :  { %6066 = vmatmul.mubr.bf16.gmra.mrb[160].mxu1 %v13998_v46  ;;  %7636 = vmatprep.mubr.bf16.mxu0 %v6230_v2  ;;  %v16987_v46 = vld [vmem:[#allocation25_spill] sm:$0xff] }
 0x7cc   :  { %7637 = vmatmul.mubr.bf16.gmra.mrb[232].mxu0 %v6222_v51  ;;  %6073 = vmatprep.mubr.bf16.mxu1 %v14003_v33 }
 0x7ce   :  { %v5859_v48 = vpop.f32.mrb[124].mxu1 }
 0x7cf   :  { %v5861_v14 = vpop.f32.mrb[125].mxu1 }
 0x7d0   :  { %v5862_v18 = vpop.f32.mrb[126].mxu1 }
 0x7d1   :  { %v6231_v60 = vpack.c.bf16 %v5862_v18, %v5859_v48  ;;  %v5864_v61 = vpop.f32.mrb[127].mxu1  ;;  %v16988_v18 = vld [vmem:[#allocation26_spill] sm:$0xff] }
 0x7d3   :  { %6074 = vmatmul.mubr.bf16.gmra.mrb[164].mxu1 %v14001_v44  ;;  %7644 = vmatprep.mubr.bf16.mxu0 %v6231_v60  ;;  %v14024_v44 = vld [vmem:[#allocation4 + $0xfec] ss:$16 sps:$4 sm:$0xff]  }
 0x7d4   :  { %7645 = vmatmul.mubr.bf16.gmra.mrb[236].mxu0 %v6223_v12  ;;  %6081 = vmatprep.mubr.bf16.mxu1 %v14006_v50 }
 0x7d6   :  { %v5867_v52 = vpop.f32.mrb[128].mxu1 }
 0x7d7   :  { %v5869_v55 = vpop.f32.mrb[129].mxu1 }
 0x7d8   :  { %v5870_v63 = vpop.f32.mrb[130].mxu1 }
 0x7d9   :  { %v6232_v51 = vpack.c.bf16 %v5870_v63, %v5867_v52  ;;  %v5872_v31 = vpop.f32.mrb[131].mxu1 }
 0x7db   :  { %6082 = vmatmul.mubr.bf16.gmra.mrb[168].mxu1 %v14004_v9  ;;  %7652 = vmatprep.mubr.bf16.mxu0 %v6232_v51 }
 0x7dc   :  { %7653 = vmatmul.mubr.bf16.gmra.mrb[240].mxu0 %v6224_v28  ;;  %6089 = vmatprep.mubr.bf16.mxu1 %v14009_v53  ;;  %v14015_v28 = vld [vmem:[#allocation4 + $0xf8c] ss:$16 sps:$4 sm:$0xff]  }
 0x7de   :  { %v5875_v49 = vpop.f32.mrb[132].mxu1 }
 0x7df   :  { %v5877_v62 = vpop.f32.mrb[133].mxu1 }
 0x7e0   :  { %v5878_v39 = vpop.f32.mrb[134].mxu1 }
 0x7e1   :  { %v6233_v12 = vpack.c.bf16 %v5878_v39, %v5875_v49  ;;  %v5880_v22 = vpop.f32.mrb[135].mxu1  ;;  %v16989_v49 = vld [vmem:[#allocation27_spill] sm:$0xff] }
 0x7e3   :  { %6090 = vmatmul.mubr.bf16.gmra.mrb[172].mxu1 %v14007_v58  ;;  %7660 = vmatprep.mubr.bf16.mxu0 %v6233_v12 }
 0x7e4   :  { %7661 = vmatmul.mubr.bf16.gmra.mrb[244].mxu0 %v6225_v42  ;;  %6097 = vmatprep.mubr.bf16.mxu1 %v14012_v20  ;;  %v14022_v20 = vld [vmem:[#allocation4 + $0xfe8] ss:$16 sps:$4 sm:$0xff]  }
 0x7e6   :  { %v16071_v41 = vpop.f32.mrb[136].mxu1 }
 0x7e7   :  { %v5885_v5 = vpop.f32.mrb[137].mxu1 }
 0x7e8   :  { %v16073_v37 = vpop.f32.mrb[138].mxu1  ;;  %v16990_v5 = vld [vmem:[#allocation28_spill] sm:$0xff] }
 0x7e9   :  { %v6234_v16 = vpack.c.bf16 %v16073_v37, %v16071_v41  ;;  %v5888_v8 = vpop.f32.mrb[139].mxu1 }
 0x7eb   :  { %6098 = vmatmul.mubr.bf16.gmra.mrb[176].mxu1 %v14010_v36 }
 0x7ec   :  { %6105 = vmatprep.mubr.bf16.mxu1 %v14015_v28 }
 0x7ee   :  { %v16077_v56 = vpop.f32.mrb[140].mxu1 }
 0x7ef   :  { %v5893_v13 = vpop.f32.mrb[141].mxu1 }
 0x7f0   :  { %v16079_v57 = vpop.f32.mrb[142].mxu1 }
 0x7f1   :  { %v6235_v42 = vpack.c.bf16 %v16079_v57, %v16077_v56  ;;  %v5896_v24 = vpop.f32.mrb[143].mxu1 }
 0x7f2   :  { %v14041_v24 = vld [vmem:[#allocation6 + $0x3c0] sm:$0xff]  }
 0x7f3   :  { %6106 = vmatmul.mubr.bf16.gmra.mrb[180].mxu1 %v14013_v6  ;;  %12199 = vmatprep.subr.bf16.mxu0 %v14041_v24 }
 0x7f4   :  { %6113 = vmatprep.mubr.bf16.mxu1 %v14018_v3 }
 0x7f6   :  { %v16083_v26 = vpop.f32.mrb[144].mxu1 }
 0x7f7   :  { %v5901_v35 = vpop.f32.mrb[145].mxu1 }
 0x7f8   :  { %v16085_v10 = vpop.f32.mrb[146].mxu1 }
 0x7f9   :  { %v6236_v30 = vpack.c.bf16 %v16085_v10, %v16083_v26  ;;  %v5904_v40 = vpop.f32.mrb[147].mxu1  ;;  %v17005_v26 = vld [vmem:[#allocation43_spill] sm:$0xff] }
 0x7fb   :  { %6114 = vmatmul.mubr.bf16.gmra.mrb[184].mxu1 %v14016_v47 }
 0x7fc   :  { %6121 = vmatprep.mubr.bf16.mxu1 %v14021_v4  ;;  %v16991_v4 = vld [vmem:[#allocation29_spill] sm:$0xff] }
 0x7fe   :  { %v5907_v54 = vpop.f32.mrb[188].mxu1 }
 0x7ff   :  { %v16090_v45 = vadd.f32 %v5907_v54, %v16987_v46  ;;  %v5909_v33 = vpop.f32.mrb[189].mxu1  ;;  %v12023_v2 = vpop.f32.mrb[184].mxu0 }
 0x800   :  { %v5910_v48 = vpop.f32.mrb[190].mxu1  ;;  %v12024_v14 = vpop.f32.mrb[185].mxu0 }
 0x801   :  { %v16093_v50 = vadd.f32 %v5910_v48, %v16988_v18  ;;  %v12025_v60 = vadd.f32 %v12024_v14, %v12023_v2  ;;  %v5912_v61 = vpop.f32.mrb[191].mxu1  ;;  %v12026_v52 = vpop.f32.mrb[186].mxu0 }
 0x802   :  { %v12027_v55 = vpop.f32.mrb[187].mxu0 }
 0x803   :  { %v6237_v9 = vpack.c.bf16 %v16093_v50, %v16090_v45  ;;  %v12028_v63 = vadd.f32 %v12027_v55, %v12026_v52  ;;  %6122 = vmatmul.mubr.bf16.gmra.mrb[0].mxu1 %v14019_v21  ;;  %v16098_v53 = vadd.f32 %v12025_v60, %v15976_v38  ;;  %v16992_v21 = vld [vmem:[#allocation30_spill] sm:$0xff]  ;;  %v17007_v45 = vld [vmem:[#allocation45_spill] sm:$0xff] }
 0x804   :  { %6129 = vmatprep.mubr.bf16.mxu1 %v14024_v44 }
 0x805   :  { %v16101_v51 = vadd.f32 %v12028_v63, %v15981_v59  ;;  %v16993_v63 = vld [vmem:[#allocation31_spill] sm:$0xff] }
 0x806   :  { %v5915_v31 = vpop.f32.mrb[192].mxu1 }
 0x807   :  { %v16104_v62 = vadd.f32 %v5915_v31, %v16989_v49  ;;  %v5917_v58 = vpop.f32.mrb[193].mxu1  ;;  %v12029_v39 = vpop.f32.mrb[188].mxu0 }
 0x808   :  { %v5918_v12 = vpop.f32.mrb[194].mxu1  ;;  %v12030_v22 = vpop.f32.mrb[189].mxu0 }
 0x809   :  { %v16107_v36 = vadd.f32 %v5918_v12, %v16990_v5  ;;  %v12031_v28 = vadd.f32 %v12030_v22, %v12029_v39  ;;  %v5920_v8 = vpop.f32.mrb[195].mxu1  ;;  %v12032_v38 = vpop.f32.mrb[190].mxu0  ;;  %v16994_v12 = vld [vmem:[#allocation32_spill] sm:$0xff] }
 0x80a   :  { %v12033_v13 = vpop.f32.mrb[191].mxu0 }
 0x80b   :  { %v6238_v59 = vpack.c.bf16 %v16107_v36, %v16104_v62  ;;  %v12034_v6 = vadd.f32 %v12033_v13, %v12032_v38  ;;  %6130 = vmatmul.mubr.bf16.gmra.mrb[4].mxu1 %v14022_v20  ;;  %v16112_v3 = vadd.f32 %v12031_v28, %v15988_v34  ;;  %v17010_v62 = vld [vmem:[#allocation48_spill] sm:$0xff] }
 0x80d   :  { %v16115_v35 = vadd.f32 %v12034_v6, %v15993_v0 }
 0x80e   :  { %v5923_v47 = vpop.f32.mrb[196].mxu1 }
 0x80f   :  { %v16118_v40 = vadd.f32 %v5923_v47, %v16991_v4  ;;  %v5925_v54 = vpop.f32.mrb[197].mxu1  ;;  %v12035_v46 = vpop.f32.mrb[192].mxu0  ;;  %v16995_v47 = vld [vmem:[#allocation33_spill] sm:$0xff] }
 0x810   :  { %v5926_v33 = vpop.f32.mrb[198].mxu1  ;;  %v12036_v2 = vpop.f32.mrb[193].mxu0 }
 0x811   :  { %v16121_v48 = vadd.f32 %v5926_v33, %v16992_v21  ;;  %v12037_v14 = vadd.f32 %v12036_v2, %v12035_v46  ;;  %v5928_v44 = vpop.f32.mrb[199].mxu1  ;;  %v12038_v34 = vpop.f32.mrb[194].mxu0  ;;  %v16996_v21 = vld [vmem:[#allocation34_spill] sm:$0xff] }
 0x812   :  { %v12039_v18 = vpop.f32.mrb[195].mxu0 }
 0x813   :  { %v6239_v0 = vpack.c.bf16 %v16121_v48, %v16118_v40  ;;  %v12040_v60 = vadd.f32 %v12039_v18, %v12038_v34  ;;  %v16126_v61 = vadd.f32 %v12037_v14, %v16000_v29  ;;  %v17012_v40 = vld [vmem:[#allocation50_spill] sm:$0xff] }
 0x815   :  { %v16129_v52 = vadd.f32 %v12040_v60, %v16005_v19 }
 0x816   :  { %v5931_v55 = vpop.f32.mrb[200].mxu1 }
 0x817   :  { %v16132_v31 = vadd.f32 %v5931_v55, %v16993_v63  ;;  %v5933_v49 = vpop.f32.mrb[201].mxu1  ;;  %v12041_v58 = vpop.f32.mrb[196].mxu0 }
 0x818   :  { %v5934_v39 = vpop.f32.mrb[202].mxu1  ;;  %v12042_v20 = vpop.f32.mrb[197].mxu0 }
 0x819   :  { %v16135_v22 = vadd.f32 %v5934_v39, %v16994_v12  ;;  %v12043_v5 = vadd.f32 %v12042_v20, %v12041_v58  ;;  %v5936_v28 = vpop.f32.mrb[203].mxu1  ;;  %v12044_v8 = vpop.f32.mrb[198].mxu0  ;;  %v16997_v58 = vld [vmem:[#allocation35_spill] sm:$0xff] }
 0x81a   :  { %v12045_v38 = vpop.f32.mrb[199].mxu0 }
 0x81b   :  { %v6240_v29 = vpack.c.bf16 %v16135_v22, %v16132_v31  ;;  %v16140_v19 = vadd.f32 %v12043_v5, %v16012_v15  ;;  %v12046_v13 = vadd.f32 %v12045_v38, %v12044_v8  ;;  %v16998_v8 = vld [vmem:[#allocation36_spill] sm:$0xff] }
 0x81c   :  { %v17014_v22 = vld [vmem:[#allocation52_spill] sm:$0xff] }
 0x81d   :  { %v16143_v6 = vadd.f32 %v12046_v13, %v16017_v1 }
 0x81e   :  { %v5939_v24 = vpop.f32.mrb[204].mxu1 }
 0x81f   :  { %v16146_v4 = vadd.f32 %v5939_v24, %v16995_v47  ;;  %v5941_v54 = vpop.f32.mrb[205].mxu1  ;;  %v12047_v46 = vpop.f32.mrb[200].mxu0 }
 0x820   :  { %v5942_v33 = vpop.f32.mrb[206].mxu1  ;;  %v12048_v2 = vpop.f32.mrb[201].mxu0 }
 0x821   :  { %v16149_v14 = vadd.f32 %v5942_v33, %v16996_v21  ;;  %v12049_v44 = vadd.f32 %v12048_v2, %v12047_v46  ;;  %v5944_v34 = vpop.f32.mrb[207].mxu1  ;;  %v12050_v18 = vpop.f32.mrb[202].mxu0  ;;  %v14043_v2 = vld [vmem:[#allocation6 + $0x3c8] sm:$0xff]  }
 0x822   :  { %v12051_v15 = vpop.f32.mrb[203].mxu0  ;;  %v16999_v34 = vld [vmem:[#allocation37_spill] sm:$0xff] }
 0x823   :  { %v6241_v60 = vpack.c.bf16 %v16149_v14, %v16146_v4  ;;  %v16154_v1 = vadd.f32 %v12049_v44, %v16024_v43  ;;  %v12052_v55 = vadd.f32 %v12051_v15, %v12050_v18  ;;  %v17016_v4 = vld [vmem:[#allocation54_spill] sm:$0xff] }
 0x825   :  { %v16157_v63 = vadd.f32 %v12052_v55, %v16027_v27  ;;  %v14042_v27 = vld [vmem:[#allocation6 + $0x380] sm:$0xff]  }
 0x826   :  { %v5947_v49 = vpop.f32.mrb[208].mxu1 }
 0x827   :  { %v5948_v39 = vadd.f32 %v5947_v49, %v16997_v58  ;;  %v5949_v20 = vpop.f32.mrb[209].mxu1  ;;  %v12053_v12 = vpop.f32.mrb[204].mxu0  ;;  %v14044_v49 = vld [vmem:[#allocation6 + $0x388] sm:$0xff]  }
 0x828   :  { %v5950_v5 = vpop.f32.mrb[210].mxu1  ;;  %v12054_v28 = vpop.f32.mrb[205].mxu0  ;;  %v17000_v20 = vld [vmem:[#allocation38_spill] sm:$0xff] }
 0x829   :  { %v5951_v38 = vadd.f32 %v5950_v5, %v16998_v8  ;;  %v12055_v13 = vadd.f32 %v12054_v28, %v12053_v12  ;;  %v5952_v24 = vpop.f32.mrb[211].mxu1  ;;  %v12056_v47 = vpop.f32.mrb[206].mxu0 }
 0x82a   :  { %v12057_v54 = vpop.f32.mrb[207].mxu0 }
 0x82b   :  { %v6242_v46 = vpack.c.bf16 %v5951_v38, %v5948_v39  ;;  %v16162_v43 = vadd.f32 %v12055_v13, %v16033_v7  ;;  %v12058_v33 = vadd.f32 %v12057_v54, %v12056_v47  ;;  %v14045_v39 = vld [vmem:[#allocation6 + $0x3d0] sm:$0xff]   ;;  %v14047_v13 = vld [vmem:[#allocation6 + $0x3d8] sm:$0xff]   ;;  %v17001_v54 = vld [vmem:[#allocation39_spill] sm:$0xff] }
 0x82d   :  { %v16165_v21 = vadd.f32 %v12058_v33, %v16036_v23  ;;  %7846 = vmatprep.mubr.bf16.mxu0 %v6242_v46 }
 0x82e   :  { %v5955_v44 = vpop.f32.mrb[212].mxu1  ;;  %7847 = vmatmul.mubr.bf16.vlgmr.msra.gmra.mrb[248].mxu0 %v6234_v16  ;;  %v14046_v16 = vld [vmem:[#allocation6 + $0x390] sm:$0xff]  }
 0x82f   :  { %v5956_v18 = vadd.f32 %v5955_v44, %v16999_v34  ;;  %v5957_v15 = vpop.f32.mrb[213].mxu1  ;;  %v12059_v55 = vpop.f32.mrb[208].mxu0  ;;  %12200 = vmatpush3.bf16.msra.mxu0 %v14042_v27  ;;  %v14049_v34 = vld [vmem:[#allocation6 + $0x3e0] sm:$0xff]  }
 0x830   :  { %v5958_v7 = vpop.f32.mrb[214].mxu1  ;;  %v12060_v58 = vpop.f32.mrb[209].mxu0  ;;  %12201 = vmatprep.subr.bf16.mxu0 %v14043_v2 }
 0x831   :  { %v5959_v12 = vadd.f32 %v5958_v7, %v17000_v20  ;;  %v12061_v23 = vadd.f32 %v12060_v58, %v12059_v55  ;;  %v5960_v5 = vpop.f32.mrb[215].mxu1  ;;  %v12062_v28 = vpop.f32.mrb[210].mxu0 }
 0x832   :  { %v12063_v8 = vpop.f32.mrb[211].mxu0 }
 0x833   :  { %v6243_v38 = vpack.c.bf16 %v5959_v12, %v5956_v18  ;;  %v16173_v41 = vadd.f32 %v12061_v23, %v16042_v11  ;;  %v12064_v37 = vadd.f32 %v12063_v8, %v12062_v28  ;;  %12202 = vmatpush3.bf16.msra.mxu0 %v14044_v49  ;;  %v14048_v11 = vld [vmem:[#allocation6 + $0x398] sm:$0xff]   ;;  %v17002_v18 = vld [vmem:[#allocation40_spill] sm:$0xff] }
 0x834   :  { %12203 = vmatprep.subr.bf16.mxu0 %v14045_v39  ;;  %v14051_v39 = vld [vmem:[#allocation6 + $0x3e8] sm:$0xff]   ;;  %v17003_v23 = vld [vmem:[#allocation41_spill] sm:$0xff] }
 0x835   :  { %v16176_v24 = vadd.f32 %v12064_v37, %v16045_v17  ;;  %7854 = vmatprep.mubr.bf16.mxu0 %v6243_v38  ;;  %v14053_v38 = vld [vmem:[#allocation6 + $0x3f0] sm:$0xff]   ;;  %v17004_v37 = vld [vmem:[#allocation42_spill] sm:$0xff] }
 0x836   :  { %v5963_v47 = vpop.f32.mrb[216].mxu1  ;;  %7855 = vmatmul.mubr.bf16.gmra.mrb[252].mxu0 %v6235_v42  ;;  %v14050_v42 = vld [vmem:[#allocation6 + $0x3a0] sm:$0xff]  }
 0x837   :  { %v5964_v46 = vadd.f32 %v5963_v47, %v17001_v54  ;;  %v5965_v33 = vpop.f32.mrb[217].mxu1  ;;  %v12065_v27 = vpop.f32.mrb[212].mxu0  ;;  %12204 = vmatpush3.bf16.msra.mxu0 %v14046_v16  ;;  %v14055_v54 = vld [vmem:[#allocation6 + $0x3f8] sm:$0xff]  }
 0x838   :  { %v5966_v2 = vpop.f32.mrb[218].mxu1  ;;  %v12066_v44 = vpop.f32.mrb[213].mxu0  ;;  %12205 = vmatprep.subr.bf16.mxu0 %v14047_v13  ;;  %v14056_v33 = vld [vmem:[#allocation6 + $0x3b8] sm:$0xff]  }
 0x839   :  { %v5967_v15 = vadd.f32 %v5966_v2, %v17002_v18  ;;  %v12067_v17 = vadd.f32 %v12066_v44, %v12065_v27  ;;  %v5968_v55 = vpop.f32.mrb[219].mxu1  ;;  %v12068_v49 = vpop.f32.mrb[214].mxu0 }
 0x83a   :  { %v12069_v7 = vpop.f32.mrb[215].mxu0 }
 0x83b   :  { %v6244_v58 = vpack.c.bf16 %v5967_v15, %v5964_v46  ;;  %v16184_v56 = vadd.f32 %v12067_v17, %v16051_v25  ;;  %v12070_v57 = vadd.f32 %v12069_v7, %v12068_v49  ;;  %12206 = vmatpush3.bf16.msra.mxu0 %v14048_v11  ;;  %v14052_v25 = vld [vmem:[#allocation6 + $0x3a8] sm:$0xff]   ;;  %v17006_v11 = vld [vmem:[#allocation44_spill] sm:$0xff]  ;;  %v17008_v17 = vld [vmem:[#allocation46_spill] sm:$0xff] }
 0x83c   :  { %12207 = vmatprep.subr.bf16.mxu0 %v14049_v34 }
 0x83d   :  { %v16187_v20 = vadd.f32 %v12070_v57, %v16054_v32  ;;  %7862 = vmatprep.mubr.bf16.mxu0 %v6244_v58  ;;  %v14054_v32 = vld [vmem:[#allocation6 + $0x3b0] sm:$0xff]   ;;  %v17009_v57 = vld [vmem:[#allocation47_spill] sm:$0xff] }
 0x83e   :  { %v5971_v12 = vpop.f32.mrb[220].mxu1  ;;  %7863 = vmatmul.mubr.bf16.gmra.mrb[0].mxu0 %v6236_v30 }
 0x83f   :  { %v5972_v5 = vadd.f32 %v5971_v12, %v17003_v23  ;;  %v5973_v28 = vpop.f32.mrb[221].mxu1  ;;  %12208 = vmatpush3.bf16.msra.mxu0 %v14050_v42 }
 0x840   :  { %v5974_v8 = vpop.f32.mrb[222].mxu1  ;;  %12209 = vmatprep.subr.bf16.mxu0 %v14051_v39  ;;  %v17011_v28 = vld [vmem:[#allocation49_spill] sm:$0xff] }
 0x841   :  { %v5975_v16 = vadd.f32 %v5974_v8, %v17004_v37  ;;  %v5976_v13 = vpop.f32.mrb[223].mxu1 }
 0x842   :  { %v17013_v13 = vld [vmem:[#allocation51_spill] sm:$0xff] }
 0x843   :  { %v6245_v47 = vpack.c.bf16 %v5975_v16, %v5972_v5  ;;  %12210 = vmatpush3.bf16.msra.mxu0 %v14052_v25 }
 0x844   :  { %12211 = vmatprep.subr.bf16.mxu0 %v14053_v38 }
 0x845   :  { %7870 = vmatprep.mubr.bf16.mxu0 %v6245_v47 }
 0x846   :  { %v5979_v46 = vpop.f32.mrb[224].mxu1  ;;  %7871 = vmatmul.mubr.bf16.gmra.mrb[4].mxu0 %v6237_v9 }
 0x847   :  { %v5980_v10 = vadd.f32 %v5979_v46, %v17005_v26  ;;  %v5981_v30 = vpop.f32.mrb[225].mxu1  ;;  %12212 = vmatpush3.bf16.msra.mxu0 %v14054_v32 }
 0x848   :  { %v5982_v27 = vpop.f32.mrb[226].mxu1  ;;  %12213 = vmatprep.subr.bf16.mxu0 %v14055_v54 }
 0x849   :  { %v5983_v2 = vadd.f32 %v5982_v27, %v17006_v11  ;;  %v5984_v44 = vpop.f32.mrb[227].mxu1 }
 0x84a   :  { %v17017_v44 = vld [vmem:[#allocation55_spill] sm:$0xff] }
 0x84b   :  { %v6246_v34 = vpack.c.bf16 %v5983_v2, %v5980_v10  ;;  %12214 = vmatpush3.bf16.msra.mxu0 %v14056_v33  ;;  %v17015_v10 = vld [vmem:[#allocation53_spill] sm:$0xff] }
 0x84d   :  { %7878 = vmatprep.mubr.bf16.mxu0 %v6246_v34 }
 0x84e   :  { %v5987_v18 = vpop.f32.mrb[228].mxu1  ;;  %7879 = vmatmul.mubr.bf16.gmra.mrb[8].mxu0 %v6238_v59 }
 0x84f   :  { %v5988_v50 = vadd.f32 %v5987_v18, %v17007_v45  ;;  %v5989_v9 = vpop.f32.mrb[229].mxu1 }
 0x850   :  { %v5990_v15 = vpop.f32.mrb[230].mxu1 }
 0x851   :  { %v5991_v55 = vadd.f32 %v5990_v15, %v17008_v17  ;;  %v5992_v49 = vpop.f32.mrb[231].mxu1 }
 0x852   :  { %v17019_v49 = vld [vmem:[#allocation57_spill] sm:$0xff] }
 0x853   :  { %v6247_v7 = vpack.c.bf16 %v5991_v55, %v5988_v50  ;;  %v17018_v50 = vld [vmem:[#allocation56_spill] sm:$0xff] }
 0x855   :  { %7886 = vmatprep.mubr.bf16.mxu0 %v6247_v7 }
 0x856   :  { %v5995_v58 = vpop.f32.mrb[232].mxu1  ;;  %7887 = vmatmul.mubr.bf16.gmra.mrb[12].mxu0 %v6239_v0 }
 0x857   :  { %v5996_v42 = vadd.f32 %v5995_v58, %v17009_v57  ;;  %v5997_v39 = vpop.f32.mrb[233].mxu1 }
 0x858   :  { %v5998_v12 = vpop.f32.mrb[234].mxu1 }
 0x859   :  { %v5999_v36 = vadd.f32 %v5998_v12, %v17010_v62  ;;  %v6000_v59 = vpop.f32.mrb[235].mxu1  ;;  %v17020_v12 = vld [vmem:[#allocation58_spill] sm:$0xff] }
 0x85b   :  { %v6248_v23 = vpack.c.bf16 %v5999_v36, %v5996_v42 }
 0x85d   :  { %7894 = vmatprep.mubr.bf16.mxu0 %v6248_v23 }
 0x85e   :  { %v6003_v5 = vpop.f32.mrb[236].mxu1  ;;  %7895 = vmatmul.mubr.bf16.gmra.mrb[16].mxu0 %v6240_v29 }
 0x85f   :  { %v6004_v25 = vadd.f32 %v6003_v5, %v17011_v28  ;;  %v6005_v8 = vpop.f32.mrb[237].mxu1 }
 0x860   :  { %v6006_v38 = vpop.f32.mrb[238].mxu1 }
 0x861   :  { %v6007_v48 = vadd.f32 %v6006_v38, %v17012_v40  ;;  %v6008_v0 = vpop.f32.mrb[239].mxu1 }
 0x863   :  { %v6249_v37 = vpack.c.bf16 %v6007_v48, %v6004_v25  ;;  %v17021_v48 = vld [vmem:[#allocation59_spill] sm:$0xff] }
 0x865   :  { %7902 = vmatprep.mubr.bf16.mxu0 %v6249_v37 }
 0x866   :  { %v6011_v16 = vpop.f32.mrb[240].mxu1  ;;  %7903 = vmatmul.mubr.bf16.gmra.mrb[20].mxu0 %v6241_v60 }
 0x867   :  { %v16218_v47 = vadd.f32 %v6011_v16, %v17013_v13  ;;  %v6013_v32 = vpop.f32.mrb[241].mxu1 }
 0x868   :  { %v6014_v31 = vpop.f32.mrb[242].mxu1 }
 0x869   :  { %v16221_v29 = vadd.f32 %v6014_v31, %v17014_v22  ;;  %v6016_v54 = vpop.f32.mrb[243].mxu1  ;;  %v17022_v31 = vld [vmem:[#allocation60_spill] sm:$0xff] }
 0x86b   :  { %v6250_v46 = vpack.c.bf16 %v16221_v29, %v16218_v47 }
 0x86e   :  { %v6019_v26 = vpop.f32.mrb[244].mxu1 }
 0x86f   :  { %v16226_v30 = vadd.f32 %v6019_v26, %v17015_v10  ;;  %v6021_v33 = vpop.f32.mrb[245].mxu1 }
 0x870   :  { %v6022_v27 = vpop.f32.mrb[246].mxu1 }
 0x871   :  { %v16229_v14 = vadd.f32 %v6022_v27, %v17016_v4  ;;  %v6024_v60 = vpop.f32.mrb[247].mxu1 }
 0x873   :  { %v6251_v11 = vpack.c.bf16 %v16229_v14, %v16226_v30 }
 0x876   :  { %v6027_v2 = vpop.f32.mrb[248].mxu1 }
 0x877   :  { %v16234_v34 = vadd.f32 %v6027_v2, %v17017_v44  ;;  %v6029_v18 = vpop.f32.mrb[249].mxu1  ;;  %v17023_v2 = vld [vmem:[#allocation61_spill] sm:$0xff] }
 0x878   :  { %v6030_v45 = vpop.f32.mrb[250].mxu1 }
 0x879   :  { %v16237_v9 = vadd.f32 %v6030_v45, %v17018_v50  ;;  %v6032_v15 = vpop.f32.mrb[251].mxu1 }
 0x87b   :  { %v6252_v17 = vpack.c.bf16 %v16237_v9, %v16234_v34  ;;  %v17038_v34 = vld [vmem:[#allocation76_spill] sm:$0xff] }
 0x87e   :  { %v6035_v55 = vpop.f32.mrb[252].mxu1 }
 0x87f   :  { %v16242_v7 = vadd.f32 %v6035_v55, %v17019_v49  ;;  %v6037_v58 = vpop.f32.mrb[253].mxu1  ;;  %v12087_v57 = vpop.f32.mrb[216].mxu0  ;;  %v17024_v55 = vld [vmem:[#allocation62_spill] sm:$0xff] }
 0x880   :  { %v6038_v42 = vpop.f32.mrb[254].mxu1  ;;  %v12088_v39 = vpop.f32.mrb[217].mxu0 }
 0x881   :  { %v16245_v62 = vadd.f32 %v6038_v42, %v17020_v12  ;;  %v12089_v36 = vadd.f32 %v12088_v39, %v12087_v57  ;;  %v6040_v59 = vpop.f32.mrb[255].mxu1  ;;  %v12090_v23 = vpop.f32.mrb[218].mxu0 }
 0x882   :  { %v12091_v5 = vpop.f32.mrb[219].mxu0 }
 0x883   :  { %v6253_v28 = vpack.c.bf16 %v16245_v62, %v16242_v7  ;;  %v16250_v25 = vadd.f32 %v12089_v36, %v16098_v53  ;;  %v12092_v8 = vadd.f32 %v12091_v5, %v12090_v23  ;;  %v17025_v23 = vld [vmem:[#allocation63_spill] sm:$0xff]  ;;  %v17040_v7 = vld [vmem:[#allocation78_spill] sm:$0xff] }
 0x885   :  { %v16253_v38 = vadd.f32 %v12092_v8, %v16101_v51 }
 0x886   :  { %v6043_v40 = vpop.f32.mrb[148].mxu1 }
 0x887   :  { %v16256_v0 = vadd.f32 %v6043_v40, %v17021_v48  ;;  %v6045_v37 = vpop.f32.mrb[149].mxu1  ;;  %v12093_v16 = vpop.f32.mrb[220].mxu0 }
 0x888   :  { %v6046_v13 = vpop.f32.mrb[150].mxu1  ;;  %v12094_v32 = vpop.f32.mrb[221].mxu0 }
 0x889   :  { %v16259_v22 = vadd.f32 %v6046_v13, %v17022_v31  ;;  %v12095_v54 = vadd.f32 %v12094_v32, %v12093_v16  ;;  %v6048_v26 = vpop.f32.mrb[151].mxu1  ;;  %v12096_v10 = vpop.f32.mrb[222].mxu0  ;;  %v17026_v16 = vld [vmem:[#allocation64_spill] sm:$0xff] }
 0x88a   :  { %v12097_v53 = vpop.f32.mrb[223].mxu0 }
 0x88b   :  { %v6254_v33 = vpack.c.bf16 %v16259_v22, %v16256_v0  ;;  %v16264_v51 = vadd.f32 %v12095_v54, %v16112_v3  ;;  %v12098_v27 = vadd.f32 %v12097_v53, %v12096_v10  ;;  %v17042_v0 = vld [vmem:[#allocation80_spill] sm:$0xff] }
 0x88d   :  { %v16267_v4 = vadd.f32 %v12098_v27, %v16115_v35 }
 0x88e   :  { %v6051_v60 = vpop.f32.mrb[152].mxu1 }
 0x88f   :  { %v16270_v44 = vadd.f32 %v6051_v60, %v17023_v2  ;;  %v6053_v18 = vpop.f32.mrb[153].mxu1  ;;  %v12099_v45 = vpop.f32.mrb[224].mxu0  ;;  %v17027_v60 = vld [vmem:[#allocation65_spill] sm:$0xff] }
 0x890   :  { %v6054_v50 = vpop.f32.mrb[154].mxu1  ;;  %v12100_v15 = vpop.f32.mrb[225].mxu0 }
 0x891   :  { %v16273_v49 = vadd.f32 %v6054_v50, %v17024_v55  ;;  %v12101_v58 = vadd.f32 %v12100_v15, %v12099_v45  ;;  %v6056_v57 = vpop.f32.mrb[155].mxu1  ;;  %v12102_v42 = vpop.f32.mrb[226].mxu0  ;;  %v17028_v55 = vld [vmem:[#allocation66_spill] sm:$0xff] }
 0x892   :  { %v12103_v3 = vpop.f32.mrb[227].mxu0 }
 0x893   :  { %v6255_v39 = vpack.c.bf16 %v16273_v49, %v16270_v44  ;;  %v16278_v35 = vadd.f32 %v12101_v58, %v16126_v61  ;;  %v12104_v12 = vadd.f32 %v12103_v3, %v12102_v42  ;;  %v17044_v44 = vld [vmem:[#allocation82_spill] sm:$0xff] }
 0x895   :  { %v16281_v36 = vadd.f32 %v12104_v12, %v16129_v52 }
 0x896   :  { %v6059_v59 = vpop.f32.mrb[156].mxu1 }
 0x897   :  { %v16284_v5 = vadd.f32 %v6059_v59, %v17025_v23  ;;  %v6061_v8 = vpop.f32.mrb[157].mxu1  ;;  %v12105_v40 = vpop.f32.mrb[228].mxu0 }
 0x898   :  { %v6062_v48 = vpop.f32.mrb[158].mxu1  ;;  %v12106_v37 = vpop.f32.mrb[229].mxu0 }
 0x899   :  { %v16287_v13 = vadd.f32 %v6062_v48, %v17026_v16  ;;  %v12107_v32 = vadd.f32 %v12106_v37, %v12105_v40  ;;  %v6064_v31 = vpop.f32.mrb[159].mxu1  ;;  %v12108_v54 = vpop.f32.mrb[230].mxu0  ;;  %v17029_v40 = vld [vmem:[#allocation67_spill] sm:$0xff] }
 0x89a   :  { %v12109_v61 = vpop.f32.mrb[231].mxu0 }
 0x89b   :  { %v6256_v26 = vpack.c.bf16 %v16287_v13, %v16284_v5  ;;  %v16292_v52 = vadd.f32 %v12107_v32, %v16140_v19  ;;  %v12110_v10 = vadd.f32 %v12109_v61, %v12108_v54  ;;  %v17030_v54 = vld [vmem:[#allocation68_spill] sm:$0xff] }
 0x89d   :  { %v16295_v53 = vadd.f32 %v12110_v10, %v16143_v6 }
 0x89e   :  { %v6067_v27 = vpop.f32.mrb[160].mxu1 }
 0x89f   :  { %v16298_v2 = vadd.f32 %v6067_v27, %v17027_v60  ;;  %v6069_v18 = vpop.f32.mrb[161].mxu1  ;;  %v12111_v45 = vpop.f32.mrb[232].mxu0 }
 0x8a0   :  { %v6070_v50 = vpop.f32.mrb[162].mxu1  ;;  %v12112_v15 = vpop.f32.mrb[233].mxu0 }
 0x8a1   :  { %v16301_v58 = vadd.f32 %v6070_v50, %v17028_v55  ;;  %v12113_v57 = vadd.f32 %v12112_v15, %v12111_v45  ;;  %v6072_v42 = vpop.f32.mrb[163].mxu1  ;;  %v12114_v3 = vpop.f32.mrb[234].mxu0  ;;  %v17031_v55 = vld [vmem:[#allocation69_spill] sm:$0xff] }
 0x8a2   :  { %v12115_v19 = vpop.f32.mrb[235].mxu0 }
 0x8a3   :  { %v6257_v12 = vpack.c.bf16 %v16301_v58, %v16298_v2  ;;  %v16306_v6 = vadd.f32 %v12113_v57, %v16154_v1  ;;  %v12116_v59 = vadd.f32 %v12115_v19, %v12114_v3 }
 0x8a5   :  { %v16309_v23 = vadd.f32 %v12116_v59, %v16157_v63 }
 0x8a6   :  { %v6075_v8 = vpop.f32.mrb[164].mxu1 }
 0x8a7   :  { %v6076_v48 = vadd.f32 %v6075_v8, %v17029_v40  ;;  %v6077_v37 = vpop.f32.mrb[165].mxu1  ;;  %v12117_v16 = vpop.f32.mrb[236].mxu0  ;;  %v17032_v8 = vld [vmem:[#allocation70_spill] sm:$0xff] }
 0x8a8   :  { %v6078_v32 = vpop.f32.mrb[166].mxu1  ;;  %v12118_v31 = vpop.f32.mrb[237].mxu0 }
 0x8a9   :  { %v6079_v61 = vadd.f32 %v6078_v32, %v17030_v54  ;;  %v12119_v10 = vadd.f32 %v12118_v31, %v12117_v16  ;;  %v6080_v27 = vpop.f32.mrb[167].mxu1  ;;  %v12120_v60 = vpop.f32.mrb[238].mxu0 }
 0x8aa   :  { %v12121_v18 = vpop.f32.mrb[239].mxu0 }
 0x8ab   :  { %v6258_v45 = vpack.c.bf16 %v6079_v61, %v6076_v48  ;;  %v16314_v1 = vadd.f32 %v12119_v10, %v16162_v43  ;;  %v12122_v50 = vadd.f32 %v12121_v18, %v12120_v60  ;;  %v17034_v18 = vld [vmem:[#allocation72_spill] sm:$0xff] }
 0x8ad   :  { %v16317_v63 = vadd.f32 %v12122_v50, %v16165_v21  ;;  %8088 = vmatprep.mubr.bf16.mxu0 %v6258_v45 }
 0x8ae   :  { %v6083_v15 = vpop.f32.mrb[168].mxu1  ;;  %8089 = vmatmul.mubr.bf16.vlgmr.msra.gmra.mrb[24].mxu0 %v6250_v46  ;;  %v17033_v46 = vld [vmem:[#allocation71_spill] sm:$0xff] }
 0x8af   :  { %v6084_v57 = vadd.f32 %v6083_v15, %v17031_v55  ;;  %v6085_v42 = vpop.f32.mrb[169].mxu1  ;;  %v12123_v3 = vpop.f32.mrb[240].mxu0 }
 0x8b0   :  { %v6086_v19 = vpop.f32.mrb[170].mxu1  ;;  %v12124_v59 = vpop.f32.mrb[241].mxu0 }
 0x8b1   :  { %v6087_v40 = vadd.f32 %v6086_v19, %v17032_v8  ;;  %v12125_v43 = vadd.f32 %v12124_v59, %v12123_v3  ;;  %v6088_v48 = vpop.f32.mrb[171].mxu1  ;;  %v12126_v37 = vpop.f32.mrb[242].mxu0  ;;  %v17036_v8 = vld [vmem:[#allocation74_spill] sm:$0xff] }
 0x8b2   :  { %v12127_v16 = vpop.f32.mrb[243].mxu0 }
 0x8b3   :  { %v6259_v21 = vpack.c.bf16 %v6087_v40, %v6084_v57  ;;  %v16325_v32 = vadd.f32 %v12125_v43, %v16173_v41  ;;  %v12128_v31 = vadd.f32 %v12127_v16, %v12126_v37 }
 0x8b5   :  { %v16328_v47 = vadd.f32 %v12128_v31, %v16176_v24  ;;  %8096 = vmatprep.mubr.bf16.mxu0 %v6259_v21 }
 0x8b6   :  { %v6091_v29 = vpop.f32.mrb[172].mxu1  ;;  %8097 = vmatmul.mubr.bf16.gmra.mrb[28].mxu0 %v6251_v11  ;;  %v17035_v11 = vld [vmem:[#allocation73_spill] sm:$0xff] }
 0x8b7   :  { %v6092_v54 = vadd.f32 %v6091_v29, %v17033_v46  ;;  %v6093_v61 = vpop.f32.mrb[173].mxu1  ;;  %v12129_v10 = vpop.f32.mrb[244].mxu0  ;;  %v17039_v46 = vld [vmem:[#allocation77_spill] sm:$0xff] }
 0x8b8   :  { %v6094_v27 = vpop.f32.mrb[174].mxu1  ;;  %v12130_v60 = vpop.f32.mrb[245].mxu0 }
 0x8b9   :  { %v6095_v45 = vadd.f32 %v6094_v27, %v17034_v18  ;;  %v12131_v41 = vadd.f32 %v12130_v60, %v12129_v10  ;;  %v12132_v50 = vpop.f32.mrb[246].mxu0  ;;  %v6096_v15 = vpop.f32.mrb[175].mxu1  ;;  %v17041_v18 = vld [vmem:[#allocation79_spill] sm:$0xff] }
 0x8ba   :  { %v12133_v55 = vpop.f32.mrb[247].mxu0 }
 0x8bb   :  { %v6260_v24 = vpack.c.bf16 %v6095_v45, %v6092_v54  ;;  %v16336_v57 = vadd.f32 %v12131_v41, %v16184_v56  ;;  %v12134_v42 = vadd.f32 %v12133_v55, %v12132_v50 }
 0x8bd   :  { %v16339_v30 = vadd.f32 %v12134_v42, %v16187_v20  ;;  %8104 = vmatprep.mubr.bf16.mxu0 %v6260_v24  ;;  %v17037_v20 = vld [vmem:[#allocation75_spill] sm:$0xff]  ;;  %v17043_v24 = vld [vmem:[#allocation81_spill] sm:$0xff] }
 0x8be   :  { %v6099_v14 = vpop.f32.mrb[176].mxu1  ;;  %8105 = vmatmul.mubr.bf16.gmra.mrb[32].mxu0 %v6252_v17 }
 0x8bf   :  { %v6100_v3 = vadd.f32 %v6099_v14, %v17035_v11  ;;  %v6101_v19 = vpop.f32.mrb[177].mxu1 }
 0x8c0   :  { %v6102_v59 = vpop.f32.mrb[178].mxu1 }
 0x8c1   :  { %v6103_v40 = vadd.f32 %v6102_v59, %v17036_v8  ;;  %v6104_v43 = vpop.f32.mrb[179].mxu1 }
 0x8c3   :  { %v6261_v48 = vpack.c.bf16 %v6103_v40, %v6100_v3 }
 0x8c5   :  { %8112 = vmatprep.mubr.bf16.mxu0 %v6261_v48 }
 0x8c6   :  { %v6107_v56 = vpop.f32.mrb[180].mxu1  ;;  %8113 = vmatmul.mubr.bf16.gmra.mrb[36].mxu0 %v6253_v28 }
 0x8c7   :  { %v6108_v37 = vadd.f32 %v6107_v56, %v17037_v20  ;;  %v6109_v16 = vpop.f32.mrb[181].mxu1 }
 0x8c8   :  { %v6110_v21 = vpop.f32.mrb[182].mxu1 }
 0x8c9   :  { %v6111_v9 = vadd.f32 %v6110_v21, %v17038_v34  ;;  %v6112_v17 = vpop.f32.mrb[183].mxu1 }
 0x8cb   :  { %v6262_v31 = vpack.c.bf16 %v6111_v9, %v6108_v37 }
 0x8cd   :  { %8120 = vmatprep.mubr.bf16.mxu0 %v6262_v31 }
 0x8ce   :  { %v6115_v29 = vpop.f32.mrb[184].mxu1  ;;  %8121 = vmatmul.mubr.bf16.gmra.mrb[40].mxu0 %v6254_v33 }
 0x8cf   :  { %v6116_v54 = vadd.f32 %v6115_v29, %v17039_v46  ;;  %v6117_v61 = vpop.f32.mrb[185].mxu1 }
 0x8d0   :  { %v6118_v10 = vpop.f32.mrb[186].mxu1 }
 0x8d1   :  { %v6119_v62 = vadd.f32 %v6118_v10, %v17040_v7  ;;  %v6120_v28 = vpop.f32.mrb[187].mxu1 }
 0x8d3   :  { %v6263_v27 = vpack.c.bf16 %v6119_v62, %v6116_v54 }
 0x8d5   :  { %8128 = vmatprep.mubr.bf16.mxu0 %v6263_v27 }
 0x8d6   :  { %v6123_v60 = vpop.f32.mrb[0].mxu1  ;;  %8129 = vmatmul.mubr.bf16.gmra.mrb[44].mxu0 %v6255_v39 }
 0x8d7   :  { %v6124_v45 = vadd.f32 %v6123_v60, %v17041_v18  ;;  %v6125_v41 = vpop.f32.mrb[1].mxu1 }
 0x8d8   :  { %v6126_v50 = vpop.f32.mrb[2].mxu1 }
 0x8d9   :  { %v6127_v22 = vadd.f32 %v6126_v50, %v17042_v0  ;;  %v6128_v33 = vpop.f32.mrb[3].mxu1 }
 0x8db   :  { %v6264_v15 = vpack.c.bf16 %v6127_v22, %v6124_v45 }
 0x8dd   :  { %8136 = vmatprep.mubr.bf16.mxu0 %v6264_v15 }
 0x8de   :  { %v6131_v55 = vpop.f32.mrb[4].mxu1  ;;  %8137 = vmatmul.mubr.bf16.gmra.mrb[48].mxu0 %v6256_v26 }
 0x8df   :  { %v6132_v42 = vadd.f32 %v6131_v55, %v17043_v24  ;;  %v6133_v14 = vpop.f32.mrb[5].mxu1 }
 0x8e0   :  { %v6134_v11 = vpop.f32.mrb[6].mxu1 }
 0x8e1   :  { %v6135_v49 = vadd.f32 %v6134_v11, %v17044_v44  ;;  %v6136_v39 = vpop.f32.mrb[7].mxu1 }
 0x8e3   :  { %v6265_v3 = vpack.c.bf16 %v6135_v49, %v6132_v42 }
 0x8e5   :  { %8144 = vmatprep.mubr.bf16.mxu0 %v6265_v3 }
 0x8e6   :  { %8145 = vmatmul.mubr.bf16.gmra.mrb[52].mxu0 %v6257_v12 }
 0x901   :  { %v12151_v19 = vpop.f32.mrb[248].mxu0 }
 0x902   :  { %v12152_v59 = vpop.f32.mrb[249].mxu0 }
 0x903   :  { %v12153_v8 = vadd.f32 %v12152_v59, %v12151_v19  ;;  %v12154_v40 = vpop.f32.mrb[250].mxu0 }
 0x904   :  { %v12155_v43 = vpop.f32.mrb[251].mxu0 }
 0x905   :  { %v16370_v5 = vadd.f32 %v12153_v8, %v16250_v25  ;;  %v12156_v13 = vadd.f32 %v12155_v43, %v12154_v40  ;;  %v14057_v43 = vld [vmem:[#allocation10] sm:$0xff]  }
 0x906   :  { %12671 = vmatprep.mubr.bf16.mxu0 %v14057_v43 }
 0x907   :  { %v16373_v26 = vadd.f32 %v12156_v13, %v16253_v38 }
 0x909   :  { %v12157_v48 = vpop.f32.mrb[252].mxu0 }
 0x90a   :  { %v12158_v56 = vpop.f32.mrb[253].mxu0 }
 0x90b   :  { %v12159_v20 = vadd.f32 %v12158_v56, %v12157_v48  ;;  %v12160_v37 = vpop.f32.mrb[254].mxu0 }
 0x90c   :  { %v12161_v16 = vpop.f32.mrb[255].mxu0 }
 0x90d   :  { %v16376_v2 = vadd.f32 %v12159_v20, %v16264_v51  ;;  %v12162_v58 = vadd.f32 %v12161_v16, %v12160_v37 }
 0x90f   :  { %v16379_v12 = vadd.f32 %v12162_v58, %v16267_v4 }
 0x911   :  { %v12163_v21 = vpop.f32.mrb[0].mxu0 }
 0x912   :  { %v12164_v34 = vpop.f32.mrb[1].mxu0 }
 0x913   :  { %v12165_v25 = vadd.f32 %v12164_v34, %v12163_v21  ;;  %v12166_v9 = vpop.f32.mrb[2].mxu0 }
 0x914   :  { %v12167_v17 = vpop.f32.mrb[3].mxu0 }
 0x915   :  { %v16382_v38 = vadd.f32 %v12165_v25, %v16278_v35  ;;  %v12168_v31 = vadd.f32 %v12167_v17, %v12166_v9 }
 0x917   :  { %v16385_v29 = vadd.f32 %v12168_v31, %v16281_v36 }
 0x919   :  { %v12169_v46 = vpop.f32.mrb[4].mxu0 }
 0x91a   :  { %v12170_v54 = vpop.f32.mrb[5].mxu0 }
 0x91b   :  { %v12171_v51 = vadd.f32 %v12170_v54, %v12169_v46  ;;  %v12172_v61 = vpop.f32.mrb[6].mxu0 }
 0x91c   :  { %v12173_v10 = vpop.f32.mrb[7].mxu0 }
 0x91d   :  { %v16388_v4 = vadd.f32 %v12171_v51, %v16292_v52  ;;  %v12174_v7 = vadd.f32 %v12173_v10, %v12172_v61 }
 0x91f   :  { %v16391_v62 = vadd.f32 %v12174_v7, %v16295_v53 }
 0x921   :  { %v12175_v28 = vpop.f32.mrb[8].mxu0 }
 0x922   :  { %v12176_v27 = vpop.f32.mrb[9].mxu0 }
 0x923   :  { %v12177_v35 = vadd.f32 %v12176_v27, %v12175_v28  ;;  %v12178_v60 = vpop.f32.mrb[10].mxu0 }
 0x924   :  { %v12179_v18 = vpop.f32.mrb[11].mxu0 }
 0x925   :  { %v16394_v36 = vadd.f32 %v12177_v35, %v16306_v6  ;;  %v12180_v45 = vadd.f32 %v12179_v18, %v12178_v60 }
 0x927   :  { %v16397_v41 = vadd.f32 %v12180_v45, %v16309_v23 }
 0x929   :  { %v12181_v50 = vpop.f32.mrb[12].mxu0 }
 0x92a   :  { %v12182_v0 = vpop.f32.mrb[13].mxu0 }
 0x92b   :  { %v12183_v52 = vadd.f32 %v12182_v0, %v12181_v50  ;;  %v12184_v22 = vpop.f32.mrb[14].mxu0 }
 0x92c   :  { %v12185_v33 = vpop.f32.mrb[15].mxu0 }
 0x92d   :  { %v16400_v53 = vadd.f32 %v12183_v52, %v16314_v1  ;;  %v12186_v15 = vadd.f32 %v12185_v33, %v12184_v22 }
 0x92f   :  { %v16403_v55 = vadd.f32 %v12186_v15, %v16317_v63 }
 0x931   :  { %v12187_v24 = vpop.f32.mrb[16].mxu0 }
 0x932   :  { %v12188_v42 = vpop.f32.mrb[17].mxu0 }
 0x933   :  { %v12189_v6 = vadd.f32 %v12188_v42, %v12187_v24  ;;  %v12190_v14 = vpop.f32.mrb[18].mxu0 }
 0x934   :  { %v12191_v11 = vpop.f32.mrb[19].mxu0 }
 0x935   :  { %v16406_v23 = vadd.f32 %v12189_v6, %v16325_v32  ;;  %v12192_v44 = vadd.f32 %v12191_v11, %v12190_v14 }
 0x937   :  { %v16409_v49 = vadd.f32 %v12192_v44, %v16328_v47 }
 0x939   :  { %v12193_v39 = vpop.f32.mrb[20].mxu0 }
 0x93a   :  { %v12194_v3 = vpop.f32.mrb[21].mxu0 }
 0x93b   :  { %v12195_v1 = vadd.f32 %v12194_v3, %v12193_v39  ;;  %v12196_v19 = vpop.f32.mrb[22].mxu0 }
 0x93c   :  { %v12197_v59 = vpop.f32.mrb[23].mxu0 }
 0x93d   :  { %v16412_v63 = vadd.f32 %v12195_v1, %v16336_v57  ;;  %v12198_v8 = vadd.f32 %v12197_v59, %v12196_v19 }
 0x93f   :  { %v16415_v40 = vadd.f32 %v12198_v8, %v16339_v30 }
 0x981   :  { %v12215_v32 = vpop.f32.mrb[24].mxu0 }
 0x982   :  { %v12216_v13 = vpop.f32.mrb[25].mxu0 }
 0x983   :  { %v12217_v48 = vadd.f32 %v12216_v13, %v12215_v32  ;;  %v12218_v56 = vpop.f32.mrb[26].mxu0 }
 0x984   :  { %v12219_v47 = vpop.f32.mrb[27].mxu0 }
 0x985   :  { %v16418_v20 = vadd.f32 %v12217_v48, %v16370_v5  ;;  %v12220_v37 = vadd.f32 %v12219_v47, %v12218_v56 }
 0x987   :  { %v16421_v16 = vadd.f32 %v12220_v37, %v16373_v26  ;;  %v8179_v57 = vmul.f32 %v16418_v20, %v16418_v20 }
 0x989   :  { %v8169_v30 = vadd.f32 %v16421_v16, %v16418_v20  ;;  %v8180_v58 = vmul.f32 %v16421_v16, %v16421_v16  ;;  %v12221_v21 = vpop.f32.mrb[28].mxu0 }
 0x98a   :  { %v12222_v34 = vpop.f32.mrb[29].mxu0 }
 0x98b   :  { %v8183_v25 = vadd.f32 %v8180_v58, %v8179_v57  ;;  %v12223_v9 = vadd.f32 %v12222_v34, %v12221_v21  ;;  %v12224_v17 = vpop.f32.mrb[30].mxu0 }
 0x98c   :  { %v12225_v5 = vpop.f32.mrb[31].mxu0 }
 0x98d   :  { %v16430_v31 = vadd.f32 %v12223_v9, %v16376_v2  ;;  %v12226_v26 = vadd.f32 %v12225_v5, %v12224_v17 }
 0x98f   :  { %v8170_v46 = vadd.f32 %v8169_v30, %v16430_v31  ;;  %v8181_v54 = vmul.f32 %v16430_v31, %v16430_v31  ;;  %v16436_v51 = vadd.f32 %v12226_v26, %v16379_v12 }
 0x991   :  { %v8184_v61 = vadd.f32 %v8183_v25, %v8181_v54  ;;  %v8171_v10 = vadd.f32 %v8170_v46, %v16436_v51  ;;  %v8182_v7 = vmul.f32 %v16436_v51, %v16436_v51  ;;  %v12227_v28 = vpop.f32.mrb[32].mxu0 }
 0x992   :  { %v12228_v27 = vpop.f32.mrb[33].mxu0 }
 0x993   :  { %v8172_v35 = vrot.slane %v8171_v10, 4  ;;  %v8185_v2 = vadd.f32 %v8184_v61, %v8182_v7  ;;  %v12229_v60 = vadd.f32 %v12228_v27, %v12227_v28  ;;  %v12230_v18 = vpop.f32.mrb[34].mxu0 }
 0x994   :  { %v12231_v45 = vpop.f32.mrb[35].mxu0 }
 0x995   :  { %v8173_v50 = vadd.f32 %v8172_v35, %v8171_v10  ;;  %v8186_v0 = vrot.slane %v8185_v2, 4  ;;  %v16442_v52 = vadd.f32 %v12229_v60, %v16382_v38  ;;  %v12232_v12 = vadd.f32 %v12231_v45, %v12230_v18 }
 0x997   :  { %v8174_v22 = vrot.slane %v8173_v50, 2  ;;  %v8187_v33 = vadd.f32 %v8186_v0, %v8185_v2  ;;  %v8158_v15 = vadd.f32 %v12232_v12, %v16385_v29  ;;  %v16474_v0 = vld [vmem:[#allocation7] ss:$0 sm:$0xff] }
 0x999   :  { %v8175_v24 = vadd.f32 %v8174_v22, %v8173_v50  ;;  %v8188_v42 = vrot.slane %v8187_v33, 2  ;;  %v12233_v6 = vpop.f32.mrb[36].mxu0 }
 0x99a   :  { %v12234_v14 = vpop.f32.mrb[37].mxu0 }
 0x99b   :  { %v8176_v11 = vrot.slane %v8175_v24, 1  ;;  %v8189_v44 = vadd.f32 %v8188_v42, %v8187_v33  ;;  %v12235_v39 = vadd.f32 %v12234_v14, %v12233_v6  ;;  %v12236_v3 = vpop.f32.mrb[38].mxu0 }
 0x99c   :  { %v12237_v1 = vpop.f32.mrb[39].mxu0 }
 0x99d   :  { %v8177_v19 = vadd.f32 %v8176_v11, %v8175_v24  ;;  %v8190_v59 = vrot.slane %v8189_v44, 1  ;;  %v8159_v8 = vadd.f32 %v12235_v39, %v16388_v4  ;;  %v12238_v38 = vadd.f32 %v12237_v1, %v12236_v3  ;;  %v16488_v1 = vld [vmem:[#allocation9] ss:$0 sm:$0xff] }
 0x99f   :  { %v16446_v43 = vmul.f32 0.03125, %v8177_v19  ;;  %v8191_v32 = vadd.f32 %v8190_v59, %v8189_v44  ;;  %v8160_v13 = vadd.f32 %v12238_v38, %v16391_v62 }
 0x9a1   :  { %v8192_v29 = vmul.f32 0.03125, %v8191_v32  ;;  %v8193_v48 = vmul.f32 %v16446_v43, %v16446_v43  ;;  %v8199_v56 = vsub.f32 %v16436_v51, %v16446_v43  ;;  %v8200_v47 = vsub.f32 %v16442_v52, %v16446_v43  ;;  %v12239_v37 = vpop.f32.mrb[40].mxu0 }
 0x9a2   :  { %v8201_v57 = vsub.f32 %v8158_v15, %v16446_v43  ;;  %v8202_v4 = vsub.f32 %v8159_v8, %v16446_v43  ;;  %v8203_v30 = vsub.f32 %v8160_v13, %v16446_v43  ;;  %v12240_v58 = vpop.f32.mrb[41].mxu0  ;;  %v8196_v62 = vsub.f32 %v16418_v20, %v16446_v43 }
 0x9a3   :  { %v8194_v21 = vsub.f32 %v8192_v29, %v8193_v48  ;;  %v12241_v34 = vadd.f32 %v12240_v58, %v12239_v37  ;;  %v12242_v25 = vpop.f32.mrb[42].mxu0  ;;  %v8197_v9 = vsub.f32 %v16421_v16, %v16446_v43  ;;  %v8198_v17 = vsub.f32 %v16430_v31, %v16446_v43 }
 0x9a4   :  { %v12243_v5 = vpop.f32.mrb[43].mxu0 }
 0x9a5   :  { %v8195_v26 = vmax.f32 %v8194_v21, 0.0  ;;  %v8161_v46 = vadd.f32 %v12241_v34, %v16394_v36  ;;  %v12244_v54 = vadd.f32 %v12243_v5, %v12242_v25 }
 0x9a7   :  { %v8212_v51 = vadd.f32 1e-05, %v8195_v26  ;;  %v8204_v61 = vsub.f32 %v8161_v46, %v16446_v43  ;;  %v8162_v10 = vadd.f32 %v12244_v54, %v16397_v41 }
 0x9a9   :  { %14251 = vrsqrt.f32 %v8212_v51  ;;  %v8205_v20 = vsub.f32 %v8162_v10, %v16446_v43  ;;  %v12245_v7 = vpop.f32.mrb[44].mxu0 }
 0x9aa   :  { %v12246_v28 = vpop.f32.mrb[45].mxu0 }
 0x9ab   :  { %v12247_v27 = vadd.f32 %v12246_v28, %v12245_v7  ;;  %v12248_v16 = vpop.f32.mrb[46].mxu0 }
 0x9ac   :  { %v12249_v35 = vpop.f32.mrb[47].mxu0 }
 0x9ad   :  { %v8163_v31 = vadd.f32 %v12247_v27, %v16400_v53  ;;  %v12250_v2 = vadd.f32 %v12249_v35, %v12248_v16 }
 0x9af   :  { %v8206_v60 = vsub.f32 %v8163_v31, %v16446_v43  ;;  %v8164_v36 = vadd.f32 %v12250_v2, %v16403_v55 }
 0x9b1   :  { %v8207_v18 = vsub.f32 %v8164_v36, %v16446_v43  ;;  %v12251_v45 = vpop.f32.mrb[48].mxu0 }
 0x9b2   :  { %v12252_v50 = vpop.f32.mrb[49].mxu0 }
 0x9b3   :  { %v16472_v41 = vpop.eup %14251  ;;  %v12253_v52 = vadd.f32 %v12252_v50, %v12251_v45  ;;  %v12254_v12 = vpop.f32.mrb[50].mxu0 }
 0x9b4   :  { %v8217_v22 = vmul.f32 %v16472_v41, %v8199_v56  ;;  %v8218_v33 = vmul.f32 %v16472_v41, %v8200_v47  ;;  %v8219_v53 = vmul.f32 %v16472_v41, %v8201_v57  ;;  %v8220_v15 = vmul.f32 %v16472_v41, %v8202_v4  ;;  %v12255_v24 = vpop.f32.mrb[51].mxu0 }
 0x9b5   :  { %v8221_v55 = vmul.f32 %v16472_v41, %v8203_v30  ;;  %v8222_v42 = vmul.f32 %v16472_v41, %v8204_v61  ;;  %v8223_v6 = vmul.f32 %v16472_v41, %v8205_v20  ;;  %v8224_v14 = vmul.f32 %v16472_v41, %v8206_v60 }
 0x9b6   :  { %v8241_v11 = vmul.f32 %v16474_v0, %v8218_v33  ;;  %v8242_v44 = vmul.f32 %v16474_v0, %v8219_v53  ;;  %v8243_v39 = vmul.f32 %v16474_v0, %v8220_v15  ;;  %v8225_v3 = vmul.f32 %v16472_v41, %v8207_v18 }
 0x9b7   :  { %v8244_v19 = vmul.f32 %v16474_v0, %v8221_v55  ;;  %v8245_v59 = vmul.f32 %v16474_v0, %v8222_v42  ;;  %v8246_v8 = vmul.f32 %v16474_v0, %v8223_v6  ;;  %v8247_v38 = vmul.f32 %v16474_v0, %v8224_v14 }
 0x9b8   :  { %v8248_v32 = vmul.f32 %v16474_v0, %v8225_v3  ;;  %v8165_v13 = vadd.f32 %v12253_v52, %v16406_v23  ;;  %v12256_v29 = vadd.f32 %v12255_v24, %v12254_v12  ;;  %v8214_v48 = vmul.f32 %v16472_v41, %v8196_v62 }
 0x9b9   :  { %v12257_v56 = vpop.f32.mrb[52].mxu0  ;;  %v8215_v47 = vmul.f32 %v16472_v41, %v8197_v9  ;;  %v8216_v37 = vmul.f32 %v16472_v41, %v8198_v17  ;;  %v8240_v57 = vmul.f32 %v16474_v0, %v8217_v22  ;;  %v8264_v4 = vadd.f32 %v16488_v1, %v8241_v11 }
 0x9ba   :  { %v8208_v30 = vsub.f32 %v8165_v13, %v16446_v43  ;;  %v8166_v58 = vadd.f32 %v12256_v29, %v16409_v49  ;;  %v12258_v21 = vpop.f32.mrb[53].mxu0  ;;  %v8237_v34 = vmul.f32 %v16474_v0, %v8214_v48  ;;  %v8265_v23 = vadd.f32 %v16488_v1, %v8242_v44 }
 0x9bb   :  { %v12259_v25 = vadd.f32 %v12258_v21, %v12257_v56  ;;  %v12260_v62 = vpop.f32.mrb[54].mxu0  ;;  %v8238_v5 = vmul.f32 %v16474_v0, %v8215_v47  ;;  %v8239_v9 = vmul.f32 %v16474_v0, %v8216_v37  ;;  %v8263_v17 = vadd.f32 %v16488_v1, %v8240_v57 }
 0x9bc   :  { %v8226_v26 = vmul.f32 %v16472_v41, %v8208_v30  ;;  %v8209_v46 = vsub.f32 %v8166_v58, %v16446_v43  ;;  %v12261_v54 = vpop.f32.mrb[55].mxu0  ;;  %v8260_v49 = vadd.f32 %v16488_v1, %v8237_v34  ;;  %v8280_v51 = vmul.f32 0.2, %v8264_v4 }
 0x9bd   :  { %v8167_v61 = vadd.f32 %v12259_v25, %v16412_v63  ;;  %v12262_v10 = vadd.f32 %v12261_v54, %v12260_v62  ;;  %v8261_v20 = vadd.f32 %v16488_v1, %v8238_v5  ;;  %v8262_v7 = vadd.f32 %v16488_v1, %v8239_v9 }
 0x9be   :  { %v8249_v28 = vmul.f32 %v16474_v0, %v8226_v26  ;;  %v8227_v27 = vmul.f32 %v16472_v41, %v8209_v46  ;;  %v8276_v16 = vmul.f32 0.2, %v8260_v49  ;;  %v8279_v35 = vmul.f32 0.2, %v8263_v17 }
 0x9bf   :  { %v8210_v31 = vsub.f32 %v8167_v61, %v16446_v43  ;;  %v8168_v2 = vadd.f32 %v12262_v10, %v16415_v40  ;;  %v8277_v60 = vmul.f32 0.2, %v8261_v20  ;;  %v8278_v36 = vmul.f32 0.2, %v8262_v7  ;;  %v14058_v61 = vld [vmem:[#allocation10 + $0x8] sm:$0xff]   ;;  %v14059_v10 = vld [vmem:[#allocation10 + $0x10] sm:$0xff]  }
 0x9c0   :  { %v8250_v18 = vmul.f32 %v16474_v0, %v8227_v27  ;;  %v8292_v63 = vmax.f32 %v8260_v49, %v8276_v16  ;;  %v8295_v45 = vmax.f32 %v8263_v17, %v8279_v35  ;;  %v8281_v50 = vmul.f32 0.2, %v8265_v23  ;;  %v14083_v27 = vld [vmem:[#allocation12 + $0xd0] sm:$0xff]   ;;  %v14060_v16 = vld [vmem:[#allocation10 + $0x18] sm:$0xff]   ;;  %v14061_v35 = vld [vmem:[#allocation10 + $0x20] sm:$0xff]  }
 0x9c1   :  { %v8228_v52 = vmul.f32 %v16472_v41, %v8210_v31  ;;  %v8211_v12 = vsub.f32 %v8168_v2, %v16446_v43  ;;  %v8293_v22 = vmax.f32 %v8261_v20, %v8277_v60  ;;  %v8294_v33 = vmax.f32 %v8262_v7, %v8278_v36  ;;  %v14076_v20 = vld [vmem:[#allocation12 + $0x80] sm:$0xff]   ;;  %v14079_v7 = vld [vmem:[#allocation12 + $0xc8] sm:$0xff]   ;;  %v14084_v31 = vld [vmem:[#allocation12 + $0x90] sm:$0xff]  }
 0x9c2   :  { %v8296_v53 = vmax.f32 %v8264_v4, %v8280_v51  ;;  %v8297_v15 = vmax.f32 %v8265_v23, %v8281_v50  ;;  %v8266_v24 = vadd.f32 %v16488_v1, %v8243_v39  ;;  %v8267_v55 = vadd.f32 %v16488_v1, %v8244_v19  ;;  %v14087_v2 = vld [vmem:[#allocation12 + $0xd8] sm:$0xff]   ;;  %v14091_v36 = vld [vmem:[#allocation12 + $0xe0] sm:$0xff]  }
 0x9c3   :  { %v8251_v40 = vmul.f32 %v16474_v0, %v8228_v52  ;;  %v8229_v42 = vmul.f32 %v16472_v41, %v8211_v12  ;;  %v8308_v6 = vpack.c.bf16 %v8293_v22, %v8292_v63  ;;  %v8309_v14 = vpack.c.bf16 %v8295_v45, %v8294_v33  ;;  %v14088_v60 = vld [vmem:[#allocation12 + $0x98] sm:$0xff]   ;;  %v14063_v63 = vld [vmem:[#allocation10 + $0x30] sm:$0xff]   ;;  %v14092_v45 = vld [vmem:[#allocation12 + $0xa0] sm:$0xff]  }
 0x9c4   :  { %v8310_v11 = vpack.c.bf16 %v8297_v15, %v8296_v53  ;;  %v8282_v44 = vmul.f32 0.2, %v8266_v24  ;;  %v8283_v3 = vmul.f32 0.2, %v8267_v55  ;;  %v8268_v13 = vadd.f32 %v16488_v1, %v8245_v59  ;;  %v14064_v50 = vld [vmem:[#allocation10 + $0x38] sm:$0xff]   ;;  %v14065_v52 = vld [vmem:[#allocation10 + $0x40] sm:$0xff]  }
 0x9c5   :  { %v8252_v43 = vmul.f32 %v16474_v0, %v8229_v42  ;;  %12655 = vmatprep.subr.bf16.mxu0 %v8308_v6  ;;  %v8269_v29 = vadd.f32 %v16488_v1, %v8246_v8  ;;  %v8270_v39 = vadd.f32 %v16488_v1, %v8247_v38  ;;  %v8271_v19 = vadd.f32 %v16488_v1, %v8248_v32  ;;  %v14066_v12 = vld [vmem:[#allocation10 + $0x48] sm:$0xff]   ;;  %v14067_v22 = vld [vmem:[#allocation10 + $0x50] sm:$0xff]   ;;  %v14068_v33 = vld [vmem:[#allocation10 + $0x58] sm:$0xff]  }
 0x9c6   :  { %12656 = vmatpush3.bf16.msra.mxu0 %v8308_v6  ;;  %v8298_v48 = vmax.f32 %v8266_v24, %v8282_v44  ;;  %v8299_v56 = vmax.f32 %v8267_v55, %v8283_v3  ;;  %v8284_v41 = vmul.f32 0.2, %v8268_v13  ;;  %v8272_v47 = vadd.f32 %v16488_v1, %v8249_v28  ;;  %v14080_v28 = vld [vmem:[#allocation12 + $0x88] sm:$0xff]   ;;  %v14069_v53 = vld [vmem:[#allocation10 + $0x60] sm:$0xff]   ;;  %v14071_v24 = vld [vmem:[#allocation10 + $0x70] sm:$0xff]  }
 0x9c7   :  { %12657 = vmatprep.subr.bf16.mxu0 %v8309_v14  ;;  %v8285_v37 = vmul.f32 0.2, %v8269_v29  ;;  %v8286_v57 = vmul.f32 0.2, %v8270_v39  ;;  %v8287_v4 = vmul.f32 0.2, %v8271_v19  ;;  %v8273_v59 = vadd.f32 %v16488_v1, %v8250_v18 }
 0x9c8   :  { %v8311_v0 = vpack.c.bf16 %v8299_v56, %v8298_v48  ;;  %v8300_v30 = vmax.f32 %v8268_v13, %v8284_v41  ;;  %v8288_v58 = vmul.f32 0.2, %v8272_v47  ;;  %v8274_v8 = vadd.f32 %v16488_v1, %v8251_v40  ;;  %v14062_v18 = vld [vmem:[#allocation10 + $0x28] sm:$0xff]   ;;  %v14072_v55 = vld [vmem:[#allocation10 + $0x78] sm:$0xff]   ;;  %v14073_v40 = vld [vmem:[#allocation10 + $0x80] sm:$0xff]  }
 0x9c9   :  { %v8301_v38 = vmax.f32 %v8269_v29, %v8285_v37  ;;  %v8302_v21 = vmax.f32 %v8270_v39, %v8286_v57  ;;  %v8303_v32 = vmax.f32 %v8271_v19, %v8287_v4  ;;  %v8289_v34 = vmul.f32 0.2, %v8273_v59  ;;  %v14070_v15 = vld [vmem:[#allocation10 + $0x68] sm:$0xff]   ;;  %v14077_v6 = vld [vmem:[#allocation10 + $0x90] sm:$0xff]   ;;  %v14086_v13 = vld [vmem:[#allocation10 + $0xb8] sm:$0xff]  }
 0x9ca   :  { %12658 = vmatpush3.bf16.msra.mxu0 %v8309_v14  ;;  %v8275_v23 = vadd.f32 %v16488_v1, %v8252_v43  ;;  %v8290_v25 = vmul.f32 0.2, %v8274_v8  ;;  %v8304_v9 = vmax.f32 %v8272_v47, %v8288_v58  ;;  %v14075_v1 = vld [vmem:[#allocation12 + $0xc0] sm:$0xff]   ;;  %v14074_v42 = vld [vmem:[#allocation10 + $0x88] sm:$0xff]   ;;  %v14078_v14 = vld [vmem:[#allocation10 + $0x98] sm:$0xff]  }
 0x9cb   :  { %12659 = vmatprep.subr.bf16.mxu0 %v8310_v11  ;;  %v8312_v62 = vpack.c.bf16 %v8301_v38, %v8300_v30  ;;  %v8313_v5 = vpack.c.bf16 %v8303_v32, %v8302_v21  ;;  %v8305_v17 = vmax.f32 %v8273_v59, %v8289_v34  ;;  %v14082_v44 = vld [vmem:[#allocation10 + $0xa8] sm:$0xff]   ;;  %v14085_v3 = vld [vmem:[#allocation10 + $0xb0] sm:$0xff]   ;;  %v14089_v43 = vld [vmem:[#allocation10 + $0xc0] sm:$0xff]  }
 0x9cc   :  { %v8291_v26 = vmul.f32 0.2, %v8275_v23  ;;  %v8306_v54 = vmax.f32 %v8274_v8, %v8290_v25  ;;  %v14097_v29 = vld [vmem:[#allocation12 + $0xe8] sm:$0xff]   ;;  %v14093_v48 = vld [vmem:[#allocation10 + $0xd0] sm:$0xff]   ;;  %v14094_v56 = vld [vmem:[#allocation10 + $0xd8] sm:$0xff]  }
 0x9cd   :  { %v8314_v46 = vpack.c.bf16 %v8305_v17, %v8304_v9  ;;  %v14098_v39 = vld [vmem:[#allocation12 + $0xa8] sm:$0xff]   ;;  %v14095_v41 = vld [vmem:[#allocation10 + $0xe0] sm:$0xff]   ;;  %v14100_v47 = vld [vmem:[#allocation12 + $0xf0] sm:$0xff]  }
 0x9ce   :  { %12660 = vmatpush3.bf16.msra.mxu0 %v8310_v11  ;;  %v8307_v49 = vmax.f32 %v8275_v23, %v8291_v26  ;;  %v14081_v11 = vld [vmem:[#allocation10 + $0xa0] sm:$0xff]   ;;  %v14090_v19 = vld [vmem:[#allocation10 + $0xc8] sm:$0xff]   ;;  %v14102_v37 = vld [vmem:[#allocation12 + $0xb0] sm:$0xff]  }
 0x9cf   :  { %12661 = vmatprep.subr.bf16.mxu0 %v8311_v0  ;;  %v14096_v57 = vld [vmem:[#allocation10 + $0xe8] sm:$0xff]   ;;  %v14099_v4 = vld [vmem:[#allocation10 + $0xf0] sm:$0xff]   ;;  %v14103_v59 = vld [vmem:[#allocation12 + $0xf8] sm:$0xff]  }
 0x9d0   :  { %v8315_v51 = vpack.c.bf16 %v8307_v49, %v8306_v54  ;;  %v14105_v30 = vld [vmem:[#allocation12 + $0x40] sm:$0xff]   ;;  %v14101_v58 = vld [vmem:[#allocation10 + $0xf8] sm:$0xff]  }
 0x9d2   :  { %12662 = vmatpush3.bf16.msra.mxu0 %v8311_v0  ;;  %v14104_v0 = vld [vmem:[#allocation12 + $0xb8] sm:$0xff]  }
 0x9d3   :  { %12663 = vmatprep.subr.bf16.mxu0 %v8312_v62 }
 0x9d6   :  { %12664 = vmatpush3.bf16.msra.mxu0 %v8312_v62 }
 0x9d7   :  { %12665 = vmatprep.subr.bf16.mxu0 %v8313_v5 }
 0x9da   :  { %12666 = vmatpush3.bf16.msra.mxu0 %v8313_v5 }
 0x9db   :  { %12667 = vmatprep.subr.bf16.mxu0 %v8314_v46 }
 0x9de   :  { %12668 = vmatpush3.bf16.msra.mxu0 %v8314_v46 }
 0x9df   :  { %12669 = vmatprep.subr.bf16.mxu0 %v8315_v51 }
 0x9e2   :  { %12670 = vmatpush3.bf16.msra.mxu0 %v8315_v51 }
 0x9e3   :  { %12303 = vmatprep.subr.bf16.mxu0 %v14075_v1 }
 0x9e5   :  { %12672 = vmatmul.mubr.bf16.vlgmr.msra.gmra.mrb[56].mxu0 %v14058_v61 }
 0x9e6   :  { %12675 = vmatprep.mubr.bf16.mxu0 %v14059_v10  ;;  %12304 = vmatpush3.bf16.msra.mxu0 %v14076_v20 }
 0x9e7   :  { %12305 = vmatprep.subr.bf16.mxu0 %v14079_v7 }
 0x9ea   :  { %12306 = vmatpush3.bf16.msra.mxu0 %v14080_v28 }
 0x9eb   :  { %12307 = vmatprep.subr.bf16.mxu0 %v14083_v27 }
 0x9ed   :  { %12676 = vmatmul.mubr.bf16.gmra.mrb[60].mxu0 %v14060_v16 }
 0x9ee   :  { %12679 = vmatprep.mubr.bf16.mxu0 %v14061_v35  ;;  %12308 = vmatpush3.bf16.msra.mxu0 %v14084_v31  ;;  %v14106_v35 = vld [vmem:[#allocation12] sm:$0xff]   ;;  %v14107_v31 = vld [vmem:[#allocation12 + $0x48] sm:$0xff]  }
 0x9ef   :  { %12309 = vmatprep.subr.bf16.mxu0 %v14087_v2  ;;  %v14108_v2 = vld [vmem:[#allocation12 + $0x8] sm:$0xff]  }
 0x9f2   :  { %12310 = vmatpush3.bf16.msra.mxu0 %v14088_v60 }
 0x9f3   :  { %12311 = vmatprep.subr.bf16.mxu0 %v14091_v36  ;;  %v14109_v36 = vld [vmem:[#allocation12 + $0x50] sm:$0xff]  }
 0x9f5   :  { %12680 = vmatmul.mubr.bf16.gmra.mrb[64].mxu0 %v14062_v18 }
 0x9f6   :  { %12683 = vmatprep.mubr.bf16.mxu0 %v14063_v63  ;;  %12312 = vmatpush3.bf16.msra.mxu0 %v14092_v45 }
 0x9f7   :  { %12313 = vmatprep.subr.bf16.mxu0 %v14097_v29 }
 0x9fa   :  { %12314 = vmatpush3.bf16.msra.mxu0 %v14098_v39 }
 0x9fb   :  { %12315 = vmatprep.subr.bf16.mxu0 %v14100_v47  ;;  %v14120_v47 = vld [vmem:[#allocation12 + $0x38] sm:$0xff]  }
 0x9fd   :  { %12684 = vmatmul.mubr.bf16.gmra.mrb[68].mxu0 %v14064_v50 }
 0x9fe   :  { %12687 = vmatprep.mubr.bf16.mxu0 %v14065_v52  ;;  %12316 = vmatpush3.bf16.msra.mxu0 %v14102_v37  ;;  %v14110_v52 = vld [vmem:[#allocation12 + $0x10] sm:$0xff]  }
 0x9ff   :  { %12317 = vmatprep.subr.bf16.mxu0 %v14103_v59 }
 0xa02   :  { %12318 = vmatpush3.bf16.msra.mxu0 %v14104_v0 }
 0xa03   :  { %12331 = vmatprep.subr.bf16.mxu0 %v14105_v30 }
 0xa05   :  { %12688 = vmatmul.mubr.bf16.gmra.mrb[72].mxu0 %v14066_v12 }
 0xa06   :  { %12691 = vmatprep.mubr.bf16.mxu0 %v14067_v22  ;;  %v14111_v22 = vld [vmem:[#allocation12 + $0x58] sm:$0xff]  }
 0xa0d   :  { %12692 = vmatmul.mubr.bf16.gmra.mrb[76].mxu0 %v14068_v33  ;;  %v14112_v33 = vld [vmem:[#allocation12 + $0x18] sm:$0xff]  }
 0xa0e   :  { %12695 = vmatprep.mubr.bf16.mxu0 %v14069_v53 }
 0xa15   :  { %12696 = vmatmul.mubr.bf16.gmra.mrb[80].mxu0 %v14070_v15  ;;  %v14113_v15 = vld [vmem:[#allocation12 + $0x60] sm:$0xff]  }
 0xa16   :  { %12699 = vmatprep.mubr.bf16.mxu0 %v14071_v24 }
 0xa1d   :  { %12700 = vmatmul.mubr.bf16.gmra.mrb[84].mxu0 %v14072_v55 }
 0xa1e   :  { %12703 = vmatprep.mubr.bf16.mxu0 %v14073_v40 }
 0xa25   :  { %12704 = vmatmul.mubr.bf16.gmra.mrb[88].mxu0 %v14074_v42 }
 0xa26   :  { %12707 = vmatprep.mubr.bf16.mxu0 %v14077_v6  ;;  %v14114_v6 = vld [vmem:[#allocation12 + $0x20] sm:$0xff]  }
 0xa2d   :  { %12708 = vmatmul.mubr.bf16.gmra.mrb[92].mxu0 %v14078_v14 }
 0xa2e   :  { %12711 = vmatprep.mubr.bf16.mxu0 %v14081_v11  ;;  %v14115_v11 = vld [vmem:[#allocation12 + $0x68] sm:$0xff]  }
 0xa35   :  { %12712 = vmatmul.mubr.bf16.gmra.mrb[96].mxu0 %v14082_v44  ;;  %v14116_v44 = vld [vmem:[#allocation12 + $0x28] sm:$0xff]  }
 0xa36   :  { %12715 = vmatprep.mubr.bf16.mxu0 %v14085_v3 }
 0xa3d   :  { %12716 = vmatmul.mubr.bf16.gmra.mrb[100].mxu0 %v14086_v13  ;;  %v14117_v13 = vld [vmem:[#allocation12 + $0x70] sm:$0xff]  }
 0xa3e   :  { %12719 = vmatprep.mubr.bf16.mxu0 %v14089_v43 }
 0xa45   :  { %12720 = vmatmul.mubr.bf16.gmra.mrb[104].mxu0 %v14090_v19 }
 0xa46   :  { %12723 = vmatprep.mubr.bf16.mxu0 %v14093_v48  ;;  %v14118_v48 = vld [vmem:[#allocation12 + $0x30] sm:$0xff]  }
 0xa4d   :  { %12724 = vmatmul.mubr.bf16.gmra.mrb[108].mxu0 %v14094_v56 }
 0xa4e   :  { %12727 = vmatprep.mubr.bf16.mxu0 %v14095_v41  ;;  %v14119_v41 = vld [vmem:[#allocation12 + $0x78] sm:$0xff]  }
 0xa55   :  { %12728 = vmatmul.mubr.bf16.gmra.mrb[112].mxu0 %v14096_v57  ;;  %v14121_v57 = vld [vmem:[#allocation12 + $0x140] sm:$0xff]  }
 0xa56   :  { %12731 = vmatprep.mubr.bf16.mxu0 %v14099_v4 }
 0xa5d   :  { %12732 = vmatmul.mubr.bf16.gmra.mrb[116].mxu0 %v14101_v58  ;;  %v14122_v58 = vld [vmem:[#allocation12 + $0x100] sm:$0xff]  }
 0xab8   :  { %v16534_v8 = vpop.f32.mrb[56].mxu0 }
 0xab9   :  { %v16536_v38 = vpop.f32.mrb[57].mxu0 }
 0xaba   :  { %v16538_v21 = vpop.f32.mrb[58].mxu0 }
 0xabb   :  { %v8862_v32 = vpack.c.bf16 %v16538_v21, %v16534_v8  ;;  %v16542_v34 = vpop.f32.mrb[59].mxu0  ;;  %v14131_v21 = vld [vmem:[#allocation12 + $0x168] sm:$0xff]  }
 0xabc   :  { %v8861_v23 = vpack.c.bf16 %v16542_v34, %v16536_v38  ;;  %v14126_v38 = vld [vmem:[#allocation12 + $0x110] sm:$0xff]  }
 0xac0   :  { %v16546_v25 = vpop.f32.mrb[60].mxu0 }
 0xac1   :  { %v8622_v62 = vpop.f32.mrb[61].mxu0 }
 0xac2   :  { %v16548_v5 = vpop.f32.mrb[62].mxu0 }
 0xac3   :  { %v8864_v9 = vpack.c.bf16 %v16548_v5, %v16546_v25  ;;  %v8625_v17 = vpop.f32.mrb[63].mxu0  ;;  %v14128_v25 = vld [vmem:[#allocation12 + $0x118] sm:$0xff]  }
 0xac4   :  { %v8863_v26 = vpack.c.bf16 %v8625_v17, %v8622_v62  ;;  %v14123_v17 = vld [vmem:[#allocation12 + $0x148] sm:$0xff]  }
 0xac8   :  { %v12681_v46 = vpop.f32.mrb[64].mxu0 }
 0xac9   :  { %v8638_v54 = vpop.f32.mrb[65].mxu0 }
 0xaca   :  { %v12682_v49 = vpop.f32.mrb[66].mxu0 }
 0xacb   :  { %v8866_v51 = vpack.c.bf16 %v12682_v49, %v12681_v46  ;;  %v8641_v1 = vpop.f32.mrb[67].mxu0 }
 0xacc   :  { %v8865_v61 = vpack.c.bf16 %v8641_v1, %v8638_v54  ;;  %v14125_v54 = vld [vmem:[#allocation12 + $0x150] sm:$0xff]  }
 0xad0   :  { %v12685_v10 = vpop.f32.mrb[68].mxu0 }
 0xad1   :  { %v8654_v20 = vpop.f32.mrb[69].mxu0 }
 0xad2   :  { %v12686_v7 = vpop.f32.mrb[70].mxu0 }
 0xad3   :  { %v8868_v28 = vpack.c.bf16 %v12686_v7, %v12685_v10  ;;  %v8657_v27 = vpop.f32.mrb[71].mxu0 }
 0xad4   :  { %v8867_v16 = vpack.c.bf16 %v8657_v27, %v8654_v20  ;;  %v14130_v27 = vld [vmem:[#allocation12 + $0x120] sm:$0xff]  }
 0xad6   :  { %9086 = vmatprep.mubr.bf16.mxu0 %v8867_v16 }
 0xad7   :  { %9087 = vmatmul.mubr.bf16.vlgmr.msra.gmra.mrb[120].mxu0 %v8865_v61 }
 0xad8   :  { %12332 = vmatpush3.bf16.msra.mxu0 %v14106_v35  ;;  %9094 = vmatprep.mubr.bf16.mxu0 %v8868_v28  ;;  %v16552_v60 = vpop.f32.mrb[72].mxu0  ;;  %v14133_v35 = vld [vmem:[#allocation12 + $0x170] sm:$0xff]  }
 0xad9   :  { %12333 = vmatprep.subr.bf16.mxu0 %v14107_v31  ;;  %v16554_v18 = vpop.f32.mrb[73].mxu0 }
 0xada   :  { %v16556_v63 = vpop.f32.mrb[74].mxu0 }
 0xadb   :  { %v8870_v45 = vpack.c.bf16 %v16556_v63, %v16552_v60  ;;  %v16560_v50 = vpop.f32.mrb[75].mxu0  ;;  %v14146_v60 = vld [vmem:[#allocation12 + $0x1a0] sm:$0xff]  }
 0xadc   :  { %12334 = vmatpush3.bf16.msra.mxu0 %v14108_v2  ;;  %v8869_v12 = vpack.c.bf16 %v16560_v50, %v16554_v18  ;;  %v14142_v18 = vld [vmem:[#allocation12 + $0x190] sm:$0xff]  }
 0xadd   :  { %12335 = vmatprep.subr.bf16.mxu0 %v14109_v36 }
 0xadf   :  { %9095 = vmatmul.mubr.bf16.gmra.mrb[124].mxu0 %v8866_v51 }
 0xae0   :  { %12336 = vmatpush3.bf16.msra.mxu0 %v14110_v52  ;;  %9231 = vmatprep.mubr.bf16.mxu0 %v8863_v26  ;;  %v16564_v53 = vpop.f32.mrb[76].mxu0  ;;  %v14124_v26 = vld [vmem:[#allocation12 + $0x108] sm:$0xff]  }
 0xae1   :  { %12337 = vmatprep.subr.bf16.mxu0 %v14111_v22  ;;  %v8686_v24 = vpop.f32.mrb[77].mxu0  ;;  %v14134_v22 = vld [vmem:[#allocation12 + $0x130] sm:$0xff]  }
 0xae2   :  { %v16566_v55 = vpop.f32.mrb[78].mxu0 }
 0xae3   :  { %v8872_v40 = vpack.c.bf16 %v16566_v55, %v16564_v53  ;;  %v8689_v42 = vpop.f32.mrb[79].mxu0  ;;  %v14144_v53 = vld [vmem:[#allocation12 + $0x198] sm:$0xff]  }
 0xae4   :  { %12338 = vmatpush3.bf16.msra.mxu0 %v14112_v33  ;;  %v8871_v14 = vpack.c.bf16 %v8689_v42, %v8686_v24  ;;  %v14136_v24 = vld [vmem:[#allocation12 + $0x138] sm:$0xff]  }
 0xae5   :  { %12339 = vmatprep.subr.bf16.mxu0 %v14113_v15  ;;  %v14135_v15 = vld [vmem:[#allocation12 + $0x178] sm:$0xff]  }
 0xae8   :  { %12340 = vmatpush3.bf16.msra.mxu0 %v14114_v6  ;;  %v16570_v3 = vpop.f32.mrb[80].mxu0  ;;  %v14137_v6 = vld [vmem:[#allocation12 + $0x1c0] sm:$0xff]  }
 0xae9   :  { %12341 = vmatprep.subr.bf16.mxu0 %v14115_v11  ;;  %v16572_v43 = vpop.f32.mrb[81].mxu0 }
 0xaea   :  { %v16574_v29 = vpop.f32.mrb[82].mxu0 }
 0xaeb   :  { %v8874_v39 = vpack.c.bf16 %v16574_v29, %v16570_v3  ;;  %v16578_v19 = vpop.f32.mrb[83].mxu0  ;;  %v14167_v3 = vld [vmem:[#allocation12 + $0x278] sm:$0xff]  }
 0xaec   :  { %12342 = vmatpush3.bf16.msra.mxu0 %v14116_v44  ;;  %v8873_v56 = vpack.c.bf16 %v16578_v19, %v16572_v43  ;;  %v14161_v43 = vld [vmem:[#allocation12 + $0x260] sm:$0xff]   ;;  %v14168_v29 = vld [vmem:[#allocation12 + $0x238] sm:$0xff]  }
 0xaed   :  { %12343 = vmatprep.subr.bf16.mxu0 %v14117_v13  ;;  %v14162_v19 = vld [vmem:[#allocation12 + $0x220] sm:$0xff]  }
 0xaf0   :  { %12344 = vmatpush3.bf16.msra.mxu0 %v14118_v48  ;;  %v16582_v37 = vpop.f32.mrb[84].mxu0  ;;  %v14138_v48 = vld [vmem:[#allocation12 + $0x180] sm:$0xff]  }
 0xaf1   :  { %12345 = vmatprep.subr.bf16.mxu0 %v14119_v41  ;;  %v16584_v4 = vpop.f32.mrb[85].mxu0 }
 0xaf2   :  { %v16586_v59 = vpop.f32.mrb[86].mxu0 }
 0xaf3   :  { %v8876_v0 = vpack.c.bf16 %v16586_v59, %v16582_v37  ;;  %v16590_v30 = vpop.f32.mrb[87].mxu0  ;;  %v14164_v37 = vld [vmem:[#allocation12 + $0x228] sm:$0xff]   ;;  %v14165_v59 = vld [vmem:[#allocation12 + $0x270] sm:$0xff]  }
 0xaf4   :  { %12346 = vmatpush3.bf16.msra.mxu0 %v14120_v47  ;;  %v8875_v62 = vpack.c.bf16 %v16590_v30, %v16584_v4  ;;  %v14139_v47 = vld [vmem:[#allocation12 + $0x1c8] sm:$0xff]  }
 0xaf5   :  { %12359 = vmatprep.subr.bf16.mxu0 %v14121_v57  ;;  %v14140_v57 = vld [vmem:[#allocation12 + $0x188] sm:$0xff]  }
 0xaf6   :  { %v14148_v4 = vld [vmem:[#allocation12 + $0x1a8] sm:$0xff]  }
 0xaf7   :  { %9232 = vmatmul.mubr.bf16.vlgmr.msra.gmra.mrb[128].mxu0 %v8861_v23  ;;  %v14127_v23 = vld [vmem:[#allocation12 + $0x158] sm:$0xff]  }
 0xaf8   :  { %9239 = vmatprep.mubr.bf16.mxu0 %v8864_v9  ;;  %12360 = vmatpush3.bf16.msra.mxu0 %v14122_v58  ;;  %v16600_v46 = vpop.f32.mrb[88].mxu0  ;;  %v14129_v9 = vld [vmem:[#allocation12 + $0x160] sm:$0xff]  }
 0xaf9   :  { %12361 = vmatprep.subr.bf16.mxu0 %v14123_v17  ;;  %v16602_v49 = vpop.f32.mrb[89].mxu0  ;;  %v14141_v17 = vld [vmem:[#allocation12 + $0x1d0] sm:$0xff]  }
 0xafa   :  { %v16604_v51 = vpop.f32.mrb[90].mxu0 }
 0xafb   :  { %v8878_v1 = vpack.c.bf16 %v16604_v51, %v16600_v46  ;;  %v16608_v61 = vpop.f32.mrb[91].mxu0  ;;  %v14183_v46 = vld [vmem:[#allocation12 + $0x2f8] sm:$0xff]  }
 0xafc   :  { %12362 = vmatpush3.bf16.msra.mxu0 %v14124_v26  ;;  %v8877_v34 = vpack.c.bf16 %v16608_v61, %v16602_v49  ;;  %v14177_v49 = vld [vmem:[#allocation12 + $0x2e0] sm:$0xff]   ;;  %v14184_v51 = vld [vmem:[#allocation12 + $0x2b8] sm:$0xff]  }
 0xafd   :  { %12363 = vmatprep.subr.bf16.mxu0 %v14125_v54  ;;  %v14178_v61 = vld [vmem:[#allocation12 + $0x2a0] sm:$0xff]  }
 0xaff   :  { %9240 = vmatmul.mubr.bf16.gmra.mrb[132].mxu0 %v8862_v32  ;;  %v14132_v32 = vld [vmem:[#allocation12 + $0x128] sm:$0xff]  }
 0xb00   :  { %12364 = vmatpush3.bf16.msra.mxu0 %v14126_v38  ;;  %9409 = vmatprep.mubr.bf16.mxu0 %v8871_v14  ;;  %v16615_v5 = vpop.f32.mrb[92].mxu0 }
 0xb01   :  { %12365 = vmatprep.subr.bf16.mxu0 %v14127_v23  ;;  %v16617_v10 = vpop.f32.mrb[93].mxu0 }
 0xb02   :  { %v16619_v20 = vpop.f32.mrb[94].mxu0 }
 0xb03   :  { %v8880_v7 = vpack.c.bf16 %v16619_v20, %v16615_v5  ;;  %v16623_v28 = vpop.f32.mrb[95].mxu0  ;;  %v14180_v5 = vld [vmem:[#allocation12 + $0x2a8] sm:$0xff]   ;;  %v14181_v20 = vld [vmem:[#allocation12 + $0x2f0] sm:$0xff]  }
 0xb04   :  { %12366 = vmatpush3.bf16.msra.mxu0 %v14128_v25  ;;  %v8879_v8 = vpack.c.bf16 %v16623_v28, %v16617_v10  ;;  %v14170_v10 = vld [vmem:[#allocation12 + $0x280] sm:$0xff]   ;;  %v14171_v28 = vld [vmem:[#allocation12 + $0x2c8] sm:$0xff]  }
 0xb05   :  { %12367 = vmatprep.subr.bf16.mxu0 %v14129_v9 }
 0xb08   :  { %12368 = vmatpush3.bf16.msra.mxu0 %v14130_v27  ;;  %v16627_v16 = vpop.f32.mrb[96].mxu0 }
 0xb09   :  { %12369 = vmatprep.subr.bf16.mxu0 %v14131_v21  ;;  %v16629_v31 = vpop.f32.mrb[97].mxu0 }
 0xb0a   :  { %v16631_v2 = vpop.f32.mrb[98].mxu0 }
 0xb0b   :  { %v8882_v36 = vpack.c.bf16 %v16631_v2, %v16627_v16  ;;  %v16635_v52 = vpop.f32.mrb[99].mxu0  ;;  %v14199_v16 = vld [vmem:[#allocation12 + $0x378] sm:$0xff]  }
 0xb0c   :  { %12370 = vmatpush3.bf16.msra.mxu0 %v14132_v32  ;;  %v8881_v33 = vpack.c.bf16 %v16635_v52, %v16629_v31  ;;  %v14193_v31 = vld [vmem:[#allocation12 + $0x360] sm:$0xff]   ;;  %v14200_v2 = vld [vmem:[#allocation12 + $0x338] sm:$0xff]  }
 0xb0d   :  { %12371 = vmatprep.subr.bf16.mxu0 %v14133_v35  ;;  %v14194_v52 = vld [vmem:[#allocation12 + $0x320] sm:$0xff]  }
 0xb10   :  { %12372 = vmatpush3.bf16.msra.mxu0 %v14134_v22  ;;  %v16639_v42 = vpop.f32.mrb[100].mxu0 }
 0xb11   :  { %12373 = vmatprep.subr.bf16.mxu0 %v14135_v15  ;;  %v16641_v14 = vpop.f32.mrb[101].mxu0 }
 0xb12   :  { %v16643_v11 = vpop.f32.mrb[102].mxu0 }
 0xb13   :  { %v8884_v44 = vpack.c.bf16 %v16643_v11, %v16639_v42  ;;  %v16647_v13 = vpop.f32.mrb[103].mxu0  ;;  %v14196_v42 = vld [vmem:[#allocation12 + $0x328] sm:$0xff]   ;;  %v14197_v11 = vld [vmem:[#allocation12 + $0x370] sm:$0xff]  }
 0xb14   :  { %12374 = vmatpush3.bf16.msra.mxu0 %v14136_v24  ;;  %v8883_v41 = vpack.c.bf16 %v16647_v13, %v16641_v14  ;;  %v14150_v24 = vld [vmem:[#allocation12 + $0x1b0] sm:$0xff]   ;;  %v14186_v14 = vld [vmem:[#allocation12 + $0x300] sm:$0xff]   ;;  %v14187_v13 = vld [vmem:[#allocation12 + $0x348] sm:$0xff]  }
 0xb15   :  { %12387 = vmatprep.subr.bf16.mxu0 %v14137_v6 }
 0xb17   :  { %9410 = vmatmul.mubr.bf16.vlgmr.msra.gmra.mrb[136].mxu0 %v8869_v12  ;;  %v14143_v12 = vld [vmem:[#allocation12 + $0x1d8] sm:$0xff]  }
 0xb18   :  { %12388 = vmatpush3.bf16.msra.mxu0 %v14138_v48  ;;  %9417 = vmatprep.mubr.bf16.mxu0 %v8872_v40  ;;  %v16657_v58 = vpop.f32.mrb[104].mxu0  ;;  %v14145_v40 = vld [vmem:[#allocation12 + $0x1e0] sm:$0xff]   ;;  %v14151_v48 = vld [vmem:[#allocation12 + $0x1f8] sm:$0xff]  }
 0xb19   :  { %12389 = vmatprep.subr.bf16.mxu0 %v14139_v47  ;;  %v16659_v26 = vpop.f32.mrb[105].mxu0  ;;  %v14152_v47 = vld [vmem:[#allocation12 + $0x1b8] sm:$0xff]  }
 0xb1a   :  { %v16661_v54 = vpop.f32.mrb[106].mxu0 }
 0xb1b   :  { %v8886_v38 = vpack.c.bf16 %v16661_v54, %v16657_v58  ;;  %v16665_v23 = vpop.f32.mrb[107].mxu0  ;;  %v14214_v58 = vld [vmem:[#allocation12 + $0x3b0] sm:$0xff]  }
 0xb1c   :  { %12390 = vmatpush3.bf16.msra.mxu0 %v14140_v57  ;;  %v8885_v50 = vpack.c.bf16 %v16665_v23, %v16659_v26  ;;  %v14209_v26 = vld [vmem:[#allocation12 + $0x3e0] sm:$0xff]  }
 0xb1d   :  { %12391 = vmatprep.subr.bf16.mxu0 %v14141_v17  ;;  %v14153_v17 = vld [vmem:[#allocation12 + $0x240] sm:$0xff]  }
 0xb1e   :  { %v14210_v23 = vld [vmem:[#allocation12 + $0x3a0] sm:$0xff]  }
 0xb1f   :  { %9418 = vmatmul.mubr.bf16.gmra.mrb[140].mxu0 %v8870_v45  ;;  %v14147_v45 = vld [vmem:[#allocation12 + $0x1e8] sm:$0xff]  }
 0xb20   :  { %12392 = vmatpush3.bf16.msra.mxu0 %v14142_v18  ;;  %9591 = vmatprep.mubr.bf16.mxu0 %v8875_v62  ;;  %v16675_v55 = vpop.f32.mrb[108].mxu0  ;;  %v14149_v62 = vld [vmem:[#allocation12 + $0x1f0] sm:$0xff]  }
 0xb21   :  { %12393 = vmatprep.subr.bf16.mxu0 %v14143_v12  ;;  %v16677_v25 = vpop.f32.mrb[109].mxu0 }
 0xb22   :  { %v16679_v9 = vpop.f32.mrb[110].mxu0 }
 0xb23   :  { %v8888_v27 = vpack.c.bf16 %v16679_v9, %v16675_v55  ;;  %v16683_v21 = vpop.f32.mrb[111].mxu0  ;;  %v14212_v55 = vld [vmem:[#allocation12 + $0x3a8] sm:$0xff]   ;;  %v14213_v9 = vld [vmem:[#allocation12 + $0x3f0] sm:$0xff]  }
 0xb24   :  { %12394 = vmatpush3.bf16.msra.mxu0 %v14144_v53  ;;  %v8887_v63 = vpack.c.bf16 %v16683_v21, %v16677_v25  ;;  %v14202_v25 = vld [vmem:[#allocation12 + $0x380] sm:$0xff]   ;;  %v14203_v21 = vld [vmem:[#allocation12 + $0x3c8] sm:$0xff]  }
 0xb25   :  { %12395 = vmatprep.subr.bf16.mxu0 %v14145_v40 }
 0xb28   :  { %12396 = vmatpush3.bf16.msra.mxu0 %v14146_v60  ;;  %v16687_v30 = vpop.f32.mrb[112].mxu0  ;;  %v14154_v60 = vld [vmem:[#allocation12 + $0x200] sm:$0xff]  }
 0xb29   :  { %12397 = vmatprep.subr.bf16.mxu0 %v14147_v45  ;;  %v16689_v32 = vpop.f32.mrb[113].mxu0 }
 0xb2a   :  { %v16691_v35 = vpop.f32.mrb[114].mxu0 }
 0xb2b   :  { %v8890_v22 = vpack.c.bf16 %v16691_v35, %v16687_v30  ;;  %v16695_v15 = vpop.f32.mrb[115].mxu0 }
 0xb2c   :  { %12398 = vmatpush3.bf16.msra.mxu0 %v14148_v4  ;;  %v8889_v6 = vpack.c.bf16 %v16695_v15, %v16689_v32  ;;  %v14155_v4 = vld [vmem:[#allocation12 + $0x248] sm:$0xff]  }
 0xb2d   :  { %12399 = vmatprep.subr.bf16.mxu0 %v14149_v62  ;;  %v14156_v62 = vld [vmem:[#allocation12 + $0x208] sm:$0xff]  }
 0xb30   :  { %12400 = vmatpush3.bf16.msra.mxu0 %v14150_v24  ;;  %v16699_v57 = vpop.f32.mrb[116].mxu0  ;;  %v14157_v24 = vld [vmem:[#allocation12 + $0x250] sm:$0xff]  }
 0xb31   :  { %12401 = vmatprep.subr.bf16.mxu0 %v14151_v48  ;;  %v16701_v18 = vpop.f32.mrb[117].mxu0  ;;  %v14158_v48 = vld [vmem:[#allocation12 + $0x210] sm:$0xff]  }
 0xb32   :  { %v16703_v12 = vpop.f32.mrb[118].mxu0 }
 0xb33   :  { %v8892_v53 = vpack.c.bf16 %v16703_v12, %v16699_v57  ;;  %v16707_v40 = vpop.f32.mrb[119].mxu0 }
 0xb34   :  { %12402 = vmatpush3.bf16.msra.mxu0 %v14152_v47  ;;  %v8891_v45 = vpack.c.bf16 %v16707_v40, %v16701_v18  ;;  %v14159_v47 = vld [vmem:[#allocation12 + $0x258] sm:$0xff]  }
 0xb35   :  { %12415 = vmatprep.subr.bf16.mxu0 %v14153_v17  ;;  %v14160_v17 = vld [vmem:[#allocation12 + $0x218] sm:$0xff]  }
 0xb36   :  { %v14215_v18 = vld [vmem:[#allocation12 + $0x3f8] sm:$0xff]  }
 0xb37   :  { %9592 = vmatmul.mubr.bf16.vlgmr.msra.gmra.mrb[144].mxu0 %v8873_v56  ;;  %v14163_v56 = vld [vmem:[#allocation12 + $0x268] sm:$0xff]  }
 0xb38   :  { %12416 = vmatpush3.bf16.msra.mxu0 %v14154_v60  ;;  %9599 = vmatprep.mubr.bf16.mxu0 %v8876_v0  ;;  %v14166_v0 = vld [vmem:[#allocation12 + $0x230] sm:$0xff]  }
 0xb39   :  { %12417 = vmatprep.subr.bf16.mxu0 %v14155_v4  ;;  %v14173_v60 = vld [vmem:[#allocation12 + $0x2d0] sm:$0xff]  }
 0xb3a   :  { %v14174_v4 = vld [vmem:[#allocation12 + $0x290] sm:$0xff]  }
 0xb3c   :  { %12418 = vmatpush3.bf16.msra.mxu0 %v14156_v62  ;;  %v14175_v62 = vld [vmem:[#allocation12 + $0x2d8] sm:$0xff]  }
 0xb3d   :  { %12419 = vmatprep.subr.bf16.mxu0 %v14157_v24  ;;  %v14176_v24 = vld [vmem:[#allocation12 + $0x298] sm:$0xff]  }
 0xb3f   :  { %9600 = vmatmul.mubr.bf16.gmra.mrb[148].mxu0 %v8874_v39  ;;  %v14169_v39 = vld [vmem:[#allocation12 + $0x2c0] sm:$0xff]  }
 0xb40   :  { %12420 = vmatpush3.bf16.msra.mxu0 %v14158_v48  ;;  %9773 = vmatprep.mubr.bf16.mxu0 %v8879_v8  ;;  %v14172_v8 = vld [vmem:[#allocation12 + $0x288] sm:$0xff]   ;;  %v14189_v48 = vld [vmem:[#allocation12 + $0x350] sm:$0xff]  }
 0xb41   :  { %12421 = vmatprep.subr.bf16.mxu0 %v14159_v47  ;;  %v14190_v47 = vld [vmem:[#allocation12 + $0x310] sm:$0xff]  }
 0xb44   :  { %12422 = vmatpush3.bf16.msra.mxu0 %v14160_v17  ;;  %v14191_v17 = vld [vmem:[#allocation12 + $0x358] sm:$0xff]  }
 0xb45   :  { %12423 = vmatprep.subr.bf16.mxu0 %v14161_v43  ;;  %v14192_v43 = vld [vmem:[#allocation12 + $0x318] sm:$0xff]  }
 0xb48   :  { %12424 = vmatpush3.bf16.msra.mxu0 %v14162_v19  ;;  %v14205_v19 = vld [vmem:[#allocation12 + $0x3d0] sm:$0xff]  }
 0xb49   :  { %12425 = vmatprep.subr.bf16.mxu0 %v14163_v56  ;;  %v14206_v56 = vld [vmem:[#allocation12 + $0x390] sm:$0xff]  }
 0xb4c   :  { %12426 = vmatpush3.bf16.msra.mxu0 %v14164_v37  ;;  %v14207_v37 = vld [vmem:[#allocation12 + $0x3d8] sm:$0xff]  }
 0xb4d   :  { %12427 = vmatprep.subr.bf16.mxu0 %v14165_v59  ;;  %v14208_v59 = vld [vmem:[#allocation12 + $0x398] sm:$0xff]  }
 0xb50   :  { %12428 = vmatpush3.bf16.msra.mxu0 %v14166_v0 }
 0xb51   :  { %12429 = vmatprep.subr.bf16.mxu0 %v14167_v3 }
 0xb54   :  { %12430 = vmatpush3.bf16.msra.mxu0 %v14168_v29 }
 0xb55   :  { %12443 = vmatprep.subr.bf16.mxu0 %v14169_v39 }
 0xb57   :  { %9774 = vmatmul.mubr.bf16.vlgmr.msra.gmra.mrb[152].mxu0 %v8877_v34  ;;  %v14179_v34 = vld [vmem:[#allocation12 + $0x2e8] sm:$0xff]  }
 0xb58   :  { %12444 = vmatpush3.bf16.msra.mxu0 %v14170_v10  ;;  %9781 = vmatprep.mubr.bf16.mxu0 %v8880_v7  ;;  %v14182_v7 = vld [vmem:[#allocation12 + $0x2b0] sm:$0xff]  }
 0xb59   :  { %12445 = vmatprep.subr.bf16.mxu0 %v14171_v28 }
 0xb5c   :  { %12446 = vmatpush3.bf16.msra.mxu0 %v14172_v8 }
 0xb5d   :  { %12447 = vmatprep.subr.bf16.mxu0 %v14173_v60 }
 0xb5f   :  { %9782 = vmatmul.mubr.bf16.gmra.mrb[156].mxu0 %v8878_v1  ;;  %v14185_v1 = vld [vmem:[#allocation12 + $0x340] sm:$0xff]  }
 0xb60   :  { %12448 = vmatpush3.bf16.msra.mxu0 %v14174_v4  ;;  %9955 = vmatprep.mubr.bf16.mxu0 %v8883_v41  ;;  %v14188_v41 = vld [vmem:[#allocation12 + $0x308] sm:$0xff]  }
 0xb61   :  { %12449 = vmatprep.subr.bf16.mxu0 %v14175_v62 }
 0xb64   :  { %12450 = vmatpush3.bf16.msra.mxu0 %v14176_v24 }
 0xb65   :  { %12451 = vmatprep.subr.bf16.mxu0 %v14177_v49 }
 0xb68   :  { %12452 = vmatpush3.bf16.msra.mxu0 %v14178_v61 }
 0xb69   :  { %12453 = vmatprep.subr.bf16.mxu0 %v14179_v34 }
 0xb6c   :  { %12454 = vmatpush3.bf16.msra.mxu0 %v14180_v5 }
 0xb6d   :  { %12455 = vmatprep.subr.bf16.mxu0 %v14181_v20 }
 0xb70   :  { %12456 = vmatpush3.bf16.msra.mxu0 %v14182_v7 }
 0xb71   :  { %12457 = vmatprep.subr.bf16.mxu0 %v14183_v46 }
 0xb74   :  { %12458 = vmatpush3.bf16.msra.mxu0 %v14184_v51 }
 0xb75   :  { %12471 = vmatprep.subr.bf16.mxu0 %v14185_v1 }
 0xb77   :  { %9956 = vmatmul.mubr.bf16.vlgmr.msra.gmra.mrb[160].mxu0 %v8881_v33  ;;  %v14195_v33 = vld [vmem:[#allocation12 + $0x368] sm:$0xff]  }
 0xb78   :  { %12472 = vmatpush3.bf16.msra.mxu0 %v14186_v14  ;;  %9963 = vmatprep.mubr.bf16.mxu0 %v8884_v44  ;;  %v14198_v44 = vld [vmem:[#allocation12 + $0x330] sm:$0xff]  }
 0xb79   :  { %12473 = vmatprep.subr.bf16.mxu0 %v14187_v13 }
 0xb7c   :  { %12474 = vmatpush3.bf16.msra.mxu0 %v14188_v41 }
 0xb7d   :  { %12475 = vmatprep.subr.bf16.mxu0 %v14189_v48 }
 0xb7f   :  { %9964 = vmatmul.mubr.bf16.gmra.mrb[164].mxu0 %v8882_v36  ;;  %v14201_v36 = vld [vmem:[#allocation12 + $0x3c0] sm:$0xff]  }
 0xb80   :  { %12476 = vmatpush3.bf16.msra.mxu0 %v14190_v47  ;;  %10137 = vmatprep.mubr.bf16.mxu0 %v8887_v63  ;;  %v14204_v63 = vld [vmem:[#allocation12 + $0x388] sm:$0xff]  }
 0xb81   :  { %12477 = vmatprep.subr.bf16.mxu0 %v14191_v17 }
 0xb84   :  { %12478 = vmatpush3.bf16.msra.mxu0 %v14192_v43 }
 0xb85   :  { %12479 = vmatprep.subr.bf16.mxu0 %v14193_v31 }
 0xb88   :  { %12480 = vmatpush3.bf16.msra.mxu0 %v14194_v52 }
 0xb89   :  { %12481 = vmatprep.subr.bf16.mxu0 %v14195_v33 }
 0xb8c   :  { %12482 = vmatpush3.bf16.msra.mxu0 %v14196_v42 }
 0xb8d   :  { %12483 = vmatprep.subr.bf16.mxu0 %v14197_v11 }
 0xb90   :  { %12484 = vmatpush3.bf16.msra.mxu0 %v14198_v44 }
 0xb91   :  { %12485 = vmatprep.subr.bf16.mxu0 %v14199_v16 }
 0xb94   :  { %12486 = vmatpush3.bf16.msra.mxu0 %v14200_v2 }
 0xb95   :  { %12499 = vmatprep.subr.bf16.mxu0 %v14201_v36 }
 0xb97   :  { %10138 = vmatmul.mubr.bf16.vlgmr.msra.gmra.mrb[168].mxu0 %v8885_v50  ;;  %v14211_v50 = vld [vmem:[#allocation12 + $0x3e8] sm:$0xff]  }
 0xb98   :  { %12500 = vmatpush3.bf16.msra.mxu0 %v14202_v25  ;;  %10145 = vmatprep.mubr.bf16.mxu0 %v8888_v27 }
 0xb99   :  { %12501 = vmatprep.subr.bf16.mxu0 %v14203_v21 }
 0xb9c   :  { %12502 = vmatpush3.bf16.msra.mxu0 %v14204_v63 }
 0xb9d   :  { %12503 = vmatprep.subr.bf16.mxu0 %v14205_v19 }
 0xb9f   :  { %10146 = vmatmul.mubr.bf16.gmra.mrb[172].mxu0 %v8886_v38 }
 0xba0   :  { %12504 = vmatpush3.bf16.msra.mxu0 %v14206_v56  ;;  %10319 = vmatprep.mubr.bf16.mxu0 %v8891_v45  ;;  %v14216_v45 = vld [vmem:[#allocation12 + $0x3b8] sm:$0xff]  }
 0xba1   :  { %12505 = vmatprep.subr.bf16.mxu0 %v14207_v37 }
 0xba4   :  { %12506 = vmatpush3.bf16.msra.mxu0 %v14208_v59 }
 0xba5   :  { %12507 = vmatprep.subr.bf16.mxu0 %v14209_v26 }
 0xba8   :  { %12508 = vmatpush3.bf16.msra.mxu0 %v14210_v23 }
 0xba9   :  { %12509 = vmatprep.subr.bf16.mxu0 %v14211_v50 }
 0xbaa   :  { %v12319_v27 = vpop.f32.mrb[120].mxu0 }
 0xbab   :  { %v12320_v0 = vpop.f32.mrb[121].mxu0 }
 0xbac   :  { %12510 = vmatpush3.bf16.msra.mxu0 %v14212_v55  ;;  %v12321_v54 = vadd.f32 %v12320_v0, %v12319_v27  ;;  %v12322_v38 = vpop.f32.mrb[122].mxu0 }
 0xbad   :  { %12511 = vmatprep.subr.bf16.mxu0 %v14213_v9  ;;  %v12323_v3 = vpop.f32.mrb[123].mxu0 }
 0xbae   :  { %v12324_v40 = vadd.f32 %v12323_v3, %v12322_v38 }
 0xbb0   :  { %12512 = vmatpush3.bf16.msra.mxu0 %v14214_v58 }
 0xbb1   :  { %12513 = vmatprep.subr.bf16.mxu0 %v14215_v18 }
 0xbb2   :  { %v12325_v29 = vpop.f32.mrb[124].mxu0 }
 0xbb3   :  { %v12326_v39 = vpop.f32.mrb[125].mxu0 }
 0xbb4   :  { %12514 = vmatpush3.bf16.msra.mxu0 %v14216_v45  ;;  %v12327_v10 = vadd.f32 %v12326_v39, %v12325_v29  ;;  %v12328_v28 = vpop.f32.mrb[126].mxu0 }
 0xbb5   :  { %v12329_v8 = vpop.f32.mrb[127].mxu0 }
 0xbb6   :  { %v12330_v60 = vadd.f32 %v12329_v8, %v12328_v28 }
 0xbb7   :  { %10320 = vmatmul.mubr.bf16.vlgmr.msra.gmra.mrb[176].mxu0 %v8889_v6 }
 0xbb8   :  { %10327 = vmatprep.mubr.bf16.mxu0 %v8892_v53 }
 0xbbf   :  { %10328 = vmatmul.mubr.bf16.gmra.mrb[180].mxu0 %v8890_v22 }
 0xbca   :  { %v12347_v4 = vpop.f32.mrb[128].mxu0 }
 0xbcb   :  { %v12348_v62 = vpop.f32.mrb[129].mxu0 }
 0xbcc   :  { %v12349_v24 = vadd.f32 %v12348_v62, %v12347_v4  ;;  %v12350_v49 = vpop.f32.mrb[130].mxu0  ;;  %v14217_v4 = vld [vmem:[#allocation16] sm:$0xff]  }
 0xbcd   :  { %v12351_v61 = vpop.f32.mrb[131].mxu0  ;;  %12739 = vmatprep.mubr.msk.bf16.mxu0 %vm10414_vm0, %v14217_v4 }
 0xbce   :  { %v9234_v34 = vadd.f32 %v12349_v24, %v12321_v54  ;;  %v12352_v5 = vadd.f32 %v12351_v61, %v12350_v49 }
 0xbd0   :  { %v9237_v20 = vadd.f32 %v12352_v5, %v12324_v40 }
 0xbd2   :  { %v12353_v7 = vpop.f32.mrb[132].mxu0 }
 0xbd3   :  { %v12354_v46 = vpop.f32.mrb[133].mxu0 }
 0xbd4   :  { %v12355_v32 = vadd.f32 %v12354_v46, %v12353_v7  ;;  %v12356_v15 = vpop.f32.mrb[134].mxu0 }
 0xbd5   :  { %v12357_v6 = vpop.f32.mrb[135].mxu0 }
 0xbd6   :  { %v9242_v51 = vadd.f32 %v12355_v32, %v12327_v10  ;;  %v12358_v57 = vadd.f32 %v12357_v6, %v12356_v15 }
 0xbd8   :  { %v9245_v12 = vadd.f32 %v12358_v57, %v12330_v60 }
 0xbea   :  { %v12375_v53 = vpop.f32.mrb[136].mxu0 }
 0xbeb   :  { %v12376_v1 = vpop.f32.mrb[137].mxu0 }
 0xbec   :  { %v12377_v30 = vadd.f32 %v12376_v1, %v12375_v53  ;;  %v12378_v35 = vpop.f32.mrb[138].mxu0 }
 0xbed   :  { %v12379_v22 = vpop.f32.mrb[139].mxu0 }
 0xbee   :  { %v9426_v14 = vadd.f32 %v12377_v30, %v9234_v34  ;;  %v12380_v13 = vadd.f32 %v12379_v22, %v12378_v35 }
 0xbf0   :  { %v9427_v41 = vadd.f32 %v12380_v13, %v9237_v20 }
 0xbf2   :  { %v12381_v48 = vpop.f32.mrb[140].mxu0 }
 0xbf3   :  { %v12382_v47 = vpop.f32.mrb[141].mxu0 }
 0xbf4   :  { %v12383_v17 = vadd.f32 %v12382_v47, %v12381_v48  ;;  %v12384_v43 = vpop.f32.mrb[142].mxu0 }
 0xbf5   :  { %v12385_v31 = vpop.f32.mrb[143].mxu0 }
 0xbf6   :  { %v9428_v52 = vadd.f32 %v12383_v17, %v9242_v51  ;;  %v12386_v33 = vadd.f32 %v12385_v31, %v12384_v43 }
 0xbf8   :  { %v9429_v42 = vadd.f32 %v12386_v33, %v9245_v12 }
 0xc0a   :  { %v12403_v11 = vpop.f32.mrb[144].mxu0 }
 0xc0b   :  { %v12404_v44 = vpop.f32.mrb[145].mxu0 }
 0xc0c   :  { %v12405_v16 = vadd.f32 %v12404_v44, %v12403_v11  ;;  %v12406_v2 = vpop.f32.mrb[146].mxu0 }
 0xc0d   :  { %v12407_v36 = vpop.f32.mrb[147].mxu0 }
 0xc0e   :  { %v9608_v25 = vadd.f32 %v12405_v16, %v9426_v14  ;;  %v12408_v21 = vadd.f32 %v12407_v36, %v12406_v2 }
 0xc10   :  { %v9609_v63 = vadd.f32 %v12408_v21, %v9427_v41 }
 0xc12   :  { %v12409_v19 = vpop.f32.mrb[148].mxu0 }
 0xc13   :  { %v12410_v56 = vpop.f32.mrb[149].mxu0 }
 0xc14   :  { %v12411_v37 = vadd.f32 %v12410_v56, %v12409_v19  ;;  %v12412_v59 = vpop.f32.mrb[150].mxu0 }
 0xc15   :  { %v12413_v26 = vpop.f32.mrb[151].mxu0 }
 0xc16   :  { %v9610_v23 = vadd.f32 %v12411_v37, %v9428_v52  ;;  %v12414_v50 = vadd.f32 %v12413_v26, %v12412_v59 }
 0xc18   :  { %v9611_v55 = vadd.f32 %v12414_v50, %v9429_v42 }
 0xc2a   :  { %v12431_v9 = vpop.f32.mrb[152].mxu0 }
 0xc2b   :  { %v12432_v27 = vpop.f32.mrb[153].mxu0 }
 0xc2c   :  { %v12433_v0 = vadd.f32 %v12432_v27, %v12431_v9  ;;  %v12434_v58 = vpop.f32.mrb[154].mxu0 }
 0xc2d   :  { %v12435_v54 = vpop.f32.mrb[155].mxu0 }
 0xc2e   :  { %v9790_v38 = vadd.f32 %v12433_v0, %v9608_v25  ;;  %v12436_v3 = vadd.f32 %v12435_v54, %v12434_v58 }
 0xc30   :  { %v9791_v18 = vadd.f32 %v12436_v3, %v9609_v63 }
 0xc32   :  { %v12437_v40 = vpop.f32.mrb[156].mxu0 }
 0xc33   :  { %v12438_v45 = vpop.f32.mrb[157].mxu0 }
 0xc34   :  { %v12439_v29 = vadd.f32 %v12438_v45, %v12437_v40  ;;  %v12440_v39 = vpop.f32.mrb[158].mxu0 }
 0xc35   :  { %v12441_v10 = vpop.f32.mrb[159].mxu0 }
 0xc36   :  { %v9792_v28 = vadd.f32 %v12439_v29, %v9610_v23  ;;  %v12442_v8 = vadd.f32 %v12441_v10, %v12440_v39 }
 0xc38   :  { %v9793_v60 = vadd.f32 %v12442_v8, %v9611_v55 }
 0xc4a   :  { %v12459_v62 = vpop.f32.mrb[160].mxu0 }
 0xc4b   :  { %v12460_v24 = vpop.f32.mrb[161].mxu0 }
 0xc4c   :  { %v12461_v49 = vadd.f32 %v12460_v24, %v12459_v62  ;;  %v12462_v61 = vpop.f32.mrb[162].mxu0 }
 0xc4d   :  { %v12463_v34 = vpop.f32.mrb[163].mxu0 }
 0xc4e   :  { %v9972_v5 = vadd.f32 %v12461_v49, %v9790_v38  ;;  %v12464_v20 = vadd.f32 %v12463_v34, %v12462_v61 }
 0xc50   :  { %v9973_v7 = vadd.f32 %v12464_v20, %v9791_v18 }
 0xc52   :  { %v12465_v46 = vpop.f32.mrb[164].mxu0 }
 0xc53   :  { %v12466_v32 = vpop.f32.mrb[165].mxu0 }
 0xc54   :  { %v12467_v15 = vadd.f32 %v12466_v32, %v12465_v46  ;;  %v12468_v6 = vpop.f32.mrb[166].mxu0  ;;  %v11673_v46 = vld [vmem:[#allocation13] ss:$0 sm:$0xff] }
 0xc55   :  { %v12469_v51 = vpop.f32.mrb[167].mxu0 }
 0xc56   :  { %v9974_v57 = vadd.f32 %v12467_v15, %v9792_v28  ;;  %v12470_v12 = vadd.f32 %v12469_v51, %v12468_v6 }
 0xc58   :  { %v9975_v53 = vadd.f32 %v12470_v12, %v9793_v60 }
 0xc6a   :  { %v12487_v1 = vpop.f32.mrb[168].mxu0 }
 0xc6b   :  { %v12488_v30 = vpop.f32.mrb[169].mxu0 }
 0xc6c   :  { %v12489_v35 = vadd.f32 %v12488_v30, %v12487_v1  ;;  %v12490_v22 = vpop.f32.mrb[170].mxu0 }
 0xc6d   :  { %v12491_v14 = vpop.f32.mrb[171].mxu0 }
 0xc6e   :  { %v10154_v13 = vadd.f32 %v12489_v35, %v9972_v5  ;;  %v12492_v41 = vadd.f32 %v12491_v14, %v12490_v22 }
 0xc70   :  { %v10155_v48 = vadd.f32 %v12492_v41, %v9973_v7 }
 0xc72   :  { %v12493_v47 = vpop.f32.mrb[172].mxu0 }
 0xc73   :  { %v12494_v17 = vpop.f32.mrb[173].mxu0 }
 0xc74   :  { %v12495_v43 = vadd.f32 %v12494_v17, %v12493_v47  ;;  %v12496_v31 = vpop.f32.mrb[174].mxu0 }
 0xc75   :  { %v12497_v52 = vpop.f32.mrb[175].mxu0 }
 0xc76   :  { %v10156_v33 = vadd.f32 %v12495_v43, %v9974_v57  ;;  %v12498_v42 = vadd.f32 %v12497_v52, %v12496_v31  ;;  %v11674_v57 = vld [vmem:[#allocation15] ss:$0 sm:$0xff] }
 0xc78   :  { %v10157_v11 = vadd.f32 %v12498_v42, %v9975_v53 }
 0xc8a   :  { %v12515_v44 = vpop.f32.mrb[176].mxu0 }
 0xc8b   :  { %v12516_v16 = vpop.f32.mrb[177].mxu0 }
 0xc8c   :  { %v12517_v2 = vadd.f32 %v12516_v16, %v12515_v44  ;;  %v12518_v36 = vpop.f32.mrb[178].mxu0  ;;  %v14219_v44 = vld [vmem:[#allocation18 + $0xc0] sm:$0xff]   ;;  %v14218_v16 = vld [vmem:[#allocation16 + $0x8] sm:$0xff]  }
 0xc8d   :  { %v12519_v25 = vpop.f32.mrb[179].mxu0 }
 0xc8e   :  { %v10336_v21 = vadd.f32 %v12517_v2, %v10154_v13  ;;  %v12520_v63 = vadd.f32 %v12519_v25, %v12518_v36  ;;  %v14220_v2 = vld [vmem:[#allocation18 + $0x80] sm:$0xff]   ;;  %v14221_v36 = vld [vmem:[#allocation18 + $0xc8] sm:$0xff]  }
 0xc8f   :  { %v14222_v25 = vld [vmem:[#allocation18 + $0x88] sm:$0xff]  }
 0xc90   :  { %v10340_v19 = vrot.slane %v10336_v21, 4  ;;  %v10347_v56 = vmul.f32 %v10336_v21, %v10336_v21  ;;  %v10337_v37 = vadd.f32 %v12520_v63, %v10155_v48  ;;  %v14224_v63 = vld [vmem:[#allocation18 + $0x90] sm:$0xff]  }
 0xc92   :  { %v10341_v59 = vadd.f32 %v10340_v19, %v10336_v21  ;;  %v10348_v26 = vrot.slane %v10347_v56, 4  ;;  %v12521_v23 = vpop.f32.mrb[180].mxu0  ;;  %v14225_v19 = vld [vmem:[#allocation18 + $0xd8] sm:$0xff]  }
 0xc93   :  { %v12522_v50 = vpop.f32.mrb[181].mxu0 }
 0xc94   :  { %v10342_v55 = vrot.slane %v10341_v59, 2  ;;  %v10349_v9 = vadd.f32 %v10348_v26, %v10347_v56  ;;  %v12523_v27 = vadd.f32 %v12522_v50, %v12521_v23  ;;  %v12524_v0 = vpop.f32.mrb[182].mxu0  ;;  %v14226_v56 = vld [vmem:[#allocation18 + $0x98] sm:$0xff]   ;;  %v14229_v26 = vld [vmem:[#allocation18 + $0xe8] sm:$0xff]   ;;  %v14231_v50 = vld [vmem:[#allocation18 + $0xf0] sm:$0xff]  }
 0xc95   :  { %v12525_v58 = vpop.f32.mrb[183].mxu0  ;;  %v14230_v23 = vld [vmem:[#allocation18 + $0xa8] sm:$0xff]  }
 0xc96   :  { %v10343_v54 = vadd.f32 %v10342_v55, %v10341_v59  ;;  %v10350_v38 = vrot.slane %v10349_v9, 2  ;;  %v10338_v3 = vadd.f32 %v12523_v27, %v10156_v33  ;;  %v12526_v18 = vadd.f32 %v12525_v58, %v12524_v0  ;;  %v14228_v59 = vld [vmem:[#allocation18 + $0xa0] sm:$0xff]   ;;  %v14232_v55 = vld [vmem:[#allocation18 + $0xb0] sm:$0xff]   ;;  %v14234_v27 = vld [vmem:[#allocation18 + $0xb8] sm:$0xff]  }
 0xc97   :  { %v14235_v0 = vld [vmem:[#allocation18 + $0x40] sm:$0xff]  }
 0xc98   :  { %v10344_v40 = vrot.slane %v10343_v54, 1  ;;  %v10351_v45 = vadd.f32 %v10350_v38, %v10349_v9  ;;  %v10339_v29 = vadd.f32 %v12526_v18, %v10157_v11  ;;  %v14233_v9 = vld [vmem:[#allocation18 + $0xf8] sm:$0xff]  }
 0xc9a   :  { %v10345_v39 = vadd.f32 %v10344_v40, %v10343_v54  ;;  %v10352_v10 = vrot.slane %v10351_v45, 1 }
 0xc9c   :  { %v10346_v28 = vmul.f32 0.125, %v10345_v39  ;;  %v10353_v8 = vadd.f32 %v10352_v10, %v10351_v45  ;;  %v14237_v39 = vld [vmem:[#allocation18 + $0x48] sm:$0xff]  }
 0xc9e   :  { %v10354_v60 = vmul.f32 0.125, %v10353_v8  ;;  %v10355_v4 = vmul.f32 %v10346_v28, %v10346_v28  ;;  %v10359_v62 = vsub.f32 %v10337_v37, %v10346_v28  ;;  %v10360_v24 = vsub.f32 %v10338_v3, %v10346_v28  ;;  %v14227_v37 = vld [vmem:[#allocation18 + $0xe0] sm:$0xff]   ;;  %v14239_v8 = vld [vmem:[#allocation18 + $0x50] sm:$0xff]  }
 0xc9f   :  { %v10361_v49 = vsub.f32 %v10339_v29, %v10346_v28  ;;  %v10358_v20 = vsub.f32 %v10336_v21, %v10346_v28  ;;  %v14223_v21 = vld [vmem:[#allocation18 + $0xd0] sm:$0xff]   ;;  %v14236_v29 = vld [vmem:[#allocation18] sm:$0xff]   ;;  %v14238_v28 = vld [vmem:[#allocation18 + $0x8] sm:$0xff]  }
 0xca0   :  { %v10356_v61 = vsub.f32 %v10354_v60, %v10355_v4  ;;  %v14240_v60 = vld [vmem:[#allocation18 + $0x10] sm:$0xff]   ;;  %v14241_v4 = vld [vmem:[#allocation18 + $0x58] sm:$0xff]  }
 0xca2   :  { %v10357_v34 = vmax.f32 %v10356_v61, 0.0  ;;  %v14245_v61 = vld [vmem:[#allocation18 + $0x68] sm:$0xff]  }
 0xca4   :  { %v10362_v5 = vadd.f32 1e-05, %v10357_v34  ;;  %v14246_v34 = vld [vmem:[#allocation18 + $0x28] sm:$0xff]  }
 0xca6   :  { %14253 = vrsqrt.f32 %v10362_v5  ;;  %v14247_v5 = vld [vmem:[#allocation18 + $0x70] sm:$0xff]  }
 0xcb0   :  { %v14254_v7 = vpop.eup %14253 }
 0xcb1   :  { %v10365_v32 = vmul.f32 %v14254_v7, %v10359_v62  ;;  %v10366_v15 = vmul.f32 %v14254_v7, %v10360_v24  ;;  %v10367_v6 = vmul.f32 %v14254_v7, %v10361_v49  ;;  %v10364_v51 = vmul.f32 %v14254_v7, %v10358_v20  ;;  %v14242_v62 = vld [vmem:[#allocation18 + $0x18] sm:$0xff]   ;;  %v14243_v24 = vld [vmem:[#allocation18 + $0x60] sm:$0xff]   ;;  %v14248_v20 = vld [vmem:[#allocation18 + $0x30] sm:$0xff]  }
 0xcb2   :  { %v14244_v49 = vld [vmem:[#allocation18 + $0x20] sm:$0xff]   ;;  %v14249_v7 = vld [vmem:[#allocation18 + $0x78] sm:$0xff]  }
 0xcb3   :  { %v10376_v12 = vmul.f32 %v11673_v46, %v10365_v32  ;;  %v10377_v53 = vmul.f32 %v11673_v46, %v10366_v15  ;;  %v10378_v1 = vmul.f32 %v11673_v46, %v10367_v6  ;;  %v10375_v30 = vmul.f32 %v11673_v46, %v10364_v51  ;;  %v14250_v46 = vld [vmem:[#allocation18 + $0x38] sm:$0xff]  }
 0xcb5   :  { %v10386_v35 = vadd.f32 %v11674_v57, %v10375_v30  ;;  %v10387_v22 = vadd.f32 %v11674_v57, %v10376_v12  ;;  %v10388_v14 = vadd.f32 %v11674_v57, %v10377_v53  ;;  %v10389_v13 = vadd.f32 %v11674_v57, %v10378_v1 }
 0xcb7   :  { %v10390_v41 = vmul.f32 0.2, %v10386_v35  ;;  %v10391_v48 = vmul.f32 0.2, %v10387_v22  ;;  %v10392_v47 = vmul.f32 0.2, %v10388_v14 }
 0xcb8   :  { %v10393_v17 = vmul.f32 0.2, %v10389_v13 }
 0xcb9   :  { %v10394_v43 = vmax.f32 %v10386_v35, %v10390_v41  ;;  %v10395_v31 = vmax.f32 %v10387_v22, %v10391_v48  ;;  %v10396_v52 = vmax.f32 %v10388_v14, %v10392_v47 }
 0xcba   :  { %v10397_v33 = vmax.f32 %v10389_v13, %v10393_v17 }
 0xcbb   :  { %v10398_v42 = vpack.c.bf16 %v10395_v31, %v10394_v43 }
 0xcbc   :  { %v10399_v11 = vpack.c.bf16 %v10397_v33, %v10396_v52 }
 0xcbd   :  { %12735 = vmatprep.subr.bf16.mxu0 %v10398_v42 }
 0xcbe   :  { %12736 = vmatpush3.bf16.msra.mxu0 %v10398_v42 }
 0xcbf   :  { %12737 = vmatprep.subr.bf16.mxu0 %v10399_v11 }
 0xcc2   :  { %12738 = vmatpush3.bf16.msra.mxu0 %v10399_v11 }
 0xcc3   :  { %12531 = vmatprep.subr.bf16.mxu0 %v14219_v44 }
 0xcc5   :  { %12740 = vmatmul.mubr.msk.bf16.vlgmr.msra.gmra.mrb[184].mxu0 %vm10414_vm0, %v14218_v16 }
 0xcc6   :  { %12532 = vmatpush3.bf16.msra.mxu0 %v14220_v2 }
 0xcc7   :  { %12533 = vmatprep.subr.bf16.mxu0 %v14221_v36 }
 0xcca   :  { %12534 = vmatpush3.bf16.msra.mxu0 %v14222_v25 }
 0xccb   :  { %12535 = vmatprep.subr.bf16.mxu0 %v14223_v21 }
 0xcce   :  { %12536 = vmatpush3.bf16.msra.mxu0 %v14224_v63 }
 0xccf   :  { %12537 = vmatprep.subr.bf16.mxu0 %v14225_v19 }
 0xcd2   :  { %12538 = vmatpush3.bf16.msra.mxu0 %v14226_v56 }
 0xcd3   :  { %12539 = vmatprep.subr.bf16.mxu0 %v14227_v37 }
 0xcd6   :  { %12540 = vmatpush3.bf16.msra.mxu0 %v14228_v59 }
 0xcd7   :  { %12541 = vmatprep.subr.bf16.mxu0 %v14229_v26 }
 0xcda   :  { %12542 = vmatpush3.bf16.msra.mxu0 %v14230_v23 }
 0xcdb   :  { %12543 = vmatprep.subr.bf16.mxu0 %v14231_v50 }
 0xcde   :  { %12544 = vmatpush3.bf16.msra.mxu0 %v14232_v55 }
 0xcdf   :  { %12545 = vmatprep.subr.bf16.mxu0 %v14233_v9 }
 0xce2   :  { %12546 = vmatpush3.bf16.msra.mxu0 %v14234_v27 }
 0xce3   :  { %12553 = vmatprep.subr.bf16.mxu0 %v14235_v0 }
 0xd98   :  { %v12741_v58 = vpop.f32.mrb[184].mxu0 }
 0xd99   :  { %v10455_v54 = vpop.f32.mrb[185].mxu0 }
 0xd9a   :  { %v12742_v38 = vpop.f32.mrb[186].mxu0 }
 0xd9b   :  { %v10471_v3 = vpack.c.bf16 %v12742_v38, %v12741_v58  ;;  %v10458_v18 = vpop.f32.mrb[187].mxu0 }
 0xd9c   :  { %v10470_v40 = vpack.c.bf16 %v10458_v18, %v10455_v54 }
 0xd9d   :  { %v10508_v45 = vrot.slane %v10471_v3, 4 }
 0xd9e   :  { %v10473_v10 = vrot.slane %v10470_v40, 4 }
 0xd9f   :  { %10671 = vmatprep.mubr.bf16.mxu0 %v10508_v45 }
 0xda0   :  { %10672 = vmatmul.mubr.bf16.vlgmr.msra.gmra.mrb[188].mxu0 %v10471_v3 }
 0xda1   :  { %12554 = vmatpush3.bf16.msra.mxu0 %v14236_v29  ;;  %10807 = vmatprep.mubr.bf16.mxu0 %v10473_v10 }
 0xda2   :  { %12555 = vmatprep.subr.bf16.mxu0 %v14237_v39 }
 0xda5   :  { %12556 = vmatpush3.bf16.msra.mxu0 %v14238_v28 }
 0xda6   :  { %12557 = vmatprep.subr.bf16.mxu0 %v14239_v8 }
 0xda9   :  { %12558 = vmatpush3.bf16.msra.mxu0 %v14240_v60 }
 0xdaa   :  { %12559 = vmatprep.subr.bf16.mxu0 %v14241_v4 }
 0xdad   :  { %12560 = vmatpush3.bf16.msra.mxu0 %v14242_v62 }
 0xdae   :  { %12561 = vmatprep.subr.bf16.mxu0 %v14243_v24 }
 0xdb1   :  { %12562 = vmatpush3.bf16.msra.mxu0 %v14244_v49 }
 0xdb2   :  { %12563 = vmatprep.subr.bf16.mxu0 %v14245_v61 }
 0xdb5   :  { %12564 = vmatpush3.bf16.msra.mxu0 %v14246_v34 }
 0xdb6   :  { %12565 = vmatprep.subr.bf16.mxu0 %v14247_v5 }
 0xdb9   :  { %12566 = vmatpush3.bf16.msra.mxu0 %v14248_v20 }
 0xdba   :  { %12567 = vmatprep.subr.bf16.mxu0 %v14249_v7 }
 0xdbd   :  { %12568 = vmatpush3.bf16.msra.mxu0 %v14250_v46 }
 0xdc0   :  { %10808 = vmatmul.mubr.bf16.vlgmr.msra.gmra.mrb[192].mxu0 %v10470_v40 }
 0xe73   :  { %v12547_v32 = vpop.f32.mrb[188].mxu0 }
 0xe74   :  { %v12548_v15 = vpop.f32.mrb[189].mxu0 }
 0xe75   :  { %v12549_v6 = vadd.f32 %v12548_v15, %v12547_v32  ;;  %v12550_v51 = vpop.f32.mrb[190].mxu0 }
 0xe76   :  { %v12551_v57 = vpop.f32.mrb[191].mxu0 }
 0xe93   :  { %v12569_v12 = vpop.f32.mrb[192].mxu0 }
 0xe94   :  { %v12570_v53 = vpop.f32.mrb[193].mxu0 }
 0xe95   :  { %v12571_v1 = vadd.f32 %v12570_v53, %v12569_v12  ;;  %v12572_v30 = vpop.f32.mrb[194].mxu0 }
 0xe96   :  { %v12573_v35 = vpop.f32.mrb[195].mxu0 }
 0xe97   :  { %v10810_v22 = vadd.f32 %v12571_v1, %v12549_v6 }
 0xe99   :  { %v10815_v14 = vsub.f32 0.0, %v10810_v22 }
 0xe9b   :  { %v10816_v13 = vmul.f32 1.442695, %v10815_v14 }
 0xe9d   :  { %14255 = vpow2.f32 %v10816_v13 }
 0xea7   :  { %v14256_v41 = vpop.eup %14255 }
 0xea8   :  { %v10818_v48 = vadd.f32 1.0, %v14256_v41 }
 0xeaa   :  { %14257 = vrcp.f32 %v10818_v48 }
 0xeb4   :  { %v14258_v47 = vpop.eup %14257 }
 0xeb5   :  { %10820 = vst [vmem:[%s16785_s12] sm:$0xff] %v14258_v47 }
 0xeb6   :  { %10825 = vsyncpa [#allocation3], 1 }
 0xeb7   :  { %10826 = vsyncpa [#allocation5], 1 }
 0xeb8   :  { %10827 = vsyncpa [#allocation8], 1 }
 0xeb9   :  { %10828 = vsyncpa [#allocation11], 1 }
 0xeba   :  { %10829 = vsyncpa [#allocation14], 1 }
 0xebb   :  { %10830 = vsyncpa [#allocation17], 1 }

</bundles_post_ra>
